<compile_context>
chip_gen: v7x
topology: tpu7x:2x2x1
jax: 0.10.0
libtpu: 0.0.40
codegen_flags: <defaults>
</compile_context>

<pallas_src>
import jax
import jax.numpy as jnp
from jax import lax
from jax.experimental import pallas as pl
from jax.experimental.pallas import tpu as pltpu


def _fused_block_kernel(x_ref, w1_ref, b1_ref, w2_ref, b2_ref, o_ref,
                        xpad_ref, ypad_ref):
    """One bottleneck block for one batch element.

    x_ref   : (1, D, H, W, C)     input tile
    w*_ref  : (27*C, C)           conv weights, (kd, kh, kw, ci) flattened
    b*_ref  : (1, C)              conv bias
    o_ref   : (1, D, H, W, C)     output = x + ReLU(conv2(ReLU(conv1(x))))
    xpad_ref: (D+2, H+2, W+2, C)  zero-padded copy of x          (VMEM scratch)
    ypad_ref: (D+2, H+2, W+2, C)  zero-padded ReLU(conv1) result (VMEM scratch)
    """
    _, D, H, W, C = o_ref.shape
    K = 27 * C
    f32 = jnp.float32

    # In-kernel halo handling (replaces host-side jnp.pad): zero the padded
    # scratch buffers, then copy the interior.  (Scratch persists across grid
    # steps, but re-zeroing ~70 KB per step is negligible and keeps the kernel
    # correct under megacore grid partitioning.)
    xpad_ref[...] = jnp.zeros_like(xpad_ref)
    ypad_ref[...] = jnp.zeros_like(ypad_ref)
    xpad_ref[1:D + 1, 1:H + 1, 1:W + 1, :] = x_ref[0].astype(f32)

    def conv_relu_depth_slice(pad_ref, wf_ref, b_ref, d):
        """ReLU(conv3d(pad)[d] + b) for one output depth slice -> (H*W, C)."""
        pieces = []
        for kd in range(3):
            plane = pad_ref[pl.ds(d + kd, 1), :, :, :]        # (1, H+2, W+2, C)
            for kh in range(3):
                for kw in range(3):
                    pieces.append(plane[:, kh:kh + H, kw:kw + W, :])
        # im2col: flatten the 27 taps into the contraction dim -> a single
        # (H*W, 27*C) x (27*C, C) MXU matmul per depth slice.
        patch = jnp.concatenate(pieces, axis=-1).reshape(H * W, K)
        acc = jnp.dot(patch, wf_ref[...], preferred_element_type=f32)
        return jnp.maximum(acc + b_ref[...].astype(f32), 0.0)

    # conv1 + ReLU, written into the padded intermediate scratch (stays in VMEM).
    def conv1_body(d, carry):
        y = conv_relu_depth_slice(xpad_ref, w1_ref, b1_ref, d)
        ypad_ref[pl.ds(d + 1, 1), 1:H + 1, 1:W + 1, :] = y.reshape(1, H, W, C)
        return carry

    lax.fori_loop(0, D, conv1_body, 0)

    # conv2 + ReLU + residual add, written straight to the output tile.
    def conv2_body(d, carry):
        z = conv_relu_depth_slice(ypad_ref, w2_ref, b2_ref, d)
        res = x_ref[:, pl.ds(d, 1), :, :, :].reshape(H * W, C).astype(f32)
        out = (res + z).reshape(1, 1, H, W, C)
        o_ref[:, pl.ds(d, 1), :, :, :] = out.astype(o_ref.dtype)
        return carry

    lax.fori_loop(0, D, conv2_body, 0)


def bottleneck_block_step_pallas(x, w1, b1, w2, b2):
    """One bottleneck block: x + ReLU(conv2(ReLU(conv1(x)))).  x: NDHWC."""
    N, D, H, W, C = x.shape
    # Flatten (kd, kh, kw, ci) into the contraction dimension on the host.
    w1f = w1.reshape(27 * C, C)
    w2f = w2.reshape(27 * C, C)
    b1r = b1.reshape(1, C)
    b2r = b2.reshape(1, C)

    flops = 2 * N * D * (2 * (H * W) * (27 * C) * C)          # 2 convs
    bytes_accessed = 4 * (2 * x.size + w1f.size + w2f.size + b1r.size + b2r.size)
    cost = pl.CostEstimate(flops=flops, transcendentals=0,
                           bytes_accessed=bytes_accessed)

    io_spec = pl.BlockSpec((1, D, H, W, C), lambda n: (n, 0, 0, 0, 0))
    w_spec = pl.BlockSpec((27 * C, C), lambda n: (0, 0))
    b_spec = pl.BlockSpec((1, C), lambda n: (0, 0))

    return pl.pallas_call(
        _fused_block_kernel,
        out_shape=jax.ShapeDtypeStruct((N, D, H, W, C), x.dtype),
        grid=(N,),
        in_specs=[io_spec, w_spec, b_spec, w_spec, b_spec],
        out_specs=io_spec,
        scratch_shapes=[
            pltpu.VMEM((D + 2, H + 2, W + 2, C), jnp.float32),   # padded x
            pltpu.VMEM((D + 2, H + 2, W + 2, C), jnp.float32),   # padded ReLU(conv1)
        ],
        compiler_params=pltpu.CompilerParams(
            dimension_semantics=("parallel",),
            vmem_limit_bytes=32 * 1024 * 1024,
        ),
        cost_estimate=cost,
    )(x, w1f, b1r, w2f, b2r)


def bottleneck_block(x_ncdhw, params):
    """Pallas equivalent of BottleneckBlock.forward.

    x_ncdhw: (N, C, D, H, W) like PyTorch.
    params:  list of (w1, b1, w2, b2) per block, weights in (kD,kH,kW,Cin,Cout).
    """
    x = jnp.transpose(x_ncdhw, (0, 2, 3, 4, 1))  # NCDHW -> NDHWC
    for (w1, b1, w2, b2) in params:
        x = bottleneck_block_step_pallas(x, w1, b1, w2, b2)
    return jnp.transpose(x, (0, 4, 1, 2, 3))     # NDHWC -> NCDHW


# ------------------------- pure-JAX reference -------------------------------
def _conv3d_ref(x, w, b):  # x NDHWC, w DHWIO
    y = jax.lax.conv_general_dilated(
        x, w, window_strides=(1, 1, 1), padding="SAME",
        dimension_numbers=("NDHWC", "DHWIO", "NDHWC"))
    return y + b.reshape(1, 1, 1, 1, -1)


def _bottleneck_ref(x_ncdhw, params):
    x = jnp.transpose(x_ncdhw, (0, 2, 3, 4, 1))
    for (w1, b1, w2, b2) in params:
        residual = x
        y = jax.nn.relu(_conv3d_ref(x, w1, b1))
        out = jax.nn.relu(_conv3d_ref(y, w2, b2))
        x = residual + out
    return jnp.transpose(x, (0, 4, 1, 2, 3))


# ----------------------------------------------------------------------------
if __name__ == "__main__":
    N, C, D, H, W = 2, 8, 4, 8, 16
    num_blocks = 2

    key = jax.random.PRNGKey(0)
    key, kx = jax.random.split(key)
    x = jax.random.normal(kx, (N, C, D, H, W), dtype=jnp.float32)

    # Deterministic synthetic parameters (shapes from nn.Conv3d(C, C, 3, padding=1)).
    params = []
    for _ in range(num_blocks):
        key, k1, k2, k3, k4 = jax.random.split(key, 5)
        w1 = 0.1 * jax.random.normal(k1, (3, 3, 3, C, C), dtype=jnp.float32)
        b1 = 0.1 * jax.random.normal(k2, (C,), dtype=jnp.float32)
        w2 = 0.1 * jax.random.normal(k3, (3, 3, 3, C, C), dtype=jnp.float32)
        b2 = 0.1 * jax.random.normal(k4, (C,), dtype=jnp.float32)
        params.append((w1, b1, w2, b2))

    out = jax.block_until_ready(bottleneck_block(x, params))

    ref = jax.block_until_ready(_bottleneck_ref(x, params))
    assert out.shape == (N, C, D, H, W)
    assert jnp.allclose(out, ref, rtol=2e-3, atol=2e-3), "mismatch vs JAX reference"

    print("KERNEL_OK")
</pallas_src>

<mosaic_0001>
module attributes {stable_mosaic.version = 11 : i64} {
  func.func @_fused_block_kernel(%arg0: i32, %arg1: memref<1x4x8x16x8xf32, #tpu.memory_space<vmem>>, %arg2: memref<216x8xf32, #tpu.memory_space<vmem>>, %arg3: memref<1x8xf32, #tpu.memory_space<vmem>>, %arg4: memref<216x8xf32, #tpu.memory_space<vmem>>, %arg5: memref<1x8xf32, #tpu.memory_space<vmem>>, %arg6: memref<1x4x8x16x8xf32, #tpu.memory_space<vmem>>, %arg7: memref<6x10x18x8xf32, #tpu.memory_space<vmem>>, %arg8: memref<6x10x18x8xf32, #tpu.memory_space<vmem>>) attributes {dimension_semantics = [#tpu.dimension_semantics<parallel>], iteration_bounds = array<i64: 2>, scalar_prefetch = 0 : i64, scratch_operands = 2 : i64, tpu.core_type = #tpu.core_type<tc>, window_params = [{transform_indices = @transform_0, window_bounds = array<i64: 1, 4, 8, 16, 8>}, {pipeline_mode = #tpu.pipeline_mode<synchronous>, transform_indices = @transform_1, window_bounds = array<i64: 216, 8>}, {pipeline_mode = #tpu.pipeline_mode<synchronous>, transform_indices = @transform_2, window_bounds = array<i64: 1, 8>}, {pipeline_mode = #tpu.pipeline_mode<synchronous>, transform_indices = @transform_3, window_bounds = array<i64: 216, 8>}, {pipeline_mode = #tpu.pipeline_mode<synchronous>, transform_indices = @transform_4, window_bounds = array<i64: 1, 8>}, {transform_indices = @transform_5, window_bounds = array<i64: 1, 4, 8, 16, 8>}]} {
    %cst = arith.constant 0.000000e+00 : f32
    %0 = vector.broadcast %cst : f32 to vector<6x10x18x8xf32>
    %c0 = arith.constant 0 : index
    %c0_0 = arith.constant 0 : index
    %c0_1 = arith.constant 0 : index
    %c0_2 = arith.constant 0 : index
    %1 = vector.load %arg7[%c0, %c0_0, %c0_1, %c0_2] : memref<6x10x18x8xf32, #tpu.memory_space<vmem>>, vector<6x10x18x8xf32>
    tpu.vector_store %arg7[%c0, %c0_0, %c0_1, %c0_2], %0 {strides = array<i32>} : memref<6x10x18x8xf32, #tpu.memory_space<vmem>>, vector<6x10x18x8xf32>,
    %cst_3 = arith.constant 0.000000e+00 : f32
    %2 = vector.broadcast %cst_3 : f32 to vector<6x10x18x8xf32>
    %c0_4 = arith.constant 0 : index
    %c0_5 = arith.constant 0 : index
    %c0_6 = arith.constant 0 : index
    %c0_7 = arith.constant 0 : index
    %3 = vector.load %arg8[%c0_4, %c0_5, %c0_6, %c0_7] : memref<6x10x18x8xf32, #tpu.memory_space<vmem>>, vector<6x10x18x8xf32>
    tpu.vector_store %arg8[%c0_4, %c0_5, %c0_6, %c0_7], %2 {strides = array<i32>} : memref<6x10x18x8xf32, #tpu.memory_space<vmem>>, vector<6x10x18x8xf32>,
    %c0_8 = arith.constant 0 : index
    %c0_9 = arith.constant 0 : index
    %c0_10 = arith.constant 0 : index
    %c0_11 = arith.constant 0 : index
    %c0_12 = arith.constant 0 : index
    %4 = vector.load %arg1[%c0_8, %c0_9, %c0_10, %c0_11, %c0_12] : memref<1x4x8x16x8xf32, #tpu.memory_space<vmem>>, vector<1x4x8x16x8xf32>
    %5 = vector.shape_cast %4 : vector<1x4x8x16x8xf32> to vector<4x8x16x8xf32>
    %c1 = arith.constant 1 : index
    %c1_13 = arith.constant 1 : index
    %c1_14 = arith.constant 1 : index
    %c0_15 = arith.constant 0 : index
    %6 = vector.load %arg7[%c1, %c1_13, %c1_14, %c0_15] : memref<6x10x18x8xf32, #tpu.memory_space<vmem>>, vector<4x8x16x8xf32>
    tpu.vector_store %arg7[%c1, %c1_13, %c1_14, %c0_15], %5 {strides = array<i32>} : memref<6x10x18x8xf32, #tpu.memory_space<vmem>>, vector<4x8x16x8xf32>,
    %c0_i32 = arith.constant 0 : i32
    %c4_i32 = arith.constant 4 : i32
    %7 = arith.addi %c0_i32, %c4_i32 : i32
    %c1_i32 = arith.constant 1 : i32
    scf.for %arg9 = %c0_i32 to %7 step %c1_i32  : i32 {
      %c0_i32_21 = arith.constant 0 : i32
      %9 = arith.addi %arg9, %c0_i32_21 : i32
      %10 = arith.index_cast %9 : i32 to index
      %c0_22 = arith.constant 0 : index
      %c0_23 = arith.constant 0 : index
      %c0_24 = arith.constant 0 : index
      %11 = vector.load %arg7[%10, %c0_22, %c0_23, %c0_24] : memref<6x10x18x8xf32, #tpu.memory_space<vmem>>, vector<1x10x18x8xf32>
      %12 = vector.extract_strided_slice %11 {offsets = [0, 0, 0, 0], sizes = [1, 8, 16, 8], strides = [1, 1, 1, 1]} : vector<1x10x18x8xf32> to vector<1x8x16x8xf32>
      %13 = vector.extract_strided_slice %11 {offsets = [0, 0, 1, 0], sizes = [1, 8, 16, 8], strides = [1, 1, 1, 1]} : vector<1x10x18x8xf32> to vector<1x8x16x8xf32>
      %14 = vector.extract_strided_slice %11 {offsets = [0, 0, 2, 0], sizes = [1, 8, 16, 8], strides = [1, 1, 1, 1]} : vector<1x10x18x8xf32> to vector<1x8x16x8xf32>
      %15 = vector.extract_strided_slice %11 {offsets = [0, 1, 0, 0], sizes = [1, 8, 16, 8], strides = [1, 1, 1, 1]} : vector<1x10x18x8xf32> to vector<1x8x16x8xf32>
      %16 = vector.extract_strided_slice %11 {offsets = [0, 1, 1, 0], sizes = [1, 8, 16, 8], strides = [1, 1, 1, 1]} : vector<1x10x18x8xf32> to vector<1x8x16x8xf32>
      %17 = vector.extract_strided_slice %11 {offsets = [0, 1, 2, 0], sizes = [1, 8, 16, 8], strides = [1, 1, 1, 1]} : vector<1x10x18x8xf32> to vector<1x8x16x8xf32>
      %18 = vector.extract_strided_slice %11 {offsets = [0, 2, 0, 0], sizes = [1, 8, 16, 8], strides = [1, 1, 1, 1]} : vector<1x10x18x8xf32> to vector<1x8x16x8xf32>
      %19 = vector.extract_strided_slice %11 {offsets = [0, 2, 1, 0], sizes = [1, 8, 16, 8], strides = [1, 1, 1, 1]} : vector<1x10x18x8xf32> to vector<1x8x16x8xf32>
      %20 = vector.extract_strided_slice %11 {offsets = [0, 2, 2, 0], sizes = [1, 8, 16, 8], strides = [1, 1, 1, 1]} : vector<1x10x18x8xf32> to vector<1x8x16x8xf32>
      %c1_i32_25 = arith.constant 1 : i32
      %21 = arith.addi %arg9, %c1_i32_25 : i32
      %22 = arith.index_cast %21 : i32 to index
      %c0_26 = arith.constant 0 : index
      %c0_27 = arith.constant 0 : index
      %c0_28 = arith.constant 0 : index
      %23 = vector.load %arg7[%22, %c0_26, %c0_27, %c0_28] : memref<6x10x18x8xf32, #tpu.memory_space<vmem>>, vector<1x10x18x8xf32>
      %24 = vector.extract_strided_slice %23 {offsets = [0, 0, 0, 0], sizes = [1, 8, 16, 8], strides = [1, 1, 1, 1]} : vector<1x10x18x8xf32> to vector<1x8x16x8xf32>
      %25 = vector.extract_strided_slice %23 {offsets = [0, 0, 1, 0], sizes = [1, 8, 16, 8], strides = [1, 1, 1, 1]} : vector<1x10x18x8xf32> to vector<1x8x16x8xf32>
      %26 = vector.extract_strided_slice %23 {offsets = [0, 0, 2, 0], sizes = [1, 8, 16, 8], strides = [1, 1, 1, 1]} : vector<1x10x18x8xf32> to vector<1x8x16x8xf32>
      %27 = vector.extract_strided_slice %23 {offsets = [0, 1, 0, 0], sizes = [1, 8, 16, 8], strides = [1, 1, 1, 1]} : vector<1x10x18x8xf32> to vector<1x8x16x8xf32>
      %28 = vector.extract_strided_slice %23 {offsets = [0, 1, 1, 0], sizes = [1, 8, 16, 8], strides = [1, 1, 1, 1]} : vector<1x10x18x8xf32> to vector<1x8x16x8xf32>
      %29 = vector.extract_strided_slice %23 {offsets = [0, 1, 2, 0], sizes = [1, 8, 16, 8], strides = [1, 1, 1, 1]} : vector<1x10x18x8xf32> to vector<1x8x16x8xf32>
      %30 = vector.extract_strided_slice %23 {offsets = [0, 2, 0, 0], sizes = [1, 8, 16, 8], strides = [1, 1, 1, 1]} : vector<1x10x18x8xf32> to vector<1x8x16x8xf32>
      %31 = vector.extract_strided_slice %23 {offsets = [0, 2, 1, 0], sizes = [1, 8, 16, 8], strides = [1, 1, 1, 1]} : vector<1x10x18x8xf32> to vector<1x8x16x8xf32>
      %32 = vector.extract_strided_slice %23 {offsets = [0, 2, 2, 0], sizes = [1, 8, 16, 8], strides = [1, 1, 1, 1]} : vector<1x10x18x8xf32> to vector<1x8x16x8xf32>
      %c2_i32 = arith.constant 2 : i32
      %33 = arith.addi %arg9, %c2_i32 : i32
      %34 = arith.index_cast %33 : i32 to index
      %c0_29 = arith.constant 0 : index
      %c0_30 = arith.constant 0 : index
      %c0_31 = arith.constant 0 : index
      %35 = vector.load %arg7[%34, %c0_29, %c0_30, %c0_31] : memref<6x10x18x8xf32, #tpu.memory_space<vmem>>, vector<1x10x18x8xf32>
      %36 = vector.extract_strided_slice %35 {offsets = [0, 0, 0, 0], sizes = [1, 8, 16, 8], strides = [1, 1, 1, 1]} : vector<1x10x18x8xf32> to vector<1x8x16x8xf32>
      %37 = vector.extract_strided_slice %35 {offsets = [0, 0, 1, 0], sizes = [1, 8, 16, 8], strides = [1, 1, 1, 1]} : vector<1x10x18x8xf32> to vector<1x8x16x8xf32>
      %38 = vector.extract_strided_slice %35 {offsets = [0, 0, 2, 0], sizes = [1, 8, 16, 8], strides = [1, 1, 1, 1]} : vector<1x10x18x8xf32> to vector<1x8x16x8xf32>
      %39 = vector.extract_strided_slice %35 {offsets = [0, 1, 0, 0], sizes = [1, 8, 16, 8], strides = [1, 1, 1, 1]} : vector<1x10x18x8xf32> to vector<1x8x16x8xf32>
      %40 = vector.extract_strided_slice %35 {offsets = [0, 1, 1, 0], sizes = [1, 8, 16, 8], strides = [1, 1, 1, 1]} : vector<1x10x18x8xf32> to vector<1x8x16x8xf32>
      %41 = vector.extract_strided_slice %35 {offsets = [0, 1, 2, 0], sizes = [1, 8, 16, 8], strides = [1, 1, 1, 1]} : vector<1x10x18x8xf32> to vector<1x8x16x8xf32>
      %42 = vector.extract_strided_slice %35 {offsets = [0, 2, 0, 0], sizes = [1, 8, 16, 8], strides = [1, 1, 1, 1]} : vector<1x10x18x8xf32> to vector<1x8x16x8xf32>
      %43 = vector.extract_strided_slice %35 {offsets = [0, 2, 1, 0], sizes = [1, 8, 16, 8], strides = [1, 1, 1, 1]} : vector<1x10x18x8xf32> to vector<1x8x16x8xf32>
      %44 = vector.extract_strided_slice %35 {offsets = [0, 2, 2, 0], sizes = [1, 8, 16, 8], strides = [1, 1, 1, 1]} : vector<1x10x18x8xf32> to vector<1x8x16x8xf32>
      %45 = tpu.concatenate %12, %13, %14, %15, %16, %17, %18, %19, %20, %24, %25, %26, %27, %28, %29, %30 in 3 : vector<1x8x16x8xf32>, vector<1x8x16x8xf32>, vector<1x8x16x8xf32>, vector<1x8x16x8xf32>, vector<1x8x16x8xf32>, vector<1x8x16x8xf32>, vector<1x8x16x8xf32>, vector<1x8x16x8xf32>, vector<1x8x16x8xf32>, vector<1x8x16x8xf32>, vector<1x8x16x8xf32>, vector<1x8x16x8xf32>, vector<1x8x16x8xf32>, vector<1x8x16x8xf32>, vector<1x8x16x8xf32>, vector<1x8x16x8xf32> -> vector<1x8x16x128xf32>
      %46 = tpu.concatenate %31, %32, %36, %37, %38, %39, %40, %41, %42, %43, %44 in 3 : vector<1x8x16x8xf32>, vector<1x8x16x8xf32>, vector<1x8x16x8xf32>, vector<1x8x16x8xf32>, vector<1x8x16x8xf32>, vector<1x8x16x8xf32>, vector<1x8x16x8xf32>, vector<1x8x16x8xf32>, vector<1x8x16x8xf32>, vector<1x8x16x8xf32>, vector<1x8x16x8xf32> -> vector<1x8x16x88xf32>
      %47 = tpu.concatenate %45, %46 in 3 : vector<1x8x16x128xf32>, vector<1x8x16x88xf32> -> vector<1x8x16x216xf32>
      %48 = vector.shape_cast %47 : vector<1x8x16x216xf32> to vector<128x216xf32>
      %c0_32 = arith.constant 0 : index
      %c0_33 = arith.constant 0 : index
      %49 = vector.load %arg2[%c0_32, %c0_33] : memref<216x8xf32, #tpu.memory_space<vmem>>, vector<216x8xf32>
      %cst_34 = arith.constant dense<0.000000e+00> : vector<128x8xf32>
      %50 = tpu.matmul %48, %49, %cst_34 {dimension_numbers = #tpu.dot_dimension_numbers<[1], [0], [0], [1], [0, 0, 1, 1], [], []>} : vector<128x216xf32>, vector<216x8xf32>, vector<128x8xf32> -> vector<128x8xf32>
      %c0_35 = arith.constant 0 : index
      %c0_36 = arith.constant 0 : index
      %51 = vector.load %arg3[%c0_35, %c0_36] : memref<1x8xf32, #tpu.memory_space<vmem>>, vector<1x8xf32>
      %52 = vector.broadcast %51 : vector<1x8xf32> to vector<128x8xf32>
      %53 = arith.addf %50, %52 : vector<128x8xf32>
      %cst_37 = arith.constant 0.000000e+00 : f32
      %54 = vector.broadcast %cst_37 : f32 to vector<128x8xf32>
      %55 = arith.maximumf %53, %54 : vector<128x8xf32>
      %56 = vector.shape_cast %55 : vector<128x8xf32> to vector<1x8x16x8xf32>
      %c1_i32_38 = arith.constant 1 : i32
      %57 = arith.addi %arg9, %c1_i32_38 : i32
      %58 = arith.index_cast %57 : i32 to index
      %c1_39 = arith.constant 1 : index
      %c1_40 = arith.constant 1 : index
      %c0_41 = arith.constant 0 : index
      %59 = vector.load %arg8[%58, %c1_39, %c1_40, %c0_41] : memref<6x10x18x8xf32, #tpu.memory_space<vmem>>, vector<1x8x16x8xf32>
      tpu.vector_store %arg8[%58, %c1_39, %c1_40, %c0_41], %56 {strides = array<i32>} : memref<6x10x18x8xf32, #tpu.memory_space<vmem>>, vector<1x8x16x8xf32>,
    }
    %c4_i32_16 = arith.constant 4 : i32
    %c0_i32_17 = arith.constant 0 : i32
    %c4_i32_18 = arith.constant 4 : i32
    %8 = arith.addi %c0_i32_17, %c4_i32_18 : i32
    %c1_i32_19 = arith.constant 1 : i32
    scf.for %arg9 = %c0_i32_17 to %8 step %c1_i32_19  : i32 {
      %c0_i32_21 = arith.constant 0 : i32
      %9 = arith.addi %arg9, %c0_i32_21 : i32
      %10 = arith.index_cast %9 : i32 to index
      %c0_22 = arith.constant 0 : index
      %c0_23 = arith.constant 0 : index
      %c0_24 = arith.constant 0 : index
      %11 = vector.load %arg8[%10, %c0_22, %c0_23, %c0_24] : memref<6x10x18x8xf32, #tpu.memory_space<vmem>>, vector<1x10x18x8xf32>
      %12 = vector.extract_strided_slice %11 {offsets = [0, 0, 0, 0], sizes = [1, 8, 16, 8], strides = [1, 1, 1, 1]} : vector<1x10x18x8xf32> to vector<1x8x16x8xf32>
      %13 = vector.extract_strided_slice %11 {offsets = [0, 0, 1, 0], sizes = [1, 8, 16, 8], strides = [1, 1, 1, 1]} : vector<1x10x18x8xf32> to vector<1x8x16x8xf32>
      %14 = vector.extract_strided_slice %11 {offsets = [0, 0, 2, 0], sizes = [1, 8, 16, 8], strides = [1, 1, 1, 1]} : vector<1x10x18x8xf32> to vector<1x8x16x8xf32>
      %15 = vector.extract_strided_slice %11 {offsets = [0, 1, 0, 0], sizes = [1, 8, 16, 8], strides = [1, 1, 1, 1]} : vector<1x10x18x8xf32> to vector<1x8x16x8xf32>
      %16 = vector.extract_strided_slice %11 {offsets = [0, 1, 1, 0], sizes = [1, 8, 16, 8], strides = [1, 1, 1, 1]} : vector<1x10x18x8xf32> to vector<1x8x16x8xf32>
      %17 = vector.extract_strided_slice %11 {offsets = [0, 1, 2, 0], sizes = [1, 8, 16, 8], strides = [1, 1, 1, 1]} : vector<1x10x18x8xf32> to vector<1x8x16x8xf32>
      %18 = vector.extract_strided_slice %11 {offsets = [0, 2, 0, 0], sizes = [1, 8, 16, 8], strides = [1, 1, 1, 1]} : vector<1x10x18x8xf32> to vector<1x8x16x8xf32>
      %19 = vector.extract_strided_slice %11 {offsets = [0, 2, 1, 0], sizes = [1, 8, 16, 8], strides = [1, 1, 1, 1]} : vector<1x10x18x8xf32> to vector<1x8x16x8xf32>
      %20 = vector.extract_strided_slice %11 {offsets = [0, 2, 2, 0], sizes = [1, 8, 16, 8], strides = [1, 1, 1, 1]} : vector<1x10x18x8xf32> to vector<1x8x16x8xf32>
      %c1_i32_25 = arith.constant 1 : i32
      %21 = arith.addi %arg9, %c1_i32_25 : i32
      %22 = arith.index_cast %21 : i32 to index
      %c0_26 = arith.constant 0 : index
      %c0_27 = arith.constant 0 : index
      %c0_28 = arith.constant 0 : index
      %23 = vector.load %arg8[%22, %c0_26, %c0_27, %c0_28] : memref<6x10x18x8xf32, #tpu.memory_space<vmem>>, vector<1x10x18x8xf32>
      %24 = vector.extract_strided_slice %23 {offsets = [0, 0, 0, 0], sizes = [1, 8, 16, 8], strides = [1, 1, 1, 1]} : vector<1x10x18x8xf32> to vector<1x8x16x8xf32>
      %25 = vector.extract_strided_slice %23 {offsets = [0, 0, 1, 0], sizes = [1, 8, 16, 8], strides = [1, 1, 1, 1]} : vector<1x10x18x8xf32> to vector<1x8x16x8xf32>
      %26 = vector.extract_strided_slice %23 {offsets = [0, 0, 2, 0], sizes = [1, 8, 16, 8], strides = [1, 1, 1, 1]} : vector<1x10x18x8xf32> to vector<1x8x16x8xf32>
      %27 = vector.extract_strided_slice %23 {offsets = [0, 1, 0, 0], sizes = [1, 8, 16, 8], strides = [1, 1, 1, 1]} : vector<1x10x18x8xf32> to vector<1x8x16x8xf32>
      %28 = vector.extract_strided_slice %23 {offsets = [0, 1, 1, 0], sizes = [1, 8, 16, 8], strides = [1, 1, 1, 1]} : vector<1x10x18x8xf32> to vector<1x8x16x8xf32>
      %29 = vector.extract_strided_slice %23 {offsets = [0, 1, 2, 0], sizes = [1, 8, 16, 8], strides = [1, 1, 1, 1]} : vector<1x10x18x8xf32> to vector<1x8x16x8xf32>
      %30 = vector.extract_strided_slice %23 {offsets = [0, 2, 0, 0], sizes = [1, 8, 16, 8], strides = [1, 1, 1, 1]} : vector<1x10x18x8xf32> to vector<1x8x16x8xf32>
      %31 = vector.extract_strided_slice %23 {offsets = [0, 2, 1, 0], sizes = [1, 8, 16, 8], strides = [1, 1, 1, 1]} : vector<1x10x18x8xf32> to vector<1x8x16x8xf32>
      %32 = vector.extract_strided_slice %23 {offsets = [0, 2, 2, 0], sizes = [1, 8, 16, 8], strides = [1, 1, 1, 1]} : vector<1x10x18x8xf32> to vector<1x8x16x8xf32>
      %c2_i32 = arith.constant 2 : i32
      %33 = arith.addi %arg9, %c2_i32 : i32
      %34 = arith.index_cast %33 : i32 to index
      %c0_29 = arith.constant 0 : index
      %c0_30 = arith.constant 0 : index
      %c0_31 = arith.constant 0 : index
      %35 = vector.load %arg8[%34, %c0_29, %c0_30, %c0_31] : memref<6x10x18x8xf32, #tpu.memory_space<vmem>>, vector<1x10x18x8xf32>
      %36 = vector.extract_strided_slice %35 {offsets = [0, 0, 0, 0], sizes = [1, 8, 16, 8], strides = [1, 1, 1, 1]} : vector<1x10x18x8xf32> to vector<1x8x16x8xf32>
      %37 = vector.extract_strided_slice %35 {offsets = [0, 0, 1, 0], sizes = [1, 8, 16, 8], strides = [1, 1, 1, 1]} : vector<1x10x18x8xf32> to vector<1x8x16x8xf32>
      %38 = vector.extract_strided_slice %35 {offsets = [0, 0, 2, 0], sizes = [1, 8, 16, 8], strides = [1, 1, 1, 1]} : vector<1x10x18x8xf32> to vector<1x8x16x8xf32>
      %39 = vector.extract_strided_slice %35 {offsets = [0, 1, 0, 0], sizes = [1, 8, 16, 8], strides = [1, 1, 1, 1]} : vector<1x10x18x8xf32> to vector<1x8x16x8xf32>
      %40 = vector.extract_strided_slice %35 {offsets = [0, 1, 1, 0], sizes = [1, 8, 16, 8], strides = [1, 1, 1, 1]} : vector<1x10x18x8xf32> to vector<1x8x16x8xf32>
      %41 = vector.extract_strided_slice %35 {offsets = [0, 1, 2, 0], sizes = [1, 8, 16, 8], strides = [1, 1, 1, 1]} : vector<1x10x18x8xf32> to vector<1x8x16x8xf32>
      %42 = vector.extract_strided_slice %35 {offsets = [0, 2, 0, 0], sizes = [1, 8, 16, 8], strides = [1, 1, 1, 1]} : vector<1x10x18x8xf32> to vector<1x8x16x8xf32>
      %43 = vector.extract_strided_slice %35 {offsets = [0, 2, 1, 0], sizes = [1, 8, 16, 8], strides = [1, 1, 1, 1]} : vector<1x10x18x8xf32> to vector<1x8x16x8xf32>
      %44 = vector.extract_strided_slice %35 {offsets = [0, 2, 2, 0], sizes = [1, 8, 16, 8], strides = [1, 1, 1, 1]} : vector<1x10x18x8xf32> to vector<1x8x16x8xf32>
      %45 = tpu.concatenate %12, %13, %14, %15, %16, %17, %18, %19, %20, %24, %25, %26, %27, %28, %29, %30 in 3 : vector<1x8x16x8xf32>, vector<1x8x16x8xf32>, vector<1x8x16x8xf32>, vector<1x8x16x8xf32>, vector<1x8x16x8xf32>, vector<1x8x16x8xf32>, vector<1x8x16x8xf32>, vector<1x8x16x8xf32>, vector<1x8x16x8xf32>, vector<1x8x16x8xf32>, vector<1x8x16x8xf32>, vector<1x8x16x8xf32>, vector<1x8x16x8xf32>, vector<1x8x16x8xf32>, vector<1x8x16x8xf32>, vector<1x8x16x8xf32> -> vector<1x8x16x128xf32>
      %46 = tpu.concatenate %31, %32, %36, %37, %38, %39, %40, %41, %42, %43, %44 in 3 : vector<1x8x16x8xf32>, vector<1x8x16x8xf32>, vector<1x8x16x8xf32>, vector<1x8x16x8xf32>, vector<1x8x16x8xf32>, vector<1x8x16x8xf32>, vector<1x8x16x8xf32>, vector<1x8x16x8xf32>, vector<1x8x16x8xf32>, vector<1x8x16x8xf32>, vector<1x8x16x8xf32> -> vector<1x8x16x88xf32>
      %47 = tpu.concatenate %45, %46 in 3 : vector<1x8x16x128xf32>, vector<1x8x16x88xf32> -> vector<1x8x16x216xf32>
      %48 = vector.shape_cast %47 : vector<1x8x16x216xf32> to vector<128x216xf32>
      %c0_32 = arith.constant 0 : index
      %c0_33 = arith.constant 0 : index
      %49 = vector.load %arg4[%c0_32, %c0_33] : memref<216x8xf32, #tpu.memory_space<vmem>>, vector<216x8xf32>
      %cst_34 = arith.constant dense<0.000000e+00> : vector<128x8xf32>
      %50 = tpu.matmul %48, %49, %cst_34 {dimension_numbers = #tpu.dot_dimension_numbers<[1], [0], [0], [1], [0, 0, 1, 1], [], []>} : vector<128x216xf32>, vector<216x8xf32>, vector<128x8xf32> -> vector<128x8xf32>
      %c0_35 = arith.constant 0 : index
      %c0_36 = arith.constant 0 : index
      %51 = vector.load %arg5[%c0_35, %c0_36] : memref<1x8xf32, #tpu.memory_space<vmem>>, vector<1x8xf32>
      %52 = vector.broadcast %51 : vector<1x8xf32> to vector<128x8xf32>
      %53 = arith.addf %50, %52 : vector<128x8xf32>
      %cst_37 = arith.constant 0.000000e+00 : f32
      %54 = vector.broadcast %cst_37 : f32 to vector<128x8xf32>
      %55 = arith.maximumf %53, %54 : vector<128x8xf32>
      %c0_38 = arith.constant 0 : index
      %56 = arith.index_cast %arg9 : i32 to index
      %c0_39 = arith.constant 0 : index
      %c0_40 = arith.constant 0 : index
      %c0_41 = arith.constant 0 : index
      %57 = vector.load %arg1[%c0_38, %56, %c0_39, %c0_40, %c0_41] : memref<1x4x8x16x8xf32, #tpu.memory_space<vmem>>, vector<1x1x8x16x8xf32>
      %58 = vector.shape_cast %57 : vector<1x1x8x16x8xf32> to vector<128x8xf32>
      %59 = arith.addf %58, %55 : vector<128x8xf32>
      %60 = vector.shape_cast %59 : vector<128x8xf32> to vector<1x1x8x16x8xf32>
      %c0_42 = arith.constant 0 : index
      %61 = arith.index_cast %arg9 : i32 to index
      %c0_43 = arith.constant 0 : index
      %c0_44 = arith.constant 0 : index
      %c0_45 = arith.constant 0 : index
      %62 = vector.load %arg6[%c0_42, %61, %c0_43, %c0_44, %c0_45] : memref<1x4x8x16x8xf32, #tpu.memory_space<vmem>>, vector<1x1x8x16x8xf32>
      tpu.vector_store %arg6[%c0_42, %61, %c0_43, %c0_44, %c0_45], %60 {strides = array<i32>} : memref<1x4x8x16x8xf32, #tpu.memory_space<vmem>>, vector<1x1x8x16x8xf32>,
    }
    %c4_i32_20 = arith.constant 4 : i32
    return
  }
  func.func @transform_0(%arg0: i32) -> (i32, i32, i32, i32, i32) {
    %c0_i32 = arith.constant 0 : i32
    %c0_i32_0 = arith.constant 0 : i32
    %c0_i32_1 = arith.constant 0 : i32
    %c0_i32_2 = arith.constant 0 : i32
    %c0_i32_3 = arith.constant 0 : i32
    return %arg0, %c0_i32, %c0_i32_0, %c0_i32_1, %c0_i32_2 : i32, i32, i32, i32, i32
  }
  func.func @transform_1(%arg0: i32) -> (i32, i32) {
    %c0_i32 = arith.constant 0 : i32
    %c0_i32_0 = arith.constant 0 : i32
    %c0_i32_1 = arith.constant 0 : i32
    return %c0_i32, %c0_i32_0 : i32, i32
  }
  func.func @transform_2(%arg0: i32) -> (i32, i32) {
    %c0_i32 = arith.constant 0 : i32
    %c0_i32_0 = arith.constant 0 : i32
    %c0_i32_1 = arith.constant 0 : i32
    return %c0_i32, %c0_i32_0 : i32, i32
  }
  func.func @transform_3(%arg0: i32) -> (i32, i32) {
    %c0_i32 = arith.constant 0 : i32
    %c0_i32_0 = arith.constant 0 : i32
    %c0_i32_1 = arith.constant 0 : i32
    return %c0_i32, %c0_i32_0 : i32, i32
  }
  func.func @transform_4(%arg0: i32) -> (i32, i32) {
    %c0_i32 = arith.constant 0 : i32
    %c0_i32_0 = arith.constant 0 : i32
    %c0_i32_1 = arith.constant 0 : i32
    return %c0_i32, %c0_i32_0 : i32, i32
  }
  func.func @transform_5(%arg0: i32) -> (i32, i32, i32, i32, i32) {
    %c0_i32 = arith.constant 0 : i32
    %c0_i32_0 = arith.constant 0 : i32
    %c0_i32_1 = arith.constant 0 : i32
    %c0_i32_2 = arith.constant 0 : i32
    %c0_i32_3 = arith.constant 0 : i32
    return %arg0, %c0_i32, %c0_i32_0, %c0_i32_1, %c0_i32_2 : i32, i32, i32, i32, i32
  }
}

</mosaic_0001>

<bundles_post_ra>
// kernel: tpu_custom_call.1
= control target key start
LH: loop header
LB: loop body
LE: loop exit
PB: predicated region body
PF: predicated region fallthrough
CT: control target
= control target key end

     0   :  { %s8042_s18 = smov 0   ;;  %s15504_s0 = inlined_call_operand.vmem [shape: f32[2,4,8,16,8], index: 0, kind: input, shape index: {}]   ;;  %s15505_s1 = inlined_call_operand.vmem [shape: f32[216,8], index: 1, kind: input, shape index: {}]   ;;  %s15506_s2 = inlined_call_operand.vmem [shape: f32[1,8], index: 2, kind: input, shape index: {}]   ;;  %s15507_s3 = inlined_call_operand.vmem [shape: f32[216,8], index: 3, kind: input, shape index: {}]   ;;  %s15508_s4 = inlined_call_operand.vmem [shape: f32[1,8], index: 4, kind: input, shape index: {}]   ;;  %s15509_s5 = inlined_call_operand.vmem [shape: f32[2,4,8,16,8], index: 5, kind: output, shape index: {}]  }
   0x1 LB: > { %s6267_s19 = sadd.s32 4294967295, %s7967_s18   ;;  %p6271_p0 = scmp.ge.s32.totalorder %s7967_s18, 1  ;;  %s7967_s18 = sphi %s8042_s18, %s15_s18  }
   0x2   : > { %p187_p1 = scmp.lt.s32.totalorder %s7967_s18, 3 }
   0x4   : > { %p188_p2 = pnand %p6271_p0, %p187_p1 }
   0x5   : > { %vm225_vm0 = vcmask (!%p188_p2), 64512   ;;  %vm228_vm1 = vcmask (!%p188_p2), 58368   ;;  %p8052_p3 = scmp.lt.s32.totalorder (!%p188_p2), %s6267_s19, 1  ;;  %v7977_v0 = vmov (!%p188_p2), 0.0   ;;  %s8918_s28 = smov (!%p188_p2), 0  }
   0x6   : > { %191 = sbr.rel (%p188_p2) target bundleno = 2358 (0x936), region = 40  ;;  %260 = vst.msk [vmem:[#allocation2 + $0x108] sm:$0xff] (!%p188_p2), %vm225_vm0, %v7977_v0  ;;  %226 = vst.msk [vmem:[#allocation2] sm:$0xff] (!%p188_p2), %vm225_vm0, %v7977_v0 }
   0x7   : > { %227 = vst.msk [vmem:[#allocation2 + $0x8] sm:$0xff] (!%p188_p2), %vm225_vm0, %v7977_v0  ;;  %230 = vst.msk [vmem:[#allocation2 + $0x18] sm:$0xff] (!%p188_p2), %vm225_vm0, %v7977_v0 }
   0x8   : > { %231 = vst.msk [vmem:[#allocation2 + $0x20] sm:$0xff] (!%p188_p2), %vm225_vm0, %v7977_v0  ;;  %233 = vst.msk [vmem:[#allocation2 + $0x30] sm:$0xff] (!%p188_p2), %vm225_vm0, %v7977_v0 }
   0x9   : > { %234 = vst.msk [vmem:[#allocation2 + $0x38] sm:$0xff] (!%p188_p2), %vm225_vm0, %v7977_v0  ;;  %236 = vst.msk [vmem:[#allocation2 + $0x48] sm:$0xff] (!%p188_p2), %vm225_vm0, %v7977_v0 }
   0xa   : > { %237 = vst.msk [vmem:[#allocation2 + $0x50] sm:$0xff] (!%p188_p2), %vm225_vm0, %v7977_v0  ;;  %239 = vst.msk [vmem:[#allocation2 + $0x60] sm:$0xff] (!%p188_p2), %vm225_vm0, %v7977_v0 }
   0xb   : > { %240 = vst.msk [vmem:[#allocation2 + $0x68] sm:$0xff] (!%p188_p2), %vm225_vm0, %v7977_v0  ;;  %242 = vst.msk [vmem:[#allocation2 + $0x78] sm:$0xff] (!%p188_p2), %vm225_vm0, %v7977_v0 }
   0xc   : > { %243 = vst.msk [vmem:[#allocation2 + $0x80] sm:$0xff] (!%p188_p2), %vm225_vm0, %v7977_v0  ;;  %245 = vst.msk [vmem:[#allocation2 + $0x90] sm:$0xff] (!%p188_p2), %vm225_vm0, %v7977_v0 }
   0xd   : > { %246 = vst.msk [vmem:[#allocation2 + $0x98] sm:$0xff] %vm225_vm0, %v7977_v0  ;;  %248 = vst.msk [vmem:[#allocation2 + $0xa8] sm:$0xff] %vm225_vm0, %v7977_v0  ;;  %s16765_s19 = smov (!%p8052_p3, %s6267_s19), 1 }
   0xe   : > { %249 = vst.msk [vmem:[#allocation2 + $0xb0] sm:$0xff] %vm225_vm0, %v7977_v0  ;;  %251 = vst.msk [vmem:[#allocation2 + $0xc0] sm:$0xff] %vm225_vm0, %v7977_v0  ;;  %s6449_s21 = sshll.u32 %s16765_s19, 9 }
   0xf   : > { %252 = vst.msk [vmem:[#allocation2 + $0xc8] sm:$0xff] %vm225_vm0, %v7977_v0  ;;  %254 = vst.msk [vmem:[#allocation2 + $0xd8] sm:$0xff] %vm225_vm0, %v7977_v0  ;;  %s8783_s24 = scalar_lea.vmem %s15504_s0, %s6449_s21  ;;  %s8788_s27 = scalar_lea.vmem %s15509_s5, %s6449_s21 }
  0x10   : > { %255 = vst.msk [vmem:[#allocation2 + $0xe0] sm:$0xff] %vm225_vm0, %v7977_v0  ;;  %257 = vst.msk [vmem:[#allocation2 + $0xf0] sm:$0xff] %vm225_vm0, %v7977_v0  ;;  %v587_v1 = vld [vmem:[%s8783_s24] sm:$0xff]  ;;  %v588_v2 = vld [vmem:[%s8783_s24 + $0x8] sm:$0xff] }
  0x11   : > { %258 = vst.msk [vmem:[#allocation2 + $0xf8] sm:$0xff] %vm225_vm0, %v7977_v0  ;;  %261 = vst.msk [vmem:[#allocation2 + $0x110] sm:$0xff] %vm225_vm0, %v7977_v0  ;;  %v589_v3 = vld [vmem:[%s8783_s24 + $0x10] sm:$0xff]  ;;  %v590_v4 = vld [vmem:[%s8783_s24 + $0x18] sm:$0xff] }
  0x12   : > { %263 = vst.msk [vmem:[#allocation2 + $0x120] sm:$0xff] %vm225_vm0, %v7977_v0  ;;  %264 = vst.msk [vmem:[#allocation2 + $0x128] sm:$0xff] %vm225_vm0, %v7977_v0  ;;  %v591_v5 = vld [vmem:[%s8783_s24 + $0x20] sm:$0xff]  ;;  %v592_v6 = vld [vmem:[%s8783_s24 + $0x28] sm:$0xff] }
  0x13   : > { %266 = vst.msk [vmem:[#allocation2 + $0x138] sm:$0xff] %vm225_vm0, %v7977_v0  ;;  %267 = vst.msk [vmem:[#allocation2 + $0x140] sm:$0xff] %vm225_vm0, %v7977_v0  ;;  %v593_v7 = vld [vmem:[%s8783_s24 + $0x30] sm:$0xff]  ;;  %v594_v8 = vld [vmem:[%s8783_s24 + $0x38] sm:$0xff] }
  0x14   : > { %269 = vst.msk [vmem:[#allocation2 + $0x150] sm:$0xff] %vm225_vm0, %v7977_v0  ;;  %270 = vst.msk [vmem:[#allocation2 + $0x158] sm:$0xff] %vm225_vm0, %v7977_v0  ;;  %v595_v9 = vld [vmem:[%s8783_s24 + $0x40] sm:$0xff]  ;;  %v596_v10 = vld [vmem:[%s8783_s24 + $0x48] sm:$0xff] }
  0x15   : > { %272 = vst.msk [vmem:[#allocation2 + $0x168] sm:$0xff] %vm225_vm0, %v7977_v0  ;;  %273 = vst.msk [vmem:[#allocation2 + $0x170] sm:$0xff] %vm225_vm0, %v7977_v0  ;;  %v597_v11 = vld [vmem:[%s8783_s24 + $0x50] sm:$0xff]  ;;  %v598_v12 = vld [vmem:[%s8783_s24 + $0x58] sm:$0xff] }
  0x16   : > { %275 = vst.msk [vmem:[#allocation2 + $0x180] sm:$0xff] %vm225_vm0, %v7977_v0  ;;  %276 = vst.msk [vmem:[#allocation2 + $0x188] sm:$0xff] %vm225_vm0, %v7977_v0  ;;  %v599_v13 = vld [vmem:[%s8783_s24 + $0x60] sm:$0xff]  ;;  %v600_v14 = vld [vmem:[%s8783_s24 + $0x68] sm:$0xff] }
  0x17   : > { %278 = vst.msk [vmem:[#allocation2 + $0x198] sm:$0xff] %vm225_vm0, %v7977_v0  ;;  %279 = vst.msk [vmem:[#allocation2 + $0x1a0] sm:$0xff] %vm225_vm0, %v7977_v0  ;;  %v601_v15 = vld [vmem:[%s8783_s24 + $0x70] sm:$0xff]  ;;  %v602_v16 = vld [vmem:[%s8783_s24 + $0x78] sm:$0xff] }
  0x18   : > { %281 = vst.msk [vmem:[#allocation2 + $0x1b0] sm:$0xff] %vm225_vm0, %v7977_v0  ;;  %282 = vst.msk [vmem:[#allocation2 + $0x1b8] sm:$0xff] %vm225_vm0, %v7977_v0  ;;  %v603_v17 = vld [vmem:[%s8783_s24 + $0x80] sm:$0xff]  ;;  %v604_v18 = vld [vmem:[%s8783_s24 + $0x88] sm:$0xff] }
  0x19   : > { %284 = vst.msk [vmem:[#allocation2 + $0x1c8] sm:$0xff] %vm225_vm0, %v7977_v0  ;;  %285 = vst.msk [vmem:[#allocation2 + $0x1d0] sm:$0xff] %vm225_vm0, %v7977_v0  ;;  %v605_v19 = vld [vmem:[%s8783_s24 + $0x90] sm:$0xff]  ;;  %v606_v20 = vld [vmem:[%s8783_s24 + $0x98] sm:$0xff] }
  0x1a   : > { %287 = vst.msk [vmem:[#allocation2 + $0x1e0] sm:$0xff] %vm225_vm0, %v7977_v0  ;;  %288 = vst.msk [vmem:[#allocation2 + $0x1e8] sm:$0xff] %vm225_vm0, %v7977_v0  ;;  %v607_v21 = vld [vmem:[%s8783_s24 + $0xa0] sm:$0xff]  ;;  %v608_v22 = vld [vmem:[%s8783_s24 + $0xa8] sm:$0xff] }
  0x1b   : > { %290 = vst.msk [vmem:[#allocation2 + $0x1f8] sm:$0xff] %vm225_vm0, %v7977_v0  ;;  %291 = vst.msk [vmem:[#allocation2 + $0x200] sm:$0xff] %vm225_vm0, %v7977_v0  ;;  %v609_v23 = vld [vmem:[%s8783_s24 + $0xb0] sm:$0xff]  ;;  %v610_v24 = vld [vmem:[%s8783_s24 + $0xb8] sm:$0xff] }
  0x1c   : > { %293 = vst.msk [vmem:[#allocation2 + $0x210] sm:$0xff] %vm225_vm0, %v7977_v0  ;;  %294 = vst.msk [vmem:[#allocation2 + $0x218] sm:$0xff] %vm225_vm0, %v7977_v0  ;;  %v611_v25 = vld [vmem:[%s8783_s24 + $0xc0] sm:$0xff]  ;;  %v612_v26 = vld [vmem:[%s8783_s24 + $0xc8] sm:$0xff] }
  0x1d   : > { %296 = vst.msk [vmem:[#allocation2 + $0x228] sm:$0xff] %vm225_vm0, %v7977_v0  ;;  %297 = vst.msk [vmem:[#allocation2 + $0x230] sm:$0xff] %vm225_vm0, %v7977_v0  ;;  %v613_v27 = vld [vmem:[%s8783_s24 + $0xd0] sm:$0xff]  ;;  %v614_v28 = vld [vmem:[%s8783_s24 + $0xd8] sm:$0xff] }
  0x1e   : > { %299 = vst.msk [vmem:[#allocation2 + $0x240] sm:$0xff] %vm225_vm0, %v7977_v0  ;;  %300 = vst.msk [vmem:[#allocation2 + $0x248] sm:$0xff] %vm225_vm0, %v7977_v0  ;;  %v615_v29 = vld [vmem:[%s8783_s24 + $0xe0] sm:$0xff]  ;;  %v616_v30 = vld [vmem:[%s8783_s24 + $0xe8] sm:$0xff] }
  0x1f   : > { %302 = vst.msk [vmem:[#allocation2 + $0x258] sm:$0xff] %vm225_vm0, %v7977_v0  ;;  %303 = vst.msk [vmem:[#allocation2 + $0x260] sm:$0xff] %vm225_vm0, %v7977_v0  ;;  %v617_v31 = vld [vmem:[%s8783_s24 + $0xf0] sm:$0xff]  ;;  %v618_v32 = vld [vmem:[%s8783_s24 + $0xf8] sm:$0xff] }
  0x20   : > { %305 = vst.msk [vmem:[#allocation2 + $0x270] sm:$0xff] %vm225_vm0, %v7977_v0  ;;  %306 = vst.msk [vmem:[#allocation2 + $0x278] sm:$0xff] %vm225_vm0, %v7977_v0  ;;  %v619_v33 = vld [vmem:[%s8783_s24 + $0x100] sm:$0xff]  ;;  %v620_v34 = vld [vmem:[%s8783_s24 + $0x108] sm:$0xff] }
  0x21   : > { %308 = vst.msk [vmem:[#allocation2 + $0x288] sm:$0xff] %vm225_vm0, %v7977_v0  ;;  %309 = vst.msk [vmem:[#allocation2 + $0x290] sm:$0xff] %vm225_vm0, %v7977_v0  ;;  %v621_v35 = vld [vmem:[%s8783_s24 + $0x110] sm:$0xff]  ;;  %v622_v36 = vld [vmem:[%s8783_s24 + $0x118] sm:$0xff] }
  0x22   : > { %311 = vst.msk [vmem:[#allocation2 + $0x2a0] sm:$0xff] %vm225_vm0, %v7977_v0  ;;  %312 = vst.msk [vmem:[#allocation2 + $0x2a8] sm:$0xff] %vm225_vm0, %v7977_v0  ;;  %v623_v37 = vld [vmem:[%s8783_s24 + $0x120] sm:$0xff]  ;;  %v624_v38 = vld [vmem:[%s8783_s24 + $0x128] sm:$0xff] }
  0x23   : > { %314 = vst.msk [vmem:[#allocation2 + $0x2b8] sm:$0xff] %vm225_vm0, %v7977_v0  ;;  %315 = vst.msk [vmem:[#allocation2 + $0x2c0] sm:$0xff] %vm225_vm0, %v7977_v0  ;;  %v625_v39 = vld [vmem:[%s8783_s24 + $0x130] sm:$0xff]  ;;  %v626_v40 = vld [vmem:[%s8783_s24 + $0x138] sm:$0xff] }
  0x24   : > { %317 = vst.msk [vmem:[#allocation2 + $0x2d0] sm:$0xff] %vm225_vm0, %v7977_v0  ;;  %318 = vst.msk [vmem:[#allocation2 + $0x2d8] sm:$0xff] %vm225_vm0, %v7977_v0  ;;  %v627_v41 = vld [vmem:[%s8783_s24 + $0x140] sm:$0xff]  ;;  %v628_v42 = vld [vmem:[%s8783_s24 + $0x148] sm:$0xff] }
  0x25   : > { %320 = vst.msk [vmem:[#allocation2 + $0x2e8] sm:$0xff] %vm225_vm0, %v7977_v0  ;;  %321 = vst.msk [vmem:[#allocation2 + $0x2f0] sm:$0xff] %vm225_vm0, %v7977_v0  ;;  %v629_v43 = vld [vmem:[%s8783_s24 + $0x150] sm:$0xff]  ;;  %v630_v44 = vld [vmem:[%s8783_s24 + $0x158] sm:$0xff] }
  0x26   : > { %323 = vst.msk [vmem:[#allocation2 + $0x300] sm:$0xff] %vm225_vm0, %v7977_v0  ;;  %324 = vst.msk [vmem:[#allocation2 + $0x308] sm:$0xff] %vm225_vm0, %v7977_v0  ;;  %v631_v45 = vld [vmem:[%s8783_s24 + $0x160] sm:$0xff]  ;;  %v632_v46 = vld [vmem:[%s8783_s24 + $0x168] sm:$0xff] }
  0x27   : > { %326 = vst.msk [vmem:[#allocation2 + $0x318] sm:$0xff] %vm225_vm0, %v7977_v0  ;;  %327 = vst.msk [vmem:[#allocation2 + $0x320] sm:$0xff] %vm225_vm0, %v7977_v0  ;;  %v633_v47 = vld [vmem:[%s8783_s24 + $0x170] sm:$0xff]  ;;  %v634_v48 = vld [vmem:[%s8783_s24 + $0x178] sm:$0xff] }
  0x28   : > { %329 = vst.msk [vmem:[#allocation2 + $0x330] sm:$0xff] %vm225_vm0, %v7977_v0  ;;  %330 = vst.msk [vmem:[#allocation2 + $0x338] sm:$0xff] %vm225_vm0, %v7977_v0  ;;  %v635_v49 = vld [vmem:[%s8783_s24 + $0x180] sm:$0xff]  ;;  %v636_v50 = vld [vmem:[%s8783_s24 + $0x188] sm:$0xff] }
  0x29   : > { %332 = vst.msk [vmem:[#allocation2 + $0x348] sm:$0xff] %vm225_vm0, %v7977_v0  ;;  %333 = vst.msk [vmem:[#allocation2 + $0x350] sm:$0xff] %vm225_vm0, %v7977_v0  ;;  %v637_v51 = vld [vmem:[%s8783_s24 + $0x190] sm:$0xff]  ;;  %v638_v52 = vld [vmem:[%s8783_s24 + $0x198] sm:$0xff] }
  0x2a   : > { %335 = vst.msk [vmem:[#allocation2 + $0x360] sm:$0xff] %vm225_vm0, %v7977_v0  ;;  %336 = vst.msk [vmem:[#allocation2 + $0x368] sm:$0xff] %vm225_vm0, %v7977_v0  ;;  %v639_v53 = vld [vmem:[%s8783_s24 + $0x1a0] sm:$0xff]  ;;  %v640_v54 = vld [vmem:[%s8783_s24 + $0x1a8] sm:$0xff] }
  0x2b   : > { %338 = vst.msk [vmem:[#allocation2 + $0x378] sm:$0xff] %vm225_vm0, %v7977_v0  ;;  %339 = vst.msk [vmem:[#allocation2 + $0x380] sm:$0xff] %vm225_vm0, %v7977_v0  ;;  %v641_v55 = vld [vmem:[%s8783_s24 + $0x1b0] sm:$0xff]  ;;  %v642_v56 = vld [vmem:[%s8783_s24 + $0x1b8] sm:$0xff] }
  0x2c   : > { %341 = vst.msk [vmem:[#allocation2 + $0x390] sm:$0xff] %vm225_vm0, %v7977_v0  ;;  %342 = vst.msk [vmem:[#allocation2 + $0x398] sm:$0xff] %vm225_vm0, %v7977_v0  ;;  %v643_v57 = vld [vmem:[%s8783_s24 + $0x1c0] sm:$0xff]  ;;  %v644_v58 = vld [vmem:[%s8783_s24 + $0x1c8] sm:$0xff] }
  0x2d   : > { %344 = vst.msk [vmem:[#allocation2 + $0x3a8] sm:$0xff] %vm225_vm0, %v7977_v0  ;;  %345 = vst.msk [vmem:[#allocation2 + $0x3b0] sm:$0xff] %vm225_vm0, %v7977_v0  ;;  %v645_v59 = vld [vmem:[%s8783_s24 + $0x1d0] sm:$0xff]  ;;  %v646_v60 = vld [vmem:[%s8783_s24 + $0x1d8] sm:$0xff] }
  0x2e   : > { %347 = vst.msk [vmem:[#allocation2 + $0x3c0] sm:$0xff] %vm225_vm0, %v7977_v0  ;;  %348 = vst.msk [vmem:[#allocation2 + $0x3c8] sm:$0xff] %vm225_vm0, %v7977_v0  ;;  %v647_v61 = vld [vmem:[%s8783_s24 + $0x1e0] sm:$0xff]  ;;  %v648_v62 = vld [vmem:[%s8783_s24 + $0x1e8] sm:$0xff] }
  0x2f   : > { %350 = vst.msk [vmem:[#allocation2 + $0x3d8] sm:$0xff] %vm225_vm0, %v7977_v0  ;;  %351 = vst.msk [vmem:[#allocation2 + $0x3e0] sm:$0xff] %vm225_vm0, %v7977_v0  ;;  %v649_v63 = vld [vmem:[%s8783_s24 + $0x1f0] sm:$0xff] }
  0x30   : > { %353 = vst.msk [vmem:[#allocation2 + $0x3f0] sm:$0xff] %vm225_vm0, %v7977_v0  ;;  %354 = vst.msk [vmem:[#allocation2 + $0x3f8] sm:$0xff] %vm225_vm0, %v7977_v0 }
  0x31   : > { %356 = vst.msk [vmem:[#allocation2 + $0x408] sm:$0xff] %vm225_vm0, %v7977_v0  ;;  %357 = vst.msk [vmem:[#allocation2 + $0x410] sm:$0xff] %vm225_vm0, %v7977_v0 }
  0x32   : > { %359 = vst.msk [vmem:[#allocation2 + $0x420] sm:$0xff] %vm225_vm0, %v7977_v0  ;;  %360 = vst.msk [vmem:[#allocation2 + $0x428] sm:$0xff] %vm225_vm0, %v7977_v0 }
  0x33   : > { %362 = vst.msk [vmem:[#allocation2 + $0x438] sm:$0xff] %vm225_vm0, %v7977_v0  ;;  %363 = vst.msk [vmem:[#allocation2 + $0x440] sm:$0xff] %vm225_vm0, %v7977_v0 }
  0x34   : > { %365 = vst.msk [vmem:[#allocation2 + $0x450] sm:$0xff] %vm225_vm0, %v7977_v0  ;;  %366 = vst.msk [vmem:[#allocation2 + $0x458] sm:$0xff] %vm225_vm0, %v7977_v0 }
  0x35   : > { %368 = vst.msk [vmem:[#allocation2 + $0x468] sm:$0xff] %vm225_vm0, %v7977_v0  ;;  %369 = vst.msk [vmem:[#allocation2 + $0x470] sm:$0xff] %vm225_vm0, %v7977_v0 }
  0x36   : > { %371 = vst.msk [vmem:[#allocation2 + $0x480] sm:$0xff] %vm225_vm0, %v7977_v0  ;;  %372 = vst.msk [vmem:[#allocation2 + $0x488] sm:$0xff] %vm225_vm0, %v7977_v0 }
  0x37   : > { %374 = vst.msk [vmem:[#allocation2 + $0x498] sm:$0xff] %vm225_vm0, %v7977_v0  ;;  %375 = vst.msk [vmem:[#allocation2 + $0x4a0] sm:$0xff] %vm225_vm0, %v7977_v0 }
  0x38   : > { %377 = vst.msk [vmem:[#allocation2 + $0x4b0] sm:$0xff] %vm225_vm0, %v7977_v0  ;;  %378 = vst.msk [vmem:[#allocation2 + $0x4b8] sm:$0xff] %vm225_vm0, %v7977_v0 }
  0x39   : > { %380 = vst.msk [vmem:[#allocation2 + $0x4c8] sm:$0xff] %vm225_vm0, %v7977_v0  ;;  %381 = vst.msk [vmem:[#allocation2 + $0x4d0] sm:$0xff] %vm225_vm0, %v7977_v0 }
  0x3a   : > { %383 = vst.msk [vmem:[#allocation2 + $0x4e0] sm:$0xff] %vm225_vm0, %v7977_v0  ;;  %384 = vst.msk [vmem:[#allocation2 + $0x4e8] sm:$0xff] %vm225_vm0, %v7977_v0 }
  0x3b   : > { %386 = vst.msk [vmem:[#allocation2 + $0x4f8] sm:$0xff] %vm225_vm0, %v7977_v0  ;;  %387 = vst.msk [vmem:[#allocation2 + $0x500] sm:$0xff] %vm225_vm0, %v7977_v0 }
  0x3c   : > { %389 = vst.msk [vmem:[#allocation2 + $0x510] sm:$0xff] %vm225_vm0, %v7977_v0  ;;  %390 = vst.msk [vmem:[#allocation2 + $0x518] sm:$0xff] %vm225_vm0, %v7977_v0 }
  0x3d   : > { %392 = vst.msk [vmem:[#allocation2 + $0x528] sm:$0xff] %vm225_vm0, %v7977_v0  ;;  %393 = vst.msk [vmem:[#allocation2 + $0x530] sm:$0xff] %vm225_vm0, %v7977_v0 }
  0x3e   : > { %395 = vst.msk [vmem:[#allocation2 + $0x540] sm:$0xff] %vm225_vm0, %v7977_v0  ;;  %396 = vst.msk [vmem:[#allocation2 + $0x548] sm:$0xff] %vm225_vm0, %v7977_v0 }
  0x3f   : > { %398 = vst.msk [vmem:[#allocation2 + $0x558] sm:$0xff] %vm225_vm0, %v7977_v0  ;;  %399 = vst.msk [vmem:[#allocation2 + $0x560] sm:$0xff] %vm225_vm0, %v7977_v0 }
  0x40   : > { %401 = vst.msk [vmem:[#allocation2 + $0x570] sm:$0xff] %vm225_vm0, %v7977_v0  ;;  %402 = vst.msk [vmem:[#allocation2 + $0x578] sm:$0xff] %vm225_vm0, %v7977_v0 }
  0x41   : > { %404 = vst.msk [vmem:[#allocation2 + $0x588] sm:$0xff] %vm225_vm0, %v7977_v0  ;;  %405 = vst.msk [vmem:[#allocation2 + $0x590] sm:$0xff] %vm225_vm0, %v7977_v0 }
  0x42   : > { %407 = vst.msk [vmem:[#allocation3] sm:$0xff] %vm225_vm0, %v7977_v0  ;;  %408 = vst.msk [vmem:[#allocation3 + $0x8] sm:$0xff] %vm225_vm0, %v7977_v0 }
  0x43   : > { %410 = vst.msk [vmem:[#allocation3 + $0x18] sm:$0xff] %vm225_vm0, %v7977_v0  ;;  %411 = vst.msk [vmem:[#allocation3 + $0x20] sm:$0xff] %vm225_vm0, %v7977_v0 }
  0x44   : > { %413 = vst.msk [vmem:[#allocation3 + $0x30] sm:$0xff] %vm225_vm0, %v7977_v0  ;;  %414 = vst.msk [vmem:[#allocation3 + $0x38] sm:$0xff] %vm225_vm0, %v7977_v0 }
  0x45   : > { %416 = vst.msk [vmem:[#allocation3 + $0x48] sm:$0xff] %vm225_vm0, %v7977_v0  ;;  %417 = vst.msk [vmem:[#allocation3 + $0x50] sm:$0xff] %vm225_vm0, %v7977_v0 }
  0x46   : > { %419 = vst.msk [vmem:[#allocation3 + $0x60] sm:$0xff] %vm225_vm0, %v7977_v0  ;;  %420 = vst.msk [vmem:[#allocation3 + $0x68] sm:$0xff] %vm225_vm0, %v7977_v0 }
  0x47   : > { %422 = vst.msk [vmem:[#allocation3 + $0x78] sm:$0xff] %vm225_vm0, %v7977_v0  ;;  %423 = vst.msk [vmem:[#allocation3 + $0x80] sm:$0xff] %vm225_vm0, %v7977_v0 }
  0x48   : > { %425 = vst.msk [vmem:[#allocation3 + $0x90] sm:$0xff] %vm225_vm0, %v7977_v0  ;;  %426 = vst.msk [vmem:[#allocation3 + $0x98] sm:$0xff] %vm225_vm0, %v7977_v0 }
  0x49   : > { %428 = vst.msk [vmem:[#allocation3 + $0xa8] sm:$0xff] %vm225_vm0, %v7977_v0  ;;  %429 = vst.msk [vmem:[#allocation3 + $0xb0] sm:$0xff] %vm225_vm0, %v7977_v0 }
  0x4a   : > { %431 = vst.msk [vmem:[#allocation3 + $0xc0] sm:$0xff] %vm225_vm0, %v7977_v0  ;;  %432 = vst.msk [vmem:[#allocation3 + $0xc8] sm:$0xff] %vm225_vm0, %v7977_v0 }
  0x4b   : > { %434 = vst.msk [vmem:[#allocation3 + $0xd8] sm:$0xff] %vm225_vm0, %v7977_v0  ;;  %435 = vst.msk [vmem:[#allocation3 + $0xe0] sm:$0xff] %vm225_vm0, %v7977_v0 }
  0x4c   : > { %437 = vst.msk [vmem:[#allocation3 + $0xf0] sm:$0xff] %vm225_vm0, %v7977_v0  ;;  %438 = vst.msk [vmem:[#allocation3 + $0xf8] sm:$0xff] %vm225_vm0, %v7977_v0 }
  0x4d   : > { %440 = vst.msk [vmem:[#allocation3 + $0x108] sm:$0xff] %vm225_vm0, %v7977_v0  ;;  %441 = vst.msk [vmem:[#allocation3 + $0x110] sm:$0xff] %vm225_vm0, %v7977_v0 }
  0x4e   : > { %443 = vst.msk [vmem:[#allocation3 + $0x120] sm:$0xff] %vm225_vm0, %v7977_v0  ;;  %444 = vst.msk [vmem:[#allocation3 + $0x128] sm:$0xff] %vm225_vm0, %v7977_v0 }
  0x4f   : > { %446 = vst.msk [vmem:[#allocation3 + $0x138] sm:$0xff] %vm225_vm0, %v7977_v0  ;;  %447 = vst.msk [vmem:[#allocation3 + $0x140] sm:$0xff] %vm225_vm0, %v7977_v0 }
  0x50   : > { %449 = vst.msk [vmem:[#allocation3 + $0x150] sm:$0xff] %vm225_vm0, %v7977_v0  ;;  %450 = vst.msk [vmem:[#allocation3 + $0x158] sm:$0xff] %vm225_vm0, %v7977_v0 }
  0x51   : > { %452 = vst.msk [vmem:[#allocation3 + $0x168] sm:$0xff] %vm225_vm0, %v7977_v0  ;;  %453 = vst.msk [vmem:[#allocation3 + $0x170] sm:$0xff] %vm225_vm0, %v7977_v0 }
  0x52   : > { %455 = vst.msk [vmem:[#allocation3 + $0x180] sm:$0xff] %vm225_vm0, %v7977_v0  ;;  %456 = vst.msk [vmem:[#allocation3 + $0x188] sm:$0xff] %vm225_vm0, %v7977_v0 }
  0x53   : > { %458 = vst.msk [vmem:[#allocation3 + $0x198] sm:$0xff] %vm225_vm0, %v7977_v0  ;;  %459 = vst.msk [vmem:[#allocation3 + $0x1a0] sm:$0xff] %vm225_vm0, %v7977_v0 }
  0x54   : > { %461 = vst.msk [vmem:[#allocation3 + $0x1b0] sm:$0xff] %vm225_vm0, %v7977_v0  ;;  %462 = vst.msk [vmem:[#allocation3 + $0x1b8] sm:$0xff] %vm225_vm0, %v7977_v0 }
  0x55   : > { %464 = vst.msk [vmem:[#allocation3 + $0x1c8] sm:$0xff] %vm225_vm0, %v7977_v0  ;;  %465 = vst.msk [vmem:[#allocation3 + $0x1d0] sm:$0xff] %vm225_vm0, %v7977_v0 }
  0x56   : > { %467 = vst.msk [vmem:[#allocation3 + $0x1e0] sm:$0xff] %vm225_vm0, %v7977_v0  ;;  %468 = vst.msk [vmem:[#allocation3 + $0x1e8] sm:$0xff] %vm225_vm0, %v7977_v0 }
  0x57   : > { %470 = vst.msk [vmem:[#allocation3 + $0x1f8] sm:$0xff] %vm225_vm0, %v7977_v0  ;;  %471 = vst.msk [vmem:[#allocation3 + $0x200] sm:$0xff] %vm225_vm0, %v7977_v0 }
  0x58   : > { %473 = vst.msk [vmem:[#allocation3 + $0x210] sm:$0xff] %vm225_vm0, %v7977_v0  ;;  %474 = vst.msk [vmem:[#allocation3 + $0x218] sm:$0xff] %vm225_vm0, %v7977_v0 }
  0x59   : > { %476 = vst.msk [vmem:[#allocation3 + $0x228] sm:$0xff] %vm225_vm0, %v7977_v0  ;;  %477 = vst.msk [vmem:[#allocation3 + $0x230] sm:$0xff] %vm225_vm0, %v7977_v0 }
  0x5a   : > { %479 = vst.msk [vmem:[#allocation3 + $0x240] sm:$0xff] %vm225_vm0, %v7977_v0  ;;  %480 = vst.msk [vmem:[#allocation3 + $0x248] sm:$0xff] %vm225_vm0, %v7977_v0 }
  0x5b   : > { %482 = vst.msk [vmem:[#allocation3 + $0x258] sm:$0xff] %vm225_vm0, %v7977_v0  ;;  %483 = vst.msk [vmem:[#allocation3 + $0x260] sm:$0xff] %vm225_vm0, %v7977_v0 }
  0x5c   : > { %485 = vst.msk [vmem:[#allocation3 + $0x270] sm:$0xff] %vm225_vm0, %v7977_v0  ;;  %486 = vst.msk [vmem:[#allocation3 + $0x278] sm:$0xff] %vm225_vm0, %v7977_v0 }
  0x5d   : > { %488 = vst.msk [vmem:[#allocation3 + $0x288] sm:$0xff] %vm225_vm0, %v7977_v0  ;;  %489 = vst.msk [vmem:[#allocation3 + $0x290] sm:$0xff] %vm225_vm0, %v7977_v0 }
  0x5e   : > { %491 = vst.msk [vmem:[#allocation3 + $0x2a0] sm:$0xff] %vm225_vm0, %v7977_v0  ;;  %492 = vst.msk [vmem:[#allocation3 + $0x2a8] sm:$0xff] %vm225_vm0, %v7977_v0 }
  0x5f   : > { %494 = vst.msk [vmem:[#allocation3 + $0x2b8] sm:$0xff] %vm225_vm0, %v7977_v0  ;;  %495 = vst.msk [vmem:[#allocation3 + $0x2c0] sm:$0xff] %vm225_vm0, %v7977_v0 }
  0x60   : > { %497 = vst.msk [vmem:[#allocation3 + $0x2d0] sm:$0xff] %vm225_vm0, %v7977_v0  ;;  %498 = vst.msk [vmem:[#allocation3 + $0x2d8] sm:$0xff] %vm225_vm0, %v7977_v0 }
  0x61   : > { %500 = vst.msk [vmem:[#allocation3 + $0x2e8] sm:$0xff] %vm225_vm0, %v7977_v0  ;;  %501 = vst.msk [vmem:[#allocation3 + $0x2f0] sm:$0xff] %vm225_vm0, %v7977_v0 }
  0x62   : > { %503 = vst.msk [vmem:[#allocation3 + $0x300] sm:$0xff] %vm225_vm0, %v7977_v0  ;;  %504 = vst.msk [vmem:[#allocation3 + $0x308] sm:$0xff] %vm225_vm0, %v7977_v0 }
  0x63   : > { %506 = vst.msk [vmem:[#allocation3 + $0x318] sm:$0xff] %vm225_vm0, %v7977_v0  ;;  %507 = vst.msk [vmem:[#allocation3 + $0x320] sm:$0xff] %vm225_vm0, %v7977_v0 }
  0x64   : > { %509 = vst.msk [vmem:[#allocation3 + $0x330] sm:$0xff] %vm225_vm0, %v7977_v0  ;;  %510 = vst.msk [vmem:[#allocation3 + $0x338] sm:$0xff] %vm225_vm0, %v7977_v0 }
  0x65   : > { %512 = vst.msk [vmem:[#allocation3 + $0x348] sm:$0xff] %vm225_vm0, %v7977_v0  ;;  %513 = vst.msk [vmem:[#allocation3 + $0x350] sm:$0xff] %vm225_vm0, %v7977_v0 }
  0x66   : > { %515 = vst.msk [vmem:[#allocation3 + $0x360] sm:$0xff] %vm225_vm0, %v7977_v0  ;;  %516 = vst.msk [vmem:[#allocation3 + $0x368] sm:$0xff] %vm225_vm0, %v7977_v0 }
  0x67   : > { %518 = vst.msk [vmem:[#allocation3 + $0x378] sm:$0xff] %vm225_vm0, %v7977_v0  ;;  %519 = vst.msk [vmem:[#allocation3 + $0x380] sm:$0xff] %vm225_vm0, %v7977_v0 }
  0x68   : > { %521 = vst.msk [vmem:[#allocation3 + $0x390] sm:$0xff] %vm225_vm0, %v7977_v0  ;;  %522 = vst.msk [vmem:[#allocation3 + $0x398] sm:$0xff] %vm225_vm0, %v7977_v0 }
  0x69   : > { %524 = vst.msk [vmem:[#allocation3 + $0x3a8] sm:$0xff] %vm225_vm0, %v7977_v0  ;;  %525 = vst.msk [vmem:[#allocation3 + $0x3b0] sm:$0xff] %vm225_vm0, %v7977_v0 }
  0x6a   : > { %527 = vst.msk [vmem:[#allocation3 + $0x3c0] sm:$0xff] %vm225_vm0, %v7977_v0  ;;  %528 = vst.msk [vmem:[#allocation3 + $0x3c8] sm:$0xff] %vm225_vm0, %v7977_v0 }
  0x6b   : > { %530 = vst.msk [vmem:[#allocation3 + $0x3d8] sm:$0xff] %vm225_vm0, %v7977_v0  ;;  %531 = vst.msk [vmem:[#allocation3 + $0x3e0] sm:$0xff] %vm225_vm0, %v7977_v0 }
  0x6c   : > { %533 = vst.msk [vmem:[#allocation3 + $0x3f0] sm:$0xff] %vm225_vm0, %v7977_v0  ;;  %534 = vst.msk [vmem:[#allocation3 + $0x3f8] sm:$0xff] %vm225_vm0, %v7977_v0 }
  0x6d   : > { %536 = vst.msk [vmem:[#allocation3 + $0x408] sm:$0xff] %vm225_vm0, %v7977_v0  ;;  %537 = vst.msk [vmem:[#allocation3 + $0x410] sm:$0xff] %vm225_vm0, %v7977_v0 }
  0x6e   : > { %539 = vst.msk [vmem:[#allocation3 + $0x420] sm:$0xff] %vm225_vm0, %v7977_v0  ;;  %540 = vst.msk [vmem:[#allocation3 + $0x428] sm:$0xff] %vm225_vm0, %v7977_v0 }
  0x6f   : > { %542 = vst.msk [vmem:[#allocation3 + $0x438] sm:$0xff] %vm225_vm0, %v7977_v0  ;;  %543 = vst.msk [vmem:[#allocation3 + $0x440] sm:$0xff] %vm225_vm0, %v7977_v0 }
  0x70   : > { %545 = vst.msk [vmem:[#allocation3 + $0x450] sm:$0xff] %vm225_vm0, %v7977_v0  ;;  %546 = vst.msk [vmem:[#allocation3 + $0x458] sm:$0xff] %vm225_vm0, %v7977_v0 }
  0x71   : > { %548 = vst.msk [vmem:[#allocation3 + $0x468] sm:$0xff] %vm225_vm0, %v7977_v0  ;;  %549 = vst.msk [vmem:[#allocation3 + $0x470] sm:$0xff] %vm225_vm0, %v7977_v0 }
  0x72   : > { %551 = vst.msk [vmem:[#allocation3 + $0x480] sm:$0xff] %vm225_vm0, %v7977_v0  ;;  %552 = vst.msk [vmem:[#allocation3 + $0x488] sm:$0xff] %vm225_vm0, %v7977_v0 }
  0x73   : > { %554 = vst.msk [vmem:[#allocation3 + $0x498] sm:$0xff] %vm225_vm0, %v7977_v0  ;;  %555 = vst.msk [vmem:[#allocation3 + $0x4a0] sm:$0xff] %vm225_vm0, %v7977_v0 }
  0x74   : > { %557 = vst.msk [vmem:[#allocation3 + $0x4b0] sm:$0xff] %vm225_vm0, %v7977_v0  ;;  %558 = vst.msk [vmem:[#allocation3 + $0x4b8] sm:$0xff] %vm225_vm0, %v7977_v0 }
  0x75   : > { %560 = vst.msk [vmem:[#allocation3 + $0x4c8] sm:$0xff] %vm225_vm0, %v7977_v0  ;;  %561 = vst.msk [vmem:[#allocation3 + $0x4d0] sm:$0xff] %vm225_vm0, %v7977_v0 }
  0x76   : > { %563 = vst.msk [vmem:[#allocation3 + $0x4e0] sm:$0xff] %vm225_vm0, %v7977_v0  ;;  %564 = vst.msk [vmem:[#allocation3 + $0x4e8] sm:$0xff] %vm225_vm0, %v7977_v0 }
  0x77   : > { %566 = vst.msk [vmem:[#allocation3 + $0x4f8] sm:$0xff] %vm225_vm0, %v7977_v0  ;;  %567 = vst.msk [vmem:[#allocation3 + $0x500] sm:$0xff] %vm225_vm0, %v7977_v0 }
  0x78   : > { %569 = vst.msk [vmem:[#allocation3 + $0x510] sm:$0xff] %vm225_vm0, %v7977_v0  ;;  %570 = vst.msk [vmem:[#allocation3 + $0x518] sm:$0xff] %vm225_vm0, %v7977_v0 }
  0x79   : > { %572 = vst.msk [vmem:[#allocation3 + $0x528] sm:$0xff] %vm225_vm0, %v7977_v0  ;;  %573 = vst.msk [vmem:[#allocation3 + $0x530] sm:$0xff] %vm225_vm0, %v7977_v0 }
  0x7a   : > { %575 = vst.msk [vmem:[#allocation3 + $0x540] sm:$0xff] %vm225_vm0, %v7977_v0  ;;  %576 = vst.msk [vmem:[#allocation3 + $0x548] sm:$0xff] %vm225_vm0, %v7977_v0 }
  0x7b   : > { %578 = vst.msk [vmem:[#allocation3 + $0x558] sm:$0xff] %vm225_vm0, %v7977_v0  ;;  %579 = vst.msk [vmem:[#allocation3 + $0x560] sm:$0xff] %vm225_vm0, %v7977_v0 }
  0x7c   : > { %581 = vst.msk [vmem:[#allocation3 + $0x570] sm:$0xff] %vm225_vm0, %v7977_v0  ;;  %582 = vst.msk [vmem:[#allocation3 + $0x578] sm:$0xff] %vm225_vm0, %v7977_v0 }
  0x7d   : > { %584 = vst.msk [vmem:[#allocation3 + $0x588] sm:$0xff] %vm225_vm0, %v7977_v0  ;;  %585 = vst.msk [vmem:[#allocation3 + $0x590] sm:$0xff] %vm225_vm0, %v7977_v0 }
  0x7e   : > { %262 = vst.msk [vmem:[#allocation2 + $0x118] sm:$0x3] %vm228_vm1, %v7977_v0  ;;  %229 = vst.msk [vmem:[#allocation2 + $0x10] sm:$0x3] %vm228_vm1, %v7977_v0 }
  0x7f   : > { %232 = vst.msk [vmem:[#allocation2 + $0x28] sm:$0x3] %vm228_vm1, %v7977_v0  ;;  %235 = vst.msk [vmem:[#allocation2 + $0x40] sm:$0x3] %vm228_vm1, %v7977_v0 }
  0x80   : > { %238 = vst.msk [vmem:[#allocation2 + $0x58] sm:$0x3] %vm228_vm1, %v7977_v0  ;;  %241 = vst.msk [vmem:[#allocation2 + $0x70] sm:$0x3] %vm228_vm1, %v7977_v0 }
  0x81   : > { %244 = vst.msk [vmem:[#allocation2 + $0x88] sm:$0x3] %vm228_vm1, %v7977_v0  ;;  %247 = vst.msk [vmem:[#allocation2 + $0xa0] sm:$0x3] %vm228_vm1, %v7977_v0 }
  0x82   : > { %250 = vst.msk [vmem:[#allocation2 + $0xb8] sm:$0x3] %vm228_vm1, %v7977_v0  ;;  %253 = vst.msk [vmem:[#allocation2 + $0xd0] sm:$0x3] %vm228_vm1, %v7977_v0 }
  0x83   : > { %256 = vst.msk [vmem:[#allocation2 + $0xe8] sm:$0x3] %vm228_vm1, %v7977_v0  ;;  %259 = vst.msk [vmem:[#allocation2 + $0x100] sm:$0x3] %vm228_vm1, %v7977_v0 }
  0x84   : > { %265 = vst.msk [vmem:[#allocation2 + $0x130] sm:$0x3] %vm228_vm1, %v7977_v0  ;;  %268 = vst.msk [vmem:[#allocation2 + $0x148] sm:$0x3] %vm228_vm1, %v7977_v0 }
  0x85   : > { %271 = vst.msk [vmem:[#allocation2 + $0x160] sm:$0x3] %vm228_vm1, %v7977_v0  ;;  %274 = vst.msk [vmem:[#allocation2 + $0x178] sm:$0x3] %vm228_vm1, %v7977_v0 }
  0x86   : > { %277 = vst.msk [vmem:[#allocation2 + $0x190] sm:$0x3] %vm228_vm1, %v7977_v0  ;;  %280 = vst.msk [vmem:[#allocation2 + $0x1a8] sm:$0x3] %vm228_vm1, %v7977_v0 }
  0x87   : > { %283 = vst.msk [vmem:[#allocation2 + $0x1c0] sm:$0x3] %vm228_vm1, %v7977_v0  ;;  %286 = vst.msk [vmem:[#allocation2 + $0x1d8] sm:$0x3] %vm228_vm1, %v7977_v0 }
  0x88   : > { %289 = vst.msk [vmem:[#allocation2 + $0x1f0] sm:$0x3] %vm228_vm1, %v7977_v0  ;;  %292 = vst.msk [vmem:[#allocation2 + $0x208] sm:$0x3] %vm228_vm1, %v7977_v0 }
  0x89   : > { %295 = vst.msk [vmem:[#allocation2 + $0x220] sm:$0x3] %vm228_vm1, %v7977_v0  ;;  %298 = vst.msk [vmem:[#allocation2 + $0x238] sm:$0x3] %vm228_vm1, %v7977_v0 }
  0x8a   : > { %301 = vst.msk [vmem:[#allocation2 + $0x250] sm:$0x3] %vm228_vm1, %v7977_v0  ;;  %304 = vst.msk [vmem:[#allocation2 + $0x268] sm:$0x3] %vm228_vm1, %v7977_v0 }
  0x8b   : > { %307 = vst.msk [vmem:[#allocation2 + $0x280] sm:$0x3] %vm228_vm1, %v7977_v0  ;;  %310 = vst.msk [vmem:[#allocation2 + $0x298] sm:$0x3] %vm228_vm1, %v7977_v0 }
  0x8c   : > { %313 = vst.msk [vmem:[#allocation2 + $0x2b0] sm:$0x3] %vm228_vm1, %v7977_v0  ;;  %316 = vst.msk [vmem:[#allocation2 + $0x2c8] sm:$0x3] %vm228_vm1, %v7977_v0 }
  0x8d   : > { %319 = vst.msk [vmem:[#allocation2 + $0x2e0] sm:$0x3] %vm228_vm1, %v7977_v0  ;;  %322 = vst.msk [vmem:[#allocation2 + $0x2f8] sm:$0x3] %vm228_vm1, %v7977_v0 }
  0x8e   : > { %325 = vst.msk [vmem:[#allocation2 + $0x310] sm:$0x3] %vm228_vm1, %v7977_v0  ;;  %328 = vst.msk [vmem:[#allocation2 + $0x328] sm:$0x3] %vm228_vm1, %v7977_v0 }
  0x8f   : > { %331 = vst.msk [vmem:[#allocation2 + $0x340] sm:$0x3] %vm228_vm1, %v7977_v0  ;;  %334 = vst.msk [vmem:[#allocation2 + $0x358] sm:$0x3] %vm228_vm1, %v7977_v0 }
  0x90   : > { %337 = vst.msk [vmem:[#allocation2 + $0x370] sm:$0x3] %vm228_vm1, %v7977_v0  ;;  %340 = vst.msk [vmem:[#allocation2 + $0x388] sm:$0x3] %vm228_vm1, %v7977_v0 }
  0x91   : > { %343 = vst.msk [vmem:[#allocation2 + $0x3a0] sm:$0x3] %vm228_vm1, %v7977_v0  ;;  %346 = vst.msk [vmem:[#allocation2 + $0x3b8] sm:$0x3] %vm228_vm1, %v7977_v0 }
  0x92   : > { %349 = vst.msk [vmem:[#allocation2 + $0x3d0] sm:$0x3] %vm228_vm1, %v7977_v0  ;;  %352 = vst.msk [vmem:[#allocation2 + $0x3e8] sm:$0x3] %vm228_vm1, %v7977_v0 }
  0x93   : > { %355 = vst.msk [vmem:[#allocation2 + $0x400] sm:$0x3] %vm228_vm1, %v7977_v0  ;;  %358 = vst.msk [vmem:[#allocation2 + $0x418] sm:$0x3] %vm228_vm1, %v7977_v0 }
  0x94   : > { %361 = vst.msk [vmem:[#allocation2 + $0x430] sm:$0x3] %vm228_vm1, %v7977_v0  ;;  %364 = vst.msk [vmem:[#allocation2 + $0x448] sm:$0x3] %vm228_vm1, %v7977_v0 }
  0x95   : > { %367 = vst.msk [vmem:[#allocation2 + $0x460] sm:$0x3] %vm228_vm1, %v7977_v0  ;;  %370 = vst.msk [vmem:[#allocation2 + $0x478] sm:$0x3] %vm228_vm1, %v7977_v0 }
  0x96   : > { %373 = vst.msk [vmem:[#allocation2 + $0x490] sm:$0x3] %vm228_vm1, %v7977_v0  ;;  %376 = vst.msk [vmem:[#allocation2 + $0x4a8] sm:$0x3] %vm228_vm1, %v7977_v0 }
  0x97   : > { %379 = vst.msk [vmem:[#allocation2 + $0x4c0] sm:$0x3] %vm228_vm1, %v7977_v0  ;;  %382 = vst.msk [vmem:[#allocation2 + $0x4d8] sm:$0x3] %vm228_vm1, %v7977_v0 }
  0x98   : > { %385 = vst.msk [vmem:[#allocation2 + $0x4f0] sm:$0x3] %vm228_vm1, %v7977_v0  ;;  %388 = vst.msk [vmem:[#allocation2 + $0x508] sm:$0x3] %vm228_vm1, %v7977_v0 }
  0x99   : > { %391 = vst.msk [vmem:[#allocation2 + $0x520] sm:$0x3] %vm228_vm1, %v7977_v0  ;;  %394 = vst.msk [vmem:[#allocation2 + $0x538] sm:$0x3] %vm228_vm1, %v7977_v0 }
  0x9a   : > { %397 = vst.msk [vmem:[#allocation2 + $0x550] sm:$0x3] %vm228_vm1, %v7977_v0  ;;  %400 = vst.msk [vmem:[#allocation2 + $0x568] sm:$0x3] %vm228_vm1, %v7977_v0 }
  0x9b   : > { %403 = vst.msk [vmem:[#allocation2 + $0x580] sm:$0x3] %vm228_vm1, %v7977_v0  ;;  %406 = vst.msk [vmem:[#allocation2 + $0x598] sm:$0x3] %vm228_vm1, %v7977_v0 }
  0x9c   : > { %409 = vst.msk [vmem:[#allocation3 + $0x10] sm:$0x3] %vm228_vm1, %v7977_v0  ;;  %412 = vst.msk [vmem:[#allocation3 + $0x28] sm:$0x3] %vm228_vm1, %v7977_v0 }
  0x9d   : > { %415 = vst.msk [vmem:[#allocation3 + $0x40] sm:$0x3] %vm228_vm1, %v7977_v0  ;;  %418 = vst.msk [vmem:[#allocation3 + $0x58] sm:$0x3] %vm228_vm1, %v7977_v0 }
  0x9e   : > { %421 = vst.msk [vmem:[#allocation3 + $0x70] sm:$0x3] %vm228_vm1, %v7977_v0  ;;  %424 = vst.msk [vmem:[#allocation3 + $0x88] sm:$0x3] %vm228_vm1, %v7977_v0 }
  0x9f   : > { %427 = vst.msk [vmem:[#allocation3 + $0xa0] sm:$0x3] %vm228_vm1, %v7977_v0  ;;  %430 = vst.msk [vmem:[#allocation3 + $0xb8] sm:$0x3] %vm228_vm1, %v7977_v0 }
  0xa0   : > { %433 = vst.msk [vmem:[#allocation3 + $0xd0] sm:$0x3] %vm228_vm1, %v7977_v0  ;;  %436 = vst.msk [vmem:[#allocation3 + $0xe8] sm:$0x3] %vm228_vm1, %v7977_v0 }
  0xa1   : > { %439 = vst.msk [vmem:[#allocation3 + $0x100] sm:$0x3] %vm228_vm1, %v7977_v0  ;;  %442 = vst.msk [vmem:[#allocation3 + $0x118] sm:$0x3] %vm228_vm1, %v7977_v0 }
  0xa2   : > { %445 = vst.msk [vmem:[#allocation3 + $0x130] sm:$0x3] %vm228_vm1, %v7977_v0  ;;  %448 = vst.msk [vmem:[#allocation3 + $0x148] sm:$0x3] %vm228_vm1, %v7977_v0 }
  0xa3   : > { %451 = vst.msk [vmem:[#allocation3 + $0x160] sm:$0x3] %vm228_vm1, %v7977_v0  ;;  %454 = vst.msk [vmem:[#allocation3 + $0x178] sm:$0x3] %vm228_vm1, %v7977_v0 }
  0xa4   : > { %457 = vst.msk [vmem:[#allocation3 + $0x190] sm:$0x3] %vm228_vm1, %v7977_v0  ;;  %460 = vst.msk [vmem:[#allocation3 + $0x1a8] sm:$0x3] %vm228_vm1, %v7977_v0 }
  0xa5   : > { %463 = vst.msk [vmem:[#allocation3 + $0x1c0] sm:$0x3] %vm228_vm1, %v7977_v0  ;;  %466 = vst.msk [vmem:[#allocation3 + $0x1d8] sm:$0x3] %vm228_vm1, %v7977_v0 }
  0xa6   : > { %469 = vst.msk [vmem:[#allocation3 + $0x1f0] sm:$0x3] %vm228_vm1, %v7977_v0  ;;  %472 = vst.msk [vmem:[#allocation3 + $0x208] sm:$0x3] %vm228_vm1, %v7977_v0 }
  0xa7   : > { %475 = vst.msk [vmem:[#allocation3 + $0x220] sm:$0x3] %vm228_vm1, %v7977_v0  ;;  %478 = vst.msk [vmem:[#allocation3 + $0x238] sm:$0x3] %vm228_vm1, %v7977_v0 }
  0xa8   : > { %481 = vst.msk [vmem:[#allocation3 + $0x250] sm:$0x3] %vm228_vm1, %v7977_v0  ;;  %484 = vst.msk [vmem:[#allocation3 + $0x268] sm:$0x3] %vm228_vm1, %v7977_v0 }
  0xa9   : > { %487 = vst.msk [vmem:[#allocation3 + $0x280] sm:$0x3] %vm228_vm1, %v7977_v0  ;;  %490 = vst.msk [vmem:[#allocation3 + $0x298] sm:$0x3] %vm228_vm1, %v7977_v0 }
  0xaa   : > { %493 = vst.msk [vmem:[#allocation3 + $0x2b0] sm:$0x3] %vm228_vm1, %v7977_v0  ;;  %496 = vst.msk [vmem:[#allocation3 + $0x2c8] sm:$0x3] %vm228_vm1, %v7977_v0 }
  0xab   : > { %499 = vst.msk [vmem:[#allocation3 + $0x2e0] sm:$0x3] %vm228_vm1, %v7977_v0  ;;  %502 = vst.msk [vmem:[#allocation3 + $0x2f8] sm:$0x3] %vm228_vm1, %v7977_v0 }
  0xac   : > { %505 = vst.msk [vmem:[#allocation3 + $0x310] sm:$0x3] %vm228_vm1, %v7977_v0  ;;  %508 = vst.msk [vmem:[#allocation3 + $0x328] sm:$0x3] %vm228_vm1, %v7977_v0 }
  0xad   : > { %511 = vst.msk [vmem:[#allocation3 + $0x340] sm:$0x3] %vm228_vm1, %v7977_v0  ;;  %514 = vst.msk [vmem:[#allocation3 + $0x358] sm:$0x3] %vm228_vm1, %v7977_v0 }
  0xae   : > { %517 = vst.msk [vmem:[#allocation3 + $0x370] sm:$0x3] %vm228_vm1, %v7977_v0  ;;  %520 = vst.msk [vmem:[#allocation3 + $0x388] sm:$0x3] %vm228_vm1, %v7977_v0 }
  0xaf   : > { %523 = vst.msk [vmem:[#allocation3 + $0x3a0] sm:$0x3] %vm228_vm1, %v7977_v0  ;;  %526 = vst.msk [vmem:[#allocation3 + $0x3b8] sm:$0x3] %vm228_vm1, %v7977_v0 }
  0xb0   : > { %529 = vst.msk [vmem:[#allocation3 + $0x3d0] sm:$0x3] %vm228_vm1, %v7977_v0  ;;  %532 = vst.msk [vmem:[#allocation3 + $0x3e8] sm:$0x3] %vm228_vm1, %v7977_v0 }
  0xb1   : > { %535 = vst.msk [vmem:[#allocation3 + $0x400] sm:$0x3] %vm228_vm1, %v7977_v0  ;;  %538 = vst.msk [vmem:[#allocation3 + $0x418] sm:$0x3] %vm228_vm1, %v7977_v0 }
  0xb2   : > { %541 = vst.msk [vmem:[#allocation3 + $0x430] sm:$0x3] %vm228_vm1, %v7977_v0  ;;  %544 = vst.msk [vmem:[#allocation3 + $0x448] sm:$0x3] %vm228_vm1, %v7977_v0 }
  0xb3   : > { %547 = vst.msk [vmem:[#allocation3 + $0x460] sm:$0x3] %vm228_vm1, %v7977_v0  ;;  %550 = vst.msk [vmem:[#allocation3 + $0x478] sm:$0x3] %vm228_vm1, %v7977_v0 }
  0xb4   : > { %553 = vst.msk [vmem:[#allocation3 + $0x490] sm:$0x3] %vm228_vm1, %v7977_v0  ;;  %556 = vst.msk [vmem:[#allocation3 + $0x4a8] sm:$0x3] %vm228_vm1, %v7977_v0 }
  0xb5   : > { %559 = vst.msk [vmem:[#allocation3 + $0x4c0] sm:$0x3] %vm228_vm1, %v7977_v0  ;;  %562 = vst.msk [vmem:[#allocation3 + $0x4d8] sm:$0x3] %vm228_vm1, %v7977_v0 }
  0xb6   : > { %565 = vst.msk [vmem:[#allocation3 + $0x4f0] sm:$0x3] %vm228_vm1, %v7977_v0  ;;  %568 = vst.msk [vmem:[#allocation3 + $0x508] sm:$0x3] %vm228_vm1, %v7977_v0 }
  0xb7   : > { %571 = vst.msk [vmem:[#allocation3 + $0x520] sm:$0x3] %vm228_vm1, %v7977_v0  ;;  %574 = vst.msk [vmem:[#allocation3 + $0x538] sm:$0x3] %vm228_vm1, %v7977_v0 }
  0xb8   : > { %577 = vst.msk [vmem:[#allocation3 + $0x550] sm:$0x3] %vm228_vm1, %v7977_v0  ;;  %580 = vst.msk [vmem:[#allocation3 + $0x568] sm:$0x3] %vm228_vm1, %v7977_v0 }
  0xb9   : > { %583 = vst.msk [vmem:[#allocation3 + $0x580] sm:$0x3] %vm228_vm1, %v7977_v0  ;;  %586 = vst.msk [vmem:[#allocation3 + $0x598] sm:$0x3] %vm228_vm1, %v7977_v0  ;;  %v650_v0 = vld [vmem:[%s8783_s24 + $0x1f8] sm:$0xff] }
  0xba   : > { %652 = vst.msk [vmem:[#allocation2 + $0x109] sm:$0xff] %vm225_vm0, %v587_v1  ;;  %653 = vst.msk [vmem:[#allocation2 + $0x111] sm:$0xff] %vm225_vm0, %v588_v2 }
  0xbb   : > { %654 = vst.msk [vmem:[#allocation2 + $0x121] sm:$0xff] %vm225_vm0, %v589_v3  ;;  %655 = vst.msk [vmem:[#allocation2 + $0x129] sm:$0xff] %vm225_vm0, %v590_v4 }
  0xbc   : > { %656 = vst.msk [vmem:[#allocation2 + $0x139] sm:$0xff] %vm225_vm0, %v591_v5  ;;  %657 = vst.msk [vmem:[#allocation2 + $0x141] sm:$0xff] %vm225_vm0, %v592_v6 }
  0xbd   : > { %658 = vst.msk [vmem:[#allocation2 + $0x151] sm:$0xff] %vm225_vm0, %v593_v7  ;;  %659 = vst.msk [vmem:[#allocation2 + $0x159] sm:$0xff] %vm225_vm0, %v594_v8 }
  0xbe   : > { %660 = vst.msk [vmem:[#allocation2 + $0x169] sm:$0xff] %vm225_vm0, %v595_v9  ;;  %661 = vst.msk [vmem:[#allocation2 + $0x171] sm:$0xff] %vm225_vm0, %v596_v10 }
  0xbf   : > { %662 = vst.msk [vmem:[#allocation2 + $0x181] sm:$0xff] %vm225_vm0, %v597_v11  ;;  %663 = vst.msk [vmem:[#allocation2 + $0x189] sm:$0xff] %vm225_vm0, %v598_v12 }
  0xc0   : > { %664 = vst.msk [vmem:[#allocation2 + $0x199] sm:$0xff] %vm225_vm0, %v599_v13  ;;  %665 = vst.msk [vmem:[#allocation2 + $0x1a1] sm:$0xff] %vm225_vm0, %v600_v14 }
  0xc1   : > { %666 = vst.msk [vmem:[#allocation2 + $0x1b1] sm:$0xff] %vm225_vm0, %v601_v15  ;;  %667 = vst.msk [vmem:[#allocation2 + $0x1b9] sm:$0xff] %vm225_vm0, %v602_v16 }
  0xc2   : > { %668 = vst.msk [vmem:[#allocation2 + $0x1f9] sm:$0xff] %vm225_vm0, %v603_v17  ;;  %669 = vst.msk [vmem:[#allocation2 + $0x201] sm:$0xff] %vm225_vm0, %v604_v18 }
  0xc3   : > { %670 = vst.msk [vmem:[#allocation2 + $0x211] sm:$0xff] %vm225_vm0, %v605_v19  ;;  %671 = vst.msk [vmem:[#allocation2 + $0x219] sm:$0xff] %vm225_vm0, %v606_v20 }
  0xc4   : > { %672 = vst.msk [vmem:[#allocation2 + $0x229] sm:$0xff] %vm225_vm0, %v607_v21  ;;  %673 = vst.msk [vmem:[#allocation2 + $0x231] sm:$0xff] %vm225_vm0, %v608_v22 }
  0xc5   : > { %674 = vst.msk [vmem:[#allocation2 + $0x241] sm:$0xff] %vm225_vm0, %v609_v23  ;;  %675 = vst.msk [vmem:[#allocation2 + $0x249] sm:$0xff] %vm225_vm0, %v610_v24 }
  0xc6   : > { %676 = vst.msk [vmem:[#allocation2 + $0x259] sm:$0xff] %vm225_vm0, %v611_v25  ;;  %677 = vst.msk [vmem:[#allocation2 + $0x261] sm:$0xff] %vm225_vm0, %v612_v26 }
  0xc7   : > { %678 = vst.msk [vmem:[#allocation2 + $0x271] sm:$0xff] %vm225_vm0, %v613_v27  ;;  %679 = vst.msk [vmem:[#allocation2 + $0x279] sm:$0xff] %vm225_vm0, %v614_v28 }
  0xc8   : > { %680 = vst.msk [vmem:[#allocation2 + $0x289] sm:$0xff] %vm225_vm0, %v615_v29  ;;  %681 = vst.msk [vmem:[#allocation2 + $0x291] sm:$0xff] %vm225_vm0, %v616_v30 }
  0xc9   : > { %682 = vst.msk [vmem:[#allocation2 + $0x2a1] sm:$0xff] %vm225_vm0, %v617_v31  ;;  %683 = vst.msk [vmem:[#allocation2 + $0x2a9] sm:$0xff] %vm225_vm0, %v618_v32 }
  0xca   : > { %684 = vst.msk [vmem:[#allocation2 + $0x2e9] sm:$0xff] %vm225_vm0, %v619_v33  ;;  %685 = vst.msk [vmem:[#allocation2 + $0x2f1] sm:$0xff] %vm225_vm0, %v620_v34 }
  0xcb   : > { %686 = vst.msk [vmem:[#allocation2 + $0x301] sm:$0xff] %vm225_vm0, %v621_v35  ;;  %687 = vst.msk [vmem:[#allocation2 + $0x309] sm:$0xff] %vm225_vm0, %v622_v36 }
  0xcc   : > { %688 = vst.msk [vmem:[#allocation2 + $0x319] sm:$0xff] %vm225_vm0, %v623_v37  ;;  %689 = vst.msk [vmem:[#allocation2 + $0x321] sm:$0xff] %vm225_vm0, %v624_v38 }
  0xcd   : > { %690 = vst.msk [vmem:[#allocation2 + $0x331] sm:$0xff] %vm225_vm0, %v625_v39  ;;  %691 = vst.msk [vmem:[#allocation2 + $0x339] sm:$0xff] %vm225_vm0, %v626_v40 }
  0xce   : > { %692 = vst.msk [vmem:[#allocation2 + $0x349] sm:$0xff] %vm225_vm0, %v627_v41  ;;  %693 = vst.msk [vmem:[#allocation2 + $0x351] sm:$0xff] %vm225_vm0, %v628_v42 }
  0xcf   : > { %694 = vst.msk [vmem:[#allocation2 + $0x361] sm:$0xff] %vm225_vm0, %v629_v43  ;;  %695 = vst.msk [vmem:[#allocation2 + $0x369] sm:$0xff] %vm225_vm0, %v630_v44 }
  0xd0   : > { %696 = vst.msk [vmem:[#allocation2 + $0x379] sm:$0xff] %vm225_vm0, %v631_v45  ;;  %697 = vst.msk [vmem:[#allocation2 + $0x381] sm:$0xff] %vm225_vm0, %v632_v46 }
  0xd1   : > { %698 = vst.msk [vmem:[#allocation2 + $0x391] sm:$0xff] %vm225_vm0, %v633_v47  ;;  %699 = vst.msk [vmem:[#allocation2 + $0x399] sm:$0xff] %vm225_vm0, %v634_v48 }
  0xd2   : > { %700 = vst.msk [vmem:[#allocation2 + $0x3d9] sm:$0xff] %vm225_vm0, %v635_v49  ;;  %701 = vst.msk [vmem:[#allocation2 + $0x3e1] sm:$0xff] %vm225_vm0, %v636_v50 }
  0xd3   : > { %702 = vst.msk [vmem:[#allocation2 + $0x3f1] sm:$0xff] %vm225_vm0, %v637_v51  ;;  %703 = vst.msk [vmem:[#allocation2 + $0x3f9] sm:$0xff] %vm225_vm0, %v638_v52 }
  0xd4   : > { %704 = vst.msk [vmem:[#allocation2 + $0x409] sm:$0xff] %vm225_vm0, %v639_v53  ;;  %705 = vst.msk [vmem:[#allocation2 + $0x411] sm:$0xff] %vm225_vm0, %v640_v54 }
  0xd5   : > { %706 = vst.msk [vmem:[#allocation2 + $0x421] sm:$0xff] %vm225_vm0, %v641_v55  ;;  %707 = vst.msk [vmem:[#allocation2 + $0x429] sm:$0xff] %vm225_vm0, %v642_v56 }
  0xd6   : > { %708 = vst.msk [vmem:[#allocation2 + $0x439] sm:$0xff] %vm225_vm0, %v643_v57  ;;  %709 = vst.msk [vmem:[#allocation2 + $0x441] sm:$0xff] %vm225_vm0, %v644_v58 }
  0xd7   : > { %710 = vst.msk [vmem:[#allocation2 + $0x451] sm:$0xff] %vm225_vm0, %v645_v59  ;;  %711 = vst.msk [vmem:[#allocation2 + $0x459] sm:$0xff] %vm225_vm0, %v646_v60 }
  0xd8   : > { %712 = vst.msk [vmem:[#allocation2 + $0x469] sm:$0xff] %vm225_vm0, %v647_v61  ;;  %713 = vst.msk [vmem:[#allocation2 + $0x471] sm:$0xff] %vm225_vm0, %v648_v62 }
  0xd9   : > { %714 = vst.msk [vmem:[#allocation2 + $0x481] sm:$0xff] %vm225_vm0, %v649_v63  ;;  %715 = vst.msk [vmem:[#allocation2 + $0x489] sm:$0xff] %vm225_vm0, %v650_v0 }
  0xda LB: >> { %s722_s29 = smul.u32 240, %s7971_s28  ;;  %vm844_vm2 = vcmask 1046528   ;;  %vm15602_vm3 = vcmask 1045504   ;;  %s7978_s6 = smov 8   ;;  %vm1807_vm4 = vcmask 130048   ;;  %vm1824_vm5 = vcmask 195584   ;;  %s7971_s28 = sphi %s8918_s28, %s721_s28  }
  0xdb   : >> { %s7979_s7 = smov 16   ;;  %s7980_s8 = smov 24   ;;  %vm1841_vm6 = vcmask 261120   ;;  %vm15603_vm7 = vcmask 1040384   ;;  %vm1858_vm8 = vcmask 326656   ;;  %vm1875_vm9 = vcmask 392192  }
  0xdc   : >> { %s8926_s30 = scalar_lea.vmem [#allocation2], %s722_s29  ;;  %s7981_s9 = smov 32   ;;  %vm1892_vm10 = vcmask 457728   ;;  %vm1909_vm11 = vcmask 523264   ;;  %vm15786_vm12 = vcmask 588800   ;;  %vm1943_vm13 = vcmask 654336  }
  0xdd   : >> { %s7982_s10 = smov 40   ;;  %s7983_s11 = smov 48   ;;  %vm1960_vm14 = vcmask 719872   ;;  %vm15635_vm15 = vcmask 785408   ;;  %vm15634_vm1 = vcmask 850944  }
  0xde   : >> { %s7984_s12 = smov 56   ;;  %s7985_s13 = smov 64  }
  0xdf   : >> { %s7986_s14 = smov 72   ;;  %s7987_s15 = smov 80  }
  0xe0   : >> { %v8929_v1 = vld [vmem:[%s8926_s30 + $0x30] sm:$0xff]  ;;  %v8932_v2 = vld [vmem:[%s8926_s30 + $0x38] sm:$0xff]  ;;  %v8935_v3 = vld [vmem:[%s8926_s30 + $0x40] sm:$0x3]  ;;  %s7988_s16 = smov 88   ;;  %s7989_s17 = smov 96  }
  0xe1   : >> { %v855_v4 = vrot.slane %v8929_v1, 1  ;;  %v856_v5 = vrot.slane %v8932_v2, 1  ;;  %v858_v6 = vrot.slane %v8935_v3, 1  ;;  %v8941_v7 = vld [vmem:[%s8926_s30] sm:$0xff]  ;;  %v8944_v8 = vld [vmem:[%s8926_s30 + $0x8] sm:$0xff]  ;;  %v8955_v13 = vld [vmem:[%s8926_s30 + $0x50] sm:$0xff] }
  0xe2   : >> { %v8947_v9 = vld [vmem:[%s8926_s30 + $0x10] sm:$0x3]  ;;  %v845_v10 = vrot.slane %v8941_v7, 1  ;;  %v846_v11 = vrot.slane %v8944_v8, 1  ;;  %v8952_v12 = vld [vmem:[%s8926_s30 + $0x48] sm:$0xff]  ;;  %v8965_v19 = vld [vmem:[%s8926_s30 + $0x18] sm:$0xff] }
  0xe3   : >> { %v857_v14 = vsel %vm844_vm2, %v855_v4, %v856_v5  ;;  %v859_v15 = vsel %vm844_vm2, %v856_v5, %v858_v6  ;;  %v848_v16 = vrot.slane %v8947_v9, 1  ;;  %v937_v17 = vrot.slane %v8947_v9, 2  ;;  %v8962_v18 = vld [vmem:[%s8926_s30 + $0x58] sm:$0x3]  ;;  %v8968_v20 = vld [vmem:[%s8926_s30 + $0x20] sm:$0xff]  ;;  %v9000_v38 = vld [vmem:[%s8926_s30 + $0x68] sm:$0xff] }
  0xe4   : >> { %v8970_v21 = vpack.i.bf16 %v859_v15, %v857_v14  ;;  %v847_v22 = vsel %vm844_vm2, %v845_v10, %v846_v11  ;;  %v860_v23 = vrot.slane %v8952_v12, 1  ;;  %v861_v24 = vrot.slane %v8955_v13, 1  ;;  %v8976_v25 = vld [vmem:[%s8926_s30 + $0x28] sm:$0x3]  ;;  %v8979_v26 = vld [vmem:[%s8926_s30 + $0x78] sm:$0xff]  ;;  %v8982_v27 = vld [vmem:[%s8926_s30 + $0x80] sm:$0xff] }
  0xe5   : >> { %v849_v28 = vsel %vm844_vm2, %v846_v11, %v848_v16  ;;  %v863_v29 = vrot.slane %v8962_v18, 1  ;;  %v850_v30 = vrot.slane %v8965_v19, 1  ;;  %v851_v31 = vrot.slane %v8968_v20, 1  ;;  %v8989_v32 = vld [vmem:[%s8926_s30 + $0x88] sm:$0x3]  ;;  %v8992_v33 = vld [vmem:[%s8926_s30 + $0x60] sm:$0xff] }
  0xe6   : >> { %6655 = vrot.lane.b32.xlu1 %v8970_v21, %s7978_s6  ;;  %v6644_v34 = vpack.i.bf16 %v849_v28, %v847_v22  ;;  %v862_v35 = vsel %vm844_vm2, %v860_v23, %v861_v24  ;;  %v853_v36 = vrot.slane %v8976_v25, 1  ;;  %v870_v37 = vrot.slane %v8979_v26, 1  ;;  %v9003_v39 = vld [vmem:[%s8926_s30 + $0x70] sm:$0x3]  ;;  %v9010_v44 = vld [vmem:[%s8926_s30 + $0xa8] sm:$0xff]  ;;  %v9028_v52 = vld [vmem:[%s8926_s30 + $0x98] sm:$0xff] }
  0xe7   : >> { %v864_v40 = vsel %vm844_vm2, %v861_v24, %v863_v29  ;;  %v852_v41 = vsel %vm844_vm2, %v850_v30, %v851_v31  ;;  %v871_v42 = vrot.slane %v8982_v27, 1  ;;  %v873_v43 = vrot.slane %v8989_v32, 1  ;;  %v9013_v45 = vld [vmem:[%s8926_s30 + $0xb0] sm:$0xff]  ;;  %v9022_v50 = vld [vmem:[%s8926_s30 + $0xb8] sm:$0x3]  ;;  %s7990_s19 = smov 104  }
  0xe8   : >> { %6645 = vrot.lane.b32.xlu0 %v6644_v34, %s7978_s6  ;;  %v9016_v46 = vpack.i.bf16 %v864_v40, %v862_v35  ;;  %v854_v47 = vsel %vm844_vm2, %v851_v31, %v853_v36  ;;  %v865_v48 = vrot.slane %v8992_v33, 1  ;;  %v866_v49 = vrot.slane %v9000_v38, 1  ;;  %v9025_v51 = vld [vmem:[%s8926_s30 + $0x90] sm:$0xff]  ;;  %v9036_v57 = vld [vmem:[%s8926_s30 + $0xa0] sm:$0x3]  ;;  %s7991_s20 = smov 112  }
  0xe9   : >> { %v9030_v53 = vpack.i.bf16 %v854_v47, %v852_v41  ;;  %v872_v54 = vsel %vm844_vm2, %v870_v37, %v871_v42  ;;  %v874_v55 = vsel %vm844_vm2, %v871_v42, %v873_v43  ;;  %v868_v56 = vrot.slane %v9003_v39, 1  ;;  %s7992_s21 = smov 120   ;;  %s721_s28 = sadd.s32 1, %s7971_s28  }
  0xea   : >> { %6660 = vrot.lane.b32.xlu1 %v9016_v46, %s7978_s6  ;;  %v9040_v58 = vpack.i.bf16 %v874_v55, %v872_v54  ;;  %v867_v59 = vsel %vm844_vm2, %v865_v48, %v866_v49  ;;  %v880_v60 = vrot.slane %v9010_v44, 1  ;;  %v881_v61 = vrot.slane %v9013_v45, 1  ;;  %p718_p4 = scmp.ge.s32.totalorder %s721_s28, 4  }
  0xeb   : >> { %v869_v62 = vsel %vm844_vm2, %v866_v49, %v868_v56  ;;  %v883_v63 = vrot.slane %v9022_v50, 1  ;;  %v875_v0 = vrot.slane %v9025_v51, 1  ;;  %v876_v4 = vrot.slane %v9028_v52, 1 }
  0xec   : >> { %6650 = vrot.lane.b32.xlu0 %v9030_v53, %s7978_s6  ;;  %v9051_v5 = vpack.i.bf16 %v869_v62, %v867_v59  ;;  %v882_v6 = vsel %vm844_vm2, %v880_v60, %v881_v61  ;;  %v878_v10 = vrot.slane %v9036_v57, 1  ;;  %v939_v11 = vrot.slane %v8965_v19, 2 }
  0xed   : >> { %v884_v14 = vsel %vm844_vm2, %v881_v61, %v883_v63  ;;  %v877_v15 = vsel %vm844_vm2, %v875_v0, %v876_v4  ;;  %v940_v16 = vrot.slane %v8968_v20, 2  ;;  %v942_v22 = vrot.slane %v8976_v25, 2 }
  0xee   : >> { %6670 = vrot.lane.b32.xlu1 %v9040_v58, %s7978_s6  ;;  %v9062_v23 = vpack.i.bf16 %v884_v14, %v882_v6  ;;  %v879_v24 = vsel %vm844_vm2, %v876_v4, %v878_v10  ;;  %v934_v28 = vrot.slane %v8941_v7, 2  ;;  %v935_v29 = vrot.slane %v8944_v8, 2 }
  0xef   : >> { %v941_v30 = vsel %vm15602_vm3, %v939_v11, %v940_v16  ;;  %v943_v31 = vsel %vm15602_vm3, %v940_v16, %v942_v22  ;;  %v949_v34 = vrot.slane %v8952_v12, 2  ;;  %v947_v35 = vrot.slane %v8935_v3, 2 }
  0xf0   : >> { %6665 = vrot.lane.b32.xlu0 %v9051_v5, %s7978_s6  ;;  %v9073_v25 = vpack.i.bf16 %v879_v24, %v877_v15  ;;  %v936_v36 = vsel %vm15602_vm3, %v934_v28, %v935_v29  ;;  %v950_v37 = vrot.slane %v8955_v13, 2  ;;  %v938_v7 = vsel %vm15602_vm3, %v935_v29, %v937_v17 }
  0xf1   : >> { %v952_v8 = vrot.slane %v8962_v18, 2  ;;  %v944_v40 = vrot.slane %v8929_v1, 2  ;;  %v945_v41 = vrot.slane %v8932_v2, 2  ;;  %v9085_v3 = vpack.i.bf16 %v943_v31, %v941_v30 }
  0xf2   : >> { %6680 = vrot.lane.b32.xlu1 %v9062_v23, %s7978_s6  ;;  %v959_v42 = vrot.slane %v8979_v26, 2  ;;  %v960_v43 = vrot.slane %v8982_v27, 2  ;;  %v951_v47 = vsel %vm15602_vm3, %v949_v34, %v950_v37  ;;  %v962_v17 = vrot.slane %v8989_v32, 2 }
  0xf3   : >> { %v953_v9 = vsel %vm15602_vm3, %v950_v37, %v952_v8  ;;  %v6684_v18 = vpack.i.bf16 %v938_v7, %v936_v36  ;;  %v946_v48 = vsel %vm15602_vm3, %v944_v40, %v945_v41  ;;  %v948_v49 = vsel %vm15602_vm3, %v945_v41, %v947_v35  ;;  %v749_v35 = vld [vmem:[%s8926_s30 + $0xc8] sm:$0xff]  ;;  %v751_v8 = vld [vmem:[%s8926_s30 + $0xd8] sm:$0xff]  ;;  %v752_v40 = vld [vmem:[%s8926_s30 + $0xe0] sm:$0xff] }
  0xf4   : >> { %6675 = vrot.lane.b32.xlu0 %v9073_v25, %s7978_s6  ;;  %v954_v54 = vrot.slane %v8992_v33, 2  ;;  %v955_v55 = vrot.slane %v9000_v38, 2  ;;  %v957_v56 = vrot.slane %v9003_v39, 2  ;;  %v9101_v59 = vpack.i.bf16 %v953_v9, %v951_v47 }
  0xf5   : >> { %v961_v32 = vsel %vm15602_vm3, %v959_v42, %v960_v43  ;;  %v963_v60 = vsel %vm15602_vm3, %v960_v43, %v962_v17  ;;  %v969_v61 = vrot.slane %v9010_v44, 2  ;;  %v970_v62 = vrot.slane %v9013_v45, 2 }
  0xf6   : >> { %6690 = vrot.lane.b32.xlu1 %v9085_v3, %s7979_s7  ;;  %v972_v63 = vrot.slane %v9022_v50, 2  ;;  %v9109_v0 = vpack.i.bf16 %v948_v49, %v946_v48  ;;  %v964_v39 = vrot.slane %v9025_v51, 2  ;;  %v956_v4 = vsel %vm15602_vm3, %v954_v54, %v955_v55 }
  0xf7   : >> { %v958_v6 = vsel %vm15602_vm3, %v955_v55, %v957_v56  ;;  %v965_v10 = vrot.slane %v9028_v52, 2  ;;  %v967_v11 = vrot.slane %v9036_v57, 2  ;;  %v9118_v14 = vpack.i.bf16 %v963_v60, %v961_v32  ;;  %v9247_v56 = vld [vmem:[%s8926_s30 + $0x108] sm:$0xff]  ;;  %v9257_v60 = vld [vmem:[%s8926_s30 + $0xf0] sm:$0xff] }
  0xf8   : >> { %6685 = vrot.lane.b32.xlu0 %v6684_v18, %s7979_s7  ;;  %v971_v50 = vsel %vm15602_vm3, %v969_v61, %v970_v62  ;;  %v973_v15 = vsel %vm15602_vm3, %v970_v62, %v972_v63  ;;  %v9124_v16 = vpack.i.bf16 %v958_v6, %v956_v4  ;;  %v6729_v29 = vpack.i.bf16 %v8932_v2, %v8929_v1  ;;  %v748_v2 = vld [vmem:[%s8926_s30 + $0xc0] sm:$0xff]  ;;  %v9260_v61 = vld [vmem:[%s8926_s30 + $0xf8] sm:$0xff] }
  0xf9   : >> { %v966_v22 = vsel %vm15602_vm3, %v964_v39, %v965_v10  ;;  %v968_v24 = vsel %vm15602_vm3, %v965_v10, %v967_v11  ;;  %v9130_v57 = vpack.i.bf16 %v973_v15, %v971_v50  ;;  %v6724_v30 = vpack.i.bf16 %v8968_v20, %v8965_v19  ;;  %v9273_v39 = vld [vmem:[%s8926_s30 + $0x140] sm:$0xff]  ;;  %v9284_v11 = vld [vmem:[%s8926_s30 + $0x128] sm:$0xff] }
  0xfa   : >> { %6700 = vrot.lane.b32.xlu1 %v9101_v59, %s7979_s7  ;;  %v9134_v28 = vpack.i.bf16 %v968_v24, %v966_v22  ;;  %v6739_v31 = vpack.i.bf16 %v9000_v38, %v8992_v33  ;;  %v6734_v34 = vpack.i.bf16 %v8955_v13, %v8952_v12  ;;  %v6749_v1 = vpack.i.bf16 %v9028_v52, %v9025_v51  ;;  %v750_v13 = vld [vmem:[%s8926_s30 + $0xd0] sm:$0x3]  ;;  %v9281_v10 = vld [vmem:[%s8926_s30 + $0x120] sm:$0xff]  ;;  %v9295_v15 = vld [vmem:[%s8926_s30 + $0x168] sm:$0xff] }
  0xfb   : >> { %v6744_v19 = vpack.i.bf16 %v8982_v27, %v8979_v26  ;;  %v6759_v20 = vpack.i.bf16 %v749_v35, %v748_v2  ;;  %v6754_v12 = vpack.i.bf16 %v9013_v45, %v9010_v44  ;;  %v1073_v33 = vrot.slane %v748_v2, 1 }
  0xfc   : >> { %6695 = vrot.lane.b32.xlu0 %v9109_v0, %s7979_s7  ;;  %v1074_v38 = vrot.slane %v749_v35, 1  ;;  %v1076_v26 = vrot.slane %v750_v13, 1  ;;  %v1126_v51 = vrot.slane %v748_v2, 2  ;;  %v1127_v52 = vrot.slane %v749_v35, 2  ;;  %v9331_v2 = vld [vmem:[%s8926_s30 + $0x1a0] sm:$0xff] }
  0xfd   : >> { %v6879_v41 = vpack.i.bf16 %v752_v40, %v751_v8  ;;  %v1231_v42 = vrot.slane %v752_v40, 1  ;;  %v1230_v43 = vrot.slane %v751_v8, 1  ;;  %v6964_v6 = vpack.i.bf16 %v9260_v61, %v9257_v60 }
  0xfe   : >> { %6710 = vrot.lane.b32.xlu1 %v9118_v14, %s7979_s7  ;;  %v1075_v27 = vsel %vm844_vm2, %v1073_v33, %v1074_v38  ;;  %v1077_v44 = vsel %vm844_vm2, %v1074_v38, %v1076_v26  ;;  %v1128_v36 = vsel %vm15602_vm3, %v1126_v51, %v1127_v52  ;;  %v9305_v24 = vpack.i.bf16 %v9284_v11, %v9281_v10  ;;  %v9347_v26 = vld [vmem:[%s8926_s30 + $0x148] sm:$0x3] }
  0xff   : >> { %v6799_v45 = vpack.i.bf16 %v1077_v44, %v1075_v27  ;;  %v1232_v9 = vsel %vm844_vm2, %v1230_v43, %v1231_v42  ;;  %v1413_v35 = vrot.slane %v9247_v56, 1  ;;  %v9350_v27 = vld [vmem:[%s8926_s30 + $0x180] sm:$0xff]  ;;  %v9353_v44 = vld [vmem:[%s8926_s30 + $0x188] sm:$0xff]  ;;  %v9382_v43 = vld [vmem:[%s8926_s30 + $0x178] sm:$0x3] }
 0x100   : >> { %6705 = vrot.lane.b32.xlu0 %v9124_v16, %s7979_s7 }
 0x102   : >> { %6720 = vrot.lane.b32.xlu1 %v9130_v57, %s7979_s7 }
 0x104   : >> { %6715 = vrot.lane.b32.xlu0 %v9134_v28, %s7979_s7 }
 0x106   : >> { %6730 = vrot.lane.b32.xlu1 %v6729_v29, %s7980_s8 }
 0x108   : >> { %6725 = vrot.lane.b32.xlu0 %v6724_v30, %s7980_s8 }
 0x10a   : >> { %6740 = vrot.lane.b32.xlu1 %v6739_v31, %s7980_s8 }
 0x10c   : >> { %6735 = vrot.lane.b32.xlu0 %v6734_v34, %s7980_s8 }
 0x10e   : >> { %6750 = vrot.lane.b32.xlu1 %v6749_v1, %s7980_s8 }
 0x110   : >> { %6745 = vrot.lane.b32.xlu0 %v6744_v19, %s7980_s8 }
 0x112   : >> { %6760 = vrot.lane.b32.xlu1 %v6759_v20, %s7980_s8 }
 0x114   : >> { %6755 = vrot.lane.b32.xlu0 %v6754_v12, %s7980_s8 }
 0x116   : >> { %6770 = vrot.lane.b32.xlu1 %v8970_v21, %s7981_s9 }
 0x118   : >> { %6765 = vrot.lane.b32.xlu0 %v9030_v53, %s7981_s9  ;;  %v1129_v53 = vrot.slane %v750_v13, 2  ;;  %v1408_v13 = vrot.slane %v9257_v60, 1 }
 0x11a   : >> { %6780 = vrot.lane.b32.xlu1 %v9051_v5, %s7981_s9  ;;  %v1130_v37 = vsel %vm15602_vm3, %v1127_v52, %v1129_v53 }
 0x11b   : >> { %v6839_v7 = vpack.i.bf16 %v1130_v37, %v1128_v36  ;;  %v9366_v36 = vld [vmem:[%s8926_s30 + $0x130] sm:$0x3] }
 0x11c   : >> { %6775 = vrot.lane.b32.xlu0 %v9016_v46, %s7981_s9 }
 0x11e   : >> { %6790 = vrot.lane.b32.xlu1 %v9073_v25, %s7981_s9 }
 0x120   : >> { %6785 = vrot.lane.b32.xlu0 %v9040_v58, %s7981_s9 }
 0x122   : >> { %6800 = vrot.lane.b32.xlu1 %v6799_v45, %s7981_s9 }
 0x124   : >> { %6795 = vrot.lane.b32.xlu0 %v9062_v23, %s7981_s9 }
 0x126   : >> { %6810 = vrot.lane.b32.xlu1 %v9109_v0, %s7982_s10 }
 0x128   : >> { %6805 = vrot.lane.b32.xlu0 %v9085_v3, %s7982_s10  ;;  %v753_v3 = vld [vmem:[%s8926_s30 + $0xe8] sm:$0x3] }
 0x129   : >> { %v1233_v47 = vrot.slane %v753_v3, 1 }
 0x12a   : >> { %6820 = vrot.lane.b32.xlu1 %v9124_v16, %s7982_s10 }
 0x12b   : >> { %v1234_v17 = vsel %vm844_vm2, %v1231_v42, %v1233_v47 }
 0x12c   : >> { %6815 = vrot.lane.b32.xlu0 %v9101_v59, %s7982_s10 }
 0x12e   : >> { %6830 = vrot.lane.b32.xlu1 %v9134_v28, %s7982_s10 }
 0x130   : >> { %6825 = vrot.lane.b32.xlu0 %v9118_v14, %s7982_s10 }
 0x132   : >> { %6840 = vrot.lane.b32.xlu1 %v6839_v7, %s7982_s10 }
 0x134   : >> { %6835 = vrot.lane.b32.xlu0 %v9130_v57, %s7982_s10 }
 0x136   : >> { %6850 = vrot.lane.b32.xlu1 %v6734_v34, %s7983_s11  ;;  %v9325_v34 = vld [vmem:[%s8926_s30 + $0x100] sm:$0x3] }
 0x138   : >> { %6845 = vrot.lane.b32.xlu0 %v6729_v29, %s7983_s11  ;;  %v9314_v29 = vld [vmem:[%s8926_s30 + $0x158] sm:$0xff] }
 0x13a   : >> { %6860 = vrot.lane.b32.xlu1 %v6744_v19, %s7983_s11 }
 0x13c   : >> { %6855 = vrot.lane.b32.xlu0 %v6739_v31, %s7983_s11 }
 0x13e   : >> { %6870 = vrot.lane.b32.xlu1 %v6754_v12, %s7983_s11  ;;  %v1409_v12 = vrot.slane %v9260_v61, 1 }
 0x140   : >> { %6865 = vrot.lane.b32.xlu0 %v6749_v1, %s7983_s11  ;;  %v9328_v1 = vld [vmem:[%s8926_s30 + $0x198] sm:$0xff]  ;;  %v1410_v42 = vsel %vm844_vm2, %v1408_v13, %v1409_v12  ;;  %v1429_v13 = vrot.slane %v9314_v29, 1 }
 0x141   : >> { %v9362_v52 = vpack.i.bf16 %v9331_v2, %v9328_v1 }
 0x142   : >> { %6880 = vrot.lane.b32.xlu1 %v6879_v41, %s7983_s11 }
 0x144   : >> { %6875 = vrot.lane.b32.xlu0 %v6759_v20, %s7983_s11 }
 0x146   : >> { %6890 = vrot.lane.b32.xlu1 %v9016_v46, %s7984_s12  ;;  %v6919_v46 = vpack.i.bf16 %v1234_v17, %v1232_v9  ;;  %v1418_v9 = vrot.slane %v9281_v10, 1  ;;  %v1419_v17 = vrot.slane %v9284_v11, 1 }
 0x148   : >> { %6885 = vrot.lane.b32.xlu0 %v8970_v21, %s7984_s12  ;;  %v1284_v21 = vrot.slane %v752_v40, 2  ;;  %v15510_v40 = vrot.slane %v9347_v26, 1 }
 0x14a   : >> { %6900 = vrot.lane.b32.xlu1 %v9040_v58, %s7984_s12  ;;  %v1283_v58 = vrot.slane %v751_v8, 2  ;;  %v1424_v8 = vrot.slane %v9273_v39, 1 }
 0x14c   : >> { %6895 = vrot.lane.b32.xlu0 %v9051_v5, %s7984_s12  ;;  %v1286_v5 = vrot.slane %v753_v3, 2  ;;  %v1285_v18 = vsel %vm15602_vm3, %v1283_v58, %v1284_v21  ;;  %v9378_v3 = vpack.i.bf16 %v9353_v44, %v9350_v27 }
 0x14e   : >> { %6910 = vrot.lane.b32.xlu1 %v9062_v23, %s7984_s12  ;;  %v1287_v48 = vsel %vm15602_vm3, %v1284_v21, %v1286_v5  ;;  %v1433_v5 = vrot.slane %v9295_v15, 1 }
 0x14f   : >> { %v6959_v55 = vpack.i.bf16 %v1287_v48, %v1285_v18  ;;  %v9397_v48 = vld [vmem:[%s8926_s30 + $0x160] sm:$0x3] }
 0x150   : >> { %6905 = vrot.lane.b32.xlu0 %v9073_v25, %s7984_s12 }
 0x152   : >> { %6920 = vrot.lane.b32.xlu1 %v6919_v46, %s7984_s12  ;;  %v15511_v46 = vrot.slane %v9366_v36, 1 }
 0x154   : >> { %6915 = vrot.lane.b32.xlu0 %v6799_v45, %s7984_s12  ;;  %v1411_v45 = vrot.slane %v9325_v34, 1 }
 0x156   : >> { %6930 = vrot.lane.b32.xlu1 %v9101_v59, %s7985_s13  ;;  %v9250_v59 = vld [vmem:[%s8926_s30 + $0x110] sm:$0xff]  ;;  %v1412_v47 = vsel %vm844_vm2, %v1409_v12, %v1411_v45  ;;  %v9415_v45 = vld [vmem:[%s8926_s30 + $0x1a8] sm:$0x3] }
 0x157   : >> { %v9267_v63 = vpack.i.bf16 %v9250_v59, %v9247_v56  ;;  %v1414_v19 = vrot.slane %v9250_v59, 1  ;;  %15796 = vst [vmem:[#allocation10_spill] sm:$0xff] %v9415_v45 }
 0x158   : >> { %6925 = vrot.lane.b32.xlu0 %v9109_v0, %s7985_s13  ;;  %v9230_v23 = vpop.permute.xlu1 %6655  ;;  %v9270_v0 = vld [vmem:[%s8926_s30 + $0x138] sm:$0xff] }
 0x159   : >> { %v9292_v50 = vpack.i.bf16 %v9273_v39, %v9270_v0  ;;  %v1423_v53 = vrot.slane %v9270_v0, 1  ;;  %v1415_v37 = vsel %vm844_vm2, %v1413_v35, %v1414_v19  ;;  %v15514_v35 = vrot.slane %v9382_v43, 1 }
 0x15a   : >> { %v9232_v25 = vpop.permute.xlu0 %6645  ;;  %6940 = vrot.lane.b32.xlu1 %v9118_v14, %s7985_s13 }
 0x15b   : >> { %15790 = vst [vmem:[#allocation4_spill] sm:$0xff] %v9232_v25 }
 0x15c   : >> { %6935 = vrot.lane.b32.xlu0 %v9124_v16, %s7985_s13  ;;  %v9240_v49 = vpop.permute.xlu1 %6660  ;;  %v9298_v16 = vld [vmem:[%s8926_s30 + $0x170] sm:$0xff] }
 0x15d   : >> { %v9322_v31 = vpack.i.bf16 %v9298_v16, %v9295_v15  ;;  %v1434_v18 = vrot.slane %v9298_v16, 1 }
 0x15e   : >> { %v9242_v54 = vpop.permute.xlu0 %6650  ;;  %6950 = vrot.lane.b32.xlu1 %v9130_v57, %s7985_s13  ;;  %v9308_v57 = vld [vmem:[%s8926_s30 + $0x118] sm:$0x3] }
 0x15f   : >> { %v1416_v20 = vrot.slane %v9308_v57, 1 }
 0x160   : >> { %6945 = vrot.lane.b32.xlu0 %v9134_v28, %s7985_s13  ;;  %v9254_v32 = vpop.permute.xlu1 %6670  ;;  %v9311_v28 = vld [vmem:[%s8926_s30 + $0x150] sm:$0xff] }
 0x161   : >> { %v9344_v38 = vpack.i.bf16 %v9314_v29, %v9311_v28  ;;  %v1428_v12 = vrot.slane %v9311_v28, 1 }
 0x162   : >> { %v9262_v62 = vpop.permute.xlu0 %6665  ;;  %6960 = vrot.lane.b32.xlu1 %v6959_v55, %s7985_s13  ;;  %v9400_v55 = vsel %vm844_vm2, %v1423_v53, %v1424_v8  ;;  %v9418_v53 = vsel %vm844_vm2, %v1418_v9, %v1419_v17  ;;  %v9438_v9 = vld [vmem:[%s8926_s30 + $0x190] sm:$0x3] }
 0x163   : >> { %15791 = vst [vmem:[#allocation5_spill] sm:$0xff] %v9262_v62  ;;  %15799 = vst [vmem:[#allocation13_spill] sm:$0xff] %v9438_v9  ;;  %v1438_v62 = vrot.slane %v9350_v27, 1 }
 0x164   : >> { %6955 = vrot.lane.b32.xlu0 %v6839_v7, %s7985_s13  ;;  %v9276_v4 = vpop.permute.xlu1 %6680  ;;  %v1417_v7 = vsel %vm844_vm2, %v1414_v19, %v1416_v20  ;;  %v7004_v20 = vpack.i.bf16 %v1412_v47, %v1410_v42  ;;  %v9435_v47 = vsel %vm844_vm2, %v1433_v5, %v1434_v18 }
 0x165   : >> { %v9392_v58 = vpack.i.bf16 %v1417_v7, %v1415_v37  ;;  %v9423_v37 = vsel %vm844_vm2, %v1419_v17, %v15511_v46  ;;  %15798 = vst [vmem:[#allocation12_spill] sm:$0xff] %v9435_v47  ;;  %v9443_v17 = vsel %vm844_vm2, %v1434_v18, %v15514_v35  ;;  %v1444_v46 = vrot.slane %v9331_v2, 1 }
 0x166   : >> { %v9286_v14 = vpop.permute.xlu0 %6675  ;;  %6970 = vrot.lane.b32.xlu1 %v9267_v63, %s7986_s14  ;;  %15800 = vst [vmem:[#allocation14_spill] sm:$0xff] %v9443_v17  ;;  %v9453_v5 = vpack.i.bf16 %v9423_v37, %v9418_v53  ;;  %v15803_v18 = vrot.slane %v9397_v48, 1  ;;  %v1439_v7 = vrot.slane %v9353_v44, 1 }
 0x168   : >> { %6965 = vrot.lane.b32.xlu0 %v6964_v6, %s7986_s14  ;;  %v9301_v22 = vpop.permute.xlu1 %6690  ;;  %v9405_v6 = vsel %vm844_vm2, %v1424_v8, %v15510_v40  ;;  %v1443_v40 = vrot.slane %v9328_v1, 1  ;;  %v9461_v35 = vsel %vm844_vm2, %v1429_v13, %v15803_v18 }
 0x169   : >> { %15794 = vst [vmem:[#allocation8_spill] sm:$0xff] %v9405_v6  ;;  %v9432_v42 = vpack.i.bf16 %v9405_v6, %v9400_v55  ;;  %v1501_v6 = vrot.slane %v9247_v56, 2 }
 0x16a   : >> { %v9316_v30 = vpop.permute.xlu0 %6685  ;;  %6980 = vrot.lane.b32.xlu1 %v9292_v50, %s7986_s14  ;;  %v9477_v18 = vsel %vm844_vm2, %v1443_v40, %v1444_v46  ;;  %v9496_v40 = vsel %vm844_vm2, %v1438_v62, %v1439_v7 }
 0x16b   : >> { %15792 = vst [vmem:[#allocation6_spill] sm:$0xff] %v9316_v30  ;;  %v9456_v30 = vsel %vm844_vm2, %v1428_v12, %v1429_v13  ;;  %v9472_v12 = vpack.i.bf16 %v9443_v17, %v9435_v47  ;;  %v1502_v13 = vrot.slane %v9250_v59, 2  ;;  %15805 = vst [vmem:[#allocation18_spill] sm:$0xff] %v9477_v18  ;;  %v1511_v47 = vrot.slane %v9270_v0, 2 }
 0x16c   : >> { %6975 = vrot.lane.b32.xlu0 %v9305_v24, %s7986_s14  ;;  %v9340_v33 = vpop.permute.xlu1 %6700  ;;  %15802 = vst [vmem:[#allocation16_spill] sm:$0xff] %v9456_v30  ;;  %v9493_v59 = vpack.i.bf16 %v9461_v35, %v9456_v30  ;;  %15808 = vst [vmem:[#allocation20_spill] sm:$0xff] %v9496_v40  ;;  %v1507_v0 = vrot.slane %v9284_v11, 2 }
 0x16d   : >> { %v1503_v17 = vsel %vm15602_vm3, %v1501_v6, %v1502_v13 }
 0x16e   : >> { %v9356_v51 = vpop.permute.xlu0 %6695  ;;  %6990 = vrot.lane.b32.xlu1 %v9322_v31, %s7986_s14 }
 0x170   : >> { %6985 = vrot.lane.b32.xlu0 %v9344_v38, %s7986_s14  ;;  %v9374_v41 = vpop.permute.xlu1 %6710 }
 0x172   : >> { %v9388_v21 = vpop.permute.xlu0 %6705  ;;  %7000 = vrot.lane.b32.xlu1 %v9362_v52, %s7986_s14 }
 0x173   : >> { %15793 = vst [vmem:[#allocation7_spill] sm:$0xff] %v9388_v21 }
 0x174   : >> { %6995 = vrot.lane.b32.xlu0 %v9378_v3, %s7986_s14  ;;  %v9410_v19 = vpop.permute.xlu1 %6720 }
 0x175   : >> { %15795 = vst [vmem:[#allocation9_spill] sm:$0xff] %v9410_v19  ;;  %v1496_v19 = vrot.slane %v9257_v60, 2 }
 0x176   : >> { %v9426_v8 = vpop.permute.xlu0 %6715  ;;  %7010 = vrot.lane.b32.xlu1 %v9392_v58, %s7987_s15 }
 0x177   : >> { %15797 = vst [vmem:[#allocation11_spill] sm:$0xff] %v9426_v8  ;;  %v1497_v8 = vrot.slane %v9260_v61, 2  ;;  %v1499_v61 = vrot.slane %v9325_v34, 2 }
 0x178   : >> { %7005 = vrot.lane.b32.xlu0 %v7004_v20, %s7987_s15  ;;  %v9449_v21 = vpop.permute.xlu1 %6730 }
 0x179   : >> { %15801 = vst [vmem:[#allocation15_spill] sm:$0xff] %v9449_v21  ;;  %v15806_v21 = vrot.slane %v9415_v45, 1  ;;  %v1500_v6 = vsel %vm15602_vm3, %v1497_v8, %v1499_v61 }
 0x17a   : >> { %v9466_v25 = vpop.permute.xlu0 %6725  ;;  %7020 = vrot.lane.b32.xlu1 %v9432_v42, %s7987_s15 }
 0x17b   : >> { %15804 = vst [vmem:[#allocation17_spill] sm:$0xff] %v9466_v25  ;;  %v9482_v20 = vsel %vm844_vm2, %v1444_v46, %v15806_v21  ;;  %v1504_v25 = vrot.slane %v9308_v57, 2  ;;  %v15809_v46 = vrot.slane %v9438_v9, 1 }
 0x17c   : >> { %15807 = vst [vmem:[#allocation19_spill] sm:$0xff] %v9482_v20  ;;  %7015 = vrot.lane.b32.xlu0 %v9453_v5, %s7987_s15  ;;  %v9489_v56 = vpop.permute.xlu1 %6740  ;;  %v9510_v21 = vpack.i.bf16 %v9482_v20, %v9477_v18  ;;  %v1498_v20 = vsel %vm15602_vm3, %v1496_v19, %v1497_v8 }
 0x17d   : >> { %v9501_v57 = vsel %vm844_vm2, %v1439_v7, %v15809_v46  ;;  %v1505_v62 = vsel %vm15602_vm3, %v1502_v13, %v1504_v25  ;;  %v1512_v7 = vrot.slane %v9273_v39, 2  ;;  %v1514_v46 = vrot.slane %v9347_v26, 2 }
 0x17e   : >> { %15810 = vst [vmem:[#allocation21_spill] sm:$0xff] %v9501_v57  ;;  %v9504_v60 = vpop.permute.xlu0 %6735  ;;  %7030 = vrot.lane.b32.xlu1 %v9472_v12, %s7987_s15  ;;  %v9523_v30 = vpack.i.bf16 %v9501_v57, %v9496_v40  ;;  %v1506_v25 = vrot.slane %v9281_v10, 2  ;;  %v1509_v39 = vrot.slane %v9366_v36, 2  ;;  %v9534_v18 = vpack.i.bf16 %v1505_v62, %v1503_v17 }
 0x17f   : >> { %v1521_v40 = vrot.slane %v9295_v15, 2  ;;  %v1522_v57 = vrot.slane %v9298_v16, 2  ;;  %v1513_v19 = vsel %vm15602_vm3, %v1511_v47, %v1512_v7  ;;  %v1515_v8 = vsel %vm15602_vm3, %v1512_v7, %v1514_v46 }
 0x180   : >> { %7025 = vrot.lane.b32.xlu0 %v9493_v59, %s7987_s15  ;;  %v9519_v34 = vpop.permute.xlu1 %6750  ;;  %v1524_v10 = vrot.slane %v9382_v43, 2  ;;  %v7044_v61 = vpack.i.bf16 %v1500_v6, %v1498_v20  ;;  %v1517_v17 = vrot.slane %v9314_v29, 2  ;;  %v1508_v15 = vsel %vm15602_vm3, %v1506_v25, %v1507_v0 }
 0x181   : >> { %v1510_v16 = vsel %vm15602_vm3, %v1507_v0, %v1509_v39  ;;  %v1519_v47 = vrot.slane %v9397_v48, 2  ;;  %v9554_v7 = vpack.i.bf16 %v1515_v8, %v1513_v19  ;;  %v1523_v20 = vsel %vm15602_vm3, %v1521_v40, %v1522_v57 }
 0x182   : >> { %v9530_v13 = vpop.permute.xlu0 %6745  ;;  %7040 = vrot.lane.b32.xlu1 %v9510_v21, %s7987_s15  ;;  %v1531_v29 = vrot.slane %v9328_v1, 2  ;;  %v1532_v46 = vrot.slane %v9331_v2, 2  ;;  %v1534_v6 = vrot.slane %v9415_v45, 2  ;;  %v9564_v0 = vpack.i.bf16 %v1510_v16, %v1508_v15 }
 0x183   : >> { %15811 = vst [vmem:[#allocation22_spill] sm:$0xff] %v9530_v13  ;;  %v1516_v13 = vrot.slane %v9311_v28, 2  ;;  %v1525_v28 = vsel %vm15602_vm3, %v1522_v57, %v1524_v10  ;;  %v1520_v19 = vsel %vm15602_vm3, %v1517_v17, %v1519_v47  ;;  %v1526_v40 = vrot.slane %v9350_v27, 2 }
 0x184   : >> { %7035 = vrot.lane.b32.xlu0 %v9523_v30, %s7987_s15  ;;  %v9543_v11 = vpop.permute.xlu1 %6760  ;;  %v1527_v57 = vrot.slane %v9353_v44, 2  ;;  %v1529_v1 = vrot.slane %v9438_v9, 2  ;;  %v9575_v2 = vpack.i.bf16 %v1525_v28, %v1523_v20  ;;  %v1533_v10 = vsel %vm15602_vm3, %v1531_v29, %v1532_v46 }
 0x185   : >> { %v1518_v39 = vsel %vm15602_vm3, %v1516_v13, %v1517_v17 }
 0x186   : >> { %v9550_v62 = vpop.permute.xlu0 %6755  ;;  %7050 = vrot.lane.b32.xlu1 %v9534_v18, %s7988_s16  ;;  %v9583_v27 = vpack.i.bf16 %v1520_v19, %v1518_v39  ;;  %v1528_v44 = vsel %vm15602_vm3, %v1526_v40, %v1527_v57  ;;  %v1530_v17 = vsel %vm15602_vm3, %v1527_v57, %v1529_v1  ;;  %v6300_v19 = vld [vmem:[%s8926_s30 + $0x1b0] sm:$0xff]  ;;  %v6301_v40 = vld [vmem:[%s8926_s30 + $0x1b8] sm:$0xff] }
 0x187   : >> { %v9597_v20 = vpack.i.bf16 %v1530_v17, %v1528_v44  ;;  %v9636_v17 = vld [vmem:[%s8926_s30 + $0x1c0] sm:$0x3] }
 0x188   : >> { %7045 = vrot.lane.b32.xlu0 %v7044_v61, %s7988_s16  ;;  %v9562_v25 = vpop.permute.xlu1 %6770  ;;  %v1535_v61 = vsel %vm15602_vm3, %v1532_v46, %v1534_v6  ;;  %15818 = vst [vmem:[#allocation29_spill] sm:$0xff] %v9636_v17  ;;  %v15539_v45 = vrot.slane %v9636_v17, 1 }
 0x189   : >> { %v9591_v16 = vpack.i.bf16 %v1535_v61, %v1533_v10  ;;  %v9624_v10 = vpack.i.bf16 %v6301_v40, %v6300_v19 }
 0x18a   : >> { %v9571_v8 = vpop.permute.xlu0 %6765  ;;  %7060 = vrot.lane.b32.xlu1 %v9554_v7, %s7988_s16 }
 0x18b   : >> { %15812 = vst [vmem:[#allocation23_spill] sm:$0xff] %v9571_v8  ;;  %v1636_v8 = vrot.slane %v6301_v40, 1 }
 0x18c   : >> { %7055 = vrot.lane.b32.xlu0 %v9564_v0, %s7988_s16  ;;  %v9581_v13 = vpop.permute.xlu1 %6780 }
 0x18e   : >> { %v9587_v15 = vpop.permute.xlu0 %6775  ;;  %7070 = vrot.lane.b32.xlu1 %v9575_v2, %s7988_s16 }
 0x190   : >> { %7065 = vrot.lane.b32.xlu0 %v9583_v27, %s7988_s16  ;;  %v9595_v47 = vpop.permute.xlu1 %6790 }
 0x192   : >> { %v9599_v28 = vpop.permute.xlu0 %6785  ;;  %7080 = vrot.lane.b32.xlu1 %v9591_v16, %s7988_s16 }
 0x193   : >> { %15813 = vst [vmem:[#allocation24_spill] sm:$0xff] %v9599_v28  ;;  %v1635_v28 = vrot.slane %v6300_v19, 1 }
 0x194   : >> { %7075 = vrot.lane.b32.xlu0 %v9597_v20, %s7988_s16  ;;  %v9605_v29 = vpop.permute.xlu1 %6800 }
 0x196   : >> { %v9607_v46 = vpop.permute.xlu0 %6795  ;;  %7090 = vrot.lane.b32.xlu1 %v9305_v24, %s7989_s17 }
 0x198   : >> { %7085 = vrot.lane.b32.xlu0 %v9267_v63, %s7989_s17  ;;  %v9611_v6 = vpop.permute.xlu1 %6810 }
 0x19a   : >> { %v9613_v39 = vpop.permute.xlu0 %6805  ;;  %7100 = vrot.lane.b32.xlu1 %v9344_v38, %s7989_s17 }
 0x19b   : >> { %15814 = vst [vmem:[#allocation25_spill] sm:$0xff] %v9613_v39 }
 0x19c   : >> { %7095 = vrot.lane.b32.xlu0 %v9292_v50, %s7989_s17  ;;  %v9619_v57 = vpop.permute.xlu1 %6820 }
 0x19e   : >> { %v9621_v1 = vpop.permute.xlu0 %6815  ;;  %7110 = vrot.lane.b32.xlu1 %v9378_v3, %s7989_s17 }
 0x1a0   : >> { %7105 = vrot.lane.b32.xlu0 %v9322_v31, %s7989_s17  ;;  %v9627_v63 = vpop.permute.xlu1 %6830 }
 0x1a1   : >> { %15815 = vst [vmem:[#allocation26_spill] sm:$0xff] %v9627_v63 }
 0x1a2   : >> { %v9629_v61 = vpop.permute.xlu0 %6825  ;;  %7120 = vrot.lane.b32.xlu1 %v9624_v10, %s7989_s17 }
 0x1a3   : >> { %15816 = vst [vmem:[#allocation27_spill] sm:$0xff] %v9629_v61 }
 0x1a4   : >> { %7115 = vrot.lane.b32.xlu0 %v9362_v52, %s7989_s17  ;;  %v9633_v44 = vpop.permute.xlu1 %6840 }
 0x1a5   : >> { %15817 = vst [vmem:[#allocation28_spill] sm:$0xff] %v9633_v44  ;;  %v9649_v44 = vsel %vm844_vm2, %v1635_v28, %v1636_v8 }
 0x1a6   : >> { %v9638_v39 = vpop.permute.xlu0 %6835  ;;  %7130 = vrot.lane.b32.xlu1 %v9453_v5, %s7990_s19  ;;  %15821 = vst [vmem:[#allocation32_spill] sm:$0xff] %v9649_v44 }
 0x1a7   : >> { %15819 = vst [vmem:[#allocation30_spill] sm:$0xff] %v9638_v39  ;;  %v9654_v39 = vsel %vm844_vm2, %v1636_v8, %v15539_v45  ;;  %v1689_v45 = vrot.slane %v6301_v40, 2  ;;  %v9711_v40 = vld [vmem:[%s8926_s30 + $0x1d0] sm:$0xff] }
 0x1a8   : >> { %7125 = vrot.lane.b32.xlu0 %v9392_v58, %s7990_s19  ;;  %v9643_v61 = vpop.permute.xlu1 %6850  ;;  %v7159_v58 = vpack.i.bf16 %v9654_v39, %v9649_v44 }
 0x1aa   : >> { %v9645_v9 = vpop.permute.xlu0 %6845  ;;  %7140 = vrot.lane.b32.xlu1 %v9493_v59, %s7990_s19 }
 0x1ab   : >> { %15820 = vst [vmem:[#allocation31_spill] sm:$0xff] %v9645_v9  ;;  %v1691_v9 = vrot.slane %v9636_v17, 2 }
 0x1ac   : >> { %7135 = vrot.lane.b32.xlu0 %v9432_v42, %s7990_s19  ;;  %v9657_v5 = vpop.permute.xlu1 %6860 }
 0x1ae   : >> { %v9659_v63 = vpop.permute.xlu0 %6855  ;;  %7150 = vrot.lane.b32.xlu1 %v9523_v30, %s7990_s19  ;;  %v1688_v30 = vrot.slane %v6300_v19, 2 }
 0x1b0   : >> { %7145 = vrot.lane.b32.xlu0 %v9472_v12, %s7990_s19  ;;  %v9665_v59 = vpop.permute.xlu1 %6870 }
 0x1b2   : >> { %v9667_v28 = vpop.permute.xlu0 %6865  ;;  %7160 = vrot.lane.b32.xlu1 %v7159_v58, %s7990_s19  ;;  %v1692_v58 = vsel %vm15602_vm3, %v1689_v45, %v1691_v9 }
 0x1b3   : >> { %15822 = vst [vmem:[#allocation33_spill] sm:$0xff] %v9667_v28 }
 0x1b4   : >> { %7155 = vrot.lane.b32.xlu0 %v9510_v21, %s7990_s19  ;;  %v9670_v8 = vpop.permute.xlu1 %6880  ;;  %v1690_v21 = vsel %vm15602_vm3, %v1688_v30, %v1689_v45  ;;  %vm15633_vm3 = vcmask 916480  }
 0x1b6   : >> { %v9672_v42 = vpop.permute.xlu0 %6875  ;;  %7170 = vrot.lane.b32.xlu1 %v9564_v0, %s7991_s20 }
 0x1b8   : >> { %7165 = vrot.lane.b32.xlu0 %v9534_v18, %s7991_s20  ;;  %v9677_v12 = vpop.permute.xlu1 %6890  ;;  %v7199_v18 = vpack.i.bf16 %v1692_v58, %v1690_v21  ;;  %v6658_v21 = vunpack.i.h.bf16 %v9230_v23  ;;  %v6663_v58 = vunpack.i.h.bf16 %v9240_v49 }
 0x1ba   : >> { %v9679_v44 = vpop.permute.xlu0 %6885  ;;  %7180 = vrot.lane.b32.xlu1 %v9583_v27, %s7991_s20 }
 0x1bb   : >> { %15823 = vst [vmem:[#allocation34_spill] sm:$0xff] %v9679_v44 }
 0x1bc   : >> { %7175 = vrot.lane.b32.xlu0 %v9554_v7, %s7991_s20  ;;  %v9685_v28 = vpop.permute.xlu1 %6900 }
 0x1be   : >> { %v9687_v0 = vpop.permute.xlu0 %6895  ;;  %7190 = vrot.lane.b32.xlu1 %v9597_v20, %s7991_s20 }
 0x1bf   : >> { %15824 = vst [vmem:[#allocation35_spill] sm:$0xff] %v9687_v0  ;;  %v7255_v0 = vld [vmem:[%s8926_s30 + $0x90] sm:$0xff] }
 0x1c0   : >> { %7185 = vrot.lane.b32.xlu0 %v9575_v2, %s7991_s20  ;;  %v9691_v19 = vpop.permute.xlu1 %6910  ;;  %v9708_v2 = vld [vmem:[%s8926_s30 + $0x1c8] sm:$0xff] }
 0x1c1   : >> { %15825 = vst [vmem:[#allocation36_spill] sm:$0xff] %v9691_v19  ;;  %v7254_v19 = vld [vmem:[%s8926_s30 + $0x98] sm:$0xff] }
 0x1c2   : >> { %v9693_v27 = vpop.permute.xlu0 %6905  ;;  %7200 = vrot.lane.b32.xlu1 %v7199_v18, %s7991_s20  ;;  %v6662_v18 = vunpack.i.l.bf16 %v9240_v49  ;;  %v6682_v49 = vunpack.i.l.bf16 %v9276_v4 }
 0x1c3   : >> { %15826 = vst [vmem:[#allocation37_spill] sm:$0xff] %v9693_v27  ;;  %v6677_v27 = vunpack.i.l.bf16 %v9286_v14 }
 0x1c4   : >> { %7195 = vrot.lane.b32.xlu0 %v9591_v16, %s7991_s20  ;;  %v9696_v45 = vpop.permute.xlu1 %6920 }
 0x1c5   : >> { %15827 = vst [vmem:[#allocation38_spill] sm:$0xff] %v9696_v45  ;;  %v7252_v45 = vld [vmem:[%s8926_s30 + $0xb0] sm:$0xff] }
 0x1c6   : >> { %v9698_v9 = vpop.permute.xlu0 %6915  ;;  %7210 = vrot.lane.b32.xlu1 %v9292_v50, %s7992_s21  ;;  %v7239_v50 = vpack.i.bf16 %v9711_v40, %v9708_v2 }
 0x1c7   : >> { %15828 = vst [vmem:[#allocation39_spill] sm:$0xff] %v9698_v9  ;;  %v7248_v9 = vld [vmem:[%s8926_s30 + $0x20] sm:$0xff] }
 0x1c8   : >> { %7205 = vrot.lane.b32.xlu0 %v9305_v24, %s7992_s21  ;;  %v9702_v7 = vpop.permute.xlu1 %6930 }
 0x1c9   : >> { %15829 = vst [vmem:[#allocation40_spill] sm:$0xff] %v9702_v7 }
 0x1ca   : >> { %v9704_v20 = vpop.permute.xlu0 %6925  ;;  %7220 = vrot.lane.b32.xlu1 %v9322_v31, %s7992_s21 }
 0x1cb   : >> { %15830 = vst [vmem:[#allocation41_spill] sm:$0xff] %v9704_v20  ;;  %v6672_v20 = vunpack.i.l.bf16 %v9254_v32 }
 0x1cc   : >> { %7215 = vrot.lane.b32.xlu0 %v9344_v38, %s7992_s21  ;;  %v9714_v16 = vpop.permute.xlu1 %6940  ;;  %v6657_v38 = vunpack.i.l.bf16 %v9230_v23  ;;  %v6683_v23 = vunpack.i.h.bf16 %v9276_v4  ;;  %v7244_v4 = vld [vmem:[%s8926_s30 + $0x38] sm:$0xff] }
 0x1cd   : >> { %15831 = vst [vmem:[#allocation42_spill] sm:$0xff] %v9714_v16  ;;  %v7247_v16 = vld [vmem:[%s8926_s30 + $0x48] sm:$0xff] }
 0x1ce   : >> { %v9716_v30 = vpop.permute.xlu0 %6935  ;;  %7230 = vrot.lane.b32.xlu1 %v9362_v52, %s7992_s21 }
 0x1cf   : >> { %15832 = vst [vmem:[#allocation43_spill] sm:$0xff] %v9716_v30  ;;  %v7246_v30 = vld [vmem:[%s8926_s30 + $0x50] sm:$0xff] }
 0x1d0   : >> { %7225 = vrot.lane.b32.xlu0 %v9378_v3, %s7992_s21  ;;  %v9722_v24 = vpop.permute.xlu1 %6950  ;;  %v6653_v3 = vunpack.i.h.bf16 %v9242_v54 }
 0x1d1   : >> { %15833 = vst [vmem:[#allocation44_spill] sm:$0xff] %v9722_v24  ;;  %v1796_v24 = vsel %vm225_vm0, %v7244_v4, %v6658_v21  ;;  %v7249_v4 = vld [vmem:[%s8926_s30 + $0x18] sm:$0xff] }
 0x1d2   : >> { %v9724_v31 = vpop.permute.xlu0 %6945  ;;  %7240 = vrot.lane.b32.xlu1 %v7239_v50, %s7992_s21  ;;  %v6673_v50 = vunpack.i.h.bf16 %v9254_v32  ;;  %v6692_v32 = vunpack.i.l.bf16 %v9301_v22  ;;  %v1794_v21 = vsel %vm225_vm0, %v7248_v9, %v6653_v3  ;;  %v1803_v9 = vsel %vm225_vm0, %v7255_v0, %v6677_v27 }
 0x1d3   : >> { %15834 = vst [vmem:[#allocation45_spill] sm:$0xff] %v9724_v31  ;;  %v6652_v31 = vunpack.i.l.bf16 %v9242_v54  ;;  %v6693_v54 = vunpack.i.h.bf16 %v9301_v22  ;;  %v1797_v22 = vsel %vm225_vm0, %v7247_v16, %v6662_v18  ;;  %v1806_v16 = vsel %vm225_vm0, %v7252_v45, %v6683_v23  ;;  %v7253_v18 = vld [vmem:[%s8926_s30 + $0xa8] sm:$0xff] }
 0x1d4   : >> { %7235 = vrot.lane.b32.xlu0 %v9624_v10, %s7992_s21  ;;  %v9731_v52 = vpop.permute.xlu1 %6960  ;;  %v6678_v10 = vunpack.i.h.bf16 %v9286_v14  ;;  %v7245_v14 = vld [vmem:[%s8926_s30 + $0x30] sm:$0xff]  ;;  %v6698_v23 = vunpack.i.h.bf16 %v9356_v51  ;;  %v6712_v0 = vunpack.i.l.bf16 %v9374_v41  ;;  %v15839_v27 = vrot.slane %v9366_v36, 1 }
 0x1d5   : >> { %15835 = vst [vmem:[#allocation46_spill] sm:$0xff] %v9731_v52  ;;  %v6703_v52 = vunpack.i.h.bf16 %v9340_v33 }
 0x1d6   : >> { %v9741_v44 = vpop.permute.xlu0 %6955  ;;  %2053 = vrot.lane.b32.xlu1 %v9423_v37, %s7978_s6  ;;  %v1798_v37 = vsel %vm225_vm0, %v7246_v30, %v6663_v58  ;;  %v7251_v30 = vld [vmem:[%s8926_s30 + $0x78] sm:$0xff] }
 0x1d7   : >> { %15836 = vst [vmem:[#allocation47_spill] sm:$0xff] %v9741_v44  ;;  %v1795_v44 = vsel %vm225_vm0, %v7245_v14, %v6657_v38  ;;  %v1793_v38 = vsel %vm225_vm0, %v7249_v4, %v6652_v31  ;;  %v7250_v14 = vld [vmem:[%s8926_s30 + $0x80] sm:$0xff]  ;;  %v1801_v58 = vsel %vm225_vm0, %v7251_v30, %v6672_v20  ;;  %v1811_v20 = vsel %vm1807_vm4, %v1794_v21, %v6693_v54  ;;  %v15842_v21 = vld [vmem:[#allocation15_spill] sm:$0xff] }
 0x1d8   : >> { %2051 = vrot.lane.b32.xlu0 %v9418_v53, %s7978_s6  ;;  %v9758_v7 = vpop.permute.xlu1 %6970  ;;  %v1802_v17 = vsel %vm225_vm0, %v7250_v14, %v6673_v50  ;;  %v1805_v53 = vsel %vm225_vm0, %v7253_v18, %v6682_v49  ;;  %v1810_v31 = vsel %vm1807_vm4, %v1793_v38, %v6692_v32  ;;  %v1815_v45 = vsel %vm1807_vm4, %v1798_v37, %v6703_v52  ;;  %v15841_v32 = vld [vmem:[#allocation11_spill] sm:$0xff] }
 0x1d9   : >> { %15837 = vst [vmem:[#allocation48_spill] sm:$0xff] %v9758_v7  ;;  %v1804_v7 = vsel %vm225_vm0, %v7254_v19, %v6678_v10  ;;  %v6702_v50 = vunpack.i.l.bf16 %v9340_v33  ;;  %v6697_v19 = vunpack.i.l.bf16 %v9356_v51  ;;  %v6713_v49 = vunpack.i.h.bf16 %v9374_v41  ;;  %v15840_v10 = vld [vmem:[#allocation9_spill] sm:$0xff] }
 0x1da   : >> { %v9776_v3 = vpop.permute.xlu0 %6965  ;;  %2057 = vrot.lane.b32.xlu1 %v9400_v55, %s7978_s6  ;;  %v6723_v54 = vunpack.i.h.bf16 %v15840_v10  ;;  %v6722_v52 = vunpack.i.l.bf16 %v15840_v10  ;;  %v6718_v33 = vunpack.i.h.bf16 %v15841_v32  ;;  %v6717_v37 = vunpack.i.l.bf16 %v15841_v32 }
 0x1db   : >> { %15838 = vst [vmem:[#allocation49_spill] sm:$0xff] %v9776_v3  ;;  %v6733_v51 = vunpack.i.h.bf16 %v15842_v21  ;;  %v6732_v4 = vunpack.i.l.bf16 %v15842_v21  ;;  %v6743_v41 = vunpack.i.h.bf16 %v9489_v56  ;;  %v6742_v38 = vunpack.i.l.bf16 %v9489_v56 }
 0x1dc   : >> { %2055 = vrot.lane.b32.xlu0 %v15839_v27, %s7978_s6  ;;  %v9791_v55 = vpop.permute.xlu1 %6980  ;;  %v15843_v14 = vrot.slane %v9347_v26, 1  ;;  %v6738_v30 = vunpack.i.h.bf16 %v9504_v60  ;;  %v6737_v18 = vunpack.i.l.bf16 %v9504_v60  ;;  %v2046_v27 = vrot.slane %v9708_v2, 1 }
 0x1dd   : >> { %v2047_v10 = vrot.slane %v9711_v40, 1  ;;  %v1814_v32 = vsel %vm1807_vm4, %v1797_v22, %v6702_v50  ;;  %v1813_v56 = vsel %vm1807_vm4, %v1796_v24, %v6698_v23  ;;  %v1812_v21 = vsel %vm1807_vm4, %v1795_v44, %v6697_v19  ;;  %v9823_v24 = vld [vmem:[%s8926_s30 + $0x1d8] sm:$0x3] }
 0x1de   : >> { %v9801_v36 = vpop.permute.xlu0 %6975  ;;  %2061 = vrot.lane.b32.xlu1 %v15843_v14, %s7978_s6  ;;  %v1819_v26 = vsel %vm1807_vm4, %v1802_v17, %v6713_v49  ;;  %v15844_v14 = vld [vmem:[#allocation8_spill] sm:$0xff]  ;;  %v1818_v60 = vsel %vm1807_vm4, %v1801_v58, %v6712_v0  ;;  %v1823_v2 = vsel %vm1807_vm4, %v1806_v16, %v6723_v54  ;;  %v1822_v40 = vsel %vm1807_vm4, %v1805_v53, %v6722_v52  ;;  %v9837_v16 = vld [vmem:[%s8926_s30 + $0x1e8] sm:$0xff] }
 0x1df   : >> { %v1820_v22 = vsel %vm1807_vm4, %v1803_v9, %v6717_v37  ;;  %v1821_v44 = vsel %vm1807_vm4, %v1804_v7, %v6718_v33  ;;  %v1827_v50 = vsel %vm1824_vm5, %v1810_v31, %v6732_v4  ;;  %v1828_v17 = vsel %vm1824_vm5, %v1811_v20, %v6733_v51  ;;  %v9834_v58 = vld [vmem:[%s8926_s30 + $0x1e0] sm:$0xff] }
 0x1e0   : >> { %2059 = vrot.lane.b32.xlu0 %v15844_v14, %s7978_s6  ;;  %v9816_v3 = vpop.permute.xlu1 %6990  ;;  %v1831_v23 = vsel %vm1824_vm5, %v1814_v32, %v6742_v38  ;;  %v1832_v53 = vsel %vm1824_vm5, %v1815_v45, %v6743_v41  ;;  %v1829_v7 = vsel %vm1824_vm5, %v1812_v21, %v6737_v18  ;;  %v1830_v9 = vsel %vm1824_vm5, %v1813_v56, %v6738_v30  ;;  %v15846_v0 = vld [vmem:[#allocation16_spill] sm:$0xff] }
 0x1e1   : >> { %v9843_v31 = vsel %vm844_vm2, %v2046_v27, %v2047_v10  ;;  %v6753_v20 = vunpack.i.h.bf16 %v9519_v34  ;;  %v6752_v49 = vunpack.i.l.bf16 %v9519_v34  ;;  %v15561_v45 = vrot.slane %v9823_v24, 1  ;;  %v9854_v52 = vld [vmem:[%s8926_s30 + $0x200] sm:$0xff]  ;;  %v9868_v27 = vld [vmem:[%s8926_s30 + $0x1f8] sm:$0xff] }
 0x1e2   : >> { %v9829_v19 = vpop.permute.xlu0 %6985  ;;  %2065 = vrot.lane.b32.xlu1 %v9461_v35, %s7978_s6  ;;  %v6763_v35 = vunpack.i.h.bf16 %v9543_v11  ;;  %15847 = vst [vmem:[#allocation11_spill] sm:$0xff] %v9854_v52  ;;  %v6762_v33 = vunpack.i.l.bf16 %v9543_v11  ;;  %v15560_v51 = vrot.slane %v9837_v16, 7  ;;  %v6758_v34 = vunpack.i.h.bf16 %v9550_v62  ;;  %v15848_v18 = vld [vmem:[#allocation12_spill] sm:$0xff]  ;;  %15849 = vst [vmem:[#allocation15_spill] sm:$0xff] %v9868_v27 }
 0x1e3   : >> { %15845 = vst [vmem:[#allocation9_spill] sm:$0xff] %v9829_v19  ;;  %v6757_v4 = vunpack.i.l.bf16 %v9550_v62  ;;  %v6773_v41 = vunpack.i.h.bf16 %v9562_v25  ;;  %v6772_v38 = vunpack.i.l.bf16 %v9562_v25  ;;  %v6783_v11 = vunpack.i.h.bf16 %v9581_v13 }
 0x1e4   : >> { %2063 = vrot.lane.b32.xlu0 %v15846_v0, %s7978_s6  ;;  %v9850_v54 = vpop.permute.xlu1 %7000  ;;  %v6782_v32 = vunpack.i.l.bf16 %v9581_v13  ;;  %v6777_v56 = vunpack.i.l.bf16 %v9587_v15  ;;  %v9874_v62 = vrot.slane %v9854_v52, 7  ;;  %v1835_v25 = vsel %vm1824_vm5, %v1818_v60, %v6752_v49  ;;  %v15866_v52 = vld [vmem:[#allocation20_spill] sm:$0xff] }
 0x1e5   : >> { %v1836_v21 = vsel %vm1824_vm5, %v1819_v26, %v6753_v20  ;;  %v6778_v14 = vunpack.i.h.bf16 %v9587_v15  ;;  %v15850_v0 = vrot.slane %v9397_v48, 1  ;;  %v9887_v13 = vsel %vm844_vm2, %v2047_v10, %v15561_v45  ;;  %v9902_v20 = vld [vmem:[%s8926_s30 + $0x210] sm:$0xff]  ;;  %v9957_v45 = vld [vmem:[%s8926_s30 + $0x228] sm:$0xff] }
 0x1e6   : >> { %v9863_v30 = vpop.permute.xlu0 %6995  ;;  %2069 = vrot.lane.b32.xlu1 %v15848_v18, %s7978_s6  ;;  %v1839_v37 = vsel %vm1824_vm5, %v1822_v40, %v6762_v33  ;;  %v1840_v60 = vsel %vm1824_vm5, %v1823_v2, %v6763_v35  ;;  %v15851_v15 = vrot.slane %v9834_v58, 7  ;;  %v9899_v48 = vrot.slane %v9868_v27, 7  ;;  %15852 = vst [vmem:[#allocation8_spill] sm:$0xff] %v9902_v20 }
 0x1e7   : >> { %v1837_v10 = vsel %vm1824_vm5, %v1820_v22, %v6757_v4  ;;  %v1838_v49 = vsel %vm1824_vm5, %v1821_v44, %v6758_v34  ;;  %v1844_v40 = vsel %vm1841_vm6, %v1827_v50, %v6772_v38  ;;  %v1845_v2 = vsel %vm1841_vm6, %v1828_v17, %v6773_v41  ;;  %v9925_v17 = vld [vmem:[%s8926_s30 + $0x230] sm:$0xff]  ;;  %v9938_v41 = vld [vmem:[%s8926_s30 + $0x240] sm:$0xff]  ;;  %v9941_v38 = vld [vmem:[%s8926_s30 + $0x248] sm:$0xff] }
 0x1e8   : >> { %2067 = vrot.lane.b32.xlu0 %v15850_v0, %s7978_s6  ;;  %v9882_v18 = vpop.permute.xlu1 %7010  ;;  %v9896_v26 = vsel %vm15603_vm7, %v15851_v15, %v15560_v51  ;;  %v15854_v33 = vrot.slane %v9382_v43, 1  ;;  %v9914_v0 = vld [vmem:[%s8926_s30 + $0x218] sm:$0xff]  ;;  %v1848_v15 = vsel %vm1841_vm6, %v1831_v23, %v6782_v32  ;;  %v1849_v22 = vsel %vm1841_vm6, %v1832_v53, %v6783_v11  ;;  %15856 = vst [vmem:[#allocation50_spill] sm:$0xff] %v9925_v17  ;;  %v15857_v23 = vld [vmem:[#allocation14_spill] sm:$0xff]  ;;  %v15861_v51 = vld [vmem:[#allocation21_spill] sm:$0xff] }
 0x1e9   : >> { %15855 = vst [vmem:[#allocation12_spill] sm:$0xff] %v9914_v0  ;;  %v1846_v44 = vsel %vm1841_vm6, %v1829_v7, %v6777_v56  ;;  %v9922_v50 = vsel %vm15603_vm7, %v9899_v48, %v9874_v62  ;;  %v1847_v34 = vsel %vm1841_vm6, %v1830_v9, %v6778_v14  ;;  %v6793_v43 = vunpack.i.h.bf16 %v9595_v47  ;;  %15858 = vst [vmem:[#allocation14_spill] sm:$0xff] %v9938_v41 }
 0x1ea   : >> { %v9908_v35 = vpop.permute.xlu0 %7005  ;;  %2073 = vrot.lane.b32.xlu1 %v15854_v33, %s7978_s6  ;;  %v6792_v4 = vunpack.i.l.bf16 %v9595_v47  ;;  %v9935_v7 = vrot.slane %v9902_v20, 7  ;;  %15859 = vst [vmem:[#allocation51_spill] sm:$0xff] %v9941_v38  ;;  %v6803_v11 = vunpack.i.h.bf16 %v9605_v29  ;;  %v6802_v9 = vunpack.i.l.bf16 %v9605_v29  ;;  %15862 = vst [vmem:[#allocation21_spill] sm:$0xff] %v9957_v45 }
 0x1eb   : >> { %15853 = vst [vmem:[#allocation16_spill] sm:$0xff] %v9908_v35  ;;  %v6798_v32 = vunpack.i.h.bf16 %v9607_v46  ;;  %v9947_v47 = vrot.slane %v9914_v0, 7  ;;  %v6797_v56 = vunpack.i.l.bf16 %v9607_v46  ;;  %v6813_v14 = vunpack.i.h.bf16 %v9611_v6 }
 0x1ec   : >> { %2071 = vrot.lane.b32.xlu0 %v15857_v23, %s7978_s6  ;;  %v9932_v53 = vpop.permute.xlu1 %7020  ;;  %v6812_v33 = vunpack.i.l.bf16 %v9611_v6  ;;  %v9960_v29 = vrot.slane %v9925_v17, 7  ;;  %v6823_v35 = vunpack.i.h.bf16 %v9619_v57  ;;  %v6822_v19 = vunpack.i.l.bf16 %v9619_v57 }
 0x1ed   : >> { %15860 = vst [vmem:[#allocation52_spill] sm:$0xff] %v9947_v47  ;;  %v9965_v46 = vrot.slane %v9938_v41, 7  ;;  %v9968_v6 = vrot.slane %v9941_v38, 7  ;;  %v1852_v20 = vsel %vm1841_vm6, %v1835_v25, %v6792_v4  ;;  %v6818_v17 = vunpack.i.h.bf16 %v9621_v1 }
 0x1ee   : >> { %v9952_v23 = vpop.permute.xlu0 %7015  ;;  %2077 = vrot.lane.b32.xlu1 %v15861_v51, %s7978_s6  ;;  %15863 = vst [vmem:[#allocation53_spill] sm:$0xff] %v9960_v29  ;;  %v1853_v51 = vsel %vm1841_vm6, %v1836_v21, %v6793_v43  ;;  %v6817_v0 = vunpack.i.l.bf16 %v9621_v1  ;;  %v1856_v41 = vsel %vm1841_vm6, %v1839_v37, %v6802_v9  ;;  %v1857_v38 = vsel %vm1841_vm6, %v1840_v60, %v6803_v11  ;;  %v15869_v60 = vld [vmem:[#allocation18_spill] sm:$0xff]  ;;  %v9997_v11 = vld [vmem:[%s8926_s30 + $0x258] sm:$0xff]  ;;  %v10000_v9 = vld [vmem:[%s8926_s30 + $0x260] sm:$0xff] }
 0x1ef   : >> { %15864 = vst [vmem:[#allocation54_spill] sm:$0xff] %v9965_v46  ;;  %15865 = vst [vmem:[#allocation55_spill] sm:$0xff] %v9968_v6  ;;  %v9983_v25 = vsel %vm15603_vm7, %v9935_v7, %v9947_v47  ;;  %v9986_v21 = vrot.slane %v9957_v45, 7  ;;  %v1854_v43 = vsel %vm1841_vm6, %v1837_v10, %v6797_v56  ;;  %v1855_v1 = vsel %vm1841_vm6, %v1838_v49, %v6798_v32  ;;  %v15874_v56 = vld [vmem:[#allocation26_spill] sm:$0xff] }
 0x1f0   : >> { %2075 = vrot.lane.b32.xlu0 %v15866_v52, %s7978_s6  ;;  %v9976_v57 = vpop.permute.xlu1 %7030  ;;  %v1861_v52 = vsel %vm1858_vm8, %v1844_v40, %v6812_v33  ;;  %v1862_v4 = vsel %vm1858_vm8, %v1845_v2, %v6813_v14  ;;  %15870 = vst [vmem:[#allocation18_spill] sm:$0xff] %v9997_v11  ;;  %15871 = vst [vmem:[#allocation57_spill] sm:$0xff] %v10000_v9  ;;  %v1865_v45 = vsel %vm1858_vm8, %v1848_v15, %v6822_v19  ;;  %v10024_v33 = vld [vmem:[%s8926_s30 + $0x270] sm:$0xff] }
 0x1f1   : >> { %15867 = vst [vmem:[#allocation20_spill] sm:$0xff] %v9986_v21  ;;  %v1866_v10 = vsel %vm1858_vm8, %v1849_v22, %v6823_v35  ;;  %v10007_v49 = vsel %vm15603_vm7, %v9986_v21, %v9960_v29  ;;  %v10012_v40 = vsel %vm15603_vm7, %v9965_v46, %v9968_v6  ;;  %v1863_v2 = vsel %vm1858_vm8, %v1846_v44, %v6817_v0  ;;  %v15875_v35 = vld [vmem:[#allocation13_spill] sm:$0xff] }
 0x1f2   : >> { %v9992_v37 = vpop.permute.xlu0 %7025  ;;  %2081 = vrot.lane.b32.xlu1 %v15869_v60, %s7978_s6  ;;  %15872 = vst [vmem:[#allocation58_spill] sm:$0xff] %v10007_v49  ;;  %15873 = vst [vmem:[#allocation59_spill] sm:$0xff] %v10012_v40  ;;  %v1864_v32 = vsel %vm1858_vm8, %v1847_v34, %v6818_v17  ;;  %v6833_v14 = vunpack.i.h.bf16 %v15874_v56  ;;  %v6832_v19 = vunpack.i.l.bf16 %v15874_v56  ;;  %v15876_v15 = vrot.slane %v15875_v35, 1  ;;  %v10027_v60 = vld [vmem:[%s8926_s30 + $0x278] sm:$0xff]  ;;  %v15882_v34 = vld [vmem:[#allocation30_spill] sm:$0xff] }
 0x1f3   : >> { %15868 = vst [vmem:[#allocation56_spill] sm:$0xff] %v9992_v37  ;;  %15877 = vst [vmem:[#allocation26_spill] sm:$0xff] %v10024_v33  ;;  %v15879_v37 = vld [vmem:[#allocation28_spill] sm:$0xff]  ;;  %v10032_v44 = vrot.slane %v9997_v11, 7  ;;  %v10035_v17 = vrot.slane %v10000_v9, 7  ;;  %v6838_v56 = vunpack.i.h.bf16 %v15882_v34  ;;  %v6837_v35 = vunpack.i.l.bf16 %v15882_v34  ;;  %v15884_v40 = vld [vmem:[#allocation10_spill] sm:$0xff] }
 0x1f4   : >> { %2079 = vrot.lane.b32.xlu0 %v15876_v15, %s7978_s6  ;;  %v10021_v22 = vpop.permute.xlu1 %7040  ;;  %15878 = vst [vmem:[#allocation13_spill] sm:$0xff] %v10027_v60  ;;  %v6843_v27 = vunpack.i.h.bf16 %v15879_v37  ;;  %v6842_v0 = vunpack.i.l.bf16 %v15879_v37  ;;  %v6853_v15 = vunpack.i.h.bf16 %v9643_v61  ;;  %v6852_v6 = vunpack.i.l.bf16 %v9643_v61 }
 0x1f5   : >> { %15880 = vst [vmem:[#allocation28_spill] sm:$0xff] %v10032_v44  ;;  %15881 = vst [vmem:[#allocation60_spill] sm:$0xff] %v10035_v17  ;;  %v15885_v49 = vrot.slane %v15884_v40, 1  ;;  %v6863_v37 = vunpack.i.h.bf16 %v9657_v5  ;;  %v6862_v11 = vunpack.i.l.bf16 %v9657_v5  ;;  %v10049_v9 = vrot.slane %v10024_v33, 7 }
 0x1f6   : >> { %v10041_v46 = vpop.permute.xlu0 %7035  ;;  %v10052_v34 = vrot.slane %v10027_v60, 7  ;;  %v1869_v29 = vsel %vm1858_vm8, %v1852_v20, %v6832_v19  ;;  %v1870_v61 = vsel %vm1858_vm8, %v1853_v51, %v6833_v14  ;;  %v6858_v47 = vunpack.i.h.bf16 %v9659_v63  ;;  %v15890_v19 = vld [vmem:[#allocation32_spill] sm:$0xff] }
 0x1f7   : >> { %15883 = vst [vmem:[#allocation30_spill] sm:$0xff] %v10041_v46  ;;  %2085 = vrot.lane.b32.xlu1 %v15885_v49, %s7978_s6  ;;  %v6857_v40 = vunpack.i.l.bf16 %v9659_v63  ;;  %v15887_v49 = vld [vmem:[#allocation19_spill] sm:$0xff]  ;;  %v1873_v5 = vsel %vm1858_vm8, %v1856_v41, %v6842_v0  ;;  %v1874_v33 = vsel %vm1858_vm8, %v1857_v38, %v6843_v27  ;;  %v6873_v60 = vunpack.i.h.bf16 %v9665_v59 }
 0x1f8   : >> { %15886 = vst [vmem:[#allocation10_spill] sm:$0xff] %v10052_v34  ;;  %2083 = vrot.lane.b32.xlu0 %v15887_v49, %s7978_s6  ;;  %v10060_v46 = vpop.permute.xlu1 %7050  ;;  %v6872_v21 = vunpack.i.l.bf16 %v9665_v59  ;;  %v1871_v20 = vsel %vm1858_vm8, %v1854_v43, %v6837_v35  ;;  %v1872_v51 = vsel %vm1858_vm8, %v1855_v1, %v6838_v56  ;;  %v1878_v14 = vsel %vm1875_vm9, %v1861_v52, %v6852_v6  ;;  %v15892_v35 = vld [vmem:[#allocation36_spill] sm:$0xff]  ;;  %v15894_v49 = vld [vmem:[#allocation29_spill] sm:$0xff] }
 0x1f9   : >> { %v10076_v41 = vsel %vm15603_vm7, %v10032_v44, %v10035_v17  ;;  %v1879_v27 = vsel %vm1875_vm9, %v1862_v4, %v6853_v15  ;;  %v1882_v59 = vsel %vm1875_vm9, %v1865_v45, %v6862_v11  ;;  %v1883_v38 = vsel %vm1875_vm9, %v1866_v10, %v6863_v37 }
 0x1fa   : >> { %v10069_v63 = vpop.permute.xlu0 %7045  ;;  %15889 = vst [vmem:[#allocation61_spill] sm:$0xff] %v10076_v41  ;;  %v10084_v6 = vsel %vm15603_vm7, %v10049_v9, %v10052_v34  ;;  %v1880_v43 = vsel %vm1875_vm9, %v1863_v2, %v6857_v40  ;;  %v6883_v1 = vunpack.i.h.bf16 %v9670_v8  ;;  %v6882_v52 = vunpack.i.l.bf16 %v9670_v8  ;;  %v15896_v34 = vld [vmem:[#allocation39_spill] sm:$0xff] }
 0x1fb   : >> { %15888 = vst [vmem:[#allocation19_spill] sm:$0xff] %v10069_v63  ;;  %2089 = vrot.lane.b32.xlu1 %v9654_v39, %s7978_s6  ;;  %v1881_v39 = vsel %vm1875_vm9, %v1864_v32, %v6858_v47  ;;  %v1886_v45 = vsel %vm1875_vm9, %v1869_v29, %v6872_v21  ;;  %v1887_v11 = vsel %vm1875_vm9, %v1870_v61, %v6873_v60  ;;  %v6878_v10 = vunpack.i.h.bf16 %v9672_v42  ;;  %v15891_v29 = vld [vmem:[#allocation35_spill] sm:$0xff]  ;;  %v15893_v61 = vld [vmem:[#allocation38_spill] sm:$0xff] }
 0x1fc   : >> { %2087 = vrot.lane.b32.xlu0 %v15890_v19, %s7978_s6  ;;  %v10092_v4 = vpop.permute.xlu1 %7060  ;;  %v6877_v0 = vunpack.i.l.bf16 %v9672_v42  ;;  %v6893_v47 = vunpack.i.h.bf16 %v9677_v12  ;;  %v6892_v2 = vunpack.i.l.bf16 %v9677_v12  ;;  %v6903_v8 = vunpack.i.h.bf16 %v9685_v28 }
 0x1fd   : >> { %v6902_v32 = vunpack.i.l.bf16 %v9685_v28  ;;  %v6898_v21 = vunpack.i.h.bf16 %v15891_v29  ;;  %v6897_v60 = vunpack.i.l.bf16 %v15891_v29  ;;  %v6913_v42 = vunpack.i.h.bf16 %v15892_v35 }
 0x1fe   : >> { %v10102_v56 = vpop.permute.xlu0 %7055  ;;  %v6912_v15 = vunpack.i.l.bf16 %v15892_v35  ;;  %v1890_v37 = vsel %vm1875_vm9, %v1873_v5, %v6882_v52  ;;  %v1891_v12 = vsel %vm1875_vm9, %v1874_v33, %v6883_v1  ;;  %v6923_v40 = vunpack.i.h.bf16 %v15893_v61 }
 0x1ff   : >> { %2093 = vrot.lane.b32.xlu1 %v9843_v31, %s7978_s6  ;;  %v6922_v28 = vunpack.i.l.bf16 %v15893_v61  ;;  %v15895_v19 = vrot.slane %v15894_v49, 1  ;;  %v1888_v29 = vsel %vm1875_vm9, %v1871_v20, %v6877_v0  ;;  %v1889_v63 = vsel %vm1875_vm9, %v1872_v51, %v6878_v10  ;;  %v15898_v0 = vld [vmem:[#allocation40_spill] sm:$0xff] }
 0x200   : >> { %v10117_v31 = vpop.permute.xlu1 %7070  ;;  %v6918_v35 = vunpack.i.h.bf16 %v15896_v34  ;;  %v6917_v5 = vunpack.i.l.bf16 %v15896_v34  ;;  %v1895_v33 = vsel %vm1892_vm10, %v1878_v14, %v6892_v2  ;;  %v1896_v1 = vsel %vm1892_vm10, %v1879_v27, %v6893_v47 }
 0x201   : >> { %2091 = vrot.lane.b32.xlu0 %v15895_v19, %s7978_s6  ;;  %v1899_v52 = vsel %vm1892_vm10, %v1882_v59, %v6902_v32  ;;  %v1900_v61 = vsel %vm1892_vm10, %v1883_v38, %v6903_v8  ;;  %v15897_v20 = vrot.slane %v9823_v24, 1  ;;  %v1897_v51 = vsel %vm1892_vm10, %v1880_v43, %v6897_v60  ;;  %v15900_v8 = vld [vmem:[#allocation43_spill] sm:$0xff]  ;;  %v15901_v60 = vld [vmem:[#allocation44_spill] sm:$0xff] }
 0x202   : >> { %v10127_v49 = vpop.permute.xlu0 %7065  ;;  %v1898_v10 = vsel %vm1892_vm10, %v1881_v39, %v6898_v21  ;;  %v1903_v34 = vsel %vm1892_vm10, %v1886_v45, %v6912_v15  ;;  %v1904_v14 = vsel %vm1892_vm10, %v1887_v11, %v6913_v42  ;;  %v1907_v27 = vsel %vm1892_vm10, %v1890_v37, %v6922_v28  ;;  %v15899_v45 = vld [vmem:[#allocation42_spill] sm:$0xff] }
 0x203   : >> { %2097 = vrot.lane.b32.xlu1 %v15897_v20, %s7978_s6  ;;  %v1908_v59 = vsel %vm1892_vm10, %v1891_v12, %v6923_v40  ;;  %v6933_v38 = vunpack.i.h.bf16 %v15898_v0  ;;  %v6932_v47 = vunpack.i.l.bf16 %v15898_v0  ;;  %v1905_v43 = vsel %vm1892_vm10, %v1888_v29, %v6917_v5  ;;  %v15903_v40 = vld [vmem:[#allocation47_spill] sm:$0xff]  ;;  %v15904_v5 = vld [vmem:[#allocation48_spill] sm:$0xff] }
 0x204   : >> { %v10142_v24 = vpop.permute.xlu1 %7080  ;;  %v1906_v39 = vsel %vm1892_vm10, %v1889_v63, %v6918_v35  ;;  %v6943_v2 = vunpack.i.h.bf16 %v15899_v45  ;;  %v6942_v11 = vunpack.i.l.bf16 %v15899_v45  ;;  %v6938_v32 = vunpack.i.h.bf16 %v15900_v8 }
 0x205   : >> { %2095 = vrot.lane.b32.xlu0 %v9887_v13, %s7978_s6  ;;  %v6937_v21 = vunpack.i.l.bf16 %v15900_v8  ;;  %v6953_v42 = vunpack.i.h.bf16 %v15901_v60  ;;  %v6952_v15 = vunpack.i.l.bf16 %v15901_v60  ;;  %v15902_v13 = vld [vmem:[#allocation46_spill] sm:$0xff]  ;;  %v6958_v28 = vunpack.i.h.bf16 %v15903_v40 }
 0x206   : >> { %v10152_v37 = vpop.permute.xlu0 %7075  ;;  %v6963_v12 = vunpack.i.h.bf16 %v15902_v13  ;;  %v6962_v63 = vunpack.i.l.bf16 %v15902_v13  ;;  %v6957_v19 = vunpack.i.l.bf16 %v15903_v40  ;;  %v1912_v29 = vsel %vm1909_vm11, %v1895_v33, %v6932_v47 }
 0x207   : >> { %2166 = vrot.lane.b32.xlu1 %v9896_v26, %s7979_s7  ;;  %v1913_v35 = vsel %vm1909_vm11, %v1896_v1, %v6933_v38  ;;  %v6973_v20 = vunpack.i.h.bf16 %v15904_v5  ;;  %v6972_v0 = vunpack.i.l.bf16 %v15904_v5  ;;  %v15905_v26 = vrot.slane %v9834_v58, 7 }
 0x208   : >> { %v10167_v45 = vpop.permute.xlu1 %7090  ;;  %v1916_v8 = vsel %vm1909_vm11, %v1899_v52, %v6942_v11  ;;  %v1917_v60 = vsel %vm1909_vm11, %v1900_v61, %v6943_v2  ;;  %v6983_v13 = vunpack.i.h.bf16 %v9791_v55  ;;  %v6982_v33 = vunpack.i.l.bf16 %v9791_v55 }
 0x209   : >> { %2164 = vrot.lane.b32.xlu0 %v15905_v26, %s7979_s7  ;;  %v1914_v1 = vsel %vm1909_vm11, %v1897_v51, %v6937_v21  ;;  %v1915_v38 = vsel %vm1909_vm11, %v1898_v10, %v6938_v32  ;;  %v1920_v47 = vsel %vm1909_vm11, %v1903_v34, %v6952_v15  ;;  %v1921_v40 = vsel %vm1909_vm11, %v1904_v14, %v6953_v42 }
 0x20a   : >> { %v10177_v5 = vpop.permute.xlu0 %7085  ;;  %v1924_v52 = vsel %vm1909_vm11, %v1907_v27, %v6962_v63  ;;  %v1925_v61 = vsel %vm1909_vm11, %v1908_v59, %v6963_v12  ;;  %v1922_v2 = vsel %vm1909_vm11, %v1905_v43, %v6957_v19  ;;  %v1923_v55 = vsel %vm1909_vm11, %v1906_v39, %v6958_v28 }
 0x20b   : >> { %2170 = vrot.lane.b32.xlu1 %v9899_v48, %s7979_s7  ;;  %v1929_v51 = vsel %vm15786_vm12, %v1912_v29, %v6972_v0  ;;  %v1930_v10 = vsel %vm15786_vm12, %v1913_v35, %v6973_v20  ;;  %v6978_v34 = vunpack.i.h.bf16 %v9801_v36  ;;  %v6977_v14 = vunpack.i.l.bf16 %v9801_v36 }
 0x20c   : >> { %v15906_v11 = vrot.slane %v9837_v16, 7  ;;  %v10192_v32 = vpop.permute.xlu1 %7100  ;;  %v1933_v27 = vsel %vm15786_vm12, %v1916_v8, %v6982_v33  ;;  %v1934_v59 = vsel %vm15786_vm12, %v1917_v60, %v6983_v13  ;;  %v6993_v43 = vunpack.i.h.bf16 %v9816_v3 }
 0x20d   : >> { %v6992_v39 = vunpack.i.l.bf16 %v9816_v3  ;;  %v7003_v21 = vunpack.i.h.bf16 %v9850_v54  ;;  %v7002_v42 = vunpack.i.l.bf16 %v9850_v54  ;;  %v6998_v36 = vunpack.i.h.bf16 %v9863_v30 }
 0x20e   : >> { %2168 = vrot.lane.b32.xlu0 %v15906_v11, %s7979_s7  ;;  %v6997_v15 = vunpack.i.l.bf16 %v9863_v30  ;;  %v10202_v12 = vpop.permute.xlu0 %7095  ;;  %v7013_v63 = vunpack.i.h.bf16 %v9882_v18  ;;  %v7012_v28 = vunpack.i.l.bf16 %v9882_v18  ;;  %v7023_v3 = vunpack.i.h.bf16 %v9932_v53 }
 0x20f   : >> { %2174 = vrot.lane.b32.xlu1 %v9874_v62, %s7979_s7  ;;  %v7022_v19 = vunpack.i.l.bf16 %v9932_v53  ;;  %v1931_v54 = vsel %vm15786_vm12, %v1914_v1, %v6977_v14  ;;  %v1932_v29 = vsel %vm15786_vm12, %v1915_v38, %v6978_v34  ;;  %v7018_v30 = vunpack.i.h.bf16 %v9952_v23 }
 0x210   : >> { %v7017_v35 = vunpack.i.l.bf16 %v9952_v23  ;;  %v10216_v20 = vpop.permute.xlu1 %7110  ;;  %v1937_v18 = vsel %vm15786_vm12, %v1920_v47, %v6992_v39  ;;  %v1938_v0 = vsel %vm15786_vm12, %v1921_v40, %v6993_v43  ;;  %v7033_v53 = vunpack.i.h.bf16 %v9976_v57  ;;  %v15907_v39 = vld [vmem:[#allocation20_spill] sm:$0xff] }
 0x211   : >> { %v7032_v26 = vunpack.i.l.bf16 %v9976_v57  ;;  %v10223_v8 = vsel %vm15786_vm12, %v1924_v52, %v7002_v42  ;;  %v10226_v60 = vsel %vm15786_vm12, %v1925_v61, %v7003_v21  ;;  %v10229_v23 = vsel %vm15786_vm12, %v1922_v2, %v6997_v15  ;;  %v15908_v21 = vld [vmem:[#allocation30_spill] sm:$0xff] }
 0x212   : >> { %2172 = vrot.lane.b32.xlu0 %v9922_v50, %s7979_s7  ;;  %v10232_v13 = vsel %vm15786_vm12, %v1923_v55, %v6998_v36  ;;  %v10234_v33 = vpop.permute.xlu0 %7105  ;;  %v1946_v1 = vsel %vm1943_vm13, %v1929_v51, %v7012_v28  ;;  %v1947_v57 = vsel %vm1943_vm13, %v1930_v10, %v7013_v63  ;;  %v1950_v38 = vsel %vm1943_vm13, %v1933_v27, %v7022_v19  ;;  %v15909_v19 = vld [vmem:[#allocation52_spill] sm:$0xff] }
 0x213   : >> { %2178 = vrot.lane.b32.xlu1 %v9983_v25, %s7979_s7  ;;  %v1951_v47 = vsel %vm1943_vm13, %v1934_v59, %v7023_v3  ;;  %v1948_v40 = vsel %vm1943_vm13, %v1931_v54, %v7017_v35  ;;  %v1949_v52 = vsel %vm1943_vm13, %v1932_v29, %v7018_v30  ;;  %v7053_v61 = vunpack.i.h.bf16 %v10060_v46 }
 0x214   : >> { %v7052_v2 = vunpack.i.l.bf16 %v10060_v46  ;;  %v10248_v55 = vpop.permute.xlu1 %7120  ;;  %v1954_v51 = vsel %vm1943_vm13, %v1937_v18, %v7032_v26  ;;  %v1955_v10 = vsel %vm1943_vm13, %v1938_v0, %v7033_v53  ;;  %v7063_v34 = vunpack.i.h.bf16 %v10092_v4 }
 0x215   : >> { %v7062_v14 = vunpack.i.l.bf16 %v10092_v4  ;;  %v7043_v11 = vunpack.i.h.bf16 %v10021_v22  ;;  %v7042_v27 = vunpack.i.l.bf16 %v10021_v22  ;;  %v7093_v59 = vunpack.i.h.bf16 %v10167_v45 }
 0x216   : >> { %2176 = vrot.lane.b32.xlu0 %v9935_v7, %s7979_s7  ;;  %v7092_v46 = vunpack.i.l.bf16 %v10167_v45  ;;  %v10258_v43 = vpop.permute.xlu0 %7115  ;;  %v7038_v42 = vunpack.i.h.bf16 %v15908_v21  ;;  %v7037_v36 = vunpack.i.l.bf16 %v15908_v21  ;;  %v7058_v15 = vunpack.i.h.bf16 %v10102_v56 }
 0x217   : >> { %2182 = vrot.lane.b32.xlu1 %v15907_v39, %s7979_s7  ;;  %v7057_v4 = vunpack.i.l.bf16 %v10102_v56  ;;  %v1963_v63 = vsel %vm1960_vm14, %v1946_v1, %v7052_v2  ;;  %v1964_v28 = vsel %vm1960_vm14, %v1947_v57, %v7053_v61  ;;  %v7073_v3 = vunpack.i.h.bf16 %v10117_v31 }
 0x218   : >> { %v7072_v45 = vunpack.i.l.bf16 %v10117_v31  ;;  %v7131_v54 = vpop.permute.xlu1 %7130  ;;  %v1967_v29 = vsel %vm1960_vm14, %v1950_v38, %v7062_v14  ;;  %v1968_v30 = vsel %vm1960_vm14, %v1951_v47, %v7063_v34  ;;  %v1980_v56 = vsel %vm15635_vm15, %v1963_v63, %v7092_v46  ;;  %v15910_v31 = vld [vmem:[#allocation53_spill] sm:$0xff] }
 0x219   : >> { %v7133_v35 = vunpack.i.h.bf16 %v7131_v54  ;;  %v7132_v18 = vunpack.i.l.bf16 %v7131_v54  ;;  %v1981_v0 = vsel %vm15635_vm15, %v1964_v28, %v7093_v59  ;;  %v7103_v53 = vunpack.i.h.bf16 %v10192_v32  ;;  %v15911_v59 = vld [vmem:[#allocation58_spill] sm:$0xff] }
 0x21a   : >> { %2180 = vrot.lane.b32.xlu0 %v15909_v19, %s7979_s7  ;;  %v7102_v26 = vunpack.i.l.bf16 %v10192_v32  ;;  %v10278_v1 = vpop.permute.xlu0 %7125  ;;  %v1965_v57 = vsel %vm1960_vm14, %v1948_v40, %v7057_v4  ;;  %v1966_v38 = vsel %vm1960_vm14, %v1949_v52, %v7058_v15  ;;  %v1971_v2 = vsel %vm1960_vm14, %v1954_v51, %v7072_v45 }
 0x21b   : >> { %2186 = vrot.lane.b32.xlu1 %v15910_v31, %s7979_s7  ;;  %v10285_v47 = vsel %vm15634_vm1, %v1980_v56, %v7132_v18  ;;  %v10288_v61 = vsel %vm15634_vm1, %v1981_v0, %v7133_v35  ;;  %v1972_v34 = vsel %vm1960_vm14, %v1955_v10, %v7073_v3  ;;  %v7098_v32 = vunpack.i.h.bf16 %v10202_v12  ;;  %v15913_v56 = vld [vmem:[#allocation54_spill] sm:$0xff] }
 0x21c   : >> { %v7097_v14 = vunpack.i.l.bf16 %v10202_v12  ;;  %v7141_v40 = vpop.permute.xlu1 %7140  ;;  %v7083_v52 = vunpack.i.h.bf16 %v10142_v24  ;;  %v7082_v46 = vunpack.i.l.bf16 %v10142_v24  ;;  %v1984_v63 = vsel %vm15635_vm15, %v1967_v29, %v7102_v26  ;;  %v15912_v12 = vld [vmem:[#allocation59_spill] sm:$0xff] }
 0x21d   : >> { %v7143_v15 = vunpack.i.h.bf16 %v7141_v40  ;;  %v7142_v4 = vunpack.i.l.bf16 %v7141_v40  ;;  %v1985_v51 = vsel %vm15635_vm15, %v1968_v30, %v7103_v53  ;;  %v7113_v10 = vunpack.i.h.bf16 %v10216_v20 }
 0x21e   : >> { %2184 = vrot.lane.b32.xlu0 %v15911_v59, %s7979_s7  ;;  %v7112_v28 = vunpack.i.l.bf16 %v10216_v20  ;;  %v7136_v3 = vpop.permute.xlu0 %7135  ;;  %v7078_v29 = vunpack.i.h.bf16 %v10152_v37  ;;  %v7077_v30 = vunpack.i.l.bf16 %v10152_v37  ;;  %v1982_v18 = vsel %vm15635_vm15, %v1965_v57, %v7097_v14 }
 0x21f   : >> { %2190 = vrot.lane.b32.xlu1 %v15912_v12, %s7979_s7  ;;  %v7138_v45 = vunpack.i.h.bf16 %v7136_v3  ;;  %v7137_v54 = vunpack.i.l.bf16 %v7136_v3  ;;  %v10305_v35 = vsel %vm15634_vm1, %v1984_v63, %v7142_v4  ;;  %v10308_v24 = vsel %vm15634_vm1, %v1985_v51, %v7143_v15 }
 0x220   : >> { %v1983_v20 = vsel %vm15635_vm15, %v1966_v38, %v7098_v32  ;;  %v7151_v0 = vpop.permute.xlu1 %7150  ;;  %v1988_v4 = vsel %vm15635_vm15, %v1971_v2, %v7112_v28  ;;  %v1989_v37 = vsel %vm15635_vm15, %v1972_v34, %v7113_v10  ;;  %v7123_v57 = vunpack.i.h.bf16 %v10248_v55 }
 0x221   : >> { %v7153_v53 = vunpack.i.h.bf16 %v7151_v0  ;;  %v7152_v26 = vunpack.i.l.bf16 %v7151_v0  ;;  %v10317_v40 = vsel %vm15634_vm1, %v1982_v18, %v7137_v54  ;;  %v10320_v15 = vsel %vm15634_vm1, %v1983_v20, %v7138_v45 }
 0x222   : >> { %2188 = vrot.lane.b32.xlu0 %v15913_v56, %s7979_s7  ;;  %v7122_v38 = vunpack.i.l.bf16 %v10248_v55  ;;  %v10326_v32 = vpop.permute.xlu0 %7145  ;;  %v1958_v14 = vsel %vm1943_vm13, %v10223_v8, %v7042_v27  ;;  %v1959_v2 = vsel %vm1943_vm13, %v10226_v60, %v7043_v11  ;;  %v1956_v55 = vsel %vm1943_vm13, %v10229_v23, %v7037_v36  ;;  %v15915_v60 = vld [vmem:[#allocation55_spill] sm:$0xff] }
 0x223   : >> { %15914 = vst [vmem:[#allocation32_spill] sm:$0xff] %v10326_v32  ;;  %2194 = vrot.lane.b32.xlu1 %v10032_v44, %s7979_s7  ;;  %v2005_v34 = vsel %vm15634_vm1, %v1988_v4, %v7152_v26  ;;  %v2006_v63 = vsel %vm15634_vm1, %v1989_v37, %v7153_v53  ;;  %v1957_v51 = vsel %vm1943_vm13, %v10232_v13, %v7038_v42  ;;  %v7118_v8 = vunpack.i.h.bf16 %v10258_v43  ;;  %v10370_v53 = vld [vmem:[%s8926_s30 + $0x290] sm:$0xff]  ;;  %v16040_v32 = vld [vmem:[#allocation24_spill] sm:$0xff] }
 0x224   : >> { %v7117_v22 = vunpack.i.l.bf16 %v10258_v43  ;;  %v7161_v11 = vpop.permute.xlu1 %7160  ;;  %v1975_v27 = vsel %vm1960_vm14, %v1958_v14, %v7082_v46  ;;  %v1976_v10 = vsel %vm1960_vm14, %v1959_v2, %v7083_v52  ;;  %v1973_v21 = vsel %vm1960_vm14, %v1956_v55, %v7077_v30  ;;  %v10361_v46 = vld [vmem:[%s8926_s30 + $0x288] sm:$0xff] }
 0x225   : >> { %v7163_v28 = vunpack.i.h.bf16 %v7161_v11  ;;  %v7162_v23 = vunpack.i.l.bf16 %v7161_v11  ;;  %v1974_v36 = vsel %vm1960_vm14, %v1957_v51, %v7078_v29  ;;  %v1992_v13 = vsel %vm15635_vm15, %v1975_v27, %v7122_v38 }
 0x226   : >> { %2192 = vrot.lane.b32.xlu0 %v15915_v60, %s7979_s7  ;;  %v1993_v42 = vsel %vm15635_vm15, %v1976_v10, %v7123_v57  ;;  %v7156_v43 = vpop.permute.xlu0 %7155  ;;  %v1990_v30 = vsel %vm15635_vm15, %v1973_v21, %v7117_v22  ;;  %v1991_v29 = vsel %vm15635_vm15, %v1974_v36, %v7118_v8  ;;  %v10379_v57 = vrot.slane %v10361_v46, 7  ;;  %v15917_v10 = vld [vmem:[#allocation10_spill] sm:$0xff] }
 0x227   : >> { %2198 = vrot.lane.b32.xlu1 %v10035_v17, %s7979_s7  ;;  %v7158_v3 = vunpack.i.h.bf16 %v7156_v43  ;;  %v7157_v45 = vunpack.i.l.bf16 %v7156_v43  ;;  %v2009_v52 = vsel %vm15634_vm1, %v1992_v13, %v7162_v23  ;;  %v2010_v54 = vsel %vm15634_vm1, %v1993_v42, %v7163_v28 }
 0x228   : >> { %v7171_v18 = vpop.permute.xlu1 %7170  ;;  %v10388_v55 = vrot.slane %v10370_v53, 7 }
 0x229   : >> { %v7173_v20 = vunpack.i.h.bf16 %v7171_v18  ;;  %v7172_v0 = vunpack.i.l.bf16 %v7171_v18  ;;  %v2007_v26 = vsel %vm15634_vm1, %v1990_v30, %v7157_v45  ;;  %v2008_v4 = vsel %vm15634_vm1, %v1991_v29, %v7158_v3 }
 0x22a   : >> { %2196 = vrot.lane.b32.xlu0 %v10076_v41, %s7979_s7  ;;  %v10374_v37 = vpop.permute.xlu0 %7165  ;;  %15916 = vst [vmem:[#allocation35_spill] sm:$0xff] %v10388_v55  ;;  %v10401_v23 = vsel %vm15603_vm7, %v10379_v57, %v10388_v55  ;;  %vm15631_vm7 = vcmask 982016  }
 0x22b   : >> { %2202 = vrot.lane.b32.xlu1 %v10084_v6, %s7979_s7  ;;  %v2014_v38 = vsel %vm15633_vm3, %v10285_v47, %v7172_v0  ;;  %v2015_v14 = vsel %vm15633_vm3, %v10288_v61, %v7173_v20 }
 0x22c   : >> { %v7181_v2 = vpop.permute.xlu1 %7180 }
 0x22d   : >> { %v7183_v51 = vunpack.i.h.bf16 %v7181_v2  ;;  %v7182_v8 = vunpack.i.l.bf16 %v7181_v2  ;;  %v10422_v2 = vld [vmem:[%s8926_s30 + $0x1f0] sm:$0x3] }
 0x22e   : >> { %2200 = vrot.lane.b32.xlu0 %v10049_v9, %s7979_s7  ;;  %v7176_v22 = vpop.permute.xlu0 %7175 }
 0x22f   : >> { %2206 = vrot.lane.b32.xlu1 %v10379_v57, %s7979_s7  ;;  %v7178_v11 = vunpack.i.h.bf16 %v7176_v22  ;;  %v7177_v27 = vunpack.i.l.bf16 %v7176_v22  ;;  %v2018_v47 = vsel %vm15633_vm3, %v10305_v35, %v7182_v8  ;;  %v2019_v61 = vsel %vm15633_vm3, %v10308_v24, %v7183_v51 }
 0x230   : >> { %v7191_v28 = vpop.permute.xlu1 %7190 }
 0x231   : >> { %v7193_v21 = vunpack.i.h.bf16 %v7191_v28  ;;  %v7192_v36 = vunpack.i.l.bf16 %v7191_v28  ;;  %v2016_v13 = vsel %vm15633_vm3, %v10317_v40, %v7177_v27  ;;  %v2017_v35 = vsel %vm15633_vm3, %v10320_v15, %v7178_v11  ;;  %v15920_v11 = vld [vmem:[#allocation15_spill] sm:$0xff] }
 0x232   : >> { %2204 = vrot.lane.b32.xlu0 %v15917_v10, %s7979_s7  ;;  %v10407_v42 = vpop.permute.xlu0 %7185 }
 0x233   : >> { %15918 = vst [vmem:[#allocation36_spill] sm:$0xff] %v10407_v42  ;;  %2210 = vrot.lane.b32.xlu1 %v10388_v55, %s7979_s7  ;;  %v2022_v24 = vsel %vm15633_vm3, %v2005_v34, %v7192_v36  ;;  %v2023_v43 = vsel %vm15633_vm3, %v2006_v63, %v7193_v21  ;;  %v7266_v42 = vld [vmem:[%s8926_s30] sm:$0xff] }
 0x234   : >> { %v7201_v3 = vpop.permute.xlu1 %7200 }
 0x235   : >> { %v7203_v45 = vunpack.i.h.bf16 %v7201_v3  ;;  %v7202_v30 = vunpack.i.l.bf16 %v7201_v3 }
 0x236   : >> { %2208 = vrot.lane.b32.xlu0 %v10401_v23, %s7979_s7  ;;  %v7196_v40 = vpop.permute.xlu0 %7195 }
 0x237   : >> { %2246 = vrot.lane.b32.xlu1 %v9837_v16, %s7980_s8  ;;  %v7198_v15 = vunpack.i.h.bf16 %v7196_v40  ;;  %v7197_v29 = vunpack.i.l.bf16 %v7196_v40  ;;  %v2026_v18 = vsel %vm15633_vm3, %v2009_v52, %v7202_v30  ;;  %v2027_v63 = vsel %vm15633_vm3, %v2010_v54, %v7203_v45  ;;  %v10431_v52 = vld [vmem:[%s8926_s30 + $0x208] sm:$0x3]  ;;  %v15925_v30 = vld [vmem:[#allocation11_spill] sm:$0xff] }
 0x238   : >> { %v7211_v34 = vpop.permute.xlu1 %7210 }
 0x239   : >> { %v7213_v20 = vunpack.i.h.bf16 %v7211_v34  ;;  %v7212_v0 = vunpack.i.l.bf16 %v7211_v34  ;;  %v2024_v51 = vsel %vm15633_vm3, %v2007_v26, %v7197_v29  ;;  %v2025_v8 = vsel %vm15633_vm3, %v2008_v4, %v7198_v15 }
 0x23a   : >> { %2244 = vrot.lane.b32.xlu0 %v9834_v58, %s7980_s8  ;;  %v10426_v22 = vpop.permute.xlu0 %7205 }
 0x23b   : >> { %15919 = vst [vmem:[#allocation38_spill] sm:$0xff] %v10426_v22  ;;  %2250 = vrot.lane.b32.xlu1 %v15920_v11, %s7980_s8  ;;  %v10434_v27 = vsel %vm15631_vm7, %v2014_v38, %v7212_v0  ;;  %v10439_v28 = vsel %vm15631_vm7, %v2015_v14, %v7213_v20 }
 0x23c   : >> { %15921 = vst [vmem:[#allocation29_spill] sm:$0xff] %v10434_v27  ;;  %v7221_v54 = vpop.permute.xlu1 %7220  ;;  %15922 = vst [vmem:[#allocation39_spill] sm:$0xff] %v10439_v28  ;;  %v15952_v28 = vld [vmem:[#allocation26_spill] sm:$0xff] }
 0x23d   : >> { %v7223_v26 = vunpack.i.h.bf16 %v7221_v54  ;;  %v7222_v21 = vunpack.i.l.bf16 %v7221_v54  ;;  %v15932_v54 = vld [vmem:[#allocation8_spill] sm:$0xff] }
 0x23e   : >> { %2248 = vrot.lane.b32.xlu0 %v10422_v2, %s7980_s8  ;;  %v7216_v4 = vpop.permute.xlu0 %7215 }
 0x23f   : >> { %2254 = vrot.lane.b32.xlu1 %v10431_v52, %s7980_s8  ;;  %v7218_v36 = vunpack.i.h.bf16 %v7216_v4  ;;  %v7217_v3 = vunpack.i.l.bf16 %v7216_v4  ;;  %v10444_v45 = vsel %vm15631_vm7, %v2018_v47, %v7222_v21  ;;  %v10447_v38 = vsel %vm15631_vm7, %v2019_v61, %v7223_v26  ;;  %v15929_v47 = vld [vmem:[#allocation12_spill] sm:$0xff] }
 0x240   : >> { %15923 = vst [vmem:[#allocation40_spill] sm:$0xff] %v10444_v45  ;;  %15924 = vst [vmem:[#allocation42_spill] sm:$0xff] %v10447_v38  ;;  %v7231_v14 = vpop.permute.xlu1 %7230  ;;  %v10470_v4 = vld [vmem:[%s8926_s30 + $0x220] sm:$0x3] }
 0x241   : >> { %v7233_v40 = vunpack.i.h.bf16 %v7231_v14  ;;  %v7232_v15 = vunpack.i.l.bf16 %v7231_v14  ;;  %v10452_v29 = vsel %vm15631_vm7, %v2016_v13, %v7217_v3  ;;  %v10455_v34 = vsel %vm15631_vm7, %v2017_v35, %v7218_v36  ;;  %v15933_v36 = vld [vmem:[#allocation21_spill] sm:$0xff] }
 0x242   : >> { %2252 = vrot.lane.b32.xlu0 %v15925_v30, %s7980_s8  ;;  %15926 = vst [vmem:[#allocation43_spill] sm:$0xff] %v10452_v29  ;;  %15927 = vst [vmem:[#allocation44_spill] sm:$0xff] %v10455_v34  ;;  %v10457_v20 = vpop.permute.xlu0 %7225  ;;  %v15948_v34 = vld [vmem:[#allocation57_spill] sm:$0xff] }
 0x243   : >> { %15928 = vst [vmem:[#allocation46_spill] sm:$0xff] %v10457_v20  ;;  %2258 = vrot.lane.b32.xlu1 %v15929_v47, %s7980_s8  ;;  %v10462_v61 = vsel %vm15631_vm7, %v2022_v24, %v7232_v15  ;;  %v10465_v0 = vsel %vm15631_vm7, %v2023_v43, %v7233_v40  ;;  %v10475_v24 = vld [vmem:[%s8926_s30 + $0x238] sm:$0x3] }
 0x244   : >> { %15930 = vst [vmem:[#allocation47_spill] sm:$0xff] %v10462_v61  ;;  %15931 = vst [vmem:[#allocation48_spill] sm:$0xff] %v10465_v0  ;;  %v7241_v26 = vpop.permute.xlu1 %7240  ;;  %v2322_v61 = vrot.slane %v15925_v30, 1 }
 0x245   : >> { %v7243_v13 = vunpack.i.h.bf16 %v7241_v26  ;;  %v7242_v21 = vunpack.i.l.bf16 %v7241_v26 }
 0x246   : >> { %2256 = vrot.lane.b32.xlu0 %v15932_v54, %s7980_s8  ;;  %v7236_v35 = vpop.permute.xlu0 %7235 }
 0x247   : >> { %2262 = vrot.lane.b32.xlu1 %v15933_v36, %s7980_s8  ;;  %v7238_v3 = vunpack.i.h.bf16 %v7236_v35  ;;  %v7237_v14 = vunpack.i.l.bf16 %v7236_v35  ;;  %v10478_v43 = vsel %vm15631_vm7, %v2026_v18, %v7242_v21  ;;  %v10481_v40 = vsel %vm15631_vm7, %v2027_v63, %v7243_v13  ;;  %v15938_v18 = vld [vmem:[#allocation50_spill] sm:$0xff]  ;;  %v15941_v21 = vld [vmem:[#allocation51_spill] sm:$0xff] }
 0x248   : >> { %15934 = vst [vmem:[#allocation20_spill] sm:$0xff] %v10478_v43  ;;  %15935 = vst [vmem:[#allocation30_spill] sm:$0xff] %v10481_v40  ;;  %v10485_v15 = vpop.permute.xlu1 %2053  ;;  %v15945_v40 = vld [vmem:[#allocation18_spill] sm:$0xff]  ;;  %v10515_v43 = vld [vmem:[%s8926_s30 + $0x268] sm:$0x3] }
 0x249   : >> { %v10488_v26 = vsel %vm15631_vm7, %v2024_v51, %v7237_v14  ;;  %v10491_v35 = vsel %vm15631_vm7, %v2025_v8, %v7238_v3  ;;  %v15942_v51 = vld [vmem:[#allocation14_spill] sm:$0xff] }
 0x24a   : >> { %2260 = vrot.lane.b32.xlu0 %v10470_v4, %s7980_s8  ;;  %15936 = vst [vmem:[#allocation52_spill] sm:$0xff] %v10488_v26  ;;  %15937 = vst [vmem:[#allocation58_spill] sm:$0xff] %v10491_v35  ;;  %v10493_v38 = vpop.permute.xlu0 %2051  ;;  %v6320_v3 = vld [vmem:[%s8926_s30 + $0x250] sm:$0x3] }
 0x24b   : >> { %2266 = vrot.lane.b32.xlu1 %v10475_v24, %s7980_s8 }
 0x24c   : >> { %v10499_v63 = vpop.permute.xlu1 %2057 }
 0x24d   : >> { %15939 = vst [vmem:[#allocation10_spill] sm:$0xff] %v10499_v63 }
 0x24e   : >> { %2264 = vrot.lane.b32.xlu0 %v15938_v18, %s7980_s8  ;;  %v10501_v13 = vpop.permute.xlu0 %2055 }
 0x24f   : >> { %15940 = vst [vmem:[#allocation15_spill] sm:$0xff] %v10501_v13  ;;  %2270 = vrot.lane.b32.xlu1 %v15941_v21, %s7980_s8 }
 0x250   : >> { %v10507_v8 = vpop.permute.xlu1 %2061 }
 0x251   : >> { %15943 = vst [vmem:[#allocation11_spill] sm:$0xff] %v10507_v8  ;;  %v2319_v8 = vrot.slane %v10422_v2, 1  ;;  %v2321_v2 = vrot.slane %v15920_v11, 1  ;;  %v10575_v11 = vrot.slane %v10431_v52, 1 }
 0x252   : >> { %2268 = vrot.lane.b32.xlu0 %v15942_v51, %s7980_s8  ;;  %v10510_v14 = vpop.permute.xlu0 %2059 }
 0x253   : >> { %15944 = vst [vmem:[#allocation12_spill] sm:$0xff] %v10510_v14  ;;  %2274 = vrot.lane.b32.xlu1 %v15945_v40, %s7980_s8  ;;  %v15951_v40 = vld [vmem:[#allocation13_spill] sm:$0xff] }
 0x254   : >> { %v10518_v45 = vpop.permute.xlu1 %2065 }
 0x255   : >> { %15946 = vst [vmem:[#allocation8_spill] sm:$0xff] %v10518_v45  ;;  %v10537_v45 = vld [vmem:[%s8926_s30 + $0x280] sm:$0x3] }
 0x256   : >> { %2272 = vrot.lane.b32.xlu0 %v6320_v3, %s7980_s8  ;;  %v10520_v35 = vpop.permute.xlu0 %2063 }
 0x257   : >> { %15947 = vst [vmem:[#allocation21_spill] sm:$0xff] %v10520_v35  ;;  %2278 = vrot.lane.b32.xlu1 %v10515_v43, %s7980_s8 }
 0x258   : >> { %v10526_v26 = vpop.permute.xlu1 %2069 }
 0x259   : >> { %15949 = vst [vmem:[#allocation50_spill] sm:$0xff] %v10526_v26  ;;  %v10545_v26 = vld [vmem:[%s8926_s30 + $0x298] sm:$0x3] }
 0x25a   : >> { %2276 = vrot.lane.b32.xlu0 %v15948_v34, %s7980_s8  ;;  %v10528_v29 = vpop.permute.xlu0 %2067 }
 0x25b   : >> { %15950 = vst [vmem:[#allocation51_spill] sm:$0xff] %v10528_v29  ;;  %2282 = vrot.lane.b32.xlu1 %v15951_v40, %s7980_s8  ;;  %v2317_v29 = vrot.slane %v9837_v16, 1 }
 0x25c   : >> { %v10534_v0 = vpop.permute.xlu1 %2073 }
 0x25d   : >> { %15953 = vst [vmem:[#allocation14_spill] sm:$0xff] %v10534_v0 }
 0x25e   : >> { %2280 = vrot.lane.b32.xlu0 %v15952_v28, %s7980_s8  ;;  %v10539_v35 = vpop.permute.xlu0 %2071  ;;  %v2316_v28 = vrot.slane %v9834_v58, 1  ;;  %v10569_v58 = vsel %vm844_vm2, %v2321_v2, %v2322_v61  ;;  %v2326_v2 = vrot.slane %v15932_v54, 1 }
 0x25f   : >> { %15954 = vst [vmem:[#allocation18_spill] sm:$0xff] %v10539_v35  ;;  %2286 = vrot.lane.b32.xlu1 %v10361_v46, %s7980_s8  ;;  %v2320_v35 = vsel %vm844_vm2, %v2317_v29, %v2319_v8 }
 0x260   : >> { %v10550_v40 = vpop.permute.xlu1 %2077  ;;  %v2318_v27 = vsel %vm844_vm2, %v2316_v28, %v2317_v29  ;;  %v10582_v29 = vrot.slane %v10470_v4, 1 }
 0x262   : >> { %2284 = vrot.lane.b32.xlu0 %v10537_v45, %s7980_s8  ;;  %v10553_v0 = vpop.permute.xlu0 %2075 }
 0x263   : >> { %2290 = vrot.lane.b32.xlu1 %v10545_v26, %s7980_s8 }
 0x264   : >> { %v10562_v16 = vpop.permute.xlu1 %2081 }
 0x265   : >> { %15955 = vst [vmem:[#allocation57_spill] sm:$0xff] %v10562_v16 }
 0x266   : >> { %2288 = vrot.lane.b32.xlu0 %v10370_v53, %s7980_s8  ;;  %v10565_v63 = vpop.permute.xlu0 %2079 }
 0x267   : >> { %15956 = vst [vmem:[#allocation13_spill] sm:$0xff] %v10565_v63  ;;  %2358 = vrot.lane.b32.xlu1 %v2320_v35, %s7981_s9  ;;  %v2327_v35 = vrot.slane %v15929_v47, 1  ;;  %v2331_v47 = vrot.slane %v15933_v36, 1 }
 0x269   : >> { %v10572_v14 = vpop.permute.xlu1 %2085  ;;  %v10599_v16 = vsel %vm844_vm2, %v2327_v35, %v10582_v29  ;;  %v10608_v54 = vsel %vm844_vm2, %v2326_v2, %v2327_v35  ;;  %v10628_v35 = vrot.slane %v6320_v3, 1  ;;  %v2337_v2 = vrot.slane %v15941_v21, 1 }
 0x26a   : >> { %2356 = vrot.lane.b32.xlu0 %v2318_v27, %s7981_s9  ;;  %15957 = vst [vmem:[#allocation26_spill] sm:$0xff] %v10572_v14  ;;  %v10577_v30 = vpop.permute.xlu0 %2083  ;;  %v10590_v27 = vsel %vm844_vm2, %v2322_v61, %v10575_v11  ;;  %v2336_v3 = vrot.slane %v15942_v51, 1  ;;  %v7993_v21 = vmov 0.0|0.0  }
 0x26b   : >> { %15958 = vst [vmem:[#allocation62_spill] sm:$0xff] %v10577_v30  ;;  %2362 = vrot.lane.b32.xlu1 %v10569_v58, %s7981_s9  ;;  %15967 = vst [vmem:[#allocation71_spill] sm:$0xff] %v10628_v35  ;;  %6451 = vmatprep.subr.bf16.mxu0 %v7993_v21  ;;  %v10654_v63 = vsel %vm844_vm2, %v2337_v2, %v10628_v35 }
 0x26c   : >> { %6529 = vmatprep.subr.bf16.mxu1 %v7993_v21  ;;  %15969 = vst [vmem:[#allocation73_spill] sm:$0xff] %v10654_v63 }
 0x26d   : >> { %v10586_v28 = vpop.permute.xlu1 %2089 }
 0x26e   : >> { %2360 = vrot.lane.b32.xlu0 %v2319_v8, %s7981_s9  ;;  %15959 = vst [vmem:[#allocation63_spill] sm:$0xff] %v10586_v28  ;;  %v10593_v14 = vpop.permute.xlu0 %2087  ;;  %v2332_v8 = vrot.slane %v15938_v18, 1  ;;  %v10622_v18 = vrot.slane %v10475_v24, 1 }
 0x26f   : >> { %15960 = vst [vmem:[#allocation64_spill] sm:$0xff] %v10593_v14  ;;  %2366 = vrot.lane.b32.xlu1 %v10575_v11, %s7981_s9 }
 0x270   : >> { %v10615_v14 = vsel %vm844_vm2, %v2331_v47, %v2332_v8  ;;  %15965 = vst [vmem:[#allocation69_spill] sm:$0xff] %v10622_v18 }
 0x271   : >> { %v10605_v61 = vpop.permute.xlu1 %2093  ;;  %15963 = vst [vmem:[#allocation67_spill] sm:$0xff] %v10615_v14 }
 0x272   : >> { %2364 = vrot.lane.b32.xlu0 %v10590_v27, %s7981_s9  ;;  %15961 = vst [vmem:[#allocation65_spill] sm:$0xff] %v10605_v61 }
 0x273   : >> { %v10610_v28 = vpop.permute.xlu0 %2091  ;;  %2370 = vrot.lane.b32.xlu1 %v10599_v16, %s7981_s9 }
 0x274   : >> { %15962 = vst [vmem:[#allocation66_spill] sm:$0xff] %v10610_v28  ;;  %v10643_v28 = vsel %vm844_vm2, %v2332_v8, %v10622_v18  ;;  %v3188_v8 = vld [vmem:[%s15505_s1 + $0x10] sm:$0xff] }
 0x275   : >> { %v10619_v36 = vpop.permute.xlu1 %2097  ;;  %15968 = vst [vmem:[#allocation72_spill] sm:$0xff] %v10643_v28 }
 0x276   : >> { %2368 = vrot.lane.b32.xlu0 %v10608_v54, %s7981_s9  ;;  %15964 = vst [vmem:[#allocation68_spill] sm:$0xff] %v10619_v36  ;;  %v3186_v36 = vld [vmem:[%s15505_s1] sm:$0xff] }
 0x277   : >> { %v10624_v61 = vpop.permute.xlu0 %2095  ;;  %2374 = vrot.lane.b32.xlu1 %v10615_v14, %s7981_s9 }
 0x278   : >> { %15966 = vst [vmem:[#allocation70_spill] sm:$0xff] %v10624_v61  ;;  %v3187_v61 = vld [vmem:[%s15505_s1 + $0x8] sm:$0xff] }
 0x279   : >> { %v10633_v47 = vpop.permute.xlu1 %2166  ;;  %v6452_v30 = vpack.c.bf16 %v3187_v61, %v3186_v36  ;;  %v3189_v61 = vld [vmem:[%s15505_s1 + $0x18] sm:$0xff]  ;;  %v10668_v36 = vsel %vm844_vm2, %v2336_v3, %v2337_v2  ;;  %v3190_v2 = vld [vmem:[%s15505_s1 + $0x20] sm:$0xff]  ;;  %v3191_v3 = vld [vmem:[%s15505_s1 + $0x28] sm:$0xff] }
 0x27a   : >> { %2372 = vrot.lane.b32.xlu0 %v10582_v29, %s7981_s9  ;;  %15971 = vst [vmem:[#allocation75_spill] sm:$0xff] %v10668_v36  ;;  %v6455_v13 = vpack.c.bf16 %v3189_v61, %v3188_v8  ;;  %v6458_v8 = vpack.c.bf16 %v3191_v3, %v3190_v2  ;;  %v3192_v2 = vld [vmem:[%s15505_s1 + $0x30] sm:$0xff]  ;;  %v3193_v3 = vld [vmem:[%s15505_s1 + $0x38] sm:$0xff] }
 0x27b   : >> { %v10648_v60 = vpop.permute.xlu0 %2164  ;;  %2378 = vrot.lane.b32.xlu1 %v10622_v18, %s7981_s9  ;;  %6453 = vmatpush1.bf16.msra.mxu0 %v6452_v30  ;;  %v16041_v18 = vld [vmem:[#allocation25_spill] sm:$0xff] }
 0x27c   : >> { %6543 = vmatpush1.bf16.msra.mxu1 %v6452_v30  ;;  %6454 = vmatprep.subr.bf16.mxu0 %v7993_v21 }
 0x27d   : >> { %v10658_v51 = vpop.permute.xlu1 %2170  ;;  %6530 = vmatprep.subr.bf16.mxu1 %v7993_v21 }
 0x27e   : >> { %2376 = vrot.lane.b32.xlu0 %v10643_v28, %s7981_s9  ;;  %15970 = vst [vmem:[#allocation74_spill] sm:$0xff] %v10658_v51 }
 0x27f   : >> { %2382 = vrot.lane.b32.xlu1 %v10654_v63, %s7981_s9  ;;  %6456 = vmatpush1.bf16.msra.mxu0 %v6455_v13 }
 0x280   : >> { %v10671_v30 = vpop.permute.xlu0 %2168  ;;  %6544 = vmatpush1.bf16.msra.mxu1 %v6455_v13  ;;  %6457 = vmatprep.subr.bf16.mxu0 %v7993_v21 }
 0x281   : >> { %15972 = vst [vmem:[#allocation76_spill] sm:$0xff] %v10671_v30  ;;  %v10677_v51 = vpop.permute.xlu1 %2174  ;;  %6531 = vmatprep.subr.bf16.mxu1 %v7993_v21  ;;  %v16031_v30 = vld [vmem:[#allocation4_spill] sm:$0xff] }
 0x282   : >> { %2380 = vrot.lane.b32.xlu0 %v10668_v36, %s7981_s9  ;;  %15973 = vst [vmem:[#allocation77_spill] sm:$0xff] %v10677_v51  ;;  %v6461_v51 = vpack.c.bf16 %v3193_v3, %v3192_v2  ;;  %v3195_v2 = vld [vmem:[%s15505_s1 + $0x48] sm:$0xff] }
 0x283   : >> { %2435 = vrot.lane.b32.xlu1 %v9922_v50, %s7982_s10  ;;  %6459 = vmatpush1.bf16.msra.mxu0 %v6458_v8 }
 0x284   : >> { %v10687_v61 = vpop.permute.xlu0 %2172  ;;  %6545 = vmatpush1.bf16.msra.mxu1 %v6458_v8  ;;  %6460 = vmatprep.subr.bf16.mxu0 %v7993_v21  ;;  %v3194_v8 = vld [vmem:[%s15505_s1 + $0x40] sm:$0xff] }
 0x285   : >> { %15974 = vst [vmem:[#allocation78_spill] sm:$0xff] %v10687_v61  ;;  %v10693_v13 = vpop.permute.xlu1 %2178  ;;  %6532 = vmatprep.subr.bf16.mxu1 %v7993_v21  ;;  %v6464_v3 = vpack.c.bf16 %v3195_v2, %v3194_v8  ;;  %v3196_v8 = vld [vmem:[%s15505_s1 + $0x50] sm:$0xff]  ;;  %v3197_v2 = vld [vmem:[%s15505_s1 + $0x58] sm:$0xff] }
 0x286   : >> { %2433 = vrot.lane.b32.xlu0 %v9899_v48, %s7982_s10  ;;  %15975 = vst [vmem:[#allocation79_spill] sm:$0xff] %v10693_v13 }
 0x287   : >> { %2459 = vrot.lane.b32.xlu1 %v10076_v41, %s7982_s10  ;;  %6462 = vmatpush1.bf16.msra.mxu0 %v6461_v51 }
 0x288   : >> { %v10703_v50 = vpop.permute.xlu0 %2176  ;;  %6546 = vmatpush1.bf16.msra.mxu1 %v6461_v51  ;;  %6463 = vmatprep.subr.bf16.mxu0 %v7993_v21  ;;  %v7256_v51 = vld [vmem:[%s8926_s30 + $0x200] sm:$0xff] }
 0x289   : >> { %15976 = vst [vmem:[#allocation80_spill] sm:$0xff] %v10703_v50  ;;  %v10709_v48 = vpop.permute.xlu1 %2182  ;;  %6533 = vmatprep.subr.bf16.mxu1 %v7993_v21 }
 0x28a   : >> { %2457 = vrot.lane.b32.xlu0 %v10032_v44, %s7982_s10  ;;  %15977 = vst [vmem:[#allocation81_spill] sm:$0xff] %v10709_v48  ;;  %v7257_v48 = vld [vmem:[%s8926_s30 + $0x1f8] sm:$0xff] }
 0x28b   : >> { %2508 = vrot.lane.b32.xlu1 %v7256_v51, %s7983_s11  ;;  %6465 = vmatpush1.bf16.msra.mxu0 %v6464_v3  ;;  %v7258_v51 = vld [vmem:[%s8926_s30 + $0x260] sm:$0xff]  ;;  %v7259_v44 = vld [vmem:[%s8926_s30 + $0x258] sm:$0xff] }
 0x28c   : >> { %v10719_v13 = vpop.permute.xlu0 %2180  ;;  %6547 = vmatpush1.bf16.msra.mxu1 %v6464_v3  ;;  %6466 = vmatprep.subr.bf16.mxu0 %v7993_v21 }
 0x28d   : >> { %15978 = vst [vmem:[#allocation82_spill] sm:$0xff] %v10719_v13  ;;  %v10725_v50 = vpop.permute.xlu1 %2186  ;;  %v6467_v13 = vpack.c.bf16 %v3197_v2, %v3196_v8  ;;  %6534 = vmatprep.subr.bf16.mxu1 %v7993_v21  ;;  %v3198_v8 = vld [vmem:[%s15505_s1 + $0x60] sm:$0xff]  ;;  %v2341_v2 = vrot.slane %v7259_v44, 1 }
 0x28e   : >> { %2506 = vrot.lane.b32.xlu0 %v7257_v48, %s7983_s11  ;;  %15979 = vst [vmem:[#allocation83_spill] sm:$0xff] %v10725_v50  ;;  %v10740_v48 = vrot.slane %v10515_v43, 1  ;;  %v2342_v50 = vrot.slane %v7258_v51, 1 }
 0x28f   : >> { %2532 = vrot.lane.b32.xlu1 %v15948_v34, %s7983_s11  ;;  %6468 = vmatpush1.bf16.msra.mxu0 %v6467_v13  ;;  %v3199_v34 = vld [vmem:[%s15505_s1 + $0x68] sm:$0xff] }
 0x290   : >> { %v10735_v3 = vpop.permute.xlu0 %2184  ;;  %15981 = vst [vmem:[#allocation85_spill] sm:$0xff] %v10740_v48  ;;  %6548 = vmatpush1.bf16.msra.mxu1 %v6467_v13  ;;  %6469 = vmatprep.subr.bf16.mxu0 %v7993_v21  ;;  %v10761_v51 = vsel %vm844_vm2, %v2342_v50, %v10740_v48 }
 0x291   : >> { %15980 = vst [vmem:[#allocation84_spill] sm:$0xff] %v10735_v3  ;;  %v10745_v41 = vpop.permute.xlu1 %2190  ;;  %v6470_v3 = vpack.c.bf16 %v3199_v34, %v3198_v8  ;;  %6535 = vmatprep.subr.bf16.mxu1 %v7993_v21  ;;  %15982 = vst [vmem:[#allocation86_spill] sm:$0xff] %v10761_v51  ;;  %v10775_v8 = vsel %vm844_vm2, %v2341_v2, %v2342_v50  ;;  %v3202_v50 = vld [vmem:[%s15505_s1 + $0x80] sm:$0xff]  ;;  %v3203_v2 = vld [vmem:[%s15505_s1 + $0x88] sm:$0xff] }
 0x292   : >> { %2530 = vrot.lane.b32.xlu0 %v7259_v44, %s7983_s11  ;;  %v3200_v44 = vld [vmem:[%s15505_s1 + $0x70] sm:$0xff]  ;;  %15984 = vst [vmem:[#allocation88_spill] sm:$0xff] %v10775_v8 }
 0x293   : >> { %2585 = vrot.lane.b32.xlu1 %v10590_v27, %s7984_s12  ;;  %6471 = vmatpush1.bf16.msra.mxu0 %v6470_v3  ;;  %v3201_v27 = vld [vmem:[%s15505_s1 + $0x78] sm:$0xff] }
 0x294   : >> { %v10755_v13 = vpop.permute.xlu0 %2188  ;;  %6549 = vmatpush1.bf16.msra.mxu1 %v6470_v3  ;;  %6472 = vmatprep.subr.bf16.mxu0 %v7993_v21  ;;  %v6473_v34 = vpack.c.bf16 %v3201_v27, %v3200_v44  ;;  %v6476_v44 = vpack.c.bf16 %v3203_v2, %v3202_v50  ;;  %v3204_v50 = vld [vmem:[%s15505_s1 + $0x90] sm:$0xff]  ;;  %v3205_v2 = vld [vmem:[%s15505_s1 + $0x98] sm:$0xff] }
 0x295   : >> { %v10765_v61 = vpop.permute.xlu1 %2194  ;;  %6536 = vmatprep.subr.bf16.mxu1 %v7993_v21 }
 0x296   : >> { %2583 = vrot.lane.b32.xlu0 %v10569_v58, %s7984_s12  ;;  %15983 = vst [vmem:[#allocation87_spill] sm:$0xff] %v10765_v61 }
 0x297   : >> { %2609 = vrot.lane.b32.xlu1 %v10761_v51, %s7984_s12  ;;  %6474 = vmatpush1.bf16.msra.mxu0 %v6473_v34 }
 0x298   : >> { %v10778_v3 = vpop.permute.xlu0 %2192  ;;  %6550 = vmatpush1.bf16.msra.mxu1 %v6473_v34  ;;  %6475 = vmatprep.subr.bf16.mxu0 %v7993_v21 }
 0x299   : >> { %15985 = vst [vmem:[#allocation89_spill] sm:$0xff] %v10778_v3  ;;  %v10784_v58 = vpop.permute.xlu1 %2198  ;;  %6537 = vmatprep.subr.bf16.mxu1 %v7993_v21  ;;  %v10892_v3 = vrot.slane %v10537_v45, 1 }
 0x29a   : >> { %2607 = vrot.lane.b32.xlu0 %v10775_v8, %s7984_s12  ;;  %15986 = vst [vmem:[#allocation90_spill] sm:$0xff] %v10784_v58  ;;  %v6479_v58 = vpack.c.bf16 %v3205_v2, %v3204_v50  ;;  %v3206_v50 = vld [vmem:[%s15505_s1 + $0xa0] sm:$0xff]  ;;  %v3207_v2 = vld [vmem:[%s15505_s1 + $0xa8] sm:$0xff] }
 0x29b   : >> { %2660 = vrot.lane.b32.xlu1 %v9935_v7, %s7985_s13  ;;  %6477 = vmatpush1.bf16.msra.mxu0 %v6476_v44  ;;  %15999 = vst [vmem:[#allocation103_spill] sm:$0xff] %v10892_v3 }
 0x29c   : >> { %v10794_v27 = vpop.permute.xlu0 %2196  ;;  %6551 = vmatpush1.bf16.msra.mxu1 %v6476_v44  ;;  %6478 = vmatprep.subr.bf16.mxu0 %v7993_v21 }
 0x29d   : >> { %15987 = vst [vmem:[#allocation91_spill] sm:$0xff] %v10794_v27  ;;  %v10800_v34 = vpop.permute.xlu1 %2202  ;;  %6538 = vmatprep.subr.bf16.mxu1 %v7993_v21  ;;  %v7994_v27 = vmov 0.0  }
 0x29e   : >> { %2384 = vrot.lane.b32.xlu0 %v10628_v35, %s7981_s9  ;;  %15988 = vst [vmem:[#allocation92_spill] sm:$0xff] %v10800_v34  ;;  %v6482_v34 = vpack.c.bf16 %v3207_v2, %v3206_v50  ;;  %v3208_v50 = vld [vmem:[%s15505_s1 + $0xb0] sm:$0xff]  ;;  %v3209_v2 = vld [vmem:[%s15505_s1 + $0xb8] sm:$0xff] }
 0x29f   : >> { %2684 = vrot.lane.b32.xlu1 %v10049_v9, %s7985_s13  ;;  %6480 = vmatpush1.bf16.msra.mxu0 %v6479_v58 }
 0x2a0   : >> { %v10810_v61 = vpop.permute.xlu0 %2200  ;;  %6552 = vmatpush1.bf16.msra.mxu1 %v6479_v58  ;;  %6481 = vmatprep.subr.bf16.mxu0 %v7993_v21 }
 0x2a1   : >> { %15989 = vst [vmem:[#allocation93_spill] sm:$0xff] %v10810_v61  ;;  %v10816_v44 = vpop.permute.xlu1 %2206  ;;  %6539 = vmatprep.subr.bf16.mxu1 %v7993_v21  ;;  %v7261_v61 = vld [vmem:[%s8926_s30 + $0x270] sm:$0xff] }
 0x2a2   : >> { %2662 = vrot.lane.b32.xlu0 %v9983_v25, %s7985_s13  ;;  %15990 = vst [vmem:[#allocation94_spill] sm:$0xff] %v10816_v44 }
 0x2a3   : >> { %2437 = vrot.lane.b32.xlu1 %v9874_v62, %s7982_s10  ;;  %6483 = vmatpush1.bf16.msra.mxu0 %v6482_v34 }
 0x2a4   : >> { %v10826_v58 = vpop.permute.xlu0 %2204  ;;  %6553 = vmatpush1.bf16.msra.mxu1 %v6482_v34  ;;  %6484 = vmatprep.subr.bf16.mxu0 %v7993_v21  ;;  %v10845_v34 = vld [vmem:[%s8926_s30 + $0x210] sm:$0xff] }
 0x2a5   : >> { %15991 = vst [vmem:[#allocation95_spill] sm:$0xff] %v10826_v58  ;;  %v10832_v44 = vpop.permute.xlu1 %2210  ;;  %v6485_v58 = vpack.c.bf16 %v3209_v2, %v3208_v50  ;;  %6540 = vmatprep.subr.bf16.mxu1 %v7993_v21  ;;  %v3210_v50 = vld [vmem:[%s15505_s1 + $0xc0] sm:$0xff]  ;;  %v3211_v2 = vld [vmem:[%s15505_s1 + $0xc8] sm:$0xff] }
 0x2a6   : >> { %2686 = vrot.lane.b32.xlu0 %v10084_v6, %s7985_s13  ;;  %15992 = vst [vmem:[#allocation96_spill] sm:$0xff] %v10832_v44 }
 0x2a7   : >> { %2733 = vrot.lane.b32.xlu1 %v10845_v34, %s7986_s14  ;;  %6486 = vmatpush1.bf16.msra.mxu0 %v6485_v58 }
 0x2a8   : >> { %v10842_v62 = vpop.permute.xlu0 %2208  ;;  %6554 = vmatpush1.bf16.msra.mxu1 %v6485_v58  ;;  %6487 = vmatprep.subr.bf16.mxu0 %v7993_v21 }
 0x2a9   : >> { %15993 = vst [vmem:[#allocation97_spill] sm:$0xff] %v10842_v62  ;;  %v10851_v44 = vpop.permute.xlu1 %2246  ;;  %v6488_v62 = vpack.c.bf16 %v3211_v2, %v3210_v50  ;;  %6541 = vmatprep.subr.bf16.mxu1 %v7993_v21  ;;  %v3212_v21 = vld [vmem:[%s15505_s1 + $0xd0] sm:$0xff]  ;;  %v2346_v50 = vrot.slane %v7261_v61, 1  ;;  %v7263_v2 = vld [vmem:[%s8926_s30 + $0x278] sm:$0xff] }
 0x2aa   : >> { %2461 = vrot.lane.b32.xlu0 %v10035_v17, %s7982_s10  ;;  %v7262_v17 = vld [vmem:[%s8926_s30 + $0x218] sm:$0xff] }
 0x2ab   : >> { %2757 = vrot.lane.b32.xlu1 %v7261_v61, %s7986_s14  ;;  %6489 = vmatpush1.bf16.msra.mxu0 %v6488_v62 }
 0x2ac   : >> { %v10861_v58 = vpop.permute.xlu0 %2244  ;;  %6555 = vmatpush1.bf16.msra.mxu1 %v6488_v62  ;;  %3304 = vmatprep.subr.mxu0 %v7994_v27  ;;  %v2347_v62 = vrot.slane %v7263_v2, 1 }
 0x2ad   : >> { %v10867_v35 = vpop.permute.xlu1 %2250  ;;  %6542 = vmatprep.subr.mxu1 %v7994_v27 }
 0x2ae   : >> { %2735 = vrot.lane.b32.xlu0 %v7262_v17, %s7986_s14  ;;  %15994 = vst [vmem:[#allocation98_spill] sm:$0xff] %v10867_v35 }
 0x2af   : >> { %2510 = vrot.lane.b32.xlu1 %v10431_v52, %s7983_s11  ;;  %3305 = vmatpush1.msra.mxu0 %v3212_v21  ;;  %v10885_v52 = vsel %vm844_vm2, %v2346_v50, %v2347_v62  ;;  %v10904_v50 = vsel %vm844_vm2, %v2347_v62, %v10892_v3 }
 0x2b0   : >> { %v10869_v63 = vpop.permute.xlu0 %2248  ;;  %6556 = vmatpush1.msra.mxu1 %v3212_v21 }
 0x2b1   : >> { %15995 = vst [vmem:[#allocation99_spill] sm:$0xff] %v10869_v63  ;;  %v10878_v35 = vpop.permute.xlu1 %2254 }
 0x2b2   : >> { %2759 = vrot.lane.b32.xlu0 %v7263_v2, %s7986_s14  ;;  %15996 = vst [vmem:[#allocation100_spill] sm:$0xff] %v10878_v35 }
 0x2b3   : >> { %2810 = vrot.lane.b32.xlu1 %v10608_v54, %s7987_s15 }
 0x2b4   : >> { %v10880_v36 = vpop.permute.xlu0 %2252 }
 0x2b5   : >> { %15997 = vst [vmem:[#allocation101_spill] sm:$0xff] %v10880_v36  ;;  %v10889_v27 = vpop.permute.xlu1 %2258 }
 0x2b6   : >> { %2534 = vrot.lane.b32.xlu0 %v10515_v43, %s7983_s11  ;;  %15998 = vst [vmem:[#allocation102_spill] sm:$0xff] %v10889_v27 }
 0x2b7   : >> { %2834 = vrot.lane.b32.xlu1 %v10885_v52, %s7987_s15 }
 0x2b8   : >> { %v10894_v21 = vpop.permute.xlu0 %2256 }
 0x2b9   : >> { %16000 = vst [vmem:[#allocation104_spill] sm:$0xff] %v10894_v21  ;;  %v10900_v35 = vpop.permute.xlu1 %2262 }
 0x2ba   : >> { %2812 = vrot.lane.b32.xlu0 %v10599_v16, %s7987_s15  ;;  %16001 = vst [vmem:[#allocation105_spill] sm:$0xff] %v10900_v35 }
 0x2bb   : >> { %2587 = vrot.lane.b32.xlu1 %v10575_v11, %s7984_s12 }
 0x2bc   : >> { %v10906_v43 = vpop.permute.xlu0 %2260 }
 0x2bd   : >> { %16002 = vst [vmem:[#allocation106_spill] sm:$0xff] %v10906_v43  ;;  %v10912_v27 = vpop.permute.xlu1 %2266 }
 0x2be   : >> { %2836 = vrot.lane.b32.xlu0 %v10904_v50, %s7987_s15  ;;  %16003 = vst [vmem:[#allocation107_spill] sm:$0xff] %v10912_v27 }
 0x2bf   : >> { %2386 = vrot.lane.b32.xlu1 %v10775_v8, %s7981_s9 }
 0x2c0   : >> { %v10914_v21 = vpop.permute.xlu0 %2264 }
 0x2c1   : >> { %16004 = vst [vmem:[#allocation108_spill] sm:$0xff] %v10914_v21  ;;  %v10920_v62 = vpop.permute.xlu1 %2270 }
 0x2c2   : >> { %2611 = vrot.lane.b32.xlu0 %v10740_v48, %s7984_s12 }
 0x2c3   : >> { %2664 = vrot.lane.b32.xlu1 %v15909_v19, %s7985_s13 }
 0x2c4   : >> { %v10922_v35 = vpop.permute.xlu0 %2268 }
 0x2c5   : >> { %v10928_v11 = vpop.permute.xlu1 %2274 }
 0x2c6   : >> { %2388 = vrot.lane.b32.xlu0 %v10761_v51, %s7981_s9  ;;  %16005 = vst [vmem:[#allocation109_spill] sm:$0xff] %v10928_v11  ;;  %v2352_v11 = vrot.slane %v10370_v53, 1 }
 0x2c7   : >> { %2439 = vrot.lane.b32.xlu1 %v9935_v7, %s7982_s10 }
 0x2c8   : >> { %v10930_v27 = vpop.permute.xlu0 %2272 }
 0x2c9   : >> { %16006 = vst [vmem:[#allocation110_spill] sm:$0xff] %v10930_v27  ;;  %v10936_v21 = vpop.permute.xlu1 %2278 }
 0x2ca   : >> { %2688 = vrot.lane.b32.xlu0 %v15917_v10, %s7985_s13  ;;  %16007 = vst [vmem:[#allocation111_spill] sm:$0xff] %v10936_v21 }
 0x2cb   : >> { %2463 = vrot.lane.b32.xlu1 %v10049_v9, %s7982_s10 }
 0x2cc   : >> { %v10938_v43 = vpop.permute.xlu0 %2276 }
 0x2cd   : >> { %16008 = vst [vmem:[#allocation112_spill] sm:$0xff] %v10938_v43  ;;  %v10944_v8 = vpop.permute.xlu1 %2282 }
 0x2ce   : >> { %2441 = vrot.lane.b32.xlu0 %v9983_v25, %s7982_s10  ;;  %16009 = vst [vmem:[#allocation113_spill] sm:$0xff] %v10944_v8 }
 0x2cf   : >> { %2737 = vrot.lane.b32.xlu1 %v10470_v4, %s7986_s14 }
 0x2d0   : >> { %v10946_v51 = vpop.permute.xlu0 %2280 }
 0x2d1   : >> { %16010 = vst [vmem:[#allocation114_spill] sm:$0xff] %v10946_v51  ;;  %v10952_v7 = vpop.permute.xlu1 %2286 }
 0x2d2   : >> { %2465 = vrot.lane.b32.xlu0 %v10084_v6, %s7982_s10  ;;  %16011 = vst [vmem:[#allocation115_spill] sm:$0xff] %v10952_v7 }
 0x2d3   : >> { %2512 = vrot.lane.b32.xlu1 %v10845_v34, %s7983_s11 }
 0x2d4   : >> { %v10954_v21 = vpop.permute.xlu0 %2284 }
 0x2d5   : >> { %16012 = vst [vmem:[#allocation116_spill] sm:$0xff] %v10954_v21  ;;  %v10960_v25 = vpop.permute.xlu1 %2290 }
 0x2d6   : >> { %2761 = vrot.lane.b32.xlu0 %v10537_v45, %s7986_s14  ;;  %16013 = vst [vmem:[#allocation117_spill] sm:$0xff] %v10960_v25 }
 0x2d7   : >> { %2536 = vrot.lane.b32.xlu1 %v7261_v61, %s7983_s11 }
 0x2d8   : >> { %v10962_v9 = vpop.permute.xlu0 %2288 }
 0x2d9   : >> { %16014 = vst [vmem:[#allocation118_spill] sm:$0xff] %v10962_v9  ;;  %v10966_v8 = vpop.permute.xlu1 %2358 }
 0x2da   : >> { %2514 = vrot.lane.b32.xlu0 %v7262_v17, %s7983_s11 }
 0x2db   : >> { %2814 = vrot.lane.b32.xlu1 %v10582_v29, %s7987_s15 }
 0x2dc   : >> { %v10968_v6 = vpop.permute.xlu0 %2356 }
 0x2dd   : >> { %v10973_v34 = vpop.permute.xlu1 %2362 }
 0x2de   : >> { %2538 = vrot.lane.b32.xlu0 %v7263_v2, %s7983_s11  ;;  %16015 = vst [vmem:[#allocation119_spill] sm:$0xff] %v10973_v34  ;;  %v2351_v34 = vrot.slane %v10361_v46, 1 }
 0x2df   : >> { %2589 = vrot.lane.b32.xlu1 %v10608_v54, %s7984_s12 }
 0x2e0   : >> { %v10975_v7 = vpop.permute.xlu0 %2360 }
 0x2e1   : >> { %16016 = vst [vmem:[#allocation120_spill] sm:$0xff] %v10975_v7  ;;  %v10981_v17 = vpop.permute.xlu1 %2366 }
 0x2e2   : >> { %2838 = vrot.lane.b32.xlu0 %v10892_v3, %s7987_s15  ;;  %16017 = vst [vmem:[#allocation121_spill] sm:$0xff] %v10981_v17  ;;  %v11050_v17 = vrot.slane %v10545_v26, 1 }
 0x2e3   : >> { %2613 = vrot.lane.b32.xlu1 %v10885_v52, %s7984_s12 }
 0x2e4   : >> { %v10983_v61 = vpop.permute.xlu0 %2364 }
 0x2e5   : >> { %16018 = vst [vmem:[#allocation122_spill] sm:$0xff] %v10983_v61  ;;  %v10989_v2 = vpop.permute.xlu1 %2370 }
 0x2e6   : >> { %2591 = vrot.lane.b32.xlu0 %v10599_v16, %s7984_s12  ;;  %16019 = vst [vmem:[#allocation123_spill] sm:$0xff] %v10989_v2  ;;  %v11031_v2 = vld [vmem:[%s8926_s30 + $0x228] sm:$0xff] }
 0x2e7   : >> { %2390 = vrot.lane.b32.xlu1 %v10740_v48, %s7981_s9 }
 0x2e8   : >> { %v10991_v25 = vpop.permute.xlu0 %2368 }
 0x2e9   : >> { %16020 = vst [vmem:[#allocation124_spill] sm:$0xff] %v10991_v25  ;;  %v10997_v54 = vpop.permute.xlu1 %2374 }
 0x2ea   : >> { %2615 = vrot.lane.b32.xlu0 %v10904_v50, %s7984_s12  ;;  %16021 = vst [vmem:[#allocation125_spill] sm:$0xff] %v10997_v54 }
 0x2eb   : >> { %2668 = vrot.lane.b32.xlu1 %v15911_v59, %s7985_s13 }
 0x2ec   : >> { %v10999_v9 = vpop.permute.xlu0 %2372 }
 0x2ed   : >> { %16022 = vst [vmem:[#allocation126_spill] sm:$0xff] %v10999_v9  ;;  %v11005_v16 = vpop.permute.xlu1 %2378 }
 0x2ee   : >> { %2666 = vrot.lane.b32.xlu0 %v15907_v39, %s7985_s13  ;;  %16023 = vst [vmem:[#allocation127_spill] sm:$0xff] %v11005_v16 }
 0x2ef   : >> { %2692 = vrot.lane.b32.xlu1 %v10401_v23, %s7985_s13 }
 0x2f0   : >> { %v11007_v21 = vpop.permute.xlu0 %2376 }
 0x2f1   : >> { %16024 = vst [vmem:[#allocation128_spill] sm:$0xff] %v11007_v21  ;;  %v11013_v54 = vpop.permute.xlu1 %2382  ;;  %v11026_v21 = vld [vmem:[%s8926_s30 + $0x230] sm:$0xff] }
 0x2f2   : >> { %2690 = vrot.lane.b32.xlu0 %v10379_v57, %s7985_s13 }
 0x2f3   : >> { %2467 = vrot.lane.b32.xlu1 %v15917_v10, %s7982_s10 }
 0x2f4   : >> { %v11015_v51 = vpop.permute.xlu0 %2380 }
 0x2f5   : >> { %v11021_v9 = vpop.permute.xlu1 %2435 }
 0x2f6   : >> { %2443 = vrot.lane.b32.xlu0 %v15909_v19, %s7982_s10 }
 0x2f7   : >> { %2741 = vrot.lane.b32.xlu1 %v11026_v21, %s7986_s14 }
 0x2f8   : >> { %v11023_v16 = vpop.permute.xlu0 %2433 }
 0x2f9   : >> { %v11035_v25 = vpop.permute.xlu1 %2459 }
 0x2fa   : >> { %2739 = vrot.lane.b32.xlu0 %v11031_v2, %s7986_s14 }
 0x2fb   : >> { %2765 = vrot.lane.b32.xlu1 %v10370_v53, %s7986_s14 }
 0x2fc   : >> { %v11037_v10 = vpop.permute.xlu0 %2457 }
 0x2fd   : >> { %v11043_v19 = vpop.permute.xlu1 %2508 }
 0x2fe   : >> { %2763 = vrot.lane.b32.xlu0 %v10361_v46, %s7986_s14 }
 0x2ff   : >> { %2540 = vrot.lane.b32.xlu1 %v10537_v45, %s7983_s11  ;;  %v11064_v45 = vsel %vm844_vm2, %v2352_v11, %v11050_v17 }
 0x300   : >> { %v11045_v48 = vpop.permute.xlu0 %2506  ;;  %16026 = vst [vmem:[#allocation130_spill] sm:$0xff] %v11064_v45 }
 0x301   : >> { %v11055_v43 = vpop.permute.xlu1 %2532 }
 0x302   : >> { %2516 = vrot.lane.b32.xlu0 %v10470_v4, %s7983_s11  ;;  %16025 = vst [vmem:[#allocation129_spill] sm:$0xff] %v11055_v43  ;;  %v11071_v4 = vsel %vm844_vm2, %v2351_v34, %v2352_v11  ;;  %v16045_v43 = vld [vmem:[#allocation34_spill] sm:$0xff] }
 0x303   : >> { %2818 = vrot.lane.b32.xlu1 %v10643_v28, %s7987_s15  ;;  %16027 = vst [vmem:[#allocation131_spill] sm:$0xff] %v11071_v4  ;;  %v16039_v28 = vld [vmem:[#allocation23_spill] sm:$0xff]  ;;  %v6887_v22 = vunpack.i.l.bf16 %v16045_v43  ;;  %v16050_v43 = vld [vmem:[#allocation49_spill] sm:$0xff] }
 0x304   : >> { %v11058_v61 = vpop.permute.xlu0 %2530 }
 0x305   : >> { %v11068_v53 = vpop.permute.xlu1 %2585 }
 0x306   : >> { %2816 = vrot.lane.b32.xlu0 %v10615_v14, %s7987_s15 }
 0x307   : >> { %2842 = vrot.lane.b32.xlu1 %v11064_v45, %s7987_s15  ;;  %v16036_v45 = vld [vmem:[#allocation17_spill] sm:$0xff] }
 0x308   : >> { %v11073_v36 = vpop.permute.xlu0 %2583  ;;  %v6727_v14 = vunpack.i.l.bf16 %v16036_v45 }
 0x309   : >> { %v11079_v46 = vpop.permute.xlu1 %2609 }
 0x30a   : >> { %2840 = vrot.lane.b32.xlu0 %v11071_v4, %s7987_s15  ;;  %16028 = vst [vmem:[#allocation132_spill] sm:$0xff] %v11079_v46 }
 0x30b   : >> { %2617 = vrot.lane.b32.xlu1 %v10892_v3, %s7984_s12  ;;  %v16034_v3 = vld [vmem:[#allocation6_spill] sm:$0xff] }
 0x30c   : >> { %v11081_v27 = vpop.permute.xlu0 %2607  ;;  %v6687_v56 = vunpack.i.l.bf16 %v16034_v3  ;;  %v6807_v3 = vunpack.i.l.bf16 %v16041_v18 }
 0x30d   : >> { %v11087_v11 = vpop.permute.xlu1 %2660 }
 0x30e   : >> { %2593 = vrot.lane.b32.xlu0 %v10582_v29, %s7984_s12  ;;  %v6647_v29 = vunpack.i.l.bf16 %v16031_v30 }
 0x30f   : >> { %2394 = vrot.lane.b32.xlu1 %v10904_v50, %s7981_s9  ;;  %v16033_v50 = vld [vmem:[#allocation5_spill] sm:$0xff] }
 0x310   : >> { %v11089_v34 = vpop.permute.xlu0 %2384  ;;  %v6667_v12 = vunpack.i.l.bf16 %v16033_v50  ;;  %v6787_v50 = vunpack.i.l.bf16 %v16040_v32  ;;  %v16044_v32 = vld [vmem:[#allocation33_spill] sm:$0xff] }
 0x311   : >> { %16029 = vst [vmem:[#allocation133_spill] sm:$0xff] %v11089_v34  ;;  %v11095_v7 = vpop.permute.xlu1 %2684  ;;  %v6867_v18 = vunpack.i.l.bf16 %v16044_v32  ;;  %v6967_v32 = vunpack.i.l.bf16 %v16050_v43 }
 0x312   : >> { %2392 = vrot.lane.b32.xlu0 %v10885_v52, %s7981_s9  ;;  %16030 = vst [vmem:[#allocation134_spill] sm:$0xff] %v11095_v7  ;;  %v16035_v52 = vld [vmem:[#allocation7_spill] sm:$0xff] }
 0x313   : >> { %2694 = vrot.lane.b32.xlu1 %v10388_v55, %s7985_s13  ;;  %v6707_v4 = vunpack.i.l.bf16 %v16035_v52  ;;  %v16038_v55 = vld [vmem:[#allocation22_spill] sm:$0xff]  ;;  %v7267_v52 = vld [vmem:[%s8926_s30 + $0x60] sm:$0xff] }
 0x314   : >> { %v11097_v63 = vpop.permute.xlu0 %2662  ;;  %v6747_v30 = vunpack.i.l.bf16 %v16038_v55  ;;  %v16042_v55 = vld [vmem:[#allocation27_spill] sm:$0xff] }
 0x315   : >> { %v11104_v34 = vpop.permute.xlu1 %2437  ;;  %v6827_v46 = vunpack.i.l.bf16 %v16042_v55 }
 0x316   : >> { %2670 = vrot.lane.b32.xlu0 %v15910_v31, %s7985_s13  ;;  %16032 = vst [vmem:[#allocation135_spill] sm:$0xff] %v11104_v34  ;;  %v6767_v31 = vunpack.i.l.bf16 %v16039_v28  ;;  %v1791_v34 = vsel %vm225_vm0, %v7266_v42, %v6647_v29  ;;  %v16043_v28 = vld [vmem:[#allocation31_spill] sm:$0xff] }
 0x317   : >> { %2447 = vrot.lane.b32.xlu1 %v15911_v59, %s7982_s10  ;;  %v1808_v59 = vsel %vm1807_vm4, %v1791_v34, %v6687_v56  ;;  %v6847_v7 = vunpack.i.l.bf16 %v16043_v28  ;;  %v16047_v34 = vld [vmem:[#allocation37_spill] sm:$0xff] }
 0x318   : >> { %v11110_v20 = vpop.permute.xlu0 %2686  ;;  %v1825_v29 = vsel %vm1824_vm5, %v1808_v59, %v6727_v14  ;;  %v16048_v28 = vld [vmem:[#allocation41_spill] sm:$0xff] }
 0x319   : >> { %16037 = vst [vmem:[#allocation136_spill] sm:$0xff] %v11110_v20  ;;  %v11122_v45 = vpop.permute.xlu1 %2733  ;;  %v1799_v20 = vsel %vm225_vm0, %v7267_v52, %v6667_v12  ;;  %v1842_v56 = vsel %vm1841_vm6, %v1825_v29, %v6767_v31  ;;  %v6907_v52 = vunpack.i.l.bf16 %v16047_v34  ;;  %v6927_v55 = vunpack.i.l.bf16 %v16048_v28 }
 0x31a   : >> { %2445 = vrot.lane.b32.xlu0 %v15907_v39, %s7982_s10  ;;  %v1816_v42 = vsel %vm1807_vm4, %v1799_v20, %v6707_v4  ;;  %v1859_v14 = vsel %vm1858_vm8, %v1842_v56, %v6807_v3  ;;  %v16049_v4 = vld [vmem:[#allocation45_spill] sm:$0xff]  ;;  %v16053_v56 = vld [vmem:[#allocation56_spill] sm:$0xff] }
 0x31b   : >> { %2471 = vrot.lane.b32.xlu1 %v10401_v23, %s7982_s10  ;;  %v1833_v12 = vsel %vm1824_vm5, %v1816_v42, %v6747_v30  ;;  %v6947_v59 = vunpack.i.l.bf16 %v16049_v4  ;;  %v1876_v30 = vsel %vm1875_vm9, %v1859_v14, %v6847_v7  ;;  %v16051_v42 = vld [vmem:[#allocation9_spill] sm:$0xff]  ;;  %v7027_v43 = vunpack.i.l.bf16 %v16053_v56  ;;  %v16054_v4 = vld [vmem:[#allocation19_spill] sm:$0xff]  ;;  %v7268_v14 = vld [vmem:[%s8926_s30 + $0x120] sm:$0xff] }
 0x31c   : >> { %v11133_v39 = vpop.permute.xlu0 %2461  ;;  %v1850_v20 = vsel %vm1841_vm6, %v1833_v12, %v6787_v50  ;;  %v6987_v29 = vunpack.i.l.bf16 %v16051_v42  ;;  %v1893_v12 = vsel %vm1892_vm10, %v1876_v30, %v6887_v22  ;;  %v7047_v28 = vunpack.i.l.bf16 %v16054_v4 }
 0x31d   : >> { %16046 = vst [vmem:[#allocation137_spill] sm:$0xff] %v11133_v39  ;;  %v11147_v23 = vpop.permute.xlu1 %2757  ;;  %v1867_v31 = vsel %vm1858_vm8, %v1850_v20, %v6827_v46  ;;  %v16052_v39 = vld [vmem:[#allocation16_spill] sm:$0xff]  ;;  %v1910_v46 = vsel %vm1909_vm11, %v1893_v12, %v6927_v55  ;;  %v7087_v20 = vunpack.i.l.bf16 %v10177_v5 }
 0x31e   : >> { %2469 = vrot.lane.b32.xlu0 %v10379_v57, %s7982_s10  ;;  %v7007_v50 = vunpack.i.l.bf16 %v16052_v39  ;;  %v1884_v3 = vsel %vm1875_vm9, %v1867_v31, %v6867_v18  ;;  %v1927_v22 = vsel %vm15786_vm12, %v1910_v46, %v6967_v32  ;;  %v2882_v31 = vsel %vm225_vm0, %v7268_v14, %v10493_v38 }
 0x31f   : >> { %2767 = vrot.lane.b32.xlu1 %v10545_v26, %s7986_s14  ;;  %v1901_v7 = vsel %vm1892_vm10, %v1884_v3, %v6907_v52  ;;  %v2906_v52 = vsel %vm1807_vm4, %v2882_v31, %v10648_v60  ;;  %v7269_v3 = vld [vmem:[%s8926_s30 + $0x128] sm:$0xff]  ;;  %v7127_v46 = vunpack.i.l.bf16 %v10278_v1 }
 0x320   : >> { %v11157_v57 = vpop.permute.xlu0 %2735  ;;  %v1918_v18 = vsel %vm1909_vm11, %v1901_v7, %v6947_v59  ;;  %v1944_v55 = vsel %vm1943_vm13, %v1927_v22, %v7007_v50  ;;  %v2883_v38 = vsel %vm225_vm0, %v7269_v3, %v10485_v15  ;;  %v7107_v15 = vunpack.i.l.bf16 %v10234_v33  ;;  %v7270_v50 = vld [vmem:[%s8926_s30 + $0x180] sm:$0xff] }
 0x321   : >> { %v11171_v30 = vpop.permute.xlu1 %2510  ;;  %v1935_v26 = vsel %vm15786_vm12, %v1918_v18, %v6987_v29  ;;  %v1961_v32 = vsel %vm1960_vm14, %v1944_v55, %v7047_v28  ;;  %v7067_v29 = vunpack.i.l.bf16 %v10127_v49  ;;  %v7271_v18 = vld [vmem:[%s8926_s30 + $0x188] sm:$0xff] }
 0x322   : >> { %2743 = vrot.lane.b32.xlu0 %v10475_v24, %s7986_s14  ;;  %v11178_v59 = vsel %vm1943_vm13, %v1935_v26, %v7027_v43  ;;  %v2930_v24 = vsel %vm1824_vm5, %v2906_v52, %v10861_v58  ;;  %v1978_v60 = vsel %vm15635_vm15, %v1961_v32, %v7087_v20  ;;  %v2907_v43 = vsel %vm1807_vm4, %v2883_v38, %v10633_v47  ;;  %v7273_v26 = vld [vmem:[%s8926_s30 + $0x288] sm:$0xff]  ;;  %v16057_v38 = vld [vmem:[#allocation134_spill] sm:$0xff] }
 0x323   : >> { %2520 = vrot.lane.b32.xlu1 %v11026_v21, %s7983_s11  ;;  %v2954_v28 = vsel %vm1841_vm6, %v2930_v24, %v10968_v6  ;;  %v2894_v58 = vsel %vm225_vm0, %v7270_v50, %v10553_v0  ;;  %v2931_v21 = vsel %vm1824_vm5, %v2907_v43, %v10851_v44  ;;  %v2895_v44 = vsel %vm225_vm0, %v7271_v18, %v10550_v40  ;;  %v16058_v43 = vld [vmem:[#allocation132_spill] sm:$0xff] }
 0x324   : >> { %v2760_v12 = vpop.permute.xlu0 %2759  ;;  %v2978_v7 = vsel %vm1858_vm8, %v2954_v28, %v11023_v16  ;;  %v2918_v6 = vsel %vm1807_vm4, %v2894_v58, %v10755_v13  ;;  %v2955_v20 = vsel %vm1841_vm6, %v2931_v21, %v10966_v8  ;;  %v7272_v8 = vld [vmem:[%s8926_s30 + $0x290] sm:$0xff]  ;;  %v16059_v58 = vld [vmem:[#allocation69_spill] sm:$0xff]  ;;  %v1995_v18 = vsel %vm15634_vm1, %v1978_v60, %v7127_v46 }
 0x325   : >> { %v2811_v47 = vpop.permute.xlu1 %2810  ;;  %v3002_v0 = vsel %vm1875_vm9, %v2978_v7, %v11045_v48  ;;  %v2979_v16 = vsel %vm1858_vm8, %v2955_v20, %v11021_v9  ;;  %v2919_v48 = vsel %vm1807_vm4, %v2895_v44, %v10745_v41  ;;  %v16060_v7 = vld [vmem:[#allocation32_spill] sm:$0xff]  ;;  %v16064_v60 = vld [vmem:[#allocation46_spill] sm:$0xff] }
 0x326   : >> { %2518 = vrot.lane.b32.xlu0 %v11031_v2, %s7983_s11  ;;  %v2942_v2 = vsel %vm1824_vm5, %v2918_v6, %v10922_v35  ;;  %v3026_v13 = vsel %vm1892_vm10, %v3002_v0, %v11073_v36  ;;  %v3003_v35 = vsel %vm1875_vm9, %v2979_v16, %v11043_v19  ;;  %v2943_v36 = vsel %vm1824_vm5, %v2919_v48, %v10920_v62  ;;  %v16061_v6 = vld [vmem:[#allocation136_spill] sm:$0xff] }
 0x327   : >> { %2544 = vrot.lane.b32.xlu1 %v7272_v8, %s7983_s11  ;;  %v2966_v40 = vsel %vm1841_vm6, %v2942_v2, %v11015_v51  ;;  %v3050_v9 = vsel %vm1909_vm11, %v3026_v13, %v11087_v11  ;;  %v3027_v31 = vsel %vm1892_vm10, %v3003_v35, %v11068_v53  ;;  %v2967_v19 = vsel %vm1841_vm6, %v2943_v36, %v11013_v54  ;;  %v16062_v44 = vld [vmem:[#allocation36_spill] sm:$0xff] }
 0x328   : >> { %v11220_v22 = vpop.permute.xlu0 %2534  ;;  %v2990_v14 = vsel %vm1858_vm8, %v2966_v40, %v11037_v10  ;;  %v3074_v41 = vsel %vm15786_vm12, %v3050_v9, %v11122_v45  ;;  %v3051_v62 = vsel %vm1909_vm11, %v3027_v31, %v11097_v63  ;;  %v7167_v53 = vunpack.i.l.bf16 %v10374_v37  ;;  %v16056_v63 = vld [vmem:[#allocation129_spill] sm:$0xff]  ;;  %v16063_v8 = vld [vmem:[#allocation72_spill] sm:$0xff]  ;;  %v16065_v31 = vld [vmem:[#allocation67_spill] sm:$0xff] }
 0x329   : >> { %v2835_v51 = vpop.permute.xlu1 %2834  ;;  %v3014_v11 = vsel %vm1875_vm9, %v2990_v14, %v11058_v61  ;;  %v3098_v10 = vsel %vm1943_vm13, %v3074_v41, %v2811_v47  ;;  %v2991_v45 = vsel %vm1858_vm8, %v2967_v19, %v11035_v25  ;;  %v3075_v52 = vsel %vm15786_vm12, %v3051_v62, %v11157_v57  ;;  %v16055_v61 = vld [vmem:[#allocation38_spill] sm:$0xff]  ;;  %v16067_v62 = vld [vmem:[#allocation131_spill] sm:$0xff] }
 0x32a   : >> { %2542 = vrot.lane.b32.xlu0 %v7273_v26, %s7983_s11  ;;  %v3038_v55 = vsel %vm1892_vm10, %v3014_v11, %v11081_v27  ;;  %v7207_v32 = vunpack.i.l.bf16 %v16055_v61  ;;  %v3015_v3 = vsel %vm1875_vm9, %v2991_v45, %v16056_v63  ;;  %v3146_v28 = vrot.slane %v3098_v10, 1  ;;  %v11318_v11 = vld [vmem:[%s8926_s30 + $0x2a0] sm:$0xff]  ;;  %v16068_v45 = vld [vmem:[#allocation54_spill] sm:$0xff] }
 0x32b   : >> { %2844 = vrot.lane.b32.xlu1 %v11050_v17, %s7987_s15  ;;  %v3062_v24 = vsel %vm1909_vm11, %v3038_v55, %v16057_v38  ;;  %v3039_v27 = vsel %vm1892_vm10, %v3015_v3, %v16058_v43  ;;  %v7147_v47 = vunpack.i.l.bf16 %v16060_v7  ;;  %v7187_v2 = vunpack.i.l.bf16 %v16062_v44  ;;  %v16070_v38 = vld [vmem:[#allocation4_spill] sm:$0xff]  ;;  %v16071_v43 = vld [vmem:[#allocation5_spill] sm:$0xff] }
 0x32c   : >> { %v2813_v54 = vpop.permute.xlu0 %2812  ;;  %v3086_v57 = vsel %vm15786_vm12, %v3062_v24, %v11147_v23  ;;  %v3063_v20 = vsel %vm1909_vm11, %v3039_v27, %v16061_v6  ;;  %v2012_v48 = vsel %vm15633_vm3, %v1995_v18, %v7167_v53  ;;  %v1969_v40 = vsel %vm1960_vm14, %v11178_v59, %v7067_v29 }
 0x32d   : >> { %v11264_v25 = vsel %vm1943_vm13, %v3075_v52, %v2813_v54  ;;  %v11273_v21 = vpop.permute.xlu1 %2587  ;;  %v3110_v0 = vsel %vm1943_vm13, %v3086_v57, %v2835_v51  ;;  %v3087_v23 = vsel %vm15786_vm12, %v3063_v20, %v2760_v12  ;;  %v7227_v46 = vunpack.i.l.bf16 %v16064_v60  ;;  %v11332_v52 = vld [vmem:[%s8926_s30 + $0x2a8] sm:$0xff]  ;;  %v16069_v54 = vld [vmem:[#allocation103_spill] sm:$0xff] }
 0x32e   : >> { %v3147_v50 = vrot.slane %v11264_v25, 1  ;;  %2820 = vrot.lane.b32.xlu0 %v16059_v58, %s7987_s15  ;;  %v2029_v12 = vsel %vm15631_vm7, %v2012_v48, %v7207_v32  ;;  %v1986_v9 = vsel %vm15635_vm15, %v1969_v40, %v7107_v15  ;;  %v3166_v36 = vrot.slane %v3110_v0, 1  ;;  %v16066_v15 = vld [vmem:[#allocation130_spill] sm:$0xff]  ;;  %v16072_v57 = vld [vmem:[#allocation59_spill] sm:$0xff]  ;;  %v16078_v48 = vld [vmem:[#allocation53_spill] sm:$0xff] }
 0x32f   : >> { %2597 = vrot.lane.b32.xlu1 %v16063_v8, %s7984_s12  ;;  %v2003_v29 = vsel %vm15634_vm1, %v1986_v9, %v7147_v47  ;;  %v11329_v55 = vrot.slane %v11318_v11, 7  ;;  %v11339_v63 = vrot.slane %v11332_v52, 7  ;;  %v6648_v24 = vunpack.i.h.bf16 %v16070_v38  ;;  %v16073_v47 = vld [vmem:[#allocation6_spill] sm:$0xff]  ;;  %v16074_v20 = vld [vmem:[#allocation7_spill] sm:$0xff] }
 0x330   : >> { %v2837_v16 = vpop.permute.xlu0 %2836  ;;  %v3148_v13 = vsel %vm844_vm2, %v3146_v28, %v3147_v50  ;;  %v2020_v51 = vsel %vm15633_vm3, %v2003_v29, %v7187_v2  ;;  %v6668_v27 = vunpack.i.h.bf16 %v16071_v43  ;;  %v6688_v6 = vunpack.i.h.bf16 %v16073_v47  ;;  %v16076_v2 = vld [vmem:[#allocation17_spill] sm:$0xff]  ;;  %v16079_v40 = vld [vmem:[#allocation23_spill] sm:$0xff] }
 0x331   : >> { %v11294_v35 = vsel %vm1943_vm13, %v3087_v23, %v2837_v16  ;;  %6337 = vmatprep.mubr.msk.f32.mxu0 %vm1960_vm14, %v3148_v13  ;;  %v11304_v59 = vpop.permute.xlu1 %2386  ;;  %v2037_v19 = vsel %vm15631_vm7, %v2020_v51, %v7227_v46  ;;  %v6708_v0 = vunpack.i.h.bf16 %v16074_v20  ;;  %vm16075_vm7 = vcmask 1040384   ;;  %v16077_v16 = vld [vmem:[#allocation22_spill] sm:$0xff]  ;;  %v7275_v29 = vld [vmem:[%s8926_s30 + $0x68] sm:$0xff]  ;;  %v16082_v47 = vld [vmem:[#allocation27_spill] sm:$0xff] }
 0x332   : >> { %v15632_v14 = vrot.slane %v11294_v35, 1  ;;  %2595 = vrot.lane.b32.xlu0 %v16065_v31, %s7984_s12  ;;  %3317 = vmatmul.mubr.f32.vlgmr.msra.gmra.mrb[0].mxu0 %v2029_v12  ;;  %v11356_v18 = vsel %vm16075_vm7, %v11329_v55, %v11339_v63  ;;  %v6728_v23 = vunpack.i.h.bf16 %v16076_v2  ;;  %v6748_v13 = vunpack.i.h.bf16 %v16077_v16  ;;  %v16080_v12 = vld [vmem:[#allocation24_spill] sm:$0xff]  ;;  %v16081_v51 = vld [vmem:[#allocation25_spill] sm:$0xff]  ;;  %v16083_v16 = vld [vmem:[#allocation31_spill] sm:$0xff] }
 0x333   : >> { %2621 = vrot.lane.b32.xlu1 %v16066_v15, %s7984_s12  ;;  %v6768_v46 = vunpack.i.h.bf16 %v16079_v40  ;;  %v6788_v9 = vunpack.i.h.bf16 %v16080_v12  ;;  %v6828_v20 = vunpack.i.h.bf16 %v16082_v47  ;;  %v7277_v47 = vld [vmem:[%s8926_s30 + $0x130] sm:$0x3]  ;;  %vm16101_vm7 = vcmask 982016  }
 0x334   : >> { %v11307_v41 = vpop.permute.xlu0 %2611  ;;  %v3168_v26 = vsel %vm844_vm2, %v3166_v36, %v15632_v14  ;;  %v7274_v36 = vld [vmem:[%s8926_s30 + $0x8] sm:$0xff]  ;;  %v16089_v14 = vld [vmem:[#allocation35_spill] sm:$0xff]  ;;  %v7188_v25 = vunpack.i.h.bf16 %v16062_v44 }
 0x335   : >> { %6345 = vmatprep.mubr.msk.f32.mxu1 %vm1960_vm14, %v3168_v26  ;;  %v11322_v10 = vpop.permute.xlu1 %2664  ;;  %v1792_v31 = vsel %vm225_vm0, %v7274_v36, %v6648_v24  ;;  %v1800_v26 = vsel %vm225_vm0, %v7275_v29, %v6668_v27  ;;  %v16084_v27 = vld [vmem:[#allocation33_spill] sm:$0xff]  ;;  %v11383_v36 = vld [vmem:[%s8926_s30 + $0x240] sm:$0xff] }
 0x336   : >> { %2619 = vrot.lane.b32.xlu0 %v16067_v62, %s7984_s12  ;;  %3357 = vmatmul.mubr.f32.vlgmr.msra.gmra.mrb[0].mxu1 %v2037_v19  ;;  %v6808_v19 = vunpack.i.h.bf16 %v16081_v51  ;;  %v1809_v38 = vsel %vm1807_vm4, %v1792_v31, %v6688_v6  ;;  %v1817_v43 = vsel %vm1807_vm4, %v1800_v26, %v6708_v0  ;;  %v6868_v40 = vunpack.i.h.bf16 %v16084_v27  ;;  %v16085_v31 = vld [vmem:[#allocation34_spill] sm:$0xff]  ;;  %v16086_v26 = vld [vmem:[#allocation41_spill] sm:$0xff] }
 0x337   : >> { %2672 = vrot.lane.b32.xlu1 %v16068_v45, %s7985_s13  ;;  %v1826_v2 = vsel %vm1824_vm5, %v1809_v38, %v6728_v23  ;;  %v1834_v24 = vsel %vm1824_vm5, %v1817_v43, %v6748_v13  ;;  %v6888_v29 = vunpack.i.h.bf16 %v16085_v31  ;;  %v6908_v23 = vunpack.i.h.bf16 %v16047_v34  ;;  %v16087_v38 = vld [vmem:[#allocation45_spill] sm:$0xff] }
 0x338   : >> { %v11324_v53 = vpop.permute.xlu0 %2388  ;;  %v1843_v6 = vsel %vm1841_vm6, %v1826_v2, %v6768_v46  ;;  %v1851_v0 = vsel %vm1841_vm6, %v1834_v24, %v6788_v9  ;;  %v6928_v51 = vunpack.i.h.bf16 %v16086_v26  ;;  %v6948_v43 = vunpack.i.h.bf16 %v16087_v38  ;;  %v16090_v2 = vld [vmem:[#allocation49_spill] sm:$0xff]  ;;  %v16091_v24 = vld [vmem:[#allocation76_spill] sm:$0xff]  ;;  %v16092_v38 = vld [vmem:[#allocation99_spill] sm:$0xff] }
 0x339   : >> { %v11336_v32 = vpop.permute.xlu1 %2439  ;;  %v1860_v13 = vsel %vm1858_vm8, %v1843_v6, %v6808_v19  ;;  %v1868_v9 = vsel %vm1858_vm8, %v1851_v0, %v6828_v20  ;;  %v6968_v34 = vunpack.i.h.bf16 %v16090_v2  ;;  %v6988_v19 = vunpack.i.h.bf16 %v16051_v42  ;;  %v16093_v0 = vld [vmem:[#allocation120_spill] sm:$0xff]  ;;  %v11424_v2 = vld [vmem:[%s8926_s30 + $0x248] sm:$0xff] }
 0x33a   : >> { %2396 = vrot.lane.b32.xlu0 %v16069_v54, %s7981_s9  ;;  %v1885_v26 = vsel %vm1875_vm9, %v1868_v9, %v6868_v40 }
 0x33b   : >> { %2696 = vrot.lane.b32.xlu1 %v11329_v55, %s7985_s13  ;;  %v1902_v42 = vsel %vm1892_vm10, %v1885_v26, %v6908_v23  ;;  %v16095_v26 = vld [vmem:[#allocation13_spill] sm:$0xff] }
 0x33c   : >> { %v11341_v3 = vpop.permute.xlu0 %2688  ;;  %v1919_v40 = vsel %vm1909_vm11, %v1902_v42, %v6948_v43 }
 0x33d   : >> { %v11349_v28 = vpop.permute.xlu1 %2463 }
 0x33e   : >> { %2674 = vrot.lane.b32.xlu0 %v16072_v57, %s7985_s13 }
 0x33f   : >> { %2449 = vrot.lane.b32.xlu1 %v16078_v48, %s7982_s10  ;;  %v6848_v48 = vunpack.i.h.bf16 %v16083_v16  ;;  %v16088_v16 = vld [vmem:[#allocation15_spill] sm:$0xff] }
 0x340   : >> { %v11360_v8 = vpop.permute.xlu0 %2441  ;;  %v2884_v27 = vsel %vm225_vm0, %v7277_v47, %v16088_v16 }
 0x341   : >> { %v2738_v54 = vpop.permute.xlu1 %2737  ;;  %v2908_v6 = vsel %vm1807_vm4, %v2884_v27, %v16091_v24  ;;  %v1877_v31 = vsel %vm1875_vm9, %v1860_v13, %v6848_v48  ;;  %v7008_v13 = vunpack.i.h.bf16 %v16052_v39  ;;  %v16094_v27 = vld [vmem:[#allocation135_spill] sm:$0xff]  ;;  %v1936_v24 = vsel %vm15786_vm12, %v1919_v40, %v6988_v19 }
 0x342   : >> { %2698 = vrot.lane.b32.xlu0 %v11356_v18, %s7985_s13  ;;  %v2932_v47 = vsel %vm1824_vm5, %v2908_v6, %v16092_v38  ;;  %v1894_v20 = vsel %vm1892_vm10, %v1877_v31, %v6888_v29  ;;  %v7088_v39 = vunpack.i.h.bf16 %v10177_v5  ;;  %v7128_v6 = vunpack.i.h.bf16 %v10278_v1  ;;  %v7279_v31 = vld [vmem:[%s8926_s30 + $0x190] sm:$0x3] }
 0x343   : >> { %2745 = vrot.lane.b32.xlu1 %v11383_v36, %s7986_s14  ;;  %v2956_v16 = vsel %vm1841_vm6, %v2932_v47, %v16093_v0  ;;  %v1911_v48 = vsel %vm1909_vm11, %v1894_v20, %v6928_v51  ;;  %v7048_v51 = vunpack.i.h.bf16 %v16054_v4  ;;  %v2896_v38 = vsel %vm225_vm0, %v7279_v31, %v16095_v26  ;;  %v16096_v4 = vld [vmem:[#allocation89_spill] sm:$0xff]  ;;  %v16097_v0 = vld [vmem:[#allocation110_spill] sm:$0xff] }
 0x344   : >> { %v11380_v12 = vpop.permute.xlu0 %2465  ;;  %v2980_v9 = vsel %vm1858_vm8, %v2956_v16, %v16094_v27  ;;  %v1928_v23 = vsel %vm15786_vm12, %v1911_v48, %v6968_v34  ;;  %v7280_v34 = vld [vmem:[%s8926_s30 + $0x238] sm:$0x3]  ;;  %v2920_v19 = vsel %vm1807_vm4, %v2896_v38, %v16096_v4  ;;  %v2578_v1 = vrot.slane %v11318_v11, 1  ;;  %v16099_v31 = vld [vmem:[#allocation137_spill] sm:$0xff] }
 0x345   : >> { %v11399_v46 = vpop.permute.xlu1 %2512  ;;  %v3004_v43 = vsel %vm1875_vm9, %v2980_v9, %v11171_v30  ;;  %v2579_v30 = vrot.slane %v11332_v52, 1  ;;  %v1945_v42 = vsel %vm1943_vm13, %v1928_v23, %v7008_v13  ;;  %v2944_v16 = vsel %vm1824_vm5, %v2920_v19, %v16097_v0  ;;  %v16098_v9 = vld [vmem:[#allocation133_spill] sm:$0xff] }
 0x346   : >> { %2473 = vrot.lane.b32.xlu0 %v16089_v14, %s7982_s10  ;;  %v3028_v47 = vsel %vm1892_vm10, %v3004_v43, %v11273_v21  ;;  %v7168_v21 = vunpack.i.h.bf16 %v10374_v37  ;;  %v7208_v27 = vunpack.i.h.bf16 %v16055_v61  ;;  %v2968_v13 = vsel %vm1841_vm6, %v2944_v16, %v16098_v9  ;;  %v11473_v61 = vld [vmem:[%s8926_s30 + $0x2b0] sm:$0x3] }
 0x347   : >> { %2769 = vrot.lane.b32.xlu1 %v11318_v11, %s7986_s14  ;;  %v3052_v5 = vsel %vm1909_vm11, %v3028_v47, %v11322_v10  ;;  %v1962_v10 = vsel %vm1960_vm14, %v1945_v42, %v7048_v51  ;;  %v7028_v37 = vunpack.i.h.bf16 %v16053_v56  ;;  %v16100_v51 = vld [vmem:[#allocation75_spill] sm:$0xff]  ;;  %v7068_v47 = vunpack.i.h.bf16 %v10127_v49 }
 0x348   : >> { %v11410_v14 = vpop.permute.xlu0 %2761  ;;  %v3076_v48 = vsel %vm15786_vm12, %v3052_v5, %v2738_v54  ;;  %v1979_v43 = vsel %vm15635_vm15, %v1962_v10, %v7088_v39  ;;  %v2992_v54 = vsel %vm1858_vm8, %v2968_v13, %v16099_v31  ;;  %v11479_v56 = vsel %vm844_vm2, %v2578_v1, %v2579_v30  ;;  %v7281_v5 = vld [vmem:[%s8926_s30 + $0x298] sm:$0x3] }
 0x349   : >> { %v11428_v29 = vpop.permute.xlu1 %2536  ;;  %v1996_v39 = vsel %vm15634_vm1, %v1979_v43, %v7128_v6  ;;  %v7108_v4 = vunpack.i.h.bf16 %v10234_v33  ;;  %v7148_v1 = vunpack.i.h.bf16 %v16060_v7  ;;  %v1953_v0 = vsel %vm1943_vm13, %v1936_v24, %v7028_v37  ;;  %v16102_v24 = vld [vmem:[#allocation73_spill] sm:$0xff]  ;;  %v16104_v43 = vld [vmem:[#allocation55_spill] sm:$0xff] }
 0x34a   : >> { %2747 = vrot.lane.b32.xlu0 %v11424_v2, %s7986_s14  ;;  %v1970_v7 = vsel %vm1960_vm14, %v1953_v0, %v7068_v47  ;;  %v16103_v9 = vrot.slane %v11294_v35, 1  ;;  %v16109_v0 = vld [vmem:[#allocation74_spill] sm:$0xff] }
 0x34b   : >> { %2522 = vrot.lane.b32.xlu1 %v7280_v34, %s7983_s11  ;;  %v3016_v34 = vsel %vm1875_vm9, %v2992_v54, %v11220_v22  ;;  %v2013_v22 = vsel %vm15633_vm3, %v1996_v39, %v7168_v21  ;;  %v16105_v39 = vld [vmem:[#allocation12_spill] sm:$0xff] }
 0x34c   : >> { %v11442_v20 = vpop.permute.xlu0 %2514  ;;  %v3040_v19 = vsel %vm1892_vm10, %v3016_v34, %v11307_v41  ;;  %v2030_v33 = vsel %vm16101_vm7, %v2013_v22, %v7208_v27  ;;  %v11499_v41 = vrot.slane %v11473_v61, 1  ;;  %v11557_v34 = vld [vmem:[%s8926_s30 + $0x250] sm:$0x3] }
 0x34d   : >> { %v2815_v40 = vpop.permute.xlu1 %2814  ;;  %v3064_v6 = vsel %vm1909_vm11, %v3040_v19, %v11341_v3  ;;  %v7228_v3 = vunpack.i.h.bf16 %v16064_v60 }
 0x34e   : >> { %2771 = vrot.lane.b32.xlu0 %v11332_v52, %s7986_s14  ;;  %v3100_v23 = vsel %vm1943_vm13, %v3076_v48, %v2815_v40  ;;  %v1987_v48 = vsel %vm15635_vm15, %v1970_v7, %v7108_v4  ;;  %v16111_v7 = vld [vmem:[#allocation62_spill] sm:$0xff] }
 0x34f   : >> { %v3149_v26 = vrot.slane %v3100_v23, 1  ;;  %2822 = vrot.lane.b32.xlu1 %v16100_v51, %s7987_s15  ;;  %v2004_v10 = vsel %vm15634_vm1, %v1987_v48, %v7148_v1  ;;  %v16108_v1 = vld [vmem:[#allocation101_spill] sm:$0xff] }
 0x350   : >> { %v11468_v38 = vpop.permute.xlu0 %2538  ;;  %v2021_v13 = vsel %vm15633_vm3, %v2004_v10, %v7188_v25  ;;  %v16113_v10 = vld [vmem:[#allocation91_spill] sm:$0xff] }
 0x351   : >> { %v11487_v42 = vpop.permute.xlu1 %2589  ;;  %v3150_v49 = vsel %vm844_vm2, %v3147_v50, %v3149_v26  ;;  %v3088_v50 = vsel %vm15786_vm12, %v3064_v6, %v11410_v14  ;;  %v11517_v14 = vsel %vm844_vm2, %v2579_v30, %v11499_v41  ;;  %v2038_v23 = vsel %vm16101_vm7, %v2021_v13, %v7228_v3 }
 0x352   : >> { %2546 = vrot.lane.b32.xlu0 %v7281_v5, %s7983_s11  ;;  %6338 = vmatprep.mubr.msk.f32.mxu0 %vm1960_vm14, %v3150_v49  ;;  %v16107_v49 = vld [vmem:[#allocation10_spill] sm:$0xff]  ;;  %vm16123_vm7 = vcmask 1040384  }
 0x353   : >> { %2846 = vrot.lane.b32.xlu1 %v11479_v56, %s7987_s15  ;;  %3322 = vmatmul.mubr.f32.gmra.mrb[2].mxu0 %v2030_v33 }
 0x354   : >> { %v2839_v21 = vpop.permute.xlu0 %2838 }
 0x355   : >> { %v3112_v16 = vsel %vm1943_vm13, %v3088_v50, %v2839_v21  ;;  %v11513_v44 = vpop.permute.xlu1 %2613  ;;  %v7285_v21 = vld [vmem:[%s8926_s30 + $0x1a0] sm:$0xff] }
 0x356   : >> { %v3169_v40 = vrot.slane %v3112_v16, 1  ;;  %2824 = vrot.lane.b32.xlu0 %v16102_v24, %s7987_s15  ;;  %v2898_v3 = vsel %vm225_vm0, %v7285_v21, %v16111_v7  ;;  %v16112_v16 = vld [vmem:[#allocation98_spill] sm:$0xff] }
 0x357   : >> { %2599 = vrot.lane.b32.xlu1 %v16059_v58, %s7984_s12 }
 0x358   : >> { %v2592_v27 = vpop.permute.xlu0 %2591  ;;  %v3170_v60 = vsel %vm844_vm2, %v16103_v9, %v3169_v40  ;;  %v2922_v9 = vsel %vm1807_vm4, %v2898_v3, %v16113_v10 }
 0x359   : >> { %6346 = vmatprep.mubr.msk.f32.mxu1 %vm1960_vm14, %v3170_v60  ;;  %v11530_v30 = vpop.permute.xlu1 %2390  ;;  %v16114_v60 = vld [vmem:[#allocation119_spill] sm:$0xff] }
 0x35a   : >> { %2848 = vrot.lane.b32.xlu0 %v11517_v14, %s7987_s15  ;;  %3362 = vmatmul.mubr.f32.gmra.mrb[2].mxu1 %v2038_v23 }
 0x35b   : >> { %2398 = vrot.lane.b32.xlu1 %v16067_v62, %s7981_s9 }
 0x35c   : >> { %v11532_v37 = vpop.permute.xlu0 %2615 }
 0x35d   : >> { %v2669_v58 = vpop.permute.xlu1 %2668 }
 0x35e   : >> { %2623 = vrot.lane.b32.xlu0 %v11050_v17, %s7984_s12 }
 0x35f   : >> { %2676 = vrot.lane.b32.xlu1 %v16104_v43, %s7985_s13 }
 0x360   : >> { %v2667_v35 = vpop.permute.xlu0 %2666 }
 0x361   : >> { %v2693_v31 = vpop.permute.xlu1 %2692 }
 0x362   : >> { %2400 = vrot.lane.b32.xlu0 %v16066_v15, %s7981_s9 }
 0x363   : >> { %2451 = vrot.lane.b32.xlu1 %v16068_v45, %s7982_s10  ;;  %v7283_v45 = vld [vmem:[%s8926_s30 + $0x140] sm:$0xff] }
 0x364   : >> { %v11542_v54 = vpop.permute.xlu0 %2690  ;;  %v2886_v4 = vsel %vm225_vm0, %v7283_v45, %v16105_v39  ;;  %v7286_v45 = vld [vmem:[%s8926_s30 + $0x198] sm:$0xff]  ;;  %v16115_v39 = vld [vmem:[#allocation57_spill] sm:$0xff] }
 0x365   : >> { %v11548_v62 = vpop.permute.xlu1 %2467 }
 0x366   : >> { %2700 = vrot.lane.b32.xlu0 %v11339_v63, %s7985_s13 }
 0x367   : >> { %2475 = vrot.lane.b32.xlu1 %v11329_v55, %s7982_s10  ;;  %v16106_v55 = vld [vmem:[#allocation78_spill] sm:$0xff] }
 0x368   : >> { %v11550_v26 = vpop.permute.xlu0 %2443  ;;  %v2910_v5 = vsel %vm1807_vm4, %v2886_v4, %v16106_v55  ;;  %v2897_v4 = vsel %vm225_vm0, %v7286_v45, %v16115_v39  ;;  %v16116_v55 = vld [vmem:[#allocation112_spill] sm:$0xff] }
 0x369   : >> { %v2742_v15 = vpop.permute.xlu1 %2741  ;;  %v2934_v6 = vsel %vm1824_vm5, %v2910_v5, %v16108_v1  ;;  %v11681_v45 = vld [vmem:[%s8926_s30 + $0x2c0] sm:$0xff] }
 0x36a   : >> { %2453 = vrot.lane.b32.xlu0 %v16072_v57, %s7982_s10  ;;  %v7284_v57 = vld [vmem:[%s8926_s30 + $0x138] sm:$0xff] }
 0x36b   : >> { %2749 = vrot.lane.b32.xlu1 %v11557_v34, %s7986_s14  ;;  %v2885_v22 = vsel %vm225_vm0, %v7284_v57, %v16107_v49 }
 0x36c   : >> { %v2740_v47 = vpop.permute.xlu0 %2739  ;;  %v2909_v25 = vsel %vm1807_vm4, %v2885_v22, %v16109_v0  ;;  %v16117_v22 = vld [vmem:[#allocation87_spill] sm:$0xff] }
 0x36d   : >> { %v2766_v19 = vpop.permute.xlu1 %2765  ;;  %v2933_v48 = vsel %vm1824_vm5, %v2909_v25, %v16112_v16  ;;  %v16118_v25 = vld [vmem:[#allocation109_spill] sm:$0xff] }
 0x36e   : >> { %2477 = vrot.lane.b32.xlu0 %v11356_v18, %s7982_s10  ;;  %v16110_v18 = vld [vmem:[#allocation122_spill] sm:$0xff]  ;;  %v2957_v13 = vsel %vm1841_vm6, %v2933_v48, %v16114_v60 }
 0x36f   : >> { %2524 = vrot.lane.b32.xlu1 %v11383_v36, %s7983_s11  ;;  %v2958_v50 = vsel %vm1841_vm6, %v2934_v6, %v16110_v18  ;;  %v2981_v5 = vsel %vm1858_vm8, %v2957_v13, %v11336_v32 }
 0x370   : >> { %v2764_v33 = vpop.permute.xlu0 %2763  ;;  %v2982_v40 = vsel %vm1858_vm8, %v2958_v50, %v11360_v8  ;;  %v2946_v8 = vsel %vm1824_vm5, %v2922_v9, %v16116_v55  ;;  %v3005_v6 = vsel %vm1875_vm9, %v2981_v5, %v11399_v46 }
 0x371   : >> { %v11588_v36 = vpop.permute.xlu1 %2540  ;;  %v3006_v23 = vsel %vm1875_vm9, %v2982_v40, %v11442_v20  ;;  %v2921_v20 = vsel %vm1807_vm4, %v2897_v4, %v16117_v22  ;;  %v2970_v1 = vsel %vm1841_vm6, %v2946_v8, %v11324_v53  ;;  %v2658_v4 = vrot.slane %v11681_v45, 7  ;;  %v16122_v8 = vld [vmem:[#allocation61_spill] sm:$0xff] }
 0x372   : >> { %2773 = vrot.lane.b32.xlu0 %v11473_v61, %s7986_s14  ;;  %v3030_v57 = vsel %vm1892_vm10, %v3006_v23, %v2592_v27  ;;  %v2945_v32 = vsel %vm1824_vm5, %v2921_v20, %v16118_v25  ;;  %v2994_v27 = vsel %vm1858_vm8, %v2970_v1, %v11380_v12  ;;  %v11678_v23 = vld [vmem:[%s8926_s30 + $0x2b8] sm:$0xff]  ;;  %v7288_v25 = vld [vmem:[%s8926_s30 + $0x1a8] sm:$0x3] }
 0x373   : >> { %2548 = vrot.lane.b32.xlu1 %v11318_v11, %s7983_s11  ;;  %v3054_v0 = vsel %vm1909_vm11, %v3030_v57, %v2669_v58  ;;  %v3029_v11 = vsel %vm1892_vm10, %v3005_v6, %v11487_v42  ;;  %v2969_v46 = vsel %vm1841_vm6, %v2945_v32, %v11304_v59  ;;  %v3018_v58 = vsel %vm1875_vm9, %v2994_v27, %v11468_v38  ;;  %v16119_v59 = vld [vmem:[#allocation71_spill] sm:$0xff]  ;;  %v16125_v32 = vld [vmem:[#allocation26_spill] sm:$0xff] }
 0x374   : >> { %v11604_v49 = vpop.permute.xlu0 %2516  ;;  %v3078_v18 = vsel %vm15786_vm12, %v3054_v0, %v2742_v15  ;;  %v3053_v50 = vsel %vm1909_vm11, %v3029_v11, %v2667_v35  ;;  %v2993_v12 = vsel %vm1858_vm8, %v2969_v46, %v11349_v28  ;;  %v3042_v42 = vsel %vm1892_vm10, %v3018_v58, %v11532_v37  ;;  %v7287_v0 = vld [vmem:[%s8926_s30 + $0x260] sm:$0xff]  ;;  %v7289_v11 = vld [vmem:[%s8926_s30 + $0x258] sm:$0xff]  ;;  %v7290_v46 = vld [vmem:[%s8926_s30 + $0x148] sm:$0x3] }
 0x375   : >> { %v2819_v53 = vpop.permute.xlu1 %2818  ;;  %v3017_v38 = vsel %vm1875_vm9, %v2993_v12, %v11428_v29  ;;  %v3066_v35 = vsel %vm1909_vm11, %v3042_v42, %v2693_v31  ;;  %v2899_v27 = vsel %vm225_vm0, %v7288_v25, %v16125_v32  ;;  %v16134_v25 = vld [vmem:[#allocation48_spill] sm:$0xff] }
 0x376   : >> { %2526 = vrot.lane.b32.xlu0 %v11424_v2, %s7983_s11  ;;  %v11630_v21 = vsel %vm1943_vm13, %v3078_v18, %v2819_v53  ;;  %v3077_v2 = vsel %vm15786_vm12, %v3053_v50, %v2740_v47  ;;  %v3041_v28 = vsel %vm1892_vm10, %v3017_v38, %v11513_v44  ;;  %v3090_v37 = vsel %vm15786_vm12, %v3066_v35, %v2766_v19  ;;  %v16120_v19 = vld [vmem:[#allocation29_spill] sm:$0xff]  ;;  %v16126_v53 = vld [vmem:[#allocation90_spill] sm:$0xff]  ;;  %v16128_v50 = vld [vmem:[#allocation111_spill] sm:$0xff] }
 0x377   : >> { %v3152_v15 = vrot.slane %v11630_v21, 1  ;;  %2826 = vrot.lane.b32.xlu1 %v16119_v59, %s7987_s15  ;;  %v3065_v48 = vsel %vm1909_vm11, %v3041_v28, %v11542_v54  ;;  %v16130_v35 = vld [vmem:[#allocation100_spill] sm:$0xff] }
 0x378   : >> { %v2817_v7 = vpop.permute.xlu0 %2816  ;;  %v3089_v29 = vsel %vm15786_vm12, %v3065_v48, %v2764_v33 }
 0x379   : >> { %v3101_v3 = vsel %vm1943_vm13, %v3077_v2, %v2817_v7  ;;  %v2843_v47 = vpop.permute.xlu1 %2842  ;;  %v16129_v2 = vld [vmem:[#allocation77_spill] sm:$0xff] }
 0x37a   : >> { %v3151_v16 = vrot.slane %v3101_v3, 1  ;;  %2550 = vrot.lane.b32.xlu0 %v11332_v52, %s7983_s11  ;;  %v11652_v40 = vsel %vm1943_vm13, %v3090_v37, %v2843_v47  ;;  %v16131_v47 = vld [vmem:[#allocation121_spill] sm:$0xff] }
 0x37b   : >> { %v3172_v31 = vrot.slane %v11652_v40, 1  ;;  %2601 = vrot.lane.b32.xlu1 %v16100_v51, %s7984_s12  ;;  %v16121_v51 = vld [vmem:[#allocation47_spill] sm:$0xff] }
 0x37c   : >> { %v2841_v10 = vpop.permute.xlu0 %2840  ;;  %v3153_v44 = vsel %vm844_vm2, %v3151_v16, %v3152_v15  ;;  %v6335_v16 = vld [vmem:[%s8926_s30 + $0x2c8] sm:$0x3]  ;;  %v16135_v40 = vld [vmem:[#allocation39_spill] sm:$0xff] }
 0x37d   : >> { %v3113_v52 = vsel %vm1943_vm13, %v3089_v29, %v2841_v10  ;;  %6339 = vmatprep.mubr.msk.f32.mxu0 %vm1960_vm14, %v3153_v44  ;;  %v2618_v33 = vpop.permute.xlu1 %2617 }
 0x37e   : >> { %v3171_v54 = vrot.slane %v3113_v52, 1  ;;  %2850 = vrot.lane.b32.xlu0 %v11499_v41, %s7987_s15  ;;  %3327 = vmatmul.mubr.f32.gmra.mrb[4].mxu0 %v16120_v19  ;;  %v2808_v19 = vrot.slane %v6335_v16, 1 }
 0x37f   : >> { %2625 = vrot.lane.b32.xlu1 %v11479_v56, %s7984_s12  ;;  %v2657_v56 = vrot.slane %v11678_v23, 7 }
 0x380   : >> { %v2594_v9 = vpop.permute.xlu0 %2593  ;;  %v3173_v60 = vsel %vm844_vm2, %v3171_v54, %v3172_v31  ;;  %v2806_v54 = vrot.slane %v11681_v45, 1 }
 0x381   : >> { %6347 = vmatprep.mubr.msk.f32.mxu1 %vm1960_vm14, %v3173_v60  ;;  %v11675_v13 = vpop.permute.xlu1 %2394  ;;  %v2659_v5 = vsel %vm16123_vm7, %v2657_v56, %v2658_v4 }
 0x382   : >> { %2603 = vrot.lane.b32.xlu0 %v16102_v24, %s7984_s12  ;;  %3367 = vmatmul.mubr.f32.gmra.mrb[4].mxu1 %v16121_v51  ;;  %v2805_v51 = vrot.slane %v11678_v23, 1 }
 0x383   : >> { %2402 = vrot.lane.b32.xlu1 %v11050_v17, %s7981_s9  ;;  %v16124_v17 = vld [vmem:[#allocation28_spill] sm:$0xff] }
 0x384   : >> { %v11683_v39 = vpop.permute.xlu0 %2392 }
 0x385   : >> { %v2695_v24 = vpop.permute.xlu1 %2694 }
 0x386   : >> { %2627 = vrot.lane.b32.xlu0 %v11517_v14, %s7984_s12 }
 0x387   : >> { %2680 = vrot.lane.b32.xlu1 %v16122_v8, %s7985_s13  ;;  %v16132_v8 = vld [vmem:[#allocation86_spill] sm:$0xff] }
 0x388   : >> { %v2671_v55 = vpop.permute.xlu0 %2670 }
 0x389   : >> { %v11698_v57 = vpop.permute.xlu1 %2447 }
 0x38a   : >> { %2678 = vrot.lane.b32.xlu0 %v16124_v17, %s7985_s13 }
 0x38b   : >> { %2704 = vrot.lane.b32.xlu1 %v2659_v5, %s7985_s13  ;;  %v2809_v5 = vsel %vm844_vm2, %v2806_v54, %v2808_v19 }
 0x38c   : >> { %v11700_v22 = vpop.permute.xlu0 %2445 }
 0x38d   : >> { %v11704_v14 = vpop.permute.xlu1 %2471 }
 0x38e   : >> { %2702 = vrot.lane.b32.xlu0 %v2657_v56, %s7985_s13 }
 0x38f   : >> { %2479 = vrot.lane.b32.xlu1 %v11339_v63, %s7982_s10  ;;  %v2923_v63 = vsel %vm1807_vm4, %v2899_v27, %v16126_v53  ;;  %v16136_v27 = vld [vmem:[#allocation60_spill] sm:$0xff] }
 0x390   : >> { %v11706_v20 = vpop.permute.xlu0 %2469  ;;  %v2947_v12 = vsel %vm1824_vm5, %v2923_v63, %v16128_v50  ;;  %v7292_v50 = vld [vmem:[%s8926_s30 + $0x150] sm:$0xff] }
 0x391   : >> { %v2768_v1 = vpop.permute.xlu1 %2767  ;;  %v2971_v38 = vsel %vm1841_vm6, %v2947_v12, %v11530_v30  ;;  %v16138_v12 = vld [vmem:[#allocation21_spill] sm:$0xff] }
 0x392   : >> { %2455 = vrot.lane.b32.xlu0 %v16104_v43, %s7982_s10  ;;  %v16127_v43 = vld [vmem:[#allocation11_spill] sm:$0xff]  ;;  %v2995_v28 = vsel %vm1858_vm8, %v2971_v38, %v11548_v62  ;;  %v16139_v38 = vld [vmem:[#allocation80_spill] sm:$0xff] }
 0x393   : >> { %2753 = vrot.lane.b32.xlu1 %v7287_v0, %s7986_s14  ;;  %v2887_v58 = vsel %vm225_vm0, %v7290_v46, %v16127_v43  ;;  %v3019_v29 = vsel %vm1875_vm9, %v2995_v28, %v11588_v36  ;;  %v16140_v28 = vld [vmem:[#allocation8_spill] sm:$0xff] }
 0x394   : >> { %v2744_v6 = vpop.permute.xlu0 %2743  ;;  %v2911_v7 = vsel %vm1807_vm4, %v2887_v58, %v16129_v2  ;;  %v3043_v10 = vsel %vm1892_vm10, %v3019_v29, %v2618_v33  ;;  %v2888_v2 = vsel %vm225_vm0, %v7292_v50, %v16138_v12 }
 0x395   : >> { %v11719_v18 = vpop.permute.xlu1 %2520  ;;  %v2935_v3 = vsel %vm1824_vm5, %v2911_v7, %v16130_v35  ;;  %v3067_v52 = vsel %vm1909_vm11, %v3043_v10, %v2695_v24  ;;  %v2912_v35 = vsel %vm1807_vm4, %v2888_v2, %v16139_v38 }
 0x396   : >> { %2751 = vrot.lane.b32.xlu0 %v7289_v11, %s7986_s14  ;;  %v2959_v48 = vsel %vm1841_vm6, %v2935_v3, %v16131_v47  ;;  %v3091_v60 = vsel %vm15786_vm12, %v3067_v52, %v2768_v1  ;;  %v2807_v1 = vsel %vm844_vm2, %v2805_v51, %v2806_v54  ;;  %v7293_v3 = vld [vmem:[%s8926_s30 + $0x158] sm:$0xff]  ;;  %v16141_v47 = vld [vmem:[#allocation104_spill] sm:$0xff]  ;;  %v7294_v54 = vld [vmem:[%s8926_s30 + $0x1b0] sm:$0xff] }
 0x397   : >> { %2777 = vrot.lane.b32.xlu1 %v11681_v45, %s7986_s14  ;;  %v2983_v30 = vsel %vm1858_vm8, %v2959_v48, %v11550_v26  ;;  %v16137_v45 = vld [vmem:[#allocation85_spill] sm:$0xff]  ;;  %v2936_v48 = vsel %vm1824_vm5, %v2912_v35, %v16141_v47 }
 0x398   : >> { %v11728_v42 = vpop.permute.xlu0 %2518  ;;  %v3007_v62 = vsel %vm1875_vm9, %v2983_v30, %v11604_v49  ;;  %v16142_v30 = vld [vmem:[#allocation79_spill] sm:$0xff]  ;;  %v16146_v51 = vld [vmem:[#allocation93_spill] sm:$0xff] }
 0x399   : >> { %v11742_v37 = vpop.permute.xlu1 %2544  ;;  %v3031_v36 = vsel %vm1892_vm10, %v3007_v62, %v2594_v9  ;;  %v16143_v62 = vld [vmem:[#allocation124_spill] sm:$0xff] }
 0x39a   : >> { %2775 = vrot.lane.b32.xlu0 %v11678_v23, %s7986_s14  ;;  %v3055_v33 = vsel %vm1909_vm11, %v3031_v36, %v2671_v55  ;;  %v2960_v52 = vsel %vm1841_vm6, %v2936_v48, %v16143_v62 }
 0x39b   : >> { %2552 = vrot.lane.b32.xlu1 %v11473_v61, %s7983_s11  ;;  %v3079_v49 = vsel %vm15786_vm12, %v3055_v33, %v2744_v6  ;;  %v2984_v33 = vsel %vm1858_vm8, %v2960_v52, %v11700_v22 }
 0x39c   : >> { %v11752_v44 = vpop.permute.xlu0 %2542 }
 0x39d   : >> { %v2845_v26 = vpop.permute.xlu1 %2844 }
 0x39e   : >> { %2528 = vrot.lane.b32.xlu0 %v11557_v34, %s7983_s11  ;;  %v3115_v61 = vsel %vm1943_vm13, %v3091_v60, %v2845_v26  ;;  %v16133_v34 = vld [vmem:[#allocation88_spill] sm:$0xff]  ;;  %v16145_v60 = vld [vmem:[#allocation102_spill] sm:$0xff]  ;;  %s11975_s11 = scalar_lea.vmem [#allocation3], %s722_s29  ;;  %s12145_s29 = smov (%p718_p4), 0  }
 0x39f   : >> { %v3174_v56 = vrot.slane %v3115_v61, 1  ;;  %2830 = vrot.lane.b32.xlu1 %v16132_v8, %s7987_s15  ;;  %v3008_v8 = vsel %vm1875_vm9, %v2984_v33, %v11728_v42 }
 0x3a0   : >> { %v2821_v24 = vpop.permute.xlu0 %2820 }
 0x3a1   : >> { %v3103_v9 = vsel %vm1943_vm13, %v3079_v49, %v2821_v24  ;;  %v11774_v55 = vpop.permute.xlu1 %2597  ;;  %v3175_v23 = vsel %vm844_vm2, %v3172_v31, %v3174_v56  ;;  %v16147_v56 = vld [vmem:[#allocation123_spill] sm:$0xff] }
 0x3a2   : >> { %v3154_v17 = vrot.slane %v3103_v9, 1  ;;  %2828 = vrot.lane.b32.xlu0 %v16133_v34, %s7987_s15  ;;  %6348 = vmatprep.mubr.msk.f32.mxu1 %vm1960_vm14, %v3175_v23  ;;  %v7295_v9 = vld [vmem:[%s8926_s30 + $0x1b8] sm:$0xff]  ;;  %v16149_v34 = vld [vmem:[#allocation114_spill] sm:$0xff] }
 0x3a3   : >> { %2854 = vrot.lane.b32.xlu1 %v2809_v5, %s7987_s15  ;;  %3372 = vmatmul.mubr.f32.gmra.mrb[6].mxu1 %v16134_v25  ;;  %v16148_v5 = vld [vmem:[#allocation63_spill] sm:$0xff]  ;;  %v16150_v25 = vld [vmem:[#allocation92_spill] sm:$0xff] }
 0x3a4   : >> { %v2596_v6 = vpop.permute.xlu0 %2595  ;;  %v3155_v0 = vsel %vm844_vm2, %v3152_v15, %v3154_v17  ;;  %v2901_v17 = vsel %vm225_vm0, %v7295_v9, %v16148_v5  ;;  %v16155_v9 = vld [vmem:[#allocation82_spill] sm:$0xff] }
 0x3a5   : >> { %6340 = vmatprep.mubr.msk.f32.mxu0 %vm1960_vm14, %v3155_v0  ;;  %v11789_v31 = vpop.permute.xlu1 %2621 }
 0x3a6   : >> { %2852 = vrot.lane.b32.xlu0 %v2807_v1, %s7987_s15  ;;  %3332 = vmatmul.mubr.f32.gmra.mrb[6].mxu0 %v16135_v40  ;;  %v3032_v1 = vsel %vm1892_vm10, %v3008_v8, %v2596_v6  ;;  %v2925_v40 = vsel %vm1807_vm4, %v2901_v17, %v16150_v25  ;;  %v16156_v17 = vld [vmem:[#allocation106_spill] sm:$0xff] }
 0x3a7   : >> { %2629 = vrot.lane.b32.xlu1 %v11499_v41, %s7984_s12  ;;  %v7291_v41 = vld [vmem:[%s8926_s30 + $0x268] sm:$0x3] }
 0x3a8   : >> { %v2620_v32 = vpop.permute.xlu0 %2619 }
 0x3a9   : >> { %v2673_v21 = vpop.permute.xlu1 %2672 }
 0x3aa   : >> { %2605 = vrot.lane.b32.xlu0 %v16119_v59, %s7984_s12 }
 0x3ab   : >> { %2706 = vrot.lane.b32.xlu1 %v2658_v4, %s7985_s13 }
 0x3ac   : >> { %v11795_v15 = vpop.permute.xlu0 %2396 }
 0x3ad   : >> { %v2697_v11 = vpop.permute.xlu1 %2696 }
 0x3ae   : >> { %2682 = vrot.lane.b32.xlu0 %v16136_v27, %s7985_s13 }
 0x3af   : >> { %2779 = vrot.lane.b32.xlu1 %v6335_v16, %s7986_s14  ;;  %v2889_v16 = vsel %vm225_vm0, %v7293_v3, %v16140_v28 }
 0x3b0   : >> { %v2675_v53 = vpop.permute.xlu0 %2674  ;;  %v2913_v10 = vsel %vm1807_vm4, %v2889_v16, %v16142_v30 }
 0x3b1   : >> { %v11805_v59 = vpop.permute.xlu1 %2449  ;;  %v2937_v26 = vsel %vm1824_vm5, %v2913_v10, %v16145_v60 }
 0x3b2   : >> { %2755 = vrot.lane.b32.xlu0 %v7291_v41, %s7986_s14  ;;  %v2961_v24 = vsel %vm1841_vm6, %v2937_v26, %v16147_v56  ;;  %v3056_v41 = vsel %vm1909_vm11, %v3032_v1, %v2673_v21  ;;  %v16154_v56 = vld [vmem:[#allocation51_spill] sm:$0xff] }
 0x3b3   : >> { %2856 = vrot.lane.b32.xlu1 %v2808_v19, %s7987_s15  ;;  %v16144_v19 = vld [vmem:[#allocation64_spill] sm:$0xff]  ;;  %v2985_v22 = vsel %vm1858_vm8, %v2961_v24, %v11698_v57 }
 0x3b4   : >> { %v2699_v63 = vpop.permute.xlu0 %2698  ;;  %v2900_v36 = vsel %vm225_vm0, %v7294_v54, %v16144_v19  ;;  %v3009_v27 = vsel %vm1875_vm9, %v2985_v22, %v11719_v18  ;;  %v16157_v22 = vld [vmem:[#allocation126_spill] sm:$0xff] }
 0x3b5   : >> { %v2746_v4 = vpop.permute.xlu1 %2745  ;;  %v2924_v49 = vsel %vm1807_vm4, %v2900_v36, %v16146_v51  ;;  %v3033_v6 = vsel %vm1892_vm10, %v3009_v27, %v11774_v55  ;;  %v7297_v27 = vld [vmem:[%s8926_s30 + $0x1c0] sm:$0x3] }
 0x3b6   : >> { %2832 = vrot.lane.b32.xlu0 %v16137_v45, %s7987_s15  ;;  %v2948_v23 = vsel %vm1824_vm5, %v2924_v49, %v16149_v34  ;;  %v16151_v45 = vld [vmem:[#allocation113_spill] sm:$0xff]  ;;  %v3080_v12 = vsel %vm15786_vm12, %v3056_v41, %v2746_v4  ;;  %v3057_v21 = vsel %vm1909_vm11, %v3033_v6, %v2675_v53  ;;  %v7296_v49 = vld [vmem:[%s8926_s30 + $0x160] sm:$0x3]  ;;  %v16158_v41 = vld [vmem:[#allocation66_spill] sm:$0xff] }
 0x3b7   : >> { %v2972_v42 = vsel %vm1841_vm6, %v2948_v23, %v11683_v39  ;;  %v2949_v50 = vsel %vm1824_vm5, %v2925_v40, %v16151_v45  ;;  %v2890_v24 = vsel %vm225_vm0, %v7296_v49, %v16154_v56  ;;  %v2902_v45 = vsel %vm225_vm0, %v7297_v27, %v16158_v41  ;;  %v16159_v6 = vld [vmem:[#allocation95_spill] sm:$0xff]  ;;  %v16165_v27 = vld [vmem:[#allocation50_spill] sm:$0xff] }
 0x3b8   : >> { %v11810_v46 = vpop.permute.xlu0 %2473  ;;  %v2996_v57 = vsel %vm1858_vm8, %v2972_v42, %v11706_v20  ;;  %v2973_v39 = vsel %vm1841_vm6, %v2949_v50, %v11675_v13  ;;  %v2914_v5 = vsel %vm1807_vm4, %v2890_v24, %v16155_v9  ;;  %v7298_v9 = vld [vmem:[%s8926_s30 + $0x170] sm:$0xff] }
 0x3b9   : >> { %v2770_v43 = vpop.permute.xlu1 %2769  ;;  %v3020_v18 = vsel %vm1875_vm9, %v2996_v57, %v11752_v44  ;;  %v2997_v35 = vsel %vm1858_vm8, %v2973_v39, %v11704_v14  ;;  %v2938_v34 = vsel %vm1824_vm5, %v2914_v5, %v16156_v17  ;;  %v16160_v39 = vld [vmem:[#allocation116_spill] sm:$0xff]  ;;  %v16163_v5 = vld [vmem:[#allocation18_spill] sm:$0xff] }
 0x3ba   : >> { %v3044_v20 = vsel %vm1892_vm10, %v3020_v18, %v2620_v32  ;;  %v3021_v4 = vsel %vm1875_vm9, %v2997_v35, %v11742_v37  ;;  %v2962_v1 = vsel %vm1841_vm6, %v2938_v34, %v16157_v22  ;;  %v2892_v17 = vsel %vm225_vm0, %v7298_v9, %v16163_v5 }
 0x3bb   : >> { %v3068_v13 = vsel %vm1909_vm11, %v3044_v20, %v2697_v11  ;;  %v3045_v44 = vsel %vm1892_vm10, %v3021_v4, %v11789_v31  ;;  %v2986_v25 = vsel %vm1858_vm8, %v2962_v1, %v11805_v59  ;;  %v16164_v1 = vld [vmem:[#allocation84_spill] sm:$0xff] }
 0x3bc   : >> { %v2748_v58 = vpop.permute.xlu0 %2747  ;;  %v3092_v53 = vsel %vm15786_vm12, %v3068_v13, %v2770_v43  ;;  %v3069_v32 = vsel %vm1909_vm11, %v3045_v44, %v2699_v63  ;;  %v16152_v43 = vld [vmem:[#allocation43_spill] sm:$0xff] }
 0x3bd   : >> { %v11815_v7 = vpop.permute.xlu1 %2522  ;;  %v3081_v55 = vsel %vm15786_vm12, %v3057_v21, %v2748_v58 }
 0x3be   : >> { %v3010_v42 = vsel %vm1875_vm9, %v2986_v25, %v11815_v7  ;;  %v2916_v25 = vsel %vm1807_vm4, %v2892_v17, %v16164_v1  ;;  %v16176_v17 = vld [vmem:[#allocation115_spill] sm:$0xff] }
 0x3c0   : >> { %v2772_v29 = vpop.permute.xlu0 %2771 }
 0x3c1   : >> { %v2823_v61 = vpop.permute.xlu1 %2822  ;;  %v3093_v48 = vsel %vm15786_vm12, %v3069_v32, %v2772_v29  ;;  %v16153_v29 = vld [vmem:[#allocation52_spill] sm:$0xff] }
 0x3c2   : >> { %v3104_v38 = vsel %vm1943_vm13, %v3080_v12, %v2823_v61  ;;  %v2926_v12 = vsel %vm1807_vm4, %v2902_v45, %v16159_v6  ;;  %v16166_v45 = vld [vmem:[#allocation108_spill] sm:$0xff] }
 0x3c3   : >> { %v3156_v16 = vrot.slane %v3104_v38, 1  ;;  %v2950_v59 = vsel %vm1824_vm5, %v2926_v12, %v16160_v39 }
 0x3c4   : >> { %v11849_v0 = vpop.permute.xlu0 %2546  ;;  %v2974_v7 = vsel %vm1841_vm6, %v2950_v59, %v11795_v15  ;;  %v16168_v59 = vld [vmem:[#allocation128_spill] sm:$0xff] }
 0x3c5   : >> { %v2847_v2 = vpop.permute.xlu1 %2846  ;;  %v2998_v35 = vsel %vm1858_vm8, %v2974_v7, %v11810_v46  ;;  %v16161_v46 = vld [vmem:[#allocation44_spill] sm:$0xff]  ;;  %v16169_v7 = vld [vmem:[#allocation70_spill] sm:$0xff] }
 0x3c6   : >> { %v3116_v58 = vsel %vm1943_vm13, %v3092_v53, %v2847_v2 }
 0x3c7   : >> { %v3176_v10 = vrot.slane %v3116_v58, 1 }
 0x3c8   : >> { %v2825_v3 = vpop.permute.xlu0 %2824 }
 0x3c9   : >> { %v3105_v28 = vsel %vm1943_vm13, %v3081_v55, %v2825_v3  ;;  %v2600_v14 = vpop.permute.xlu1 %2599  ;;  %v3022_v3 = vsel %vm1875_vm9, %v2998_v35, %v11849_v0  ;;  %v16170_v35 = vld [vmem:[#allocation105_spill] sm:$0xff] }
 0x3ca   : >> { %v3157_v47 = vrot.slane %v3105_v28, 1  ;;  %v3034_v50 = vsel %vm1892_vm10, %v3010_v42, %v2600_v14  ;;  %v7299_v42 = vld [vmem:[%s8926_s30 + $0x168] sm:$0xff] }
 0x3cb   : >> { %v2891_v41 = vsel %vm225_vm0, %v7299_v42, %v16165_v27 }
 0x3cc   : >> { %v2849_v30 = vpop.permute.xlu0 %2848  ;;  %v3158_v37 = vsel %vm844_vm2, %v3156_v16, %v3157_v47 }
 0x3cd   : >> { %v3117_v11 = vsel %vm1943_vm13, %v3093_v48, %v2849_v30  ;;  %6341 = vmatprep.mubr.msk.f32.mxu0 %vm1960_vm14, %v3158_v37  ;;  %v11889_v62 = vpop.permute.xlu1 %2398 }
 0x3ce   : >> { %v3177_v31 = vrot.slane %v3117_v11, 1  ;;  %3337 = vmatmul.mubr.f32.gmra.mrb[8].mxu0 %v16152_v43 }
 0x3d0   : >> { %v2624_v52 = vpop.permute.xlu0 %2623  ;;  %v3178_v63 = vsel %vm844_vm2, %v3176_v10, %v3177_v31 }
 0x3d1   : >> { %6349 = vmatprep.mubr.msk.f32.mxu1 %vm1960_vm14, %v3178_v63  ;;  %v2677_v54 = vpop.permute.xlu1 %2676  ;;  %v3046_v4 = vsel %vm1892_vm10, %v3022_v3, %v2624_v52 }
 0x3d2   : >> { %3377 = vmatmul.mubr.f32.gmra.mrb[8].mxu1 %v16153_v29  ;;  %v3058_v2 = vsel %vm1909_vm11, %v3034_v50, %v2677_v54  ;;  %v2940_v50 = vsel %vm1824_vm5, %v2916_v25, %v16166_v45 }
 0x3d4   : >> { %v11894_v19 = vpop.permute.xlu0 %2400 }
 0x3d5   : >> { %v11896_v36 = vpop.permute.xlu1 %2451 }
 0x3d8   : >> { %v2701_v60 = vpop.permute.xlu0 %2700 }
 0x3d9   : >> { %v11898_v26 = vpop.permute.xlu1 %2475  ;;  %v3070_v44 = vsel %vm1909_vm11, %v3046_v4, %v2701_v60 }
 0x3dc   : >> { %v11900_v33 = vpop.permute.xlu0 %2453 }
 0x3dd   : >> { %v2750_v61 = vpop.permute.xlu1 %2749 }
 0x3de   : >> { %v3082_v18 = vsel %vm15786_vm12, %v3058_v2, %v2750_v61  ;;  %v16167_v2 = vld [vmem:[#allocation81_spill] sm:$0xff] }
 0x3df   : >> { %v2915_v39 = vsel %vm1807_vm4, %v2891_v41, %v16167_v2 }
 0x3e0   : >> { %v11902_v51 = vpop.permute.xlu0 %2477 }
 0x3e1   : >> { %v11907_v8 = vpop.permute.xlu1 %2524 }
 0x3e4   : >> { %v2774_v23 = vpop.permute.xlu0 %2773 }
 0x3e5   : >> { %v11917_v40 = vpop.permute.xlu1 %2548  ;;  %v3094_v15 = vsel %vm15786_vm12, %v3070_v44, %v2774_v23 }
 0x3e8   : >> { %v11925_v57 = vpop.permute.xlu0 %2526 }
 0x3e9   : >> { %v2827_v21 = vpop.permute.xlu1 %2826 }
 0x3ea   : >> { %v3106_v38 = vsel %vm1943_vm13, %v3082_v18, %v2827_v21  ;;  %v2964_v18 = vsel %vm1841_vm6, %v2940_v50, %v16168_v59  ;;  %v7300_v21 = vld [vmem:[%s8926_s30 + $0x1d0] sm:$0xff] }
 0x3eb   : >> { %v3159_v20 = vrot.slane %v3106_v38, 1  ;;  %v2904_v38 = vsel %vm225_vm0, %v7300_v21, %v16169_v7  ;;  %v2988_v3 = vsel %vm1858_vm8, %v2964_v18, %v11900_v33  ;;  %v7302_v21 = vld [vmem:[%s8926_s30 + $0x1d8] sm:$0x3] }
 0x3ec   : >> { %v11938_v55 = vpop.permute.xlu0 %2550 }
 0x3ed   : >> { %v11943_v13 = vpop.permute.xlu1 %2601  ;;  %v3160_v28 = vsel %vm844_vm2, %v3157_v47, %v3159_v20  ;;  %v16162_v47 = vld [vmem:[#allocation58_spill] sm:$0xff]  ;;  %v2939_v20 = vsel %vm1824_vm5, %v2915_v39, %v16170_v35 }
 0x3ee   : >> { %6342 = vmatprep.mubr.msk.f32.mxu0 %vm1960_vm14, %v3160_v28  ;;  %v16171_v28 = vld [vmem:[#allocation97_spill] sm:$0xff] }
 0x3ef   : >> { %3342 = vmatmul.mubr.f32.gmra.mrb[10].mxu0 %v16161_v46  ;;  %v2928_v44 = vsel %vm1807_vm4, %v2904_v38, %v16171_v28  ;;  %v3012_v46 = vsel %vm1875_vm9, %v2988_v3, %v11925_v57  ;;  %v16179_v38 = vld [vmem:[#allocation20_spill] sm:$0xff]  ;;  %v7303_v28 = vld [vmem:[%s8926_s30 + $0x178] sm:$0x3] }
 0x3f0   : >> { %v2851_v53 = vpop.permute.xlu0 %2850 }
 0x3f1   : >> { %v3118_v16 = vsel %vm1943_vm13, %v3094_v15, %v2851_v53  ;;  %v11951_v32 = vpop.permute.xlu1 %2625  ;;  %v16172_v15 = vld [vmem:[#allocation125_spill] sm:$0xff] }
 0x3f2   : >> { %v3179_v14 = vrot.slane %v3118_v16, 1  ;;  %v2963_v53 = vsel %vm1841_vm6, %v2939_v20, %v16172_v15  ;;  %v7301_v16 = vld [vmem:[%s8926_s30 + $0x1c8] sm:$0xff]  ;;  %v16180_v20 = vld [vmem:[#allocation96_spill] sm:$0xff] }
 0x3f4   : >> { %v2604_v0 = vpop.permute.xlu0 %2603  ;;  %v3180_v58 = vsel %vm844_vm2, %v3177_v31, %v3179_v14  ;;  %v11965_v31 = vld [vmem:[%s15506_s2] ss:$0 sm:$0xff]  ;;  %v16173_v14 = vld [vmem:[#allocation65_spill] sm:$0xff] }
 0x3f5   : >> { %6350 = vmatprep.mubr.msk.f32.mxu1 %vm1960_vm14, %v3180_v58  ;;  %v11956_v48 = vpop.permute.xlu1 %2402  ;;  %v2903_v58 = vsel %vm225_vm0, %v7301_v16, %v16173_v14  ;;  %v16183_v14 = vld [vmem:[#allocation83_spill] sm:$0xff] }
 0x3f6   : >> { %3382 = vmatmul.mubr.f32.gmra.mrb[10].mxu1 %v16162_v47  ;;  %v16174_v47 = vld [vmem:[#allocation118_spill] sm:$0xff] }
 0x3f7   : >> { %v2952_v33 = vsel %vm1824_vm5, %v2928_v44, %v16174_v47  ;;  %v16181_v44 = vld [vmem:[#allocation14_spill] sm:$0xff] }
 0x3f8   : >> { %v2628_v30 = vpop.permute.xlu0 %2627  ;;  %v2976_v9 = vsel %vm1841_vm6, %v2952_v33, %v11894_v19  ;;  %v2893_v15 = vsel %vm225_vm0, %v7303_v28, %v16181_v44  ;;  %v16184_v33 = vld [vmem:[#allocation107_spill] sm:$0xff] }
 0x3f9   : >> { %v2681_v37 = vpop.permute.xlu1 %2680 }
 0x3fc   : >> { %v2679_v11 = vpop.permute.xlu0 %2678 }
 0x3fd   : >> { %v2705_v10 = vpop.permute.xlu1 %2704 }
 0x400   : >> { %v11958_v43 = vpop.permute.xlu0 %2702 }
 0x401   : >> { %v11960_v52 = vpop.permute.xlu1 %2479 }
 0x404   : >> { %v11967_v63 = vpop.permute.xlu0 %2455 }
 0x405   : >> { %v3318_v29 = vpop.f32.mrb[0].mxu0  ;;  %v2754_v61 = vpop.permute.xlu1 %2753 }
 0x406   : >> { %v3319_v54 = vadd.f32 %v11965_v31, %v3318_v29  ;;  %v3320_v60 = vpop.f32.mrb[1].mxu0  ;;  %v2987_v29 = vsel %vm1858_vm8, %v2963_v53, %v11896_v36  ;;  %v3000_v36 = vsel %vm1858_vm8, %v2976_v9, %v11902_v51  ;;  %v16182_v53 = vld [vmem:[#allocation117_spill] sm:$0xff] }
 0x407   : >> { %v3011_v57 = vsel %vm1875_vm9, %v2987_v29, %v11907_v8  ;;  %v3024_v8 = vsel %vm1875_vm9, %v3000_v36, %v11938_v55 }
 0x408   : >> { %v3397_v49 = vmax.f32 %v3319_v54, 0.0  ;;  %v2752_v56 = vpop.permute.xlu0 %2751  ;;  %v3036_v54 = vsel %vm1892_vm10, %v3012_v46, %v2604_v0  ;;  %v3035_v0 = vsel %vm1892_vm10, %v3011_v57, %v11943_v13  ;;  %v3048_v42 = vsel %vm1892_vm10, %v3024_v8, %v2628_v30 }
 0x409   : >> { %v3358_v24 = vpop.f32.mrb[0].mxu1  ;;  %v2778_v22 = vpop.permute.xlu1 %2777  ;;  %v3060_v5 = vsel %vm1909_vm11, %v3036_v54, %v2681_v37  ;;  %v3059_v37 = vsel %vm1909_vm11, %v3035_v0, %v2679_v11  ;;  %v3072_v55 = vsel %vm1909_vm11, %v3048_v42, %v2705_v10 }
 0x40a   : >> { %6353 = vst.msk [vmem:[%s11975_s11 + $0x109] sm:$0xff] %vm225_vm0, %v3397_v49  ;;  %v3359_v34 = vadd.f32 %v11965_v31, %v3358_v24  ;;  %v3360_v23 = vpop.f32.mrb[1].mxu1  ;;  %v16175_v49 = vld [vmem:[#allocation94_spill] sm:$0xff]  ;;  %v3083_v13 = vsel %vm15786_vm12, %v3059_v37, %v2752_v56  ;;  %v3096_v45 = vsel %vm15786_vm12, %v3072_v55, %v2778_v22  ;;  %v16177_v22 = vld [vmem:[#allocation40_spill] sm:$0xff] }
 0x40b   : >> { %v2927_v24 = vsel %vm1807_vm4, %v2903_v58, %v16175_v49  ;;  %v3084_v23 = vsel %vm15786_vm12, %v3060_v5, %v2754_v61  ;;  %v2917_v58 = vsel %vm1807_vm4, %v2893_v15, %v16183_v14  ;;  %v16186_v55 = vld [vmem:[#allocation30_spill] sm:$0xff] }
 0x40c   : >> { %v3405_v6 = vmax.f32 %v3359_v34, 0.0  ;;  %v2776_v12 = vpop.permute.xlu0 %2775  ;;  %v2951_v34 = vsel %vm1824_vm5, %v2927_v24, %v16176_v17  ;;  %v2941_v29 = vsel %vm1824_vm5, %v2917_v58, %v16184_v33  ;;  %v16185_v24 = vld [vmem:[#allocation127_spill] sm:$0xff] }
 0x40d   : >> { %v12000_v4 = vpop.permute.xlu1 %2552  ;;  %v2975_v19 = vsel %vm1841_vm6, %v2951_v34, %v11889_v62  ;;  %v2965_v9 = vsel %vm1841_vm6, %v2941_v29, %v16185_v24 }
 0x40e   : >> { %6361 = vst.msk [vmem:[%s11975_s11 + $0x169] sm:$0xff] %vm225_vm0, %v3405_v6  ;;  %v2999_v51 = vsel %vm1858_vm8, %v2975_v19, %v11898_v26  ;;  %v2989_v5 = vsel %vm1858_vm8, %v2965_v9, %v11967_v63 }
 0x40f   : >> { %v3023_v62 = vsel %vm1875_vm9, %v2999_v51, %v11917_v40 }
 0x410   : >> { %v2529_v60 = vpop.permute.xlu0 %2528  ;;  %v3047_v41 = vsel %vm1892_vm10, %v3023_v62, %v11951_v32 }
 0x411   : >> { %v2831_v1 = vpop.permute.xlu1 %2830  ;;  %v3071_v56 = vsel %vm1909_vm11, %v3047_v41, %v11958_v43 }
 0x412   : >> { %v12036_v25 = vsel %vm1943_vm13, %v3084_v23, %v2831_v1  ;;  %v3095_v6 = vsel %vm15786_vm12, %v3071_v56, %v2776_v12  ;;  %v16178_v12 = vld [vmem:[#allocation68_spill] sm:$0xff] }
 0x413   : >> { %v3162_v61 = vrot.slane %v12036_v25, 1  ;;  %v2905_v7 = vsel %vm225_vm0, %v7302_v21, %v16178_v12 }
 0x414   : >> { %v2829_v27 = vpop.permute.xlu0 %2828  ;;  %v2929_v3 = vsel %vm1807_vm4, %v2905_v7, %v16180_v20 }
 0x415   : >> { %v3107_v11 = vsel %vm1943_vm13, %v3083_v13, %v2829_v27  ;;  %v2855_v30 = vpop.permute.xlu1 %2854  ;;  %v2953_v46 = vsel %vm1824_vm5, %v2929_v3, %v16182_v53 }
 0x416   : >> { %v3161_v26 = vrot.slane %v3107_v11, 1  ;;  %v3120_v50 = vsel %vm1943_vm13, %v3096_v45, %v2855_v30  ;;  %v2977_v47 = vsel %vm1841_vm6, %v2953_v46, %v11956_v48  ;;  %v3013_v48 = vsel %vm1875_vm9, %v2989_v5, %v2529_v60  ;;  %v16187_v45 = vld [vmem:[#allocation42_spill] sm:$0xff] }
 0x417   : >> { %v3182_v40 = vrot.slane %v3120_v50, 1  ;;  %v3001_v54 = vsel %vm1858_vm8, %v2977_v47, %v11960_v52 }
 0x418   : >> { %v2853_v10 = vpop.permute.xlu0 %2852  ;;  %v3163_v2 = vsel %vm844_vm2, %v3161_v26, %v3162_v61  ;;  %v3025_v57 = vsel %vm1875_vm9, %v3001_v54, %v12000_v4 }
 0x419   : >> { %v3119_v39 = vsel %vm1943_vm13, %v3095_v6, %v2853_v10  ;;  %6343 = vmatprep.mubr.msk.f32.mxu0 %vm1960_vm14, %v3163_v2  ;;  %v2630_v59 = vpop.permute.xlu1 %2629 }
 0x41a   : >> { %v3181_v32 = vrot.slane %v3119_v39, 1  ;;  %3347 = vmatmul.mubr.f32.gmra.mrb[12].mxu0 %v16177_v22  ;;  %v3049_v17 = vsel %vm1892_vm10, %v3025_v57, %v2630_v59 }
 0x41c   : >> { %v2606_v18 = vpop.permute.xlu0 %2605  ;;  %v3183_v43 = vsel %vm844_vm2, %v3181_v32, %v3182_v40 }
 0x41d   : >> { %6351 = vmatprep.mubr.msk.f32.mxu1 %vm1960_vm14, %v3183_v43  ;;  %v2707_v35 = vpop.permute.xlu1 %2706  ;;  %v3037_v0 = vsel %vm1892_vm10, %v3013_v48, %v2606_v18 }
 0x41e   : >> { %3387 = vmatmul.mubr.f32.gmra.mrb[12].mxu1 %v16179_v38  ;;  %v3073_v36 = vsel %vm1909_vm11, %v3049_v17, %v2707_v35 }
 0x420   : >> { %v2683_v16 = vpop.permute.xlu0 %2682 }
 0x421   : >> { %v2780_v49 = vpop.permute.xlu1 %2779  ;;  %v3061_v1 = vsel %vm1909_vm11, %v3037_v0, %v2683_v16 }
 0x422   : >> { %v3097_v52 = vsel %vm15786_vm12, %v3073_v36, %v2780_v49 }
 0x424   : >> { %v2756_v34 = vpop.permute.xlu0 %2755 }
 0x425   : >> { %v2857_v23 = vpop.permute.xlu1 %2856  ;;  %v3085_v63 = vsel %vm15786_vm12, %v3061_v1, %v2756_v34 }
 0x426   : >> { %v3121_v4 = vsel %vm1943_vm13, %v3097_v52, %v2857_v23  ;;  %v3323_v19 = vpop.f32.mrb[2].mxu0 }
 0x427   : >> { %v3184_v8 = vrot.slane %v3121_v4, 1  ;;  %v3324_v25 = vadd.f32 %v11965_v31, %v3323_v19  ;;  %v3325_v60 = vpop.f32.mrb[3].mxu0 }
 0x428   : >> { %v2833_v37 = vpop.permute.xlu0 %2832 }
 0x429   : >> { %v3109_v51 = vsel %vm1943_vm13, %v3085_v63, %v2833_v37  ;;  %v3398_v13 = vmax.f32 %v3324_v25, 0.0  ;;  %v3185_v27 = vsel %vm844_vm2, %v3182_v40, %v3184_v8 }
 0x42a   : >> { %v3164_v42 = vrot.slane %v3109_v51, 1  ;;  %6352 = vmatprep.mubr.msk.f32.mxu1 %vm1960_vm14, %v3185_v27 }
 0x42b   : >> { %6354 = vst.msk [vmem:[%s11975_s11 + $0x111] sm:$0xff] %vm225_vm0, %v3398_v13  ;;  %3392 = vmatmul.mubr.f32.gmra.mrb[14].mxu1 %v16186_v55 }
 0x42c   : >> { %v3165_v62 = vsel %vm844_vm2, %v3162_v61, %v3164_v42 }
 0x42d   : >> { %6344 = vmatprep.mubr.msk.f32.mxu0 %vm1960_vm14, %v3165_v62  ;;  %v3363_v11 = vpop.f32.mrb[2].mxu1 }
 0x42e   : >> { %v3364_v41 = vadd.f32 %v11965_v31, %v3363_v11  ;;  %3352 = vmatmul.mubr.f32.gmra.mrb[14].mxu0 %v16187_v45  ;;  %v3365_v26 = vpop.f32.mrb[3].mxu1 }
 0x430   : >> { %v3406_v30 = vmax.f32 %v3364_v41, 0.0 }
 0x432   : >> { %6362 = vst.msk [vmem:[%s11975_s11 + $0x171] sm:$0xff] %vm225_vm0, %v3406_v30 }
 0x451   : >> { %v3328_v56 = vpop.f32.mrb[4].mxu0 }
 0x452   : >> { %v3329_v50 = vadd.f32 %v11965_v31, %v3328_v56  ;;  %v3330_v6 = vpop.f32.mrb[5].mxu0 }
 0x454   : >> { %v3399_v61 = vmax.f32 %v3329_v50, 0.0 }
 0x455   : >> { %v3368_v40 = vpop.f32.mrb[4].mxu1 }
 0x456   : >> { %6355 = vst.msk [vmem:[%s11975_s11 + $0x121] sm:$0xff] %vm225_vm0, %v3399_v61  ;;  %v3369_v10 = vadd.f32 %v11965_v31, %v3368_v40  ;;  %v3370_v2 = vpop.f32.mrb[5].mxu1 }
 0x458   : >> { %v3407_v39 = vmax.f32 %v3369_v10, 0.0 }
 0x45a   : >> { %6363 = vst.msk [vmem:[%s11975_s11 + $0x181] sm:$0xff] %vm225_vm0, %v3407_v39 }
 0x476   : >> { %v3373_v32 = vpop.f32.mrb[6].mxu1 }
 0x477   : >> { %v3374_v22 = vadd.f32 %v11965_v31, %v3373_v32  ;;  %v3375_v59 = vpop.f32.mrb[7].mxu1 }
 0x479   : >> { %v3333_v18 = vpop.f32.mrb[6].mxu0  ;;  %v3408_v21 = vmax.f32 %v3374_v22, 0.0 }
 0x47a   : >> { %v3334_v43 = vadd.f32 %v11965_v31, %v3333_v18  ;;  %v3335_v12 = vpop.f32.mrb[7].mxu0 }
 0x47b   : >> { %6364 = vst.msk [vmem:[%s11975_s11 + $0x189] sm:$0xff] %vm225_vm0, %v3408_v21 }
 0x47c   : >> { %v3400_v7 = vmax.f32 %v3334_v43, 0.0 }
 0x47e   : >> { %6356 = vst.msk [vmem:[%s11975_s11 + $0x129] sm:$0xff] %vm225_vm0, %v3400_v7 }
 0x4a1   : >> { %v3338_v38 = vpop.f32.mrb[8].mxu0 }
 0x4a2   : >> { %v3339_v35 = vadd.f32 %v11965_v31, %v3338_v38  ;;  %v3340_v20 = vpop.f32.mrb[9].mxu0 }
 0x4a4   : >> { %v3401_v3 = vmax.f32 %v3339_v35, 0.0 }
 0x4a5   : >> { %v3378_v28 = vpop.f32.mrb[8].mxu1 }
 0x4a6   : >> { %6357 = vst.msk [vmem:[%s11975_s11 + $0x139] sm:$0xff] %vm225_vm0, %v3401_v3  ;;  %v3379_v44 = vadd.f32 %v11965_v31, %v3378_v28  ;;  %v3380_v15 = vpop.f32.mrb[9].mxu1 }
 0x4a8   : >> { %v3409_v53 = vmax.f32 %v3379_v44, 0.0 }
 0x4aa   : >> { %6365 = vst.msk [vmem:[%s11975_s11 + $0x199] sm:$0xff] %vm225_vm0, %v3409_v53 }
 0x4c2   : >> { %v3343_v46 = vpop.f32.mrb[10].mxu0 }
 0x4c3   : >> { %v3344_v16 = vadd.f32 %v11965_v31, %v3343_v46  ;;  %v3345_v14 = vpop.f32.mrb[11].mxu0 }
 0x4c5   : >> { %v3402_v58 = vmax.f32 %v3344_v16, 0.0 }
 0x4c7   : >> { %6358 = vst.msk [vmem:[%s11975_s11 + $0x141] sm:$0xff] %vm225_vm0, %v3402_v58 }
 0x4c9   : >> { %v3383_v47 = vpop.f32.mrb[10].mxu1 }
 0x4ca   : >> { %v3384_v33 = vadd.f32 %v11965_v31, %v3383_v47  ;;  %v3385_v29 = vpop.f32.mrb[11].mxu1 }
 0x4cc   : >> { %v3410_v54 = vmax.f32 %v3384_v33, 0.0 }
 0x4ce   : >> { %6366 = vst.msk [vmem:[%s11975_s11 + $0x1a1] sm:$0xff] %vm225_vm0, %v3410_v54 }
 0x4ed   : >> { %v3348_v49 = vpop.f32.mrb[12].mxu0 }
 0x4ee   : >> { %v3349_v24 = vadd.f32 %v11965_v31, %v3348_v49  ;;  %v3350_v9 = vpop.f32.mrb[13].mxu0 }
 0x4f0   : >> { %v3403_v57 = vmax.f32 %v3349_v24, 0.0 }
 0x4f1   : >> { %v3388_v5 = vpop.f32.mrb[12].mxu1 }
 0x4f2   : >> { %6359 = vst.msk [vmem:[%s11975_s11 + $0x151] sm:$0xff] %vm225_vm0, %v3403_v57  ;;  %v3389_v17 = vadd.f32 %v11965_v31, %v3388_v5  ;;  %v3390_v34 = vpop.f32.mrb[13].mxu1 }
 0x4f4   : >> { %v3411_v48 = vmax.f32 %v3389_v17, 0.0 }
 0x4f6   : >> { %6367 = vst.msk [vmem:[%s11975_s11 + $0x1b1] sm:$0xff] %vm225_vm0, %v3411_v48 }
 0x4fe   : >> { %v3393_v36 = vpop.f32.mrb[14].mxu1 }
 0x4ff   : >> { %v3394_v0 = vadd.f32 %v11965_v31, %v3393_v36  ;;  %v3395_v52 = vpop.f32.mrb[15].mxu1 }
 0x500   : > { %720 = sbr.rel (!%p718_p4) target bundleno = 218 (0xda), region = 94 }
 0x501   : >> { %v3353_v23 = vpop.f32.mrb[14].mxu0  ;;  %v3412_v4 = vmax.f32 %v3394_v0, 0.0 }
 0x502   : >> { %v3354_v1 = vadd.f32 %v11965_v31, %v3353_v23  ;;  %v3355_v19 = vpop.f32.mrb[15].mxu0 }
 0x503   : >> { %6368 = vst.msk [vmem:[%s11975_s11 + $0x1b9] sm:$0xff] %vm225_vm0, %v3412_v4 }
 0x504   : >> { %v3404_v63 = vmax.f32 %v3354_v1, 0.0 }
 0x506   : >> { %6360 = vst.msk [vmem:[%s11975_s11 + $0x159] sm:$0xff] %vm225_vm0, %v3404_v63 }
 0x507 LB: >> { %s3437_s30 = smul.u32 240, %s7975_s29  ;;  %s7995_s28 = smov 8   ;;  %vm16188_vm7 = vcmask 1045504   ;;  %vm16461_vm12 = vcmask 588800   ;;  %s7975_s29 = sphi %s12145_s29, %s3436_s29  }
 0x508   : >> { %vm16189_vm3 = vmmov %vm16188_vm7  ;;  %s7996_s13 = smov 16   ;;  %s7997_s14 = smov 24  }
 0x509   : >> { %s12151_s12 = scalar_lea.vmem [#allocation3], %s3437_s30  ;;  %vm16190_vm1 = vmmov %vm16189_vm3  ;;  %s7998_s15 = smov 32  }
 0x50a   : >> { %vm16191_vm15 = vmmov %vm16190_vm1  ;;  %s7999_s8 = smov 40   ;;  %s8000_s16 = smov 48  }
 0x50b   : >> { %s8001_s17 = smov 56   ;;  %s8002_s19 = smov 64  }
 0x50c   : >> { %s8003_s20 = smov 72   ;;  %s8004_s21 = smov 80  }
 0x50d   : >> { %v12154_v31 = vld [vmem:[%s12151_s12 + $0x30] sm:$0xff]  ;;  %v12157_v8 = vld [vmem:[%s12151_s12 + $0x38] sm:$0xff]  ;;  %v12160_v37 = vld [vmem:[%s12151_s12 + $0x40] sm:$0x3]  ;;  %s8005_s22 = smov 88   ;;  %s8006_s23 = smov 96  }
 0x50e   : >> { %v3570_v25 = vrot.slane %v12154_v31, 1  ;;  %v3571_v60 = vrot.slane %v12157_v8, 1  ;;  %v3573_v51 = vrot.slane %v12160_v37, 1  ;;  %v12166_v42 = vld [vmem:[%s12151_s12] sm:$0xff]  ;;  %v12169_v13 = vld [vmem:[%s12151_s12 + $0x8] sm:$0xff]  ;;  %v12180_v41 = vld [vmem:[%s12151_s12 + $0x50] sm:$0xff] }
 0x50f   : >> { %v12172_v27 = vld [vmem:[%s12151_s12 + $0x10] sm:$0x3]  ;;  %v3560_v62 = vrot.slane %v12166_v42, 1  ;;  %v3561_v55 = vrot.slane %v12169_v13, 1  ;;  %v12177_v11 = vld [vmem:[%s12151_s12 + $0x48] sm:$0xff]  ;;  %v12190_v6 = vld [vmem:[%s12151_s12 + $0x18] sm:$0xff] }
 0x510   : >> { %v3572_v45 = vsel %vm844_vm2, %v3570_v25, %v3571_v60  ;;  %v3574_v26 = vsel %vm844_vm2, %v3571_v60, %v3573_v51  ;;  %v3563_v30 = vrot.slane %v12172_v27, 1  ;;  %v3652_v56 = vrot.slane %v12172_v27, 2  ;;  %v12187_v50 = vld [vmem:[%s12151_s12 + $0x58] sm:$0x3]  ;;  %v12193_v61 = vld [vmem:[%s12151_s12 + $0x20] sm:$0xff]  ;;  %v12222_v44 = vld [vmem:[%s12151_s12 + $0x68] sm:$0xff] }
 0x511   : >> { %v12195_v40 = vpack.i.bf16 %v3574_v26, %v3572_v45  ;;  %v3562_v10 = vsel %vm844_vm2, %v3560_v62, %v3561_v55  ;;  %v3575_v2 = vrot.slane %v12177_v11, 1  ;;  %v3576_v39 = vrot.slane %v12180_v41, 1  ;;  %v3444_v32 = vld [vmem:[%s12151_s12 + $0x28] sm:$0x3]  ;;  %v12202_v22 = vld [vmem:[%s12151_s12 + $0x78] sm:$0xff]  ;;  %v12205_v59 = vld [vmem:[%s12151_s12 + $0x80] sm:$0xff] }
 0x512   : >> { %v3564_v18 = vsel %vm844_vm2, %v3561_v55, %v3563_v30  ;;  %v3578_v43 = vrot.slane %v12187_v50, 1  ;;  %v3565_v21 = vrot.slane %v12190_v6, 1  ;;  %v3566_v12 = vrot.slane %v12193_v61, 1  ;;  %v12212_v7 = vld [vmem:[%s12151_s12 + $0x88] sm:$0x3]  ;;  %v12215_v38 = vld [vmem:[%s12151_s12 + $0x60] sm:$0xff] }
 0x513   : >> { %7315 = vrot.lane.b32.xlu1 %v12195_v40, %s7995_s28  ;;  %v7304_v35 = vpack.i.bf16 %v3564_v18, %v3562_v10  ;;  %v3577_v20 = vsel %vm844_vm2, %v3575_v2, %v3576_v39  ;;  %v3568_v3 = vrot.slane %v3444_v32, 1  ;;  %v3585_v28 = vrot.slane %v12202_v22, 1  ;;  %v12225_v15 = vld [vmem:[%s12151_s12 + $0x70] sm:$0x3]  ;;  %v12232_v58 = vld [vmem:[%s12151_s12 + $0xa8] sm:$0xff]  ;;  %v12250_v57 = vld [vmem:[%s12151_s12 + $0x98] sm:$0xff] }
 0x514   : >> { %v3579_v53 = vsel %vm844_vm2, %v3576_v39, %v3578_v43  ;;  %v3567_v46 = vsel %vm844_vm2, %v3565_v21, %v3566_v12  ;;  %v3586_v16 = vrot.slane %v12205_v59, 1  ;;  %v3588_v14 = vrot.slane %v12212_v7, 1  ;;  %v12235_v47 = vld [vmem:[%s12151_s12 + $0xb0] sm:$0xff]  ;;  %v12244_v24 = vld [vmem:[%s12151_s12 + $0xb8] sm:$0x3]  ;;  %s8007_s25 = smov 104  }
 0x515   : >> { %7305 = vrot.lane.b32.xlu0 %v7304_v35, %s7995_s28  ;;  %v12238_v33 = vpack.i.bf16 %v3579_v53, %v3577_v20  ;;  %v3569_v29 = vsel %vm844_vm2, %v3566_v12, %v3568_v3  ;;  %v3580_v54 = vrot.slane %v12215_v38, 1  ;;  %v3581_v49 = vrot.slane %v12222_v44, 1  ;;  %v12247_v9 = vld [vmem:[%s12151_s12 + $0x90] sm:$0xff]  ;;  %v12258_v36 = vld [vmem:[%s12151_s12 + $0xa0] sm:$0x3]  ;;  %s8008_s26 = smov 112  }
 0x516   : >> { %v12252_v5 = vpack.i.bf16 %v3569_v29, %v3567_v46  ;;  %v3587_v17 = vsel %vm844_vm2, %v3585_v28, %v3586_v16  ;;  %v3589_v34 = vsel %vm844_vm2, %v3586_v16, %v3588_v14  ;;  %v3583_v48 = vrot.slane %v12225_v15, 1  ;;  %s8009_s6 = smov 120  }
 0x517   : >> { %7320 = vrot.lane.b32.xlu1 %v12238_v33, %s7995_s28  ;;  %v12262_v0 = vpack.i.bf16 %v3589_v34, %v3587_v17  ;;  %v3582_v52 = vsel %vm844_vm2, %v3580_v54, %v3581_v49  ;;  %v3595_v23 = vrot.slane %v12232_v58, 1  ;;  %v3596_v1 = vrot.slane %v12235_v47, 1 }
 0x518   : >> { %v3584_v4 = vsel %vm844_vm2, %v3581_v49, %v3583_v48  ;;  %v3598_v19 = vrot.slane %v12244_v24, 1  ;;  %v3590_v63 = vrot.slane %v12247_v9, 1  ;;  %v3591_v25 = vrot.slane %v12250_v57, 1 }
 0x519   : >> { %7310 = vrot.lane.b32.xlu0 %v12252_v5, %s7995_s28  ;;  %v12273_v60 = vpack.i.bf16 %v3584_v4, %v3582_v52  ;;  %v3597_v51 = vsel %vm844_vm2, %v3595_v23, %v3596_v1  ;;  %v3593_v62 = vrot.slane %v12258_v36, 1  ;;  %v3654_v55 = vrot.slane %v12190_v6, 2 }
 0x51a   : >> { %v3599_v45 = vsel %vm844_vm2, %v3596_v1, %v3598_v19  ;;  %v3592_v26 = vsel %vm844_vm2, %v3590_v63, %v3591_v25  ;;  %v3655_v30 = vrot.slane %v12193_v61, 2  ;;  %v3657_v10 = vrot.slane %v3444_v32, 2 }
 0x51b   : >> { %7330 = vrot.lane.b32.xlu1 %v12262_v0, %s7995_s28  ;;  %v12283_v2 = vpack.i.bf16 %v3599_v45, %v3597_v51  ;;  %v3594_v39 = vsel %vm844_vm2, %v3591_v25, %v3593_v62  ;;  %v3649_v18 = vrot.slane %v12166_v42, 2  ;;  %v3650_v43 = vrot.slane %v12169_v13, 2 }
 0x51c   : >> { %v3656_v21 = vsel %vm16188_vm7, %v3654_v55, %v3655_v30  ;;  %v3658_v12 = vsel %vm16189_vm3, %v3655_v30, %v3657_v10  ;;  %v3664_v35 = vrot.slane %v12177_v11, 2  ;;  %v3662_v20 = vrot.slane %v12160_v37, 2  ;;  %vm16192_vm3 = vmmov %vm16190_vm1 }
 0x51d   : >> { %7325 = vrot.lane.b32.xlu0 %v12273_v60, %s7995_s28  ;;  %v12294_v32 = vpack.i.bf16 %v3594_v39, %v3592_v26  ;;  %v3651_v3 = vsel %vm16190_vm1, %v3649_v18, %v3650_v43  ;;  %v3665_v28 = vrot.slane %v12180_v41, 2  ;;  %v3653_v42 = vsel %vm16191_vm15, %v3650_v43, %v3652_v56  ;;  %vm16193_vm15 = vmmov %vm16190_vm1 }
 0x51e   : >> { %v3667_v13 = vrot.slane %v12187_v50, 2  ;;  %v3659_v53 = vrot.slane %v12154_v31, 2  ;;  %v3660_v46 = vrot.slane %v12157_v8, 2  ;;  %v12306_v37 = vpack.i.bf16 %v3658_v12, %v3656_v21  ;;  %vm16194_vm7 = vmmov %vm16190_vm1 }
 0x51f   : >> { %7340 = vrot.lane.b32.xlu1 %v12283_v2, %s7995_s28  ;;  %v3674_v16 = vrot.slane %v12202_v22, 2  ;;  %v3675_v14 = vrot.slane %v12205_v59, 2  ;;  %v3666_v29 = vsel %vm16192_vm3, %v3664_v35, %v3665_v28  ;;  %v3677_v56 = vrot.slane %v12212_v7, 2  ;;  %vm16195_vm3 = vmmov %vm16190_vm1 }
 0x520   : >> { %v3668_v27 = vsel %vm16190_vm1, %v3665_v28, %v3667_v13  ;;  %v7344_v50 = vpack.i.bf16 %v3653_v42, %v3651_v3  ;;  %v3661_v54 = vsel %vm16193_vm15, %v3659_v53, %v3660_v46  ;;  %v3663_v49 = vsel %vm16194_vm7, %v3660_v46, %v3662_v20  ;;  %vm16196_vm15 = vmmov %vm16190_vm1  ;;  %v3466_v13 = vld [vmem:[%s12151_s12 + $0xd8] sm:$0xff]  ;;  %v3467_v53 = vld [vmem:[%s12151_s12 + $0xe0] sm:$0xff] }
 0x521   : >> { %7335 = vrot.lane.b32.xlu0 %v12294_v32, %s7995_s28  ;;  %v3669_v17 = vrot.slane %v12215_v38, 2  ;;  %v3670_v34 = vrot.slane %v12222_v44, 2  ;;  %v3672_v48 = vrot.slane %v12225_v15, 2  ;;  %v12322_v52 = vpack.i.bf16 %v3668_v27, %v3666_v29  ;;  %vm16197_vm7 = vmmov %vm16190_vm1 }
 0x522   : >> { %v3676_v7 = vsel %vm16195_vm3, %v3674_v16, %v3675_v14  ;;  %v3678_v23 = vsel %vm16190_vm1, %v3675_v14, %v3677_v56  ;;  %v3684_v1 = vrot.slane %v12232_v58, 2  ;;  %v3685_v4 = vrot.slane %v12235_v47, 2  ;;  %vm16198_vm3 = vmmov %vm16190_vm1 }
 0x523   : >> { %7350 = vrot.lane.b32.xlu1 %v12306_v37, %s7996_s13  ;;  %v3687_v19 = vrot.slane %v12244_v24, 2  ;;  %v12330_v63 = vpack.i.bf16 %v3663_v49, %v3661_v54  ;;  %v3679_v15 = vrot.slane %v12247_v9, 2  ;;  %v3671_v25 = vsel %vm16196_vm15, %v3669_v17, %v3670_v34  ;;  %vm16199_vm15 = vmmov %vm16190_vm1 }
 0x524   : >> { %v3673_v51 = vsel %vm16197_vm7, %v3670_v34, %v3672_v48  ;;  %v3680_v62 = vrot.slane %v12250_v57, 2  ;;  %v3682_v55 = vrot.slane %v12258_v36, 2  ;;  %v12339_v45 = vpack.i.bf16 %v3678_v23, %v3676_v7  ;;  %vm16200_vm7 = vmmov %vm16190_vm1  ;;  %v12468_v48 = vld [vmem:[%s12151_s12 + $0x108] sm:$0xff]  ;;  %v12478_v23 = vld [vmem:[%s12151_s12 + $0xf0] sm:$0xff] }
 0x525   : >> { %7345 = vrot.lane.b32.xlu0 %v7344_v50, %s7996_s13  ;;  %v3686_v24 = vsel %vm16198_vm3, %v3684_v1, %v3685_v4  ;;  %v3688_v26 = vsel %vm16190_vm1, %v3685_v4, %v3687_v19  ;;  %v12345_v30 = vpack.i.bf16 %v3673_v51, %v3671_v25  ;;  %v7389_v43 = vpack.i.bf16 %v12157_v8, %v12154_v31  ;;  %v3463_v8 = vld [vmem:[%s12151_s12 + $0xc0] sm:$0xff]  ;;  %vm16201_vm3 = vmmov %vm16190_vm1  ;;  %v12481_v1 = vld [vmem:[%s12151_s12 + $0xf8] sm:$0xff] }
 0x526   : >> { %v3681_v10 = vsel %vm16199_vm15, %v3679_v15, %v3680_v62  ;;  %v3683_v39 = vsel %vm16200_vm7, %v3680_v62, %v3682_v55  ;;  %v12351_v36 = vpack.i.bf16 %v3688_v26, %v3686_v24  ;;  %v7384_v21 = vpack.i.bf16 %v12193_v61, %v12190_v6  ;;  %v3464_v6 = vld [vmem:[%s12151_s12 + $0xc8] sm:$0xff]  ;;  %vm16204_vm15 = vmmov %vm16190_vm1  ;;  %v12494_v15 = vld [vmem:[%s12151_s12 + $0x140] sm:$0xff] }
 0x527   : >> { %7360 = vrot.lane.b32.xlu1 %v12322_v52, %s7996_s13  ;;  %v12355_v18 = vpack.i.bf16 %v3683_v39, %v3681_v10  ;;  %v7399_v12 = vpack.i.bf16 %v12222_v44, %v12215_v38  ;;  %v7394_v35 = vpack.i.bf16 %v12180_v41, %v12177_v11  ;;  %v7409_v31 = vpack.i.bf16 %v12250_v57, %v12247_v9  ;;  %v3465_v41 = vld [vmem:[%s12151_s12 + $0xd0] sm:$0x3]  ;;  %vm16205_vm7 = vmmov %vm16190_vm1  ;;  %v12502_v62 = vld [vmem:[%s12151_s12 + $0x120] sm:$0xff] }
 0x528   : >> { %v7404_v61 = vpack.i.bf16 %v12205_v59, %v12202_v22  ;;  %v7419_v38 = vpack.i.bf16 %v3464_v6, %v3463_v8  ;;  %v7414_v11 = vpack.i.bf16 %v12235_v47, %v12232_v58  ;;  %v3788_v44 = vrot.slane %v3463_v8, 1  ;;  %v12505_v55 = vld [vmem:[%s12151_s12 + $0x128] sm:$0xff] }
 0x529   : >> { %7355 = vrot.lane.b32.xlu0 %v12330_v63, %s7996_s13  ;;  %v3789_v9 = vrot.slane %v3464_v6, 1  ;;  %v3791_v22 = vrot.slane %v3465_v41, 1  ;;  %v3841_v57 = vrot.slane %v3463_v8, 2  ;;  %v3844_v20 = vrot.slane %v3465_v41, 2  ;;  %v12516_v26 = vld [vmem:[%s12151_s12 + $0x168] sm:$0xff]  ;;  %v12552_v8 = vld [vmem:[%s12151_s12 + $0x1a0] sm:$0xff] }
 0x52a   : >> { %v7539_v46 = vpack.i.bf16 %v3467_v53, %v3466_v13  ;;  %v3945_v16 = vrot.slane %v3466_v13, 1  ;;  %v3946_v14 = vrot.slane %v3467_v53, 1  ;;  %v7624_v51 = vpack.i.bf16 %v12481_v1, %v12478_v23 }
 0x52b   : >> { %7370 = vrot.lane.b32.xlu1 %v12339_v45, %s7996_s13  ;;  %v3790_v59 = vsel %vm844_vm2, %v3788_v44, %v3789_v9  ;;  %v3792_v58 = vsel %vm844_vm2, %v3789_v9, %v3791_v22  ;;  %v12526_v39 = vpack.i.bf16 %v12505_v55, %v12502_v62  ;;  %v12566_v44 = vld [vmem:[%s12151_s12 + $0x148] sm:$0x3]  ;;  %v12569_v9 = vld [vmem:[%s12151_s12 + $0x180] sm:$0xff] }
 0x52c   : >> { %v7459_v47 = vpack.i.bf16 %v3792_v58, %v3790_v59  ;;  %v3947_v27 = vsel %vm844_vm2, %v3945_v16, %v3946_v14  ;;  %v12572_v22 = vld [vmem:[%s12151_s12 + $0x188] sm:$0xff]  ;;  %v4123_v59 = vrot.slane %v12478_v23, 1  ;;  %v4124_v58 = vrot.slane %v12481_v1, 1 }
 0x52d   : >> { %7365 = vrot.lane.b32.xlu0 %v12345_v30, %s7996_s13  ;;  %v4133_v16 = vrot.slane %v12502_v62, 1 }
 0x52f   : >> { %7380 = vrot.lane.b32.xlu1 %v12351_v36, %s7996_s13 }
 0x531   : >> { %7375 = vrot.lane.b32.xlu0 %v12355_v18, %s7996_s13 }
 0x533   : >> { %7390 = vrot.lane.b32.xlu1 %v7389_v43, %s7997_s14 }
 0x535   : >> { %7385 = vrot.lane.b32.xlu0 %v7384_v21, %s7997_s14 }
 0x537   : >> { %7400 = vrot.lane.b32.xlu1 %v7399_v12, %s7997_s14 }
 0x539   : >> { %7395 = vrot.lane.b32.xlu0 %v7394_v35, %s7997_s14 }
 0x53b   : >> { %7410 = vrot.lane.b32.xlu1 %v7409_v31, %s7997_s14 }
 0x53d   : >> { %7405 = vrot.lane.b32.xlu0 %v7404_v61, %s7997_s14 }
 0x53f   : >> { %7420 = vrot.lane.b32.xlu1 %v7419_v38, %s7997_s14 }
 0x541   : >> { %7415 = vrot.lane.b32.xlu0 %v7414_v11, %s7997_s14 }
 0x543   : >> { %7430 = vrot.lane.b32.xlu1 %v12195_v40, %s7998_s15 }
 0x545   : >> { %7425 = vrot.lane.b32.xlu0 %v12252_v5, %s7998_s15  ;;  %v3842_v5 = vrot.slane %v3464_v6, 2  ;;  %v4128_v6 = vrot.slane %v12468_v48, 1 }
 0x547   : >> { %7440 = vrot.lane.b32.xlu1 %v12273_v60, %s7998_s15  ;;  %v3843_v3 = vsel %vm16201_vm3, %v3841_v57, %v3842_v5  ;;  %v3845_v28 = vsel %vm16190_vm1, %v3842_v5, %v3844_v20  ;;  %vm16227_vm3 = vmmov %vm16190_vm1 }
 0x548   : >> { %v7499_v42 = vpack.i.bf16 %v3845_v28, %v3843_v3  ;;  %v12587_v3 = vld [vmem:[%s12151_s12 + $0x130] sm:$0x3] }
 0x549   : >> { %7435 = vrot.lane.b32.xlu0 %v12238_v33, %s7998_s15 }
 0x54b   : >> { %7450 = vrot.lane.b32.xlu1 %v12294_v32, %s7998_s15 }
 0x54d   : >> { %7445 = vrot.lane.b32.xlu0 %v12262_v0, %s7998_s15 }
 0x54f   : >> { %7460 = vrot.lane.b32.xlu1 %v7459_v47, %s7998_s15 }
 0x551   : >> { %7455 = vrot.lane.b32.xlu0 %v12283_v2, %s7998_s15 }
 0x553   : >> { %7470 = vrot.lane.b32.xlu1 %v12330_v63, %s7999_s8 }
 0x555   : >> { %7465 = vrot.lane.b32.xlu0 %v12306_v37, %s7999_s8  ;;  %v3468_v37 = vld [vmem:[%s12151_s12 + $0xe8] sm:$0x3] }
 0x556   : >> { %v3948_v29 = vrot.slane %v3468_v37, 1 }
 0x557   : >> { %7480 = vrot.lane.b32.xlu1 %v12345_v30, %s7999_s8 }
 0x558   : >> { %v3949_v56 = vsel %vm844_vm2, %v3946_v14, %v3948_v29  ;;  %v12603_v14 = vld [vmem:[%s12151_s12 + $0x178] sm:$0x3]  ;;  %v4125_v29 = vsel %vm844_vm2, %v4123_v59, %v4124_v58 }
 0x559   : >> { %7475 = vrot.lane.b32.xlu0 %v12322_v52, %s7999_s8 }
 0x55b   : >> { %7490 = vrot.lane.b32.xlu1 %v12355_v18, %s7999_s8 }
 0x55d   : >> { %7485 = vrot.lane.b32.xlu0 %v12339_v45, %s7999_s8 }
 0x55f   : >> { %7500 = vrot.lane.b32.xlu1 %v7499_v42, %s7999_s8 }
 0x561   : >> { %7495 = vrot.lane.b32.xlu0 %v12351_v36, %s7999_s8 }
 0x563   : >> { %7510 = vrot.lane.b32.xlu1 %v7394_v35, %s8000_s16  ;;  %v12546_v35 = vld [vmem:[%s12151_s12 + $0x100] sm:$0x3] }
 0x565   : >> { %7505 = vrot.lane.b32.xlu0 %v7389_v43, %s8000_s16  ;;  %v12535_v43 = vld [vmem:[%s12151_s12 + $0x158] sm:$0xff] }
 0x567   : >> { %7520 = vrot.lane.b32.xlu1 %v7404_v61, %s8000_s16 }
 0x569   : >> { %7515 = vrot.lane.b32.xlu0 %v7399_v12, %s8000_s16 }
 0x56b   : >> { %7530 = vrot.lane.b32.xlu1 %v7414_v11, %s8000_s16 }
 0x56d   : >> { %7525 = vrot.lane.b32.xlu0 %v7409_v31, %s8000_s16  ;;  %v12549_v31 = vld [vmem:[%s12151_s12 + $0x198] sm:$0xff] }
 0x56e   : >> { %v12583_v5 = vpack.i.bf16 %v12552_v8, %v12549_v31 }
 0x56f   : >> { %7540 = vrot.lane.b32.xlu1 %v7539_v46, %s8000_s16 }
 0x571   : >> { %7535 = vrot.lane.b32.xlu0 %v7419_v38, %s8000_s16 }
 0x573   : >> { %7550 = vrot.lane.b32.xlu1 %v12238_v33, %s8001_s17  ;;  %v7579_v33 = vpack.i.bf16 %v3949_v56, %v3947_v27  ;;  %v4134_v56 = vrot.slane %v12505_v55, 1 }
 0x575   : >> { %7545 = vrot.lane.b32.xlu0 %v12195_v40, %s8001_s17  ;;  %v3998_v40 = vrot.slane %v3466_v13, 2  ;;  %v4139_v13 = vrot.slane %v12494_v15, 1 }
 0x577   : >> { %7560 = vrot.lane.b32.xlu1 %v12262_v0, %s8001_s17  ;;  %v3999_v0 = vrot.slane %v3467_v53, 2  ;;  %v15636_v53 = vrot.slane %v12566_v44, 1 }
 0x579   : >> { %7555 = vrot.lane.b32.xlu0 %v12273_v60, %s8001_s17  ;;  %v4001_v60 = vrot.slane %v3468_v37, 2  ;;  %v4000_v50 = vsel %vm16204_vm15, %v3998_v40, %v3999_v0  ;;  %v12599_v37 = vpack.i.bf16 %v12572_v22, %v12569_v9  ;;  %vm16229_vm15 = vmmov %vm16190_vm1 }
 0x57b   : >> { %7570 = vrot.lane.b32.xlu1 %v12283_v2, %s8001_s17  ;;  %v4002_v54 = vsel %vm16205_vm7, %v3999_v0, %v4001_v60  ;;  %v4148_v60 = vrot.slane %v12516_v26, 1  ;;  %vm16230_vm7 = vmmov %vm16190_vm1 }
 0x57c   : >> { %v7619_v34 = vpack.i.bf16 %v4002_v54, %v4000_v50  ;;  %v12618_v54 = vld [vmem:[%s12151_s12 + $0x160] sm:$0x3] }
 0x57d   : >> { %7565 = vrot.lane.b32.xlu0 %v12294_v32, %s8001_s17 }
 0x57f   : >> { %7580 = vrot.lane.b32.xlu1 %v7579_v33, %s8001_s17  ;;  %v15637_v33 = vrot.slane %v12587_v3, 1 }
 0x581   : >> { %7575 = vrot.lane.b32.xlu0 %v7459_v47, %s8001_s17  ;;  %v4126_v47 = vrot.slane %v12546_v35, 1 }
 0x583   : >> { %7590 = vrot.lane.b32.xlu1 %v12322_v52, %s8002_s19  ;;  %v12471_v52 = vld [vmem:[%s12151_s12 + $0x110] sm:$0xff]  ;;  %v4127_v27 = vsel %vm844_vm2, %v4124_v58, %v4126_v47  ;;  %v4144_v58 = vrot.slane %v12535_v43, 1  ;;  %v12636_v47 = vld [vmem:[%s12151_s12 + $0x1a8] sm:$0x3] }
 0x584   : >> { %v12488_v19 = vpack.i.bf16 %v12471_v52, %v12468_v48  ;;  %v4129_v61 = vrot.slane %v12471_v52, 1 }
 0x585   : >> { %7585 = vrot.lane.b32.xlu0 %v12330_v63, %s8002_s19  ;;  %v12451_v2 = vpop.permute.xlu1 %7315  ;;  %v12491_v63 = vld [vmem:[%s12151_s12 + $0x138] sm:$0xff] }
 0x586   : >> { %16202 = vst [vmem:[#allocation138_spill] sm:$0xff] %v12451_v2  ;;  %v12513_v24 = vpack.i.bf16 %v12494_v15, %v12491_v63  ;;  %v4138_v20 = vrot.slane %v12491_v63, 1  ;;  %v4130_v28 = vsel %vm844_vm2, %v4128_v6, %v4129_v61  ;;  %v15640_v6 = vrot.slane %v12603_v14, 1 }
 0x587   : >> { %v12453_v32 = vpop.permute.xlu0 %7305  ;;  %7600 = vrot.lane.b32.xlu1 %v12339_v45, %s8002_s19 }
 0x588   : >> { %16203 = vst [vmem:[#allocation139_spill] sm:$0xff] %v12453_v32 }
 0x589   : >> { %7595 = vrot.lane.b32.xlu0 %v12345_v30, %s8002_s19  ;;  %v12461_v49 = vpop.permute.xlu1 %7320  ;;  %v12519_v30 = vld [vmem:[%s12151_s12 + $0x170] sm:$0xff] }
 0x58a   : >> { %16206 = vst [vmem:[#allocation140_spill] sm:$0xff] %v12461_v49  ;;  %v12543_v12 = vpack.i.bf16 %v12519_v30, %v12516_v26  ;;  %v4149_v50 = vrot.slane %v12519_v30, 1 }
 0x58b   : >> { %v12463_v17 = vpop.permute.xlu0 %7310  ;;  %7610 = vrot.lane.b32.xlu1 %v12351_v36, %s8002_s19  ;;  %v12529_v36 = vld [vmem:[%s12151_s12 + $0x118] sm:$0x3] }
 0x58c   : >> { %16207 = vst [vmem:[#allocation141_spill] sm:$0xff] %v12463_v17  ;;  %v4131_v38 = vrot.slane %v12529_v36, 1  ;;  %v4237_v17 = vrot.slane %v12519_v30, 2 }
 0x58d   : >> { %7605 = vrot.lane.b32.xlu0 %v12355_v18, %s8002_s19  ;;  %v12475_v7 = vpop.permute.xlu1 %7330  ;;  %v12532_v18 = vld [vmem:[%s12151_s12 + $0x150] sm:$0xff] }
 0x58e   : >> { %16208 = vst [vmem:[#allocation142_spill] sm:$0xff] %v12475_v7  ;;  %v12563_v41 = vpack.i.bf16 %v12535_v43, %v12532_v18  ;;  %v4143_v59 = vrot.slane %v12532_v18, 1  ;;  %v4236_v7 = vrot.slane %v12516_v26, 2 }
 0x58f   : >> { %v12483_v4 = vpop.permute.xlu0 %7325  ;;  %7620 = vrot.lane.b32.xlu1 %v7619_v34, %s8002_s19  ;;  %v12621_v34 = vsel %vm844_vm2, %v4138_v20, %v4139_v13  ;;  %v12639_v20 = vsel %vm844_vm2, %v4133_v16, %v4134_v56  ;;  %v12656_v16 = vsel %vm844_vm2, %v4148_v60, %v4149_v50 }
 0x590   : >> { %16209 = vst [vmem:[#allocation143_spill] sm:$0xff] %v12483_v4 }
 0x591   : >> { %7615 = vrot.lane.b32.xlu0 %v7499_v42, %s8002_s19  ;;  %v12497_v25 = vpop.permute.xlu1 %7340  ;;  %v4132_v42 = vsel %vm844_vm2, %v4129_v61, %v4131_v38  ;;  %v7664_v38 = vpack.i.bf16 %v4127_v27, %v4125_v29  ;;  %v12659_v27 = vld [vmem:[%s12151_s12 + $0x190] sm:$0x3] }
 0x592   : >> { %16210 = vst [vmem:[#allocation144_spill] sm:$0xff] %v12497_v25  ;;  %v12613_v0 = vpack.i.bf16 %v4132_v42, %v4130_v28  ;;  %v12644_v28 = vsel %vm844_vm2, %v4134_v56, %v15637_v33  ;;  %v12664_v56 = vsel %vm844_vm2, %v4149_v50, %v15640_v6  ;;  %v4159_v33 = vrot.slane %v12552_v8, 1 }
 0x593   : >> { %v12507_v45 = vpop.permute.xlu0 %7335  ;;  %7630 = vrot.lane.b32.xlu1 %v12488_v19, %s8003_s20  ;;  %v12674_v60 = vpack.i.bf16 %v12644_v28, %v12639_v20  ;;  %v16221_v50 = vrot.slane %v12618_v54, 1  ;;  %v4153_v25 = vrot.slane %v12569_v9, 1  ;;  %v4154_v42 = vrot.slane %v12572_v22, 1 }
 0x594   : >> { %16211 = vst [vmem:[#allocation145_spill] sm:$0xff] %v12507_v45  ;;  %v4219_v45 = vrot.slane %v12529_v36, 2 }
 0x595   : >> { %7625 = vrot.lane.b32.xlu0 %v7624_v51, %s8003_s20  ;;  %v12522_v10 = vpop.permute.xlu1 %7350  ;;  %v12626_v51 = vsel %vm844_vm2, %v4139_v13, %v15636_v53  ;;  %v4158_v53 = vrot.slane %v12549_v31, 1  ;;  %v12682_v6 = vsel %vm844_vm2, %v4144_v58, %v16221_v50 }
 0x596   : >> { %16212 = vst [vmem:[#allocation146_spill] sm:$0xff] %v12522_v10  ;;  %v12653_v29 = vpack.i.bf16 %v12626_v51, %v12621_v34 }
 0x597   : >> { %v12537_v21 = vpop.permute.xlu0 %7345  ;;  %7640 = vrot.lane.b32.xlu1 %v12513_v24, %s8003_s20  ;;  %v12698_v50 = vsel %vm844_vm2, %v4158_v53, %v4159_v33  ;;  %v4212_v53 = vrot.slane %v12481_v1, 2 }
 0x598   : >> { %16213 = vst [vmem:[#allocation147_spill] sm:$0xff] %v12537_v21 }
 0x599   : >> { %7635 = vrot.lane.b32.xlu0 %v12526_v39, %s8003_s20  ;;  %v12559_v11 = vpop.permute.xlu1 %7360 }
 0x59a   : >> { %16214 = vst [vmem:[#allocation148_spill] sm:$0xff] %v12559_v11  ;;  %v12677_v11 = vsel %vm844_vm2, %v4143_v59, %v4144_v58  ;;  %v12693_v59 = vpack.i.bf16 %v12664_v56, %v12656_v16  ;;  %v4217_v58 = vrot.slane %v12471_v52, 2  ;;  %v4211_v52 = vrot.slane %v12478_v23, 2 }
 0x59b   : >> { %v12577_v57 = vpop.permute.xlu0 %7355  ;;  %7650 = vrot.lane.b32.xlu1 %v12543_v12, %s8003_s20 }
 0x59c   : >> { %16215 = vst [vmem:[#allocation149_spill] sm:$0xff] %v12577_v57  ;;  %v16223_v57 = vrot.slane %v12636_v47, 1  ;;  %v4213_v10 = vsel %vm16229_vm15, %v4211_v52, %v4212_v53  ;;  %vm16234_vm15 = vmmov %vm16190_vm1 }
 0x59d   : >> { %7645 = vrot.lane.b32.xlu0 %v12563_v41, %s8003_s20  ;;  %v12595_v46 = vpop.permute.xlu1 %7370 }
 0x59e   : >> { %16216 = vst [vmem:[#allocation150_spill] sm:$0xff] %v12595_v46 }
 0x59f   : >> { %v12609_v40 = vpop.permute.xlu0 %7365  ;;  %7660 = vrot.lane.b32.xlu1 %v12583_v5, %s8003_s20 }
 0x5a0   : >> { %16217 = vst [vmem:[#allocation151_spill] sm:$0xff] %v12609_v40 }
 0x5a1   : >> { %7655 = vrot.lane.b32.xlu0 %v12599_v37, %s8003_s20  ;;  %v12631_v61 = vpop.permute.xlu1 %7380 }
 0x5a2   : >> { %16218 = vst [vmem:[#allocation152_spill] sm:$0xff] %v12631_v61 }
 0x5a3   : >> { %v12647_v13 = vpop.permute.xlu0 %7375  ;;  %7670 = vrot.lane.b32.xlu1 %v12613_v0, %s8004_s21 }
 0x5a4   : >> { %16219 = vst [vmem:[#allocation153_spill] sm:$0xff] %v12647_v13  ;;  %v4216_v13 = vrot.slane %v12468_v48, 2  ;;  %v12712_v48 = vpack.i.bf16 %v12682_v6, %v12677_v11 }
 0x5a5   : >> { %7665 = vrot.lane.b32.xlu0 %v7664_v38, %s8004_s21  ;;  %v12670_v61 = vpop.permute.xlu1 %7390  ;;  %v12703_v38 = vsel %vm844_vm2, %v4159_v33, %v16223_v57  ;;  %v16225_v57 = vrot.slane %v12659_v27, 1  ;;  %v4214_v33 = vrot.slane %v12546_v35, 2 }
 0x5a6   : >> { %16220 = vst [vmem:[#allocation154_spill] sm:$0xff] %v12670_v61  ;;  %v12717_v61 = vsel %vm844_vm2, %v4153_v25, %v4154_v42  ;;  %v12731_v23 = vpack.i.bf16 %v12703_v38, %v12698_v50  ;;  %v4218_v1 = vsel %vm16227_vm3, %v4216_v13, %v4217_v58  ;;  %v4220_v25 = vsel %vm16190_vm1, %v4217_v58, %v4219_v45  ;;  %vm16232_vm3 = vmmov %vm16190_vm1 }
 0x5a7   : >> { %v12687_v49 = vpop.permute.xlu0 %7385  ;;  %7680 = vrot.lane.b32.xlu1 %v12653_v29, %s8004_s21  ;;  %v12722_v36 = vsel %vm844_vm2, %v4154_v42, %v16225_v57  ;;  %v4227_v42 = vrot.slane %v12494_v15, 2  ;;  %v4229_v57 = vrot.slane %v12566_v44, 2  ;;  %v4215_v13 = vsel %vm16230_vm7, %v4212_v53, %v4214_v33  ;;  %vm16235_vm7 = vmmov %vm16190_vm1 }
 0x5a8   : >> { %16222 = vst [vmem:[#allocation155_spill] sm:$0xff] %v12687_v49  ;;  %v4221_v45 = vrot.slane %v12502_v62, 2  ;;  %v4224_v15 = vrot.slane %v12587_v3, 2  ;;  %v4239_v62 = vrot.slane %v12603_v14, 2  ;;  %v7704_v33 = vpack.i.bf16 %v4215_v13, %v4213_v10 }
 0x5a9   : >> { %7675 = vrot.lane.b32.xlu0 %v12674_v60, %s8004_s21  ;;  %v12708_v2 = vpop.permute.xlu1 %7400  ;;  %v4230_v53 = vsel %vm16190_vm1, %v4227_v42, %v4229_v57  ;;  %v4247_v57 = vrot.slane %v12552_v8, 2  ;;  %v4249_v13 = vrot.slane %v12636_v47, 2 }
 0x5aa   : >> { %16224 = vst [vmem:[#allocation156_spill] sm:$0xff] %v12708_v2  ;;  %v4226_v2 = vrot.slane %v12491_v63, 2  ;;  %v4222_v63 = vrot.slane %v12505_v55, 2 }
 0x5ab   : >> { %v12725_v46 = vpop.permute.xlu0 %7395  ;;  %7690 = vrot.lane.b32.xlu1 %v12693_v59, %s8004_s21 }
 0x5ac   : >> { %16226 = vst [vmem:[#allocation157_spill] sm:$0xff] %v12725_v46  ;;  %v12744_v46 = vpack.i.bf16 %v12722_v36, %v12717_v61  ;;  %v4228_v52 = vsel %vm16232_vm3, %v4226_v2, %v4227_v42  ;;  %v4223_v26 = vsel %vm16234_vm15, %v4221_v45, %v4222_v63  ;;  %v4225_v30 = vsel %vm16235_vm7, %v4222_v63, %v4224_v15  ;;  %vm16237_vm3 = vmmov %vm16190_vm1 }
 0x5ad   : >> { %7685 = vrot.lane.b32.xlu0 %v12712_v48, %s8004_s21  ;;  %v12740_v35 = vpop.permute.xlu1 %7410  ;;  %v4234_v2 = vrot.slane %v12618_v54, 2  ;;  %v12775_v42 = vpack.i.bf16 %v4230_v53, %v4228_v52  ;;  %v4238_v10 = vsel %vm16237_vm3, %v4236_v7, %v4237_v17  ;;  %v12785_v63 = vpack.i.bf16 %v4225_v30, %v4223_v26  ;;  %vm16239_vm15 = vmmov %vm16190_vm1 }
 0x5ae   : >> { %16228 = vst [vmem:[#allocation158_spill] sm:$0xff] %v12740_v35  ;;  %v12755_v35 = vpack.i.bf16 %v4220_v25, %v4218_v1  ;;  %v4232_v1 = vrot.slane %v12535_v43, 2  ;;  %v4246_v43 = vrot.slane %v12549_v31, 2  ;;  %vm16240_vm7 = vmmov %vm16190_vm1  ;;  %v4241_v7 = vrot.slane %v12569_v9, 2 }
 0x5af   : >> { %v12751_v58 = vpop.permute.xlu0 %7405  ;;  %7700 = vrot.lane.b32.xlu1 %v12731_v23, %s8004_s21  ;;  %v4244_v31 = vrot.slane %v12659_v27, 2  ;;  %vm16242_vm3 = vmmov %vm16190_vm1 }
 0x5b0   : >> { %16231 = vst [vmem:[#allocation159_spill] sm:$0xff] %v12751_v58  ;;  %v4231_v58 = vrot.slane %v12532_v18, 2  ;;  %v4240_v18 = vsel %vm16190_vm1, %v4237_v17, %v4239_v62  ;;  %v4235_v52 = vsel %vm16240_vm7, %v4232_v1, %v4234_v2  ;;  %v4242_v17 = vrot.slane %v12572_v22, 2  ;;  %vm16245_vm7 = vmmov %vm16190_vm1 }
 0x5b1   : >> { %7695 = vrot.lane.b32.xlu0 %v12744_v46, %s8004_s21  ;;  %v12764_v55 = vpop.permute.xlu1 %7420  ;;  %v12796_v8 = vpack.i.bf16 %v4240_v18, %v4238_v10  ;;  %v4248_v62 = vsel %vm16242_vm3, %v4246_v43, %v4247_v57  ;;  %vm16269_vm3 = vmmov %vm16190_vm1 }
 0x5b2   : >> { %16233 = vst [vmem:[#allocation160_spill] sm:$0xff] %v12764_v55  ;;  %v4233_v15 = vsel %vm16239_vm15, %v4231_v58, %v4232_v1  ;;  %vm16244_vm15 = vmmov %vm16190_vm1  ;;  %v4245_v1 = vsel %vm16245_vm7, %v4242_v17, %v4244_v31 }
 0x5b3   : >> { %v12771_v25 = vpop.permute.xlu0 %7415  ;;  %7710 = vrot.lane.b32.xlu1 %v12755_v35, %s8005_s22  ;;  %v12804_v9 = vpack.i.bf16 %v4235_v52, %v4233_v15  ;;  %v4243_v22 = vsel %vm16244_vm15, %v4241_v7, %v4242_v17  ;;  %v6393_v52 = vld [vmem:[%s12151_s12 + $0x1b0] sm:$0xff]  ;;  %v6394_v7 = vld [vmem:[%s12151_s12 + $0x1b8] sm:$0xff]  ;;  %vm16313_vm15 = vcmask 1040384  }
 0x5b4   : >> { %16236 = vst [vmem:[#allocation161_spill] sm:$0xff] %v12771_v25  ;;  %v12818_v10 = vpack.i.bf16 %v4245_v1, %v4243_v22  ;;  %v12857_v1 = vld [vmem:[%s12151_s12 + $0x1c0] sm:$0x3]  ;;  %vm16319_vm7 = vmmov %vm16313_vm15 }
 0x5b5   : >> { %7705 = vrot.lane.b32.xlu0 %v7704_v33, %s8005_s22  ;;  %v12783_v45 = vpop.permute.xlu1 %7430  ;;  %v4250_v33 = vsel %vm16190_vm1, %v4247_v57, %v4249_v13  ;;  %v15665_v55 = vrot.slane %v12857_v1, 1 }
 0x5b6   : >> { %16238 = vst [vmem:[#allocation162_spill] sm:$0xff] %v12783_v45  ;;  %v12812_v30 = vpack.i.bf16 %v4250_v33, %v4248_v62  ;;  %v12845_v62 = vpack.i.bf16 %v6394_v7, %v6393_v52 }
 0x5b7   : >> { %v12792_v53 = vpop.permute.xlu0 %7425  ;;  %7720 = vrot.lane.b32.xlu1 %v12775_v42, %s8005_s22 }
 0x5b8   : >> { %16241 = vst [vmem:[#allocation163_spill] sm:$0xff] %v12792_v53 }
 0x5b9   : >> { %7715 = vrot.lane.b32.xlu0 %v12785_v63, %s8005_s22  ;;  %v12802_v58 = vpop.permute.xlu1 %7440 }
 0x5ba   : >> { %16243 = vst [vmem:[#allocation164_spill] sm:$0xff] %v12802_v58  ;;  %v4351_v58 = vrot.slane %v6394_v7, 1 }
 0x5bb   : >> { %v12808_v26 = vpop.permute.xlu0 %7435  ;;  %7730 = vrot.lane.b32.xlu1 %v12796_v8, %s8005_s22 }
 0x5bc   : >> { %16246 = vst [vmem:[#allocation165_spill] sm:$0xff] %v12808_v26 }
 0x5bd   : >> { %7725 = vrot.lane.b32.xlu0 %v12804_v9, %s8005_s22  ;;  %v12816_v2 = vpop.permute.xlu1 %7450 }
 0x5be   : >> { %16247 = vst [vmem:[#allocation166_spill] sm:$0xff] %v12816_v2 }
 0x5bf   : >> { %v12820_v18 = vpop.permute.xlu0 %7445  ;;  %7740 = vrot.lane.b32.xlu1 %v12812_v30, %s8005_s22 }
 0x5c0   : >> { %16248 = vst [vmem:[#allocation167_spill] sm:$0xff] %v12820_v18 }
 0x5c1   : >> { %7735 = vrot.lane.b32.xlu0 %v12818_v10, %s8005_s22  ;;  %v12826_v43 = vpop.permute.xlu1 %7460 }
 0x5c2   : >> { %16249 = vst [vmem:[#allocation168_spill] sm:$0xff] %v12826_v43  ;;  %v4350_v43 = vrot.slane %v6393_v52, 1 }
 0x5c3   : >> { %v12828_v57 = vpop.permute.xlu0 %7455  ;;  %7750 = vrot.lane.b32.xlu1 %v12526_v39, %s8006_s23 }
 0x5c4   : >> { %16250 = vst [vmem:[#allocation169_spill] sm:$0xff] %v12828_v57 }
 0x5c5   : >> { %7745 = vrot.lane.b32.xlu0 %v12488_v19, %s8006_s23  ;;  %v12832_v13 = vpop.permute.xlu1 %7470 }
 0x5c6   : >> { %16251 = vst [vmem:[#allocation170_spill] sm:$0xff] %v12832_v13  ;;  %v13242_v13 = vld [vmem:[%s12151_s12 + $0x290] sm:$0xff] }
 0x5c7   : >> { %v12834_v15 = vpop.permute.xlu0 %7465  ;;  %7760 = vrot.lane.b32.xlu1 %v12563_v41, %s8006_s23  ;;  %v13249_v45 = vrot.slane %v13242_v13, 7 }
 0x5c8   : >> { %16252 = vst [vmem:[#allocation171_spill] sm:$0xff] %v12834_v15 }
 0x5c9   : >> { %7755 = vrot.lane.b32.xlu0 %v12513_v24, %s8006_s23  ;;  %v12840_v17 = vpop.permute.xlu1 %7480 }
 0x5ca   : >> { %16253 = vst [vmem:[#allocation172_spill] sm:$0xff] %v12840_v17 }
 0x5cb   : >> { %v12842_v31 = vpop.permute.xlu0 %7475  ;;  %7770 = vrot.lane.b32.xlu1 %v12599_v37, %s8006_s23 }
 0x5cc   : >> { %16254 = vst [vmem:[#allocation173_spill] sm:$0xff] %v12842_v31 }
 0x5cd   : >> { %7765 = vrot.lane.b32.xlu0 %v12543_v12, %s8006_s23  ;;  %v12848_v19 = vpop.permute.xlu1 %7490 }
 0x5ce   : >> { %16255 = vst [vmem:[#allocation174_spill] sm:$0xff] %v12848_v19 }
 0x5cf   : >> { %v12850_v33 = vpop.permute.xlu0 %7485  ;;  %7780 = vrot.lane.b32.xlu1 %v12845_v62, %s8006_s23 }
 0x5d0   : >> { %16256 = vst [vmem:[#allocation175_spill] sm:$0xff] %v12850_v33 }
 0x5d1   : >> { %7775 = vrot.lane.b32.xlu0 %v12583_v5, %s8006_s23  ;;  %v12854_v22 = vpop.permute.xlu1 %7500 }
 0x5d2   : >> { %16257 = vst [vmem:[#allocation176_spill] sm:$0xff] %v12854_v22  ;;  %v12870_v22 = vsel %vm844_vm2, %v4350_v43, %v4351_v58 }
 0x5d3   : >> { %v12859_v17 = vpop.permute.xlu0 %7495  ;;  %7790 = vrot.lane.b32.xlu1 %v12674_v60, %s8007_s25 }
 0x5d4   : >> { %16258 = vst [vmem:[#allocation177_spill] sm:$0xff] %v12859_v17  ;;  %v12875_v17 = vsel %vm844_vm2, %v4351_v58, %v15665_v55  ;;  %v4404_v55 = vrot.slane %v6394_v7, 2 }
 0x5d5   : >> { %7785 = vrot.lane.b32.xlu0 %v12613_v0, %s8007_s25  ;;  %v12864_v31 = vpop.permute.xlu1 %7510  ;;  %v7819_v0 = vpack.i.bf16 %v12875_v17, %v12870_v22 }
 0x5d6   : >> { %16259 = vst [vmem:[#allocation178_spill] sm:$0xff] %v12864_v31  ;;  %v13228_v31 = vld [vmem:[%s12151_s12 + $0x288] sm:$0xff] }
 0x5d7   : >> { %v12866_v57 = vpop.permute.xlu0 %7505  ;;  %7800 = vrot.lane.b32.xlu1 %v12712_v48, %s8007_s25 }
 0x5d8   : >> { %16260 = vst [vmem:[#allocation179_spill] sm:$0xff] %v12866_v57 }
 0x5d9   : >> { %7795 = vrot.lane.b32.xlu0 %v12653_v29, %s8007_s25  ;;  %v12878_v60 = vpop.permute.xlu1 %7520 }
 0x5da   : >> { %16261 = vst [vmem:[#allocation180_spill] sm:$0xff] %v12878_v60  ;;  %v4406_v60 = vrot.slane %v12857_v1, 2 }
 0x5db   : >> { %v12880_v26 = vpop.permute.xlu0 %7515  ;;  %7810 = vrot.lane.b32.xlu1 %v12744_v46, %s8007_s25  ;;  %v4403_v46 = vrot.slane %v6393_v52, 2 }
 0x5dc   : >> { %16262 = vst [vmem:[#allocation181_spill] sm:$0xff] %v12880_v26 }
 0x5dd   : >> { %7805 = vrot.lane.b32.xlu0 %v12693_v59, %s8007_s25  ;;  %v12886_v48 = vpop.permute.xlu1 %7530 }
 0x5de   : >> { %16263 = vst [vmem:[#allocation182_spill] sm:$0xff] %v12886_v48 }
 0x5df   : >> { %v12888_v43 = vpop.permute.xlu0 %7525  ;;  %7820 = vrot.lane.b32.xlu1 %v7819_v0, %s8007_s25  ;;  %v4407_v0 = vsel %vm16190_vm1, %v4404_v55, %v4406_v60  ;;  %v12930_v60 = vld [vmem:[%s12151_s12 + $0x1d0] sm:$0xff] }
 0x5e0   : >> { %16264 = vst [vmem:[#allocation183_spill] sm:$0xff] %v12888_v43 }
 0x5e1   : >> { %7815 = vrot.lane.b32.xlu0 %v12731_v23, %s8007_s25  ;;  %v12891_v58 = vpop.permute.xlu1 %7540  ;;  %v4405_v23 = vsel %vm16269_vm3, %v4403_v46, %v4404_v55  ;;  %vm16321_vm3 = vmmov %vm16319_vm7 }
 0x5e2   : >> { %16265 = vst [vmem:[#allocation184_spill] sm:$0xff] %v12891_v58  ;;  %vm16330_vm1 = vmmov %vm16321_vm3 }
 0x5e3   : >> { %v12893_v29 = vpop.permute.xlu0 %7535  ;;  %7830 = vrot.lane.b32.xlu1 %v12785_v63, %s8008_s26 }
 0x5e4   : >> { %16266 = vst [vmem:[#allocation185_spill] sm:$0xff] %v12893_v29 }
 0x5e5   : >> { %7825 = vrot.lane.b32.xlu0 %v12755_v35, %s8008_s26  ;;  %v12898_v59 = vpop.permute.xlu1 %7550  ;;  %v7859_v35 = vpack.i.bf16 %v4407_v0, %v4405_v23 }
 0x5e6   : >> { %16267 = vst [vmem:[#allocation186_spill] sm:$0xff] %v12898_v59 }
 0x5e7   : >> { %v12900_v26 = vpop.permute.xlu0 %7545  ;;  %7840 = vrot.lane.b32.xlu1 %v12804_v9, %s8008_s26 }
 0x5e8   : >> { %16268 = vst [vmem:[#allocation187_spill] sm:$0xff] %v12900_v26 }
 0x5e9   : >> { %7835 = vrot.lane.b32.xlu0 %v12775_v42, %s8008_s26  ;;  %v12906_v58 = vpop.permute.xlu1 %7560 }
 0x5ea   : >> { %16270 = vst [vmem:[#allocation188_spill] sm:$0xff] %v12906_v58 }
 0x5eb   : >> { %v12908_v63 = vpop.permute.xlu0 %7555  ;;  %7850 = vrot.lane.b32.xlu1 %v12818_v10, %s8008_s26 }
 0x5ec   : >> { %16271 = vst [vmem:[#allocation189_spill] sm:$0xff] %v12908_v63 }
 0x5ed   : >> { %7845 = vrot.lane.b32.xlu0 %v12796_v8, %s8008_s26  ;;  %v12912_v52 = vpop.permute.xlu1 %7570  ;;  %v6396_v8 = vld [vmem:[%s12151_s12 + $0x1c8] sm:$0xff] }
 0x5ee   : >> { %16272 = vst [vmem:[#allocation190_spill] sm:$0xff] %v12912_v52 }
 0x5ef   : >> { %v12914_v9 = vpop.permute.xlu0 %7565  ;;  %7860 = vrot.lane.b32.xlu1 %v7859_v35, %s8008_s26 }
 0x5f0   : >> { %16273 = vst [vmem:[#allocation191_spill] sm:$0xff] %v12914_v9 }
 0x5f1   : >> { %7855 = vrot.lane.b32.xlu0 %v12812_v30, %s8008_s26  ;;  %v12917_v55 = vpop.permute.xlu1 %7580 }
 0x5f2   : >> { %16274 = vst [vmem:[#allocation192_spill] sm:$0xff] %v12917_v55 }
 0x5f3   : >> { %v12919_v42 = vpop.permute.xlu0 %7575  ;;  %7870 = vrot.lane.b32.xlu1 %v12513_v24, %s8009_s6  ;;  %v7899_v24 = vpack.i.bf16 %v12930_v60, %v6396_v8 }
 0x5f4   : >> { %16275 = vst [vmem:[#allocation193_spill] sm:$0xff] %v12919_v42 }
 0x5f5   : >> { %7865 = vrot.lane.b32.xlu0 %v12526_v39, %s8009_s6  ;;  %v12923_v10 = vpop.permute.xlu1 %7590 }
 0x5f6   : >> { %16276 = vst [vmem:[#allocation194_spill] sm:$0xff] %v12923_v10 }
 0x5f7   : >> { %v12925_v7 = vpop.permute.xlu0 %7585  ;;  %7880 = vrot.lane.b32.xlu1 %v12543_v12, %s8009_s6 }
 0x5f8   : >> { %16277 = vst [vmem:[#allocation195_spill] sm:$0xff] %v12925_v7 }
 0x5f9   : >> { %7875 = vrot.lane.b32.xlu0 %v12563_v41, %s8009_s6  ;;  %v12933_v30 = vpop.permute.xlu1 %7600 }
 0x5fa   : >> { %16278 = vst [vmem:[#allocation196_spill] sm:$0xff] %v12933_v30  ;;  %v13079_v30 = vld [vmem:[%s12151_s12 + $0x218] sm:$0xff] }
 0x5fb   : >> { %v12935_v46 = vpop.permute.xlu0 %7595  ;;  %7890 = vrot.lane.b32.xlu1 %v12583_v5, %s8009_s6 }
 0x5fc   : >> { %16279 = vst [vmem:[#allocation197_spill] sm:$0xff] %v12935_v46 }
 0x5fd   : >> { %7885 = vrot.lane.b32.xlu0 %v12599_v37, %s8009_s6  ;;  %v12940_v39 = vpop.permute.xlu1 %7610 }
 0x5fe   : >> { %16280 = vst [vmem:[#allocation198_spill] sm:$0xff] %v12940_v39 }
 0x5ff   : >> { %v12942_v23 = vpop.permute.xlu0 %7605  ;;  %7900 = vrot.lane.b32.xlu1 %v7899_v24, %s8009_s6 }
 0x600   : >> { %16281 = vst [vmem:[#allocation199_spill] sm:$0xff] %v12942_v23 }
 0x601   : >> { %7895 = vrot.lane.b32.xlu0 %v12845_v62, %s8009_s6  ;;  %v12945_v12 = vpop.permute.xlu1 %7620  ;;  %v16286_v62 = vrot.slane %v12587_v3, 1 }
 0x602   : >> { %16282 = vst [vmem:[#allocation200_spill] sm:$0xff] %v12945_v12  ;;  %v13076_v12 = vld [vmem:[%s12151_s12 + $0x210] sm:$0xff] }
 0x603   : >> { %v12947_v41 = vpop.permute.xlu0 %7615  ;;  %4768 = vrot.lane.b32.xlu1 %v12644_v28, %s7995_s28  ;;  %v16289_v28 = vrot.slane %v12566_v44, 1  ;;  %v16294_v44 = vrot.slane %v12618_v54, 1 }
 0x604   : >> { %16283 = vst [vmem:[#allocation201_spill] sm:$0xff] %v12947_v41  ;;  %v13136_v41 = vld [vmem:[%s12151_s12 + $0x248] sm:$0xff] }
 0x605   : >> { %4766 = vrot.lane.b32.xlu0 %v12639_v20, %s7995_s28  ;;  %v12953_v5 = vpop.permute.xlu1 %7630  ;;  %v13149_v29 = vrot.slane %v13136_v41, 7  ;;  %v5052_v43 = vrot.slane %v13136_v41, 1 }
 0x606   : >> { %16284 = vst [vmem:[#allocation202_spill] sm:$0xff] %v12953_v5  ;;  %v13194_v5 = vld [vmem:[%s12151_s12 + $0x278] sm:$0xff] }
 0x607   : >> { %v12955_v37 = vpop.permute.xlu0 %7625  ;;  %4772 = vrot.lane.b32.xlu1 %v12621_v34, %s7995_s28  ;;  %16328 = vst [vmem:[#allocation236_spill] sm:$0xff] %v13149_v29  ;;  %v13207_v10 = vrot.slane %v13194_v5, 7 }
 0x608   : >> { %16285 = vst [vmem:[#allocation203_spill] sm:$0xff] %v12955_v37 }
 0x609   : >> { %4770 = vrot.lane.b32.xlu0 %v16286_v62, %s7995_s28  ;;  %v12962_v0 = vpop.permute.xlu1 %7640 }
 0x60a   : >> { %16287 = vst [vmem:[#allocation204_spill] sm:$0xff] %v12962_v0 }
 0x60b   : >> { %v12964_v35 = vpop.permute.xlu0 %7635  ;;  %4776 = vrot.lane.b32.xlu1 %v16289_v28, %s7995_s28 }
 0x60c   : >> { %16288 = vst [vmem:[#allocation205_spill] sm:$0xff] %v12964_v35  ;;  %v13133_v35 = vld [vmem:[%s12151_s12 + $0x240] sm:$0xff] }
 0x60d   : >> { %4774 = vrot.lane.b32.xlu0 %v12626_v51, %s7995_s28  ;;  %v12971_v20 = vpop.permute.xlu1 %7650  ;;  %v13146_v63 = vrot.slane %v13133_v35, 7  ;;  %v5051_v26 = vrot.slane %v13133_v35, 1 }
 0x60e   : >> { %16290 = vst [vmem:[#allocation206_spill] sm:$0xff] %v12971_v20  ;;  %v13191_v20 = vld [vmem:[%s12151_s12 + $0x270] sm:$0xff] }
 0x60f   : >> { %v12973_v24 = vpop.permute.xlu0 %7645  ;;  %4780 = vrot.lane.b32.xlu1 %v12682_v6, %s7995_s28  ;;  %v16297_v6 = vrot.slane %v12603_v14, 1  ;;  %v16302_v14 = vrot.slane %v12659_v27, 1  ;;  %v6398_v27 = vld [vmem:[%s12151_s12 + $0x1d8] sm:$0x3]  ;;  %16327 = vst [vmem:[#allocation235_spill] sm:$0xff] %v13146_v63  ;;  %v13204_v39 = vrot.slane %v13191_v20, 7 }
 0x610   : >> { %16291 = vst [vmem:[#allocation207_spill] sm:$0xff] %v12973_v24 }
 0x611   : >> { %4778 = vrot.lane.b32.xlu0 %v12677_v11, %s7995_s28  ;;  %v12979_v3 = vpop.permute.xlu1 %7660 }
 0x612   : >> { %16292 = vst [vmem:[#allocation208_spill] sm:$0xff] %v12979_v3  ;;  %v13058_v3 = vld [vmem:[%s12151_s12 + $0x1f8] sm:$0xff] }
 0x613   : >> { %v12981_v34 = vpop.permute.xlu0 %7655  ;;  %4784 = vrot.lane.b32.xlu1 %v12656_v16, %s7995_s28 }
 0x614   : >> { %16293 = vst [vmem:[#allocation209_spill] sm:$0xff] %v12981_v34 }
 0x615   : >> { %4782 = vrot.lane.b32.xlu0 %v16294_v44, %s7995_s28  ;;  %v12988_v51 = vpop.permute.xlu1 %7670 }
 0x616   : >> { %16295 = vst [vmem:[#allocation210_spill] sm:$0xff] %v12988_v51 }
 0x617   : >> { %v12990_v62 = vpop.permute.xlu0 %7665  ;;  %4788 = vrot.lane.b32.xlu1 %v16297_v6, %s7995_s28  ;;  %v4762_v6 = vrot.slane %v12930_v60, 1  ;;  %v13040_v60 = vld [vmem:[%s12151_s12 + $0x1e8] sm:$0xff] }
 0x618   : >> { %16296 = vst [vmem:[#allocation211_spill] sm:$0xff] %v12990_v62 }
 0x619   : >> { %4786 = vrot.lane.b32.xlu0 %v12664_v56, %s7995_s28  ;;  %v12997_v11 = vpop.permute.xlu1 %7680 }
 0x61a   : >> { %16298 = vst [vmem:[#allocation212_spill] sm:$0xff] %v12997_v11 }
 0x61b   : >> { %v12999_v28 = vpop.permute.xlu0 %7675  ;;  %4792 = vrot.lane.b32.xlu1 %v12722_v36, %s7995_s28  ;;  %v4761_v36 = vrot.slane %v6396_v8, 1  ;;  %v13037_v8 = vld [vmem:[%s12151_s12 + $0x1e0] sm:$0xff] }
 0x61c   : >> { %16299 = vst [vmem:[#allocation213_spill] sm:$0xff] %v12999_v28  ;;  %v13126_v28 = vld [vmem:[%s12151_s12 + $0x230] sm:$0xff] }
 0x61d   : >> { %4790 = vrot.lane.b32.xlu0 %v12717_v61, %s7995_s28  ;;  %v13005_v54 = vpop.permute.xlu1 %7690  ;;  %v16305_v61 = vrot.slane %v12636_v47, 1  ;;  %v13139_v46 = vrot.slane %v13126_v28, 7 }
 0x61e   : >> { %16300 = vst [vmem:[#allocation214_spill] sm:$0xff] %v13005_v54  ;;  %v13184_v54 = vld [vmem:[%s12151_s12 + $0x260] sm:$0xff] }
 0x61f   : >> { %v13007_v16 = vpop.permute.xlu0 %7685  ;;  %4796 = vrot.lane.b32.xlu1 %v12698_v50, %s7995_s28  ;;  %16325 = vst [vmem:[#allocation233_spill] sm:$0xff] %v13139_v46 }
 0x620   : >> { %16301 = vst [vmem:[#allocation215_spill] sm:$0xff] %v13007_v16 }
 0x621   : >> { %4794 = vrot.lane.b32.xlu0 %v16302_v14, %s7995_s28  ;;  %v13014_v56 = vpop.permute.xlu1 %7700  ;;  %v4763_v14 = vsel %vm844_vm2, %v4761_v36, %v4762_v6  ;;  %v4856_v36 = vrot.slane %v13040_v60, 7 }
 0x622   : >> { %16303 = vst [vmem:[#allocation216_spill] sm:$0xff] %v13014_v56  ;;  %v16310_v56 = vrot.slane %v12857_v1, 1 }
 0x623   : >> { %v13016_v44 = vpop.permute.xlu0 %7695  ;;  %4800 = vrot.lane.b32.xlu1 %v16305_v61, %s7995_s28 }
 0x624   : >> { %16304 = vst [vmem:[#allocation217_spill] sm:$0xff] %v13016_v44  ;;  %v13112_v44 = vld [vmem:[%s12151_s12 + $0x228] sm:$0xff] }
 0x625   : >> { %4798 = vrot.lane.b32.xlu0 %v12703_v38, %s7995_s28  ;;  %v13024_v50 = vpop.permute.xlu1 %7710  ;;  %v4764_v38 = vrot.slane %v6398_v27, 1 }
 0x626   : >> { %16306 = vst [vmem:[#allocation218_spill] sm:$0xff] %v13024_v50 }
 0x627   : >> { %v13026_v11 = vpop.permute.xlu0 %7705  ;;  %4804 = vrot.lane.b32.xlu1 %v12875_v17, %s7995_s28  ;;  %v4855_v17 = vrot.slane %v13037_v8, 7 }
 0x628   : >> { %16307 = vst [vmem:[#allocation219_spill] sm:$0xff] %v13026_v11 }
 0x629   : >> { %4802 = vrot.lane.b32.xlu0 %v12870_v22, %s7995_s28  ;;  %v13034_v47 = vpop.permute.xlu1 %7720 }
 0x62a   : >> { %16308 = vst [vmem:[#allocation220_spill] sm:$0xff] %v13034_v47  ;;  %v4765_v47 = vsel %vm844_vm2, %v4762_v6, %v4764_v38  ;;  %v13070_v6 = vld [vmem:[%s12151_s12 + $0x200] sm:$0xff] }
 0x62b   : >> { %v13042_v61 = vpop.permute.xlu0 %7715  ;;  %4808 = vrot.lane.b32.xlu1 %v4763_v14, %s7995_s28  ;;  %v4857_v14 = vsel %vm16313_vm15, %v4855_v17, %v4856_v36  ;;  %vm16332_vm15 = vmmov %vm16330_vm1  ;;  %v5037_v37 = vrot.slane %v13070_v6, 1 }
 0x62c   : >> { %16309 = vst [vmem:[#allocation221_spill] sm:$0xff] %v13042_v61 }
 0x62d   : >> { %4806 = vrot.lane.b32.xlu0 %v16310_v56, %s7995_s28  ;;  %v13050_v22 = vpop.permute.xlu1 %7730  ;;  %v13067_v56 = vrot.slane %v13058_v3, 7 }
 0x62e   : >> { %16311 = vst [vmem:[#allocation222_spill] sm:$0xff] %v13050_v22  ;;  %v13170_v22 = vld [vmem:[%s12151_s12 + $0x258] sm:$0xff] }
 0x62f   : >> { %v13053_v27 = vpop.permute.xlu0 %7725  ;;  %4812 = vrot.lane.b32.xlu1 %v4764_v38, %s7995_s28  ;;  %v13181_v50 = vrot.slane %v13170_v22, 7 }
 0x630   : >> { %16312 = vst [vmem:[#allocation223_spill] sm:$0xff] %v13053_v27 }
 0x631   : >> { %4810 = vrot.lane.b32.xlu0 %v4765_v47, %s7995_s28  ;;  %v13061_v0 = vpop.permute.xlu1 %7740  ;;  %v13082_v47 = vrot.slane %v13070_v6, 7  ;;  %16336 = vst [vmem:[#allocation242_spill] sm:$0xff] %v13181_v50 }
 0x632   : >> { %16314 = vst [vmem:[#allocation224_spill] sm:$0xff] %v13061_v0 }
 0x633   : >> { %v13063_v1 = vpop.permute.xlu0 %7735  ;;  %4881 = vrot.lane.b32.xlu1 %v4857_v14, %s7996_s13  ;;  %v13089_v14 = vrot.slane %v13076_v12, 7  ;;  %v13100_v58 = vsel %vm16319_vm7, %v13067_v56, %v13082_v47  ;;  %vm16341_vm7 = vmmov %vm16330_vm1 }
 0x634   : >> { %16315 = vst [vmem:[#allocation225_spill] sm:$0xff] %v13063_v1 }
 0x635   : >> { %4879 = vrot.lane.b32.xlu0 %v4855_v17, %s7996_s13  ;;  %v13073_v38 = vpop.permute.xlu1 %7750  ;;  %v13092_v17 = vrot.slane %v13079_v30, 7 }
 0x636   : >> { %16316 = vst [vmem:[#allocation226_spill] sm:$0xff] %v13073_v38 }
 0x637   : >> { %v13084_v0 = vpop.permute.xlu0 %7745  ;;  %4885 = vrot.lane.b32.xlu1 %v13067_v56, %s7996_s13  ;;  %v13109_v61 = vsel %vm16321_vm3, %v13089_v14, %v13092_v17  ;;  %vm16344_vm3 = vmmov %vm16330_vm1 }
 0x638   : >> { %16317 = vst [vmem:[#allocation227_spill] sm:$0xff] %v13084_v0  ;;  %v13225_v48 = vsel %vm16344_vm3, %v13204_v39, %v13207_v10  ;;  %vm16475_vm3 = vcmask 916480  }
 0x639   : >> { %4883 = vrot.lane.b32.xlu0 %v4856_v36, %s7996_s13  ;;  %v13095_v55 = vpop.permute.xlu1 %7760 }
 0x63a   : >> { %16318 = vst [vmem:[#allocation228_spill] sm:$0xff] %v13095_v55 }
 0x63b   : >> { %v13102_v1 = vpop.permute.xlu0 %7755  ;;  %4889 = vrot.lane.b32.xlu1 %v13082_v47, %s7996_s13 }
 0x63c   : >> { %16320 = vst [vmem:[#allocation229_spill] sm:$0xff] %v13102_v1  ;;  %v13123_v1 = vrot.slane %v13112_v44, 7 }
 0x63d   : >> { %4887 = vrot.lane.b32.xlu0 %v13100_v58, %s7996_s13  ;;  %v13116_v36 = vpop.permute.xlu1 %7770 }
 0x63e   : >> { %16322 = vst [vmem:[#allocation230_spill] sm:$0xff] %v13116_v36  ;;  %v13167_v36 = vsel %vm16332_vm15, %v13146_v63, %v13149_v29  ;;  %vm16467_vm15 = vcmask 785408  }
 0x63f   : >> { %v13118_v55 = vpop.permute.xlu0 %7765  ;;  %4893 = vrot.lane.b32.xlu1 %v13109_v61, %s7996_s13  ;;  %16333 = vst [vmem:[#allocation239_spill] sm:$0xff] %v13167_v36 }
 0x640   : >> { %16323 = vst [vmem:[#allocation231_spill] sm:$0xff] %v13118_v55 }
 0x641   : >> { %4891 = vrot.lane.b32.xlu0 %v13089_v14, %s7996_s13  ;;  %v13130_v34 = vpop.permute.xlu1 %7780 }
 0x642   : >> { %16324 = vst [vmem:[#allocation232_spill] sm:$0xff] %v13130_v34 }
 0x643   : >> { %v13141_v42 = vpop.permute.xlu0 %7775  ;;  %4897 = vrot.lane.b32.xlu1 %v13123_v1, %s7996_s13 }
 0x644   : >> { %16326 = vst [vmem:[#allocation234_spill] sm:$0xff] %v13141_v42  ;;  %v13158_v42 = vsel %vm16330_vm1, %v13123_v1, %v13139_v46 }
 0x645   : >> { %4895 = vrot.lane.b32.xlu0 %v13092_v17, %s7996_s13  ;;  %v13153_v34 = vpop.permute.xlu1 %7790 }
 0x646   : >> { %16329 = vst [vmem:[#allocation237_spill] sm:$0xff] %v13153_v34 }
 0x647   : >> { %v13160_v25 = vpop.permute.xlu0 %7785  ;;  %4901 = vrot.lane.b32.xlu1 %v13139_v46, %s7996_s13 }
 0x648   : >> { %16331 = vst [vmem:[#allocation238_spill] sm:$0xff] %v13160_v25 }
 0x649   : >> { %4899 = vrot.lane.b32.xlu0 %v13158_v42, %s7996_s13  ;;  %v13174_v34 = vpop.permute.xlu1 %7800 }
 0x64a   : >> { %16334 = vst [vmem:[#allocation240_spill] sm:$0xff] %v13174_v34  ;;  %v13197_v34 = vrot.slane %v13184_v54, 7 }
 0x64b   : >> { %v13176_v38 = vpop.permute.xlu0 %7795  ;;  %4905 = vrot.lane.b32.xlu1 %v13167_v36, %s7996_s13 }
 0x64c   : >> { %16335 = vst [vmem:[#allocation241_spill] sm:$0xff] %v13176_v38  ;;  %16338 = vst [vmem:[#allocation244_spill] sm:$0xff] %v13197_v34  ;;  %v13216_v52 = vsel %vm16341_vm7, %v13181_v50, %v13197_v34  ;;  %vm16473_vm7 = vcmask 850944  }
 0x64d   : >> { %4903 = vrot.lane.b32.xlu0 %v13146_v63, %s7996_s13  ;;  %v13188_v51 = vpop.permute.xlu1 %7810  ;;  %16342 = vst [vmem:[#allocation247_spill] sm:$0xff] %v13216_v52 }
 0x64e   : >> { %16337 = vst [vmem:[#allocation243_spill] sm:$0xff] %v13188_v51 }
 0x64f   : >> { %v13199_v38 = vpop.permute.xlu0 %7805  ;;  %4909 = vrot.lane.b32.xlu1 %v13181_v50, %s7996_s13 }
 0x650   : >> { %16339 = vst [vmem:[#allocation245_spill] sm:$0xff] %v13199_v38 }
 0x651   : >> { %4907 = vrot.lane.b32.xlu0 %v13149_v29, %s7996_s13  ;;  %v13211_v51 = vpop.permute.xlu1 %7820 }
 0x652   : >> { %16340 = vst [vmem:[#allocation246_spill] sm:$0xff] %v13211_v51 }
 0x653   : >> { %v13218_v59 = vpop.permute.xlu0 %7815  ;;  %4913 = vrot.lane.b32.xlu1 %v13197_v34, %s7996_s13 }
 0x654   : >> { %16343 = vst [vmem:[#allocation248_spill] sm:$0xff] %v13218_v59  ;;  %v13239_v59 = vrot.slane %v13228_v31, 7 }
 0x655   : >> { %4911 = vrot.lane.b32.xlu0 %v13216_v52, %s7996_s13  ;;  %v13232_v51 = vpop.permute.xlu1 %7830 }
 0x656   : >> { %16345 = vst [vmem:[#allocation249_spill] sm:$0xff] %v13232_v51  ;;  %v13262_v63 = vsel %vm16330_vm1, %v13239_v59, %v13249_v45  ;;  %vm16478_vm1 = vcmask 982016  }
 0x657   : >> { %v13234_v19 = vpop.permute.xlu0 %7825  ;;  %4917 = vrot.lane.b32.xlu1 %v13225_v48, %s7996_s13 }
 0x658   : >> { %16346 = vst [vmem:[#allocation250_spill] sm:$0xff] %v13234_v19 }
 0x659   : >> { %4915 = vrot.lane.b32.xlu0 %v13204_v39, %s7996_s13  ;;  %v13246_v2 = vpop.permute.xlu1 %7840 }
 0x65a   : >> { %16347 = vst [vmem:[#allocation251_spill] sm:$0xff] %v13246_v2 }
 0x65b   : >> { %v13251_v51 = vpop.permute.xlu0 %7835  ;;  %4921 = vrot.lane.b32.xlu1 %v13239_v59, %s7996_s13 }
 0x65c   : >> { %16348 = vst [vmem:[#allocation252_spill] sm:$0xff] %v13251_v51 }
 0x65d   : >> { %4919 = vrot.lane.b32.xlu0 %v13207_v10, %s7996_s13  ;;  %v13257_v29 = vpop.permute.xlu1 %7850 }
 0x65e   : >> { %16349 = vst [vmem:[#allocation253_spill] sm:$0xff] %v13257_v29 }
 0x65f   : >> { %v13264_v2 = vpop.permute.xlu0 %7845  ;;  %4925 = vrot.lane.b32.xlu1 %v13249_v45, %s7996_s13 }
 0x660   : >> { %16350 = vst [vmem:[#allocation254_spill] sm:$0xff] %v13264_v2  ;;  %v13281_v2 = vld [vmem:[%s12151_s12 + $0x1f0] sm:$0x3] }
 0x661   : >> { %4923 = vrot.lane.b32.xlu0 %v13262_v63, %s7996_s13  ;;  %v13270_v51 = vpop.permute.xlu1 %7860  ;;  %v5034_v16 = vrot.slane %v13281_v2, 1 }
 0x662   : >> { %16351 = vst [vmem:[#allocation255_spill] sm:$0xff] %v13270_v51  ;;  %v13288_v51 = vld [vmem:[%s12151_s12 + $0x208] sm:$0x3] }
 0x663   : >> { %v13272_v36 = vpop.permute.xlu0 %7855  ;;  %4961 = vrot.lane.b32.xlu1 %v13040_v60, %s7997_s14  ;;  %v13409_v7 = vrot.slane %v13288_v51, 1 }
 0x664   : >> { %16352 = vst [vmem:[#allocation256_spill] sm:$0xff] %v13272_v36 }
 0x665   : >> { %4959 = vrot.lane.b32.xlu0 %v13037_v8, %s7997_s14  ;;  %v13278_v29 = vpop.permute.xlu1 %7870 }
 0x666   : >> { %16353 = vst [vmem:[#allocation257_spill] sm:$0xff] %v13278_v29 }
 0x667   : >> { %v13283_v38 = vpop.permute.xlu0 %7865  ;;  %4965 = vrot.lane.b32.xlu1 %v13058_v3, %s7997_s14 }
 0x668   : >> { %16354 = vst [vmem:[#allocation258_spill] sm:$0xff] %v13283_v38 }
 0x669   : >> { %4963 = vrot.lane.b32.xlu0 %v13281_v2, %s7997_s14  ;;  %v13292_v36 = vpop.permute.xlu1 %7880  ;;  %v5036_v2 = vrot.slane %v13058_v3, 1 }
 0x66a   : >> { %16355 = vst [vmem:[#allocation259_spill] sm:$0xff] %v13292_v36 }
 0x66b   : >> { %v13294_v19 = vpop.permute.xlu0 %7875  ;;  %4969 = vrot.lane.b32.xlu1 %v13288_v51, %s7997_s14 }
 0x66c   : >> { %16356 = vst [vmem:[#allocation260_spill] sm:$0xff] %v13294_v19  ;;  %v13311_v19 = vld [vmem:[%s12151_s12 + $0x220] sm:$0x3] }
 0x66d   : >> { %4967 = vrot.lane.b32.xlu0 %v13070_v6, %s7997_s14  ;;  %v13300_v29 = vpop.permute.xlu1 %7890 }
 0x66e   : >> { %16357 = vst [vmem:[#allocation261_spill] sm:$0xff] %v13300_v29  ;;  %v13318_v29 = vld [vmem:[%s12151_s12 + $0x238] sm:$0x3] }
 0x66f   : >> { %v13302_v38 = vpop.permute.xlu0 %7885  ;;  %4973 = vrot.lane.b32.xlu1 %v13079_v30, %s7997_s14  ;;  %16361 = vst [vmem:[#allocation265_spill] sm:$0xff] %v13318_v29 }
 0x670   : >> { %16358 = vst [vmem:[#allocation262_spill] sm:$0xff] %v13302_v38 }
 0x671   : >> { %4971 = vrot.lane.b32.xlu0 %v13076_v12, %s7997_s14  ;;  %v13308_v36 = vpop.permute.xlu1 %7900 }
 0x672   : >> { %16359 = vst [vmem:[#allocation263_spill] sm:$0xff] %v13308_v36 }
 0x673   : >> { %v13313_v25 = vpop.permute.xlu0 %7895  ;;  %4977 = vrot.lane.b32.xlu1 %v13112_v44, %s7997_s14 }
 0x674   : >> { %16360 = vst [vmem:[#allocation264_spill] sm:$0xff] %v13313_v25 }
 0x675   : >> { %4975 = vrot.lane.b32.xlu0 %v13311_v19, %s7997_s14  ;;  %v13322_v38 = vpop.permute.xlu1 %4768 }
 0x676   : >> { %16362 = vst [vmem:[#allocation266_spill] sm:$0xff] %v13322_v38 }
 0x677   : >> { %v13324_v55 = vpop.permute.xlu0 %4766  ;;  %4981 = vrot.lane.b32.xlu1 %v13318_v29, %s7997_s14 }
 0x678   : >> { %16363 = vst [vmem:[#allocation267_spill] sm:$0xff] %v13324_v55  ;;  %v13341_v55 = vld [vmem:[%s12151_s12 + $0x250] sm:$0x3] }
 0x679   : >> { %4979 = vrot.lane.b32.xlu0 %v13126_v28, %s7997_s14  ;;  %v13330_v36 = vpop.permute.xlu1 %4772 }
 0x67a   : >> { %16364 = vst [vmem:[#allocation268_spill] sm:$0xff] %v13330_v36  ;;  %v13348_v36 = vld [vmem:[%s12151_s12 + $0x268] sm:$0x3] }
 0x67b   : >> { %v13332_v25 = vpop.permute.xlu0 %4770  ;;  %4985 = vrot.lane.b32.xlu1 %v13136_v41, %s7997_s14 }
 0x67c   : >> { %16365 = vst [vmem:[#allocation269_spill] sm:$0xff] %v13332_v25 }
 0x67d   : >> { %4983 = vrot.lane.b32.xlu0 %v13133_v35, %s7997_s14  ;;  %v13338_v27 = vpop.permute.xlu1 %4776 }
 0x67e   : >> { %16366 = vst [vmem:[#allocation270_spill] sm:$0xff] %v13338_v27 }
 0x67f   : >> { %v13343_v38 = vpop.permute.xlu0 %4774  ;;  %4989 = vrot.lane.b32.xlu1 %v13170_v22, %s7997_s14 }
 0x680   : >> { %16367 = vst [vmem:[#allocation271_spill] sm:$0xff] %v13343_v38 }
 0x681   : >> { %4987 = vrot.lane.b32.xlu0 %v13341_v55, %s7997_s14  ;;  %v13352_v25 = vpop.permute.xlu1 %4780 }
 0x682   : >> { %16368 = vst [vmem:[#allocation272_spill] sm:$0xff] %v13352_v25  ;;  %v13371_v25 = vld [vmem:[%s12151_s12 + $0x280] sm:$0x3] }
 0x683   : >> { %v13354_v0 = vpop.permute.xlu0 %4778  ;;  %4993 = vrot.lane.b32.xlu1 %v13348_v36, %s7997_s14 }
 0x684   : >> { %16369 = vst [vmem:[#allocation273_spill] sm:$0xff] %v13354_v0 }
 0x685   : >> { %4991 = vrot.lane.b32.xlu0 %v13184_v54, %s7997_s14  ;;  %v13360_v27 = vpop.permute.xlu1 %4784 }
 0x686   : >> { %16370 = vst [vmem:[#allocation274_spill] sm:$0xff] %v13360_v27  ;;  %v13379_v27 = vld [vmem:[%s12151_s12 + $0x298] sm:$0x3] }
 0x687   : >> { %v13362_v38 = vpop.permute.xlu0 %4782  ;;  %4997 = vrot.lane.b32.xlu1 %v13194_v5, %s7997_s14 }
 0x688   : >> { %16371 = vst [vmem:[#allocation275_spill] sm:$0xff] %v13362_v38  ;;  %v5032_v38 = vrot.slane %v13040_v60, 1 }
 0x689   : >> { %4995 = vrot.lane.b32.xlu0 %v13191_v20, %s7997_s14  ;;  %v13368_v11 = vpop.permute.xlu1 %4788 }
 0x68a   : >> { %16372 = vst [vmem:[#allocation276_spill] sm:$0xff] %v13368_v11  ;;  %v5031_v11 = vrot.slane %v13037_v8, 1  ;;  %v13403_v8 = vsel %vm844_vm2, %v5036_v2, %v5037_v37  ;;  %v5041_v2 = vrot.slane %v13076_v12, 1 }
 0x68b   : >> { %v13373_v0 = vpop.permute.xlu0 %4786  ;;  %5001 = vrot.lane.b32.xlu1 %v13228_v31, %s7997_s14 }
 0x68c   : >> { %16373 = vst [vmem:[#allocation277_spill] sm:$0xff] %v13373_v0  ;;  %v5035_v0 = vsel %vm844_vm2, %v5032_v38, %v5034_v16 }
 0x68d   : >> { %4999 = vrot.lane.b32.xlu0 %v13371_v25, %s7997_s14  ;;  %v13384_v62 = vpop.permute.xlu1 %4792 }
 0x68e   : >> { %16374 = vst [vmem:[#allocation278_spill] sm:$0xff] %v13384_v62  ;;  %v5033_v62 = vsel %vm844_vm2, %v5031_v11, %v5032_v38  ;;  %v13416_v11 = vrot.slane %v13311_v19, 1 }
 0x68f   : >> { %v13387_v24 = vpop.permute.xlu0 %4790  ;;  %5005 = vrot.lane.b32.xlu1 %v13379_v27, %s7997_s14 }
 0x690   : >> { %16375 = vst [vmem:[#allocation279_spill] sm:$0xff] %v13387_v24 }
 0x691   : >> { %5003 = vrot.lane.b32.xlu0 %v13242_v13, %s7997_s14  ;;  %v13396_v60 = vpop.permute.xlu1 %4796 }
 0x692   : >> { %16376 = vst [vmem:[#allocation280_spill] sm:$0xff] %v13396_v60  ;;  %v5046_v60 = vrot.slane %v13112_v44, 1 }
 0x693   : >> { %v13399_v23 = vpop.permute.xlu0 %4794  ;;  %5073 = vrot.lane.b32.xlu1 %v5035_v0, %s7998_s15  ;;  %v5042_v0 = vrot.slane %v13079_v30, 1 }
 0x694   : >> { %16377 = vst [vmem:[#allocation281_spill] sm:$0xff] %v13399_v23 }
 0x695   : >> { %5071 = vrot.lane.b32.xlu0 %v5033_v62, %s7998_s15  ;;  %v13406_v24 = vpop.permute.xlu1 %4800  ;;  %v13424_v62 = vsel %vm844_vm2, %v5037_v37, %v13409_v7 }
 0x696   : >> { %16378 = vst [vmem:[#allocation282_spill] sm:$0xff] %v13406_v24 }
 0x697   : >> { %v13411_v9 = vpop.permute.xlu0 %4798  ;;  %5077 = vrot.lane.b32.xlu1 %v13403_v8, %s7998_s15 }
 0x698   : >> { %16379 = vst [vmem:[#allocation283_spill] sm:$0xff] %v13411_v9  ;;  %v13433_v9 = vsel %vm844_vm2, %v5042_v0, %v13416_v11 }
 0x699   : >> { %5075 = vrot.lane.b32.xlu0 %v5034_v16, %s7998_s15  ;;  %v13420_v38 = vpop.permute.xlu1 %4804  ;;  %v5047_v16 = vrot.slane %v13126_v28, 1 }
 0x69a   : >> { %16380 = vst [vmem:[#allocation284_spill] sm:$0xff] %v13420_v38  ;;  %v13442_v38 = vsel %vm844_vm2, %v5041_v2, %v5042_v0  ;;  %v5901_v0 = vld [vmem:[%s15507_s3] sm:$0xff]  ;;  %v5902_v2 = vld [vmem:[%s15507_s3 + $0x8] sm:$0xff] }
 0x69b   : >> { %v13427_v24 = vpop.permute.xlu0 %4802  ;;  %5081 = vrot.lane.b32.xlu1 %v13409_v7, %s7998_s15  ;;  %v13449_v23 = vsel %vm844_vm2, %v5046_v60, %v5047_v16  ;;  %v13464_v60 = vrot.slane %v13318_v29, 1  ;;  %v6491_v41 = vpack.c.bf16 %v5902_v2, %v5901_v0  ;;  %v5903_v0 = vld [vmem:[%s15507_s3 + $0x10] sm:$0xff]  ;;  %v5904_v2 = vld [vmem:[%s15507_s3 + $0x18] sm:$0xff] }
 0x69c   : >> { %16381 = vst [vmem:[#allocation285_spill] sm:$0xff] %v13427_v24 }
 0x69d   : >> { %5079 = vrot.lane.b32.xlu0 %v13424_v62, %s7998_s15  ;;  %v13439_v37 = vpop.permute.xlu1 %4808 }
 0x69e   : >> { %16382 = vst [vmem:[#allocation286_spill] sm:$0xff] %v13439_v37  ;;  %v8010_v37 = vmov 0.0|0.0  }
 0x69f   : >> { %v13444_v24 = vpop.permute.xlu0 %4806  ;;  %5085 = vrot.lane.b32.xlu1 %v13433_v9, %s7998_s15  ;;  %6490 = vmatprep.subr.bf16.mxu0 %v8010_v37 }
 0x6a0   : >> { %16383 = vst [vmem:[#allocation287_spill] sm:$0xff] %v13444_v24  ;;  %6557 = vmatprep.subr.bf16.mxu1 %v8010_v37  ;;  %6492 = vmatpush1.bf16.msra.mxu0 %v6491_v41 }
 0x6a1   : >> { %5083 = vrot.lane.b32.xlu0 %v13442_v38, %s7998_s15  ;;  %v13455_v57 = vpop.permute.xlu1 %4812  ;;  %6571 = vmatpush1.bf16.msra.mxu1 %v6491_v41  ;;  %v13491_v41 = vsel %vm844_vm2, %v5047_v16, %v13464_v60  ;;  %v5906_v16 = vld [vmem:[%s15507_s3 + $0x28] sm:$0xff] }
 0x6a2   : >> { %16384 = vst [vmem:[#allocation288_spill] sm:$0xff] %v13455_v57  ;;  %v13473_v57 = vsel %vm844_vm2, %v5051_v26, %v5052_v43  ;;  %6493 = vmatprep.subr.bf16.mxu0 %v8010_v37  ;;  %v13487_v26 = vrot.slane %v13341_v55, 1  ;;  %6558 = vmatprep.subr.bf16.mxu1 %v8010_v37  ;;  %v5905_v55 = vld [vmem:[%s15507_s3 + $0x20] sm:$0xff] }
 0x6a3   : >> { %v13468_v35 = vpop.permute.xlu0 %4810  ;;  %5089 = vrot.lane.b32.xlu1 %v13449_v23, %s7998_s15  ;;  %16386 = vst [vmem:[#allocation290_spill] sm:$0xff] %v13473_v57 }
 0x6a4   : >> { %16385 = vst [vmem:[#allocation289_spill] sm:$0xff] %v13468_v35  ;;  %16388 = vst [vmem:[#allocation292_spill] sm:$0xff] %v13487_v26  ;;  %v6494_v35 = vpack.c.bf16 %v5904_v2, %v5903_v0  ;;  %v13511_v0 = vsel %vm844_vm2, %v5052_v43, %v13487_v26  ;;  %v5907_v43 = vld [vmem:[%s15507_s3 + $0x30] sm:$0xff] }
 0x6a5   : >> { %5087 = vrot.lane.b32.xlu0 %v13416_v11, %s7998_s15  ;;  %v13477_v24 = vpop.permute.xlu1 %4881  ;;  %16390 = vst [vmem:[#allocation294_spill] sm:$0xff] %v13511_v0 }
 0x6a6   : >> { %16387 = vst [vmem:[#allocation291_spill] sm:$0xff] %v13477_v24  ;;  %6495 = vmatpush1.bf16.msra.mxu0 %v6494_v35  ;;  %6572 = vmatpush1.bf16.msra.mxu1 %v6494_v35  ;;  %v6497_v35 = vpack.c.bf16 %v5906_v16, %v5905_v55  ;;  %v5908_v55 = vld [vmem:[%s15507_s3 + $0x38] sm:$0xff] }
 0x6a7   : >> { %v13494_v24 = vpop.permute.xlu0 %4879  ;;  %5095 = vrot.lane.b32.xlu1 %v13473_v57, %s7998_s15  ;;  %6496 = vmatprep.subr.bf16.mxu0 %v8010_v37  ;;  %v6500_v16 = vpack.c.bf16 %v5908_v55, %v5907_v43  ;;  %v5909_v43 = vld [vmem:[%s15507_s3 + $0x40] sm:$0xff]  ;;  %v5910_v55 = vld [vmem:[%s15507_s3 + $0x48] sm:$0xff]  ;;  %v7367_v57 = vunpack.i.l.bf16 %v12609_v40  ;;  %v7467_v40 = vunpack.i.l.bf16 %v12834_v15 }
 0x6a8   : >> { %6559 = vmatprep.subr.bf16.mxu1 %v8010_v37 }
 0x6a9   : >> { %5091 = vrot.lane.b32.xlu0 %v13491_v41, %s7998_s15  ;;  %v13500_v29 = vpop.permute.xlu1 %4885 }
 0x6aa   : >> { %16389 = vst [vmem:[#allocation293_spill] sm:$0xff] %v13500_v29  ;;  %6498 = vmatpush1.bf16.msra.mxu0 %v6497_v35  ;;  %6573 = vmatpush1.bf16.msra.mxu1 %v6497_v35 }
 0x6ab   : >> { %v13514_v2 = vpop.permute.xlu0 %4883  ;;  %5148 = vrot.lane.b32.xlu1 %v13067_v56, %s7999_s8  ;;  %6499 = vmatprep.subr.bf16.mxu0 %v8010_v37 }
 0x6ac   : >> { %16391 = vst [vmem:[#allocation295_spill] sm:$0xff] %v13514_v2  ;;  %6560 = vmatprep.subr.bf16.mxu1 %v8010_v37  ;;  %v7427_v2 = vunpack.i.l.bf16 %v12792_v53 }
 0x6ad   : >> { %5097 = vrot.lane.b32.xlu0 %v13511_v0, %s7998_s15  ;;  %v13520_v29 = vpop.permute.xlu1 %4889  ;;  %v7387_v0 = vunpack.i.l.bf16 %v12687_v49  ;;  %v7487_v49 = vunpack.i.l.bf16 %v12850_v33  ;;  %v16450_v33 = vld [vmem:[#allocation191_spill] sm:$0xff] }
 0x6ae   : >> { %16392 = vst [vmem:[#allocation296_spill] sm:$0xff] %v13520_v29  ;;  %6501 = vmatpush1.bf16.msra.mxu0 %v6500_v16  ;;  %6574 = vmatpush1.bf16.msra.mxu1 %v6500_v16  ;;  %v6503_v29 = vpack.c.bf16 %v5910_v55, %v5909_v43  ;;  %v5911_v16 = vld [vmem:[%s15507_s3 + $0x50] sm:$0xff]  ;;  %v5912_v43 = vld [vmem:[%s15507_s3 + $0x58] sm:$0xff] }
 0x6af   : >> { %v13530_v56 = vpop.permute.xlu0 %4887  ;;  %5172 = vrot.lane.b32.xlu1 %v13181_v50, %s7999_s8  ;;  %6502 = vmatprep.subr.bf16.mxu0 %v8010_v37  ;;  %v6506_v55 = vpack.c.bf16 %v5912_v43, %v5911_v16  ;;  %v5913_v16 = vld [vmem:[%s15507_s3 + $0x60] sm:$0xff]  ;;  %v5914_v43 = vld [vmem:[%s15507_s3 + $0x68] sm:$0xff] }
 0x6b0   : >> { %16393 = vst [vmem:[#allocation297_spill] sm:$0xff] %v13530_v56  ;;  %6561 = vmatprep.subr.bf16.mxu1 %v8010_v37  ;;  %v7327_v56 = vunpack.i.l.bf16 %v12483_v4 }
 0x6b1   : >> { %5150 = vrot.lane.b32.xlu0 %v13100_v58, %s7999_s8  ;;  %v13536_v35 = vpop.permute.xlu1 %4893 }
 0x6b2   : >> { %16394 = vst [vmem:[#allocation298_spill] sm:$0xff] %v13536_v35  ;;  %6504 = vmatpush1.bf16.msra.mxu0 %v6503_v29  ;;  %6575 = vmatpush1.bf16.msra.mxu1 %v6503_v29  ;;  %v5056_v29 = vrot.slane %v13170_v22, 1 }
 0x6b3   : >> { %v13546_v50 = vpop.permute.xlu0 %4891  ;;  %5221 = vrot.lane.b32.xlu1 %v13058_v3, %s8000_s16  ;;  %6505 = vmatprep.subr.bf16.mxu0 %v8010_v37 }
 0x6b4   : >> { %16395 = vst [vmem:[#allocation299_spill] sm:$0xff] %v13546_v50  ;;  %6562 = vmatprep.subr.bf16.mxu1 %v8010_v37 }
 0x6b5   : >> { %5174 = vrot.lane.b32.xlu0 %v13216_v52, %s7999_s8  ;;  %v13552_v58 = vpop.permute.xlu1 %4897 }
 0x6b6   : >> { %16396 = vst [vmem:[#allocation300_spill] sm:$0xff] %v13552_v58  ;;  %v5057_v58 = vrot.slane %v13184_v54, 1  ;;  %6507 = vmatpush1.bf16.msra.mxu0 %v6506_v55  ;;  %6576 = vmatpush1.bf16.msra.mxu1 %v6506_v55 }
 0x6b7   : >> { %v13562_v3 = vpop.permute.xlu0 %4895  ;;  %5245 = vrot.lane.b32.xlu1 %v13170_v22, %s8000_s16  ;;  %6508 = vmatprep.subr.bf16.mxu0 %v8010_v37  ;;  %v6509_v22 = vpack.c.bf16 %v5914_v43, %v5913_v16  ;;  %v5915_v16 = vld [vmem:[%s15507_s3 + $0x70] sm:$0xff] }
 0x6b8   : >> { %16397 = vst [vmem:[#allocation301_spill] sm:$0xff] %v13562_v3  ;;  %6563 = vmatprep.subr.bf16.mxu1 %v8010_v37 }
 0x6b9   : >> { %5223 = vrot.lane.b32.xlu0 %v13070_v6, %s8000_s16  ;;  %v13570_v50 = vpop.permute.xlu1 %4901  ;;  %v13585_v6 = vsel %vm844_vm2, %v5056_v29, %v5057_v58  ;;  %v13599_v29 = vrot.slane %v13348_v36, 1 }
 0x6ba   : >> { %16398 = vst [vmem:[#allocation302_spill] sm:$0xff] %v13570_v50  ;;  %16400 = vst [vmem:[#allocation304_spill] sm:$0xff] %v13585_v6  ;;  %6510 = vmatpush1.bf16.msra.mxu0 %v6509_v22  ;;  %6577 = vmatpush1.bf16.msra.mxu1 %v6509_v22 }
 0x6bb   : >> { %v13580_v3 = vpop.permute.xlu0 %4899  ;;  %5298 = vrot.lane.b32.xlu1 %v13403_v8, %s8001_s17  ;;  %6511 = vmatprep.subr.bf16.mxu0 %v8010_v37  ;;  %v5916_v8 = vld [vmem:[%s15507_s3 + $0x78] sm:$0xff]  ;;  %16401 = vst [vmem:[#allocation305_spill] sm:$0xff] %v13599_v29  ;;  %v13619_v50 = vsel %vm844_vm2, %v5057_v58, %v13599_v29  ;;  %v5919_v58 = vld [vmem:[%s15507_s3 + $0x90] sm:$0xff] }
 0x6bc   : >> { %16399 = vst [vmem:[#allocation303_spill] sm:$0xff] %v13580_v3  ;;  %v6512_v43 = vpack.c.bf16 %v5916_v8, %v5915_v16  ;;  %6564 = vmatprep.subr.bf16.mxu1 %v8010_v37  ;;  %v5917_v16 = vld [vmem:[%s15507_s3 + $0x80] sm:$0xff]  ;;  %v5918_v8 = vld [vmem:[%s15507_s3 + $0x88] sm:$0xff]  ;;  %16403 = vst [vmem:[#allocation307_spill] sm:$0xff] %v13619_v50 }
 0x6bd   : >> { %5247 = vrot.lane.b32.xlu0 %v13184_v54, %s8000_s16  ;;  %v13589_v55 = vpop.permute.xlu1 %4905 }
 0x6be   : >> { %6513 = vmatpush1.bf16.msra.mxu0 %v6512_v43  ;;  %6578 = vmatpush1.bf16.msra.mxu1 %v6512_v43  ;;  %v6515_v43 = vpack.c.bf16 %v5918_v8, %v5917_v16  ;;  %v5920_v16 = vld [vmem:[%s15507_s3 + $0x98] sm:$0xff] }
 0x6bf   : >> { %v13602_v22 = vpop.permute.xlu0 %4903  ;;  %5322 = vrot.lane.b32.xlu1 %v13585_v6, %s8001_s17  ;;  %6514 = vmatprep.subr.bf16.mxu0 %v8010_v37  ;;  %v6518_v8 = vpack.c.bf16 %v5920_v16, %v5919_v58  ;;  %v5921_v58 = vld [vmem:[%s15507_s3 + $0xa0] sm:$0xff]  ;;  %v5922_v16 = vld [vmem:[%s15507_s3 + $0xa8] sm:$0xff] }
 0x6c0   : >> { %6565 = vmatprep.subr.bf16.mxu1 %v8010_v37 }
 0x6c1   : >> { %5300 = vrot.lane.b32.xlu0 %v13424_v62, %s8001_s17  ;;  %v13608_v54 = vpop.permute.xlu1 %4909 }
 0x6c2   : >> { %16402 = vst [vmem:[#allocation306_spill] sm:$0xff] %v13608_v54  ;;  %6516 = vmatpush1.bf16.msra.mxu0 %v6515_v43  ;;  %6579 = vmatpush1.bf16.msra.mxu1 %v6515_v43 }
 0x6c3   : >> { %v13622_v62 = vpop.permute.xlu0 %4907  ;;  %5099 = vrot.lane.b32.xlu1 %v13487_v26, %s7998_s15  ;;  %6517 = vmatprep.subr.bf16.mxu0 %v8010_v37 }
 0x6c4   : >> { %16404 = vst [vmem:[#allocation308_spill] sm:$0xff] %v13622_v62  ;;  %6566 = vmatprep.subr.bf16.mxu1 %v8010_v37 }
 0x6c5   : >> { %5324 = vrot.lane.b32.xlu0 %v13619_v50, %s8001_s17  ;;  %v13628_v3 = vpop.permute.xlu1 %4913 }
 0x6c6   : >> { %16405 = vst [vmem:[#allocation309_spill] sm:$0xff] %v13628_v3  ;;  %6519 = vmatpush1.bf16.msra.mxu0 %v6518_v8  ;;  %6580 = vmatpush1.bf16.msra.mxu1 %v6518_v8  ;;  %v6521_v3 = vpack.c.bf16 %v5922_v16, %v5921_v58  ;;  %v5923_v58 = vld [vmem:[%s15507_s3 + $0xb0] sm:$0xff]  ;;  %v5924_v16 = vld [vmem:[%s15507_s3 + $0xb8] sm:$0xff] }
 0x6c7   : >> { %v13638_v35 = vpop.permute.xlu0 %4911  ;;  %5377 = vrot.lane.b32.xlu1 %v13109_v61, %s8002_s19  ;;  %6520 = vmatprep.subr.bf16.mxu0 %v8010_v37 }
 0x6c8   : >> { %16406 = vst [vmem:[#allocation310_spill] sm:$0xff] %v13638_v35  ;;  %6567 = vmatprep.subr.bf16.mxu1 %v8010_v37 }
 0x6c9   : >> { %5375 = vrot.lane.b32.xlu0 %v13089_v14, %s8002_s19  ;;  %v13644_v43 = vpop.permute.xlu1 %4917 }
 0x6ca   : >> { %16407 = vst [vmem:[#allocation311_spill] sm:$0xff] %v13644_v43  ;;  %6522 = vmatpush1.bf16.msra.mxu0 %v6521_v3  ;;  %6581 = vmatpush1.bf16.msra.mxu1 %v6521_v3 }
 0x6cb   : >> { %v13654_v52 = vpop.permute.xlu0 %4915  ;;  %5401 = vrot.lane.b32.xlu1 %v13225_v48, %s8002_s19  ;;  %6523 = vmatprep.subr.bf16.mxu0 %v8010_v37 }
 0x6cc   : >> { %16408 = vst [vmem:[#allocation312_spill] sm:$0xff] %v13654_v52  ;;  %v6524_v52 = vpack.c.bf16 %v5924_v16, %v5923_v58  ;;  %6568 = vmatprep.subr.bf16.mxu1 %v8010_v37  ;;  %v5925_v58 = vld [vmem:[%s15507_s3 + $0xc0] sm:$0xff]  ;;  %v5926_v16 = vld [vmem:[%s15507_s3 + $0xc8] sm:$0xff] }
 0x6cd   : >> { %5399 = vrot.lane.b32.xlu0 %v13204_v39, %s8002_s19  ;;  %v13660_v8 = vpop.permute.xlu1 %4921 }
 0x6ce   : >> { %16409 = vst [vmem:[#allocation313_spill] sm:$0xff] %v13660_v8  ;;  %6525 = vmatpush1.bf16.msra.mxu0 %v6524_v52  ;;  %6582 = vmatpush1.bf16.msra.mxu1 %v6524_v52  ;;  %v6527_v8 = vpack.c.bf16 %v5926_v16, %v5925_v58  ;;  %v13710_v16 = vrot.slane %v13371_v25, 1 }
 0x6cf   : >> { %v13670_v43 = vpop.permute.xlu0 %4919  ;;  %5176 = vrot.lane.b32.xlu1 %v13197_v34, %s7999_s8  ;;  %6526 = vmatprep.subr.bf16.mxu0 %v8010_v37 }
 0x6d0   : >> { %16410 = vst [vmem:[#allocation314_spill] sm:$0xff] %v13670_v43  ;;  %6569 = vmatprep.subr.bf16.mxu1 %v8010_v37  ;;  %v5927_v37 = vld [vmem:[%s15507_s3 + $0xd0] sm:$0xff]  ;;  %16415 = vst [vmem:[#allocation319_spill] sm:$0xff] %v13710_v16 }
 0x6d1   : >> { %5152 = vrot.lane.b32.xlu0 %v13082_v47, %s7999_s8  ;;  %v13676_v3 = vpop.permute.xlu1 %4925  ;;  %v8011_v47 = vmov 0.0  }
 0x6d2   : >> { %16411 = vst [vmem:[#allocation315_spill] sm:$0xff] %v13676_v3  ;;  %6528 = vmatpush1.bf16.msra.mxu0 %v6527_v8  ;;  %6583 = vmatpush1.bf16.msra.mxu1 %v6527_v8 }
 0x6d3   : >> { %v13686_v43 = vpop.permute.xlu0 %4923  ;;  %5450 = vrot.lane.b32.xlu1 %v13079_v30, %s8003_s20  ;;  %6019 = vmatprep.subr.mxu0 %v8011_v47 }
 0x6d4   : >> { %16412 = vst [vmem:[#allocation316_spill] sm:$0xff] %v13686_v43  ;;  %6570 = vmatprep.subr.mxu1 %v8011_v47  ;;  %v5062_v47 = vrot.slane %v13194_v5, 1 }
 0x6d5   : >> { %5448 = vrot.lane.b32.xlu0 %v13076_v12, %s8003_s20  ;;  %v13692_v52 = vpop.permute.xlu1 %4961 }
 0x6d6   : >> { %6020 = vmatpush1.msra.mxu0 %v5927_v37  ;;  %6584 = vmatpush1.msra.mxu1 %v5927_v37  ;;  %v5061_v37 = vrot.slane %v13191_v20, 1 }
 0x6d7   : >> { %v13694_v3 = vpop.permute.xlu0 %4959  ;;  %5474 = vrot.lane.b32.xlu1 %v13194_v5, %s8003_s20 }
 0x6d9   : >> { %5472 = vrot.lane.b32.xlu0 %v13191_v20, %s8003_s20  ;;  %v13703_v8 = vpop.permute.xlu1 %4965 }
 0x6da   : >> { %16413 = vst [vmem:[#allocation317_spill] sm:$0xff] %v13703_v8  ;;  %v7347_v8 = vunpack.i.l.bf16 %v12537_v21 }
 0x6db   : >> { %v13705_v58 = vpop.permute.xlu0 %4963  ;;  %5249 = vrot.lane.b32.xlu1 %v13348_v36, %s8000_s16  ;;  %v13724_v36 = vsel %vm844_vm2, %v5062_v47, %v13710_v16 }
 0x6dc   : >> { %16414 = vst [vmem:[#allocation318_spill] sm:$0xff] %v13705_v58 }
 0x6dd   : >> { %5225 = vrot.lane.b32.xlu0 %v13288_v51, %s8000_s16  ;;  %v13715_v43 = vpop.permute.xlu1 %4969  ;;  %v13731_v51 = vsel %vm844_vm2, %v5061_v37, %v5062_v47 }
 0x6de   : >> { %16416 = vst [vmem:[#allocation320_spill] sm:$0xff] %v13715_v43 }
 0x6df   : >> { %v13718_v34 = vpop.permute.xlu0 %4967  ;;  %5527 = vrot.lane.b32.xlu1 %v13433_v9, %s8004_s21 }
 0x6e0   : >> { %16417 = vst [vmem:[#allocation321_spill] sm:$0xff] %v13718_v34 }
 0x6e1   : >> { %5525 = vrot.lane.b32.xlu0 %v13442_v38, %s8004_s21  ;;  %v13728_v26 = vpop.permute.xlu1 %4973 }
 0x6e2   : >> { %16418 = vst [vmem:[#allocation322_spill] sm:$0xff] %v13728_v26 }
 0x6e3   : >> { %v13733_v43 = vpop.permute.xlu0 %4971  ;;  %5551 = vrot.lane.b32.xlu1 %v13724_v36, %s8004_s21 }
 0x6e4   : >> { %16419 = vst [vmem:[#allocation323_spill] sm:$0xff] %v13733_v43 }
 0x6e5   : >> { %5549 = vrot.lane.b32.xlu0 %v13731_v51, %s8004_s21  ;;  %v13739_v35 = vpop.permute.xlu1 %4977 }
 0x6e6   : >> { %16420 = vst [vmem:[#allocation324_spill] sm:$0xff] %v13739_v35 }
 0x6e7   : >> { %v13741_v54 = vpop.permute.xlu0 %4975  ;;  %5326 = vrot.lane.b32.xlu1 %v13599_v29, %s8001_s17 }
 0x6e8   : >> { %16421 = vst [vmem:[#allocation325_spill] sm:$0xff] %v13741_v54 }
 0x6e9   : >> { %5302 = vrot.lane.b32.xlu0 %v13409_v7, %s8001_s17  ;;  %v13747_v47 = vpop.permute.xlu1 %4981 }
 0x6ea   : >> { %16422 = vst [vmem:[#allocation326_spill] sm:$0xff] %v13747_v47 }
 0x6eb   : >> { %v13749_v37 = vpop.permute.xlu0 %4979  ;;  %5103 = vrot.lane.b32.xlu1 %v13619_v50, %s7998_s15 }
 0x6ec   : >> { %16423 = vst [vmem:[#allocation327_spill] sm:$0xff] %v13749_v37 }
 0x6ed   : >> { %5101 = vrot.lane.b32.xlu0 %v13585_v6, %s7998_s15  ;;  %v13755_v43 = vpop.permute.xlu1 %4985 }
 0x6ef   : >> { %v13757_v35 = vpop.permute.xlu0 %4983  ;;  %5403 = vrot.lane.b32.xlu1 %v13207_v10, %s8002_s19 }
 0x6f1   : >> { %5379 = vrot.lane.b32.xlu0 %v13092_v17, %s8002_s19  ;;  %v13763_v7 = vpop.permute.xlu1 %4989 }
 0x6f2   : >> { %16424 = vst [vmem:[#allocation328_spill] sm:$0xff] %v13763_v7 }
 0x6f3   : >> { %v13765_v47 = vpop.permute.xlu0 %4987  ;;  %5156 = vrot.lane.b32.xlu1 %v13109_v61, %s7999_s8 }
 0x6f4   : >> { %16425 = vst [vmem:[#allocation329_spill] sm:$0xff] %v13765_v47  ;;  %v7447_v47 = vunpack.i.l.bf16 %v12820_v18  ;;  %v16447_v18 = vld [vmem:[#allocation179_spill] sm:$0xff] }
 0x6f5   : >> { %5154 = vrot.lane.b32.xlu0 %v13089_v14, %s7999_s8  ;;  %v13771_v37 = vpop.permute.xlu1 %4993  ;;  %v7507_v4 = vunpack.i.l.bf16 %v16447_v18 }
 0x6f6   : >> { %16426 = vst [vmem:[#allocation330_spill] sm:$0xff] %v13771_v37 }
 0x6f7   : >> { %v13773_v54 = vpop.permute.xlu0 %4991  ;;  %5180 = vrot.lane.b32.xlu1 %v13225_v48, %s7999_s8 }
 0x6f8   : >> { %16427 = vst [vmem:[#allocation331_spill] sm:$0xff] %v13773_v54 }
 0x6f9   : >> { %5178 = vrot.lane.b32.xlu0 %v13204_v39, %s7999_s8  ;;  %v13779_v26 = vpop.permute.xlu1 %4997 }
 0x6fa   : >> { %16428 = vst [vmem:[#allocation332_spill] sm:$0xff] %v13779_v26 }
 0x6fb   : >> { %v13781_v6 = vpop.permute.xlu0 %4995  ;;  %5476 = vrot.lane.b32.xlu1 %v13371_v25, %s8003_s20 }
 0x6fc   : >> { %16429 = vst [vmem:[#allocation333_spill] sm:$0xff] %v13781_v6 }
 0x6fd   : >> { %5452 = vrot.lane.b32.xlu0 %v13311_v19, %s8003_s20  ;;  %v13787_v61 = vpop.permute.xlu1 %5001 }
 0x6fe   : >> { %16430 = vst [vmem:[#allocation334_spill] sm:$0xff] %v13787_v61 }
 0x6ff   : >> { %v13789_v14 = vpop.permute.xlu0 %4999  ;;  %5229 = vrot.lane.b32.xlu1 %v13079_v30, %s8000_s16 }
 0x700   : >> { %16431 = vst [vmem:[#allocation335_spill] sm:$0xff] %v13789_v14 }
 0x701   : >> { %5227 = vrot.lane.b32.xlu0 %v13076_v12, %s8000_s16  ;;  %v13795_v48 = vpop.permute.xlu1 %5005 }
 0x702   : >> { %16432 = vst [vmem:[#allocation336_spill] sm:$0xff] %v13795_v48 }
 0x703   : >> { %v13797_v39 = vpop.permute.xlu0 %5003  ;;  %5253 = vrot.lane.b32.xlu1 %v13194_v5, %s8000_s16 }
 0x704   : >> { %16433 = vst [vmem:[#allocation337_spill] sm:$0xff] %v13797_v39 }
 0x705   : >> { %5251 = vrot.lane.b32.xlu0 %v13191_v20, %s8000_s16  ;;  %v13803_v6 = vpop.permute.xlu1 %5073 }
 0x707   : >> { %v13805_v61 = vpop.permute.xlu0 %5071  ;;  %5553 = vrot.lane.b32.xlu1 %v13710_v16, %s8004_s21 }
 0x709   : >> { %5529 = vrot.lane.b32.xlu0 %v13416_v11, %s8004_s21  ;;  %v13811_v30 = vpop.permute.xlu1 %5077 }
 0x70a   : >> { %16434 = vst [vmem:[#allocation338_spill] sm:$0xff] %v13811_v30 }
 0x70b   : >> { %v13813_v12 = vpop.permute.xlu0 %5075  ;;  %5306 = vrot.lane.b32.xlu1 %v13433_v9, %s8001_s17 }
 0x70c   : >> { %16435 = vst [vmem:[#allocation339_spill] sm:$0xff] %v13813_v12  ;;  %v16445_v12 = vld [vmem:[#allocation159_spill] sm:$0xff] }
 0x70d   : >> { %5304 = vrot.lane.b32.xlu0 %v13442_v38, %s8001_s17  ;;  %v13819_v5 = vpop.permute.xlu1 %5081  ;;  %v7407_v58 = vunpack.i.l.bf16 %v16445_v12 }
 0x70e   : >> { %16436 = vst [vmem:[#allocation340_spill] sm:$0xff] %v13819_v5  ;;  %v13891_v5 = vrot.slane %v13379_v27, 1 }
 0x70f   : >> { %v13821_v20 = vpop.permute.xlu0 %5079  ;;  %5330 = vrot.lane.b32.xlu1 %v13724_v36, %s8001_s17 }
 0x710   : >> { %16437 = vst [vmem:[#allocation341_spill] sm:$0xff] %v13821_v20 }
 0x711   : >> { %5328 = vrot.lane.b32.xlu0 %v13731_v51, %s8001_s17  ;;  %v13827_v48 = vpop.permute.xlu1 %5085 }
 0x712   : >> { %16438 = vst [vmem:[#allocation342_spill] sm:$0xff] %v13827_v48 }
 0x713   : >> { %v13829_v39 = vpop.permute.xlu0 %5083  ;;  %5381 = vrot.lane.b32.xlu1 %v13123_v1, %s8002_s19 }
 0x714   : >> { %16439 = vst [vmem:[#allocation343_spill] sm:$0xff] %v13829_v39 }
 0x715   : >> { %5105 = vrot.lane.b32.xlu0 %v13599_v29, %s7998_s15  ;;  %v13835_v9 = vpop.permute.xlu1 %5089  ;;  %v5066_v29 = vrot.slane %v13228_v31, 1 }
 0x716   : >> { %16440 = vst [vmem:[#allocation344_spill] sm:$0xff] %v13835_v9 }
 0x717   : >> { %v13837_v38 = vpop.permute.xlu0 %5087  ;;  %5405 = vrot.lane.b32.xlu1 %v13239_v59, %s8002_s19 }
 0x718   : >> { %16441 = vst [vmem:[#allocation345_spill] sm:$0xff] %v13837_v38 }
 0x719   : >> { %5383 = vrot.lane.b32.xlu0 %v13158_v42, %s8002_s19  ;;  %v13843_v14 = vpop.permute.xlu1 %5095 }
 0x71b   : >> { %v13845_v26 = vpop.permute.xlu0 %5091  ;;  %5158 = vrot.lane.b32.xlu1 %v13092_v17, %s7999_s8 }
 0x71c   : >> { %16442 = vst [vmem:[#allocation346_spill] sm:$0xff] %v13845_v26 }
 0x71d   : >> { %5407 = vrot.lane.b32.xlu0 %v13262_v63, %s8002_s19  ;;  %v13851_v39 = vpop.permute.xlu1 %5148 }
 0x71f   : >> { %v13853_v9 = vpop.permute.xlu0 %5097  ;;  %5454 = vrot.lane.b32.xlu1 %v13112_v44, %s8003_s20 }
 0x721   : >> { %5182 = vrot.lane.b32.xlu0 %v13207_v10, %s7999_s8  ;;  %v13859_v38 = vpop.permute.xlu1 %5172  ;;  %v5067_v10 = vrot.slane %v13242_v13, 1 }
 0x723   : >> { %v13861_v48 = vpop.permute.xlu0 %5150  ;;  %5478 = vrot.lane.b32.xlu1 %v13228_v31, %s8003_s20 }
 0x725   : >> { %5456 = vrot.lane.b32.xlu0 %v13126_v28, %s8003_s20  ;;  %v13867_v17 = vpop.permute.xlu1 %5221  ;;  %v13884_v28 = vsel %vm844_vm2, %v5066_v29, %v5067_v10  ;;  %v13903_v29 = vsel %vm844_vm2, %v5067_v10, %v13891_v5 }
 0x726   : >> { %16443 = vst [vmem:[#allocation347_spill] sm:$0xff] %v13903_v29 }
 0x727   : >> { %v13869_v26 = vpop.permute.xlu0 %5174  ;;  %5231 = vrot.lane.b32.xlu1 %v13311_v19, %s8000_s16 }
 0x729   : >> { %5480 = vrot.lane.b32.xlu0 %v13242_v13, %s8003_s20  ;;  %v13877_v50 = vpop.permute.xlu1 %5245 }
 0x72b   : >> { %v13879_v37 = vpop.permute.xlu0 %5223  ;;  %5531 = vrot.lane.b32.xlu1 %v13449_v23, %s8004_s21 }
 0x72d   : >> { %5255 = vrot.lane.b32.xlu0 %v13371_v25, %s8000_s16  ;;  %v13888_v19 = vpop.permute.xlu1 %5298 }
 0x72f   : >> { %v13893_v54 = vpop.permute.xlu0 %5247  ;;  %5555 = vrot.lane.b32.xlu1 %v13884_v28, %s8004_s21 }
 0x731   : >> { %5533 = vrot.lane.b32.xlu0 %v13491_v41, %s8004_s21  ;;  %v13899_v7 = vpop.permute.xlu1 %5322 }
 0x733   : >> { %v13905_v25 = vpop.permute.xlu0 %5300  ;;  %5308 = vrot.lane.b32.xlu1 %v13416_v11, %s8001_s17  ;;  %v7307_v11 = vunpack.i.l.bf16 %v12453_v32  ;;  %v16448_v32 = vld [vmem:[#allocation183_spill] sm:$0xff] }
 0x735   : >> { %5557 = vrot.lane.b32.xlu0 %v13903_v29, %s8004_s21  ;;  %v13911_v20 = vpop.permute.xlu1 %5099  ;;  %v7567_v29 = vunpack.i.l.bf16 %v16450_v33  ;;  %v16455_v33 = vld [vmem:[#allocation207_spill] sm:$0xff] }
 0x736   : >> { %16444 = vst [vmem:[#allocation348_spill] sm:$0xff] %v13911_v20 }
 0x737   : >> { %v13913_v34 = vpop.permute.xlu0 %5324  ;;  %5107 = vrot.lane.b32.xlu1 %v13731_v51, %s7998_s15 }
 0x739   : >> { %5332 = vrot.lane.b32.xlu0 %v13710_v16, %s8001_s17  ;;  %v13919_v10 = vpop.permute.xlu1 %5377 }
 0x73b   : >> { %v13921_v30 = vpop.permute.xlu0 %5375  ;;  %5385 = vrot.lane.b32.xlu1 %v13139_v46, %s8002_s19  ;;  %v7905_v46 = vld [vmem:[%s12151_s12 + $0x60] sm:$0xff] }
 0x73c   : >> { %v4514_v21 = vsel %vm225_vm0, %v7905_v46, %v7327_v56  ;;  %v16449_v56 = vld [vmem:[#allocation187_spill] sm:$0xff] }
 0x73d   : >> { %5109 = vrot.lane.b32.xlu0 %v13724_v36, %s7998_s15  ;;  %v13929_v51 = vpop.permute.xlu1 %5401  ;;  %v7904_v36 = vld [vmem:[%s12151_s12] sm:$0xff]  ;;  %v4531_v53 = vsel %vm1807_vm4, %v4514_v21, %v7367_v57  ;;  %v7547_v15 = vunpack.i.l.bf16 %v16449_v56  ;;  %v16452_v57 = vld [vmem:[#allocation195_spill] sm:$0xff]  ;;  %v7647_v56 = vunpack.i.l.bf16 %v16455_v33 }
 0x73e   : >> { %v4506_v62 = vsel %vm225_vm0, %v7904_v36, %v7307_v11  ;;  %v7527_v11 = vunpack.i.l.bf16 %v16448_v32  ;;  %v4548_v46 = vsel %vm1824_vm5, %v4531_v53, %v7407_v58  ;;  %v16454_v58 = vld [vmem:[#allocation203_spill] sm:$0xff] }
 0x73f   : >> { %v13935_v20 = vpop.permute.xlu0 %5399  ;;  %5160 = vrot.lane.b32.xlu1 %v13123_v1, %s7999_s8  ;;  %v4523_v1 = vsel %vm1807_vm4, %v4506_v62, %v7347_v8  ;;  %v4565_v21 = vsel %vm1841_vm6, %v4548_v46, %v7447_v47  ;;  %v7587_v8 = vunpack.i.l.bf16 %v16452_v57 }
 0x740   : >> { %v4540_v36 = vsel %vm1824_vm5, %v4523_v1, %v7387_v0  ;;  %v4582_v53 = vsel %vm1858_vm8, %v4565_v21, %v7487_v49  ;;  %v7627_v1 = vunpack.i.l.bf16 %v16454_v58  ;;  %v16459_v58 = vld [vmem:[#allocation265_spill] sm:$0xff] }
 0x741   : >> { %5409 = vrot.lane.b32.xlu0 %v13249_v45, %s8002_s19  ;;  %v13949_v12 = vpop.permute.xlu1 %5176  ;;  %v4557_v62 = vsel %vm1841_vm6, %v4540_v36, %v7427_v2  ;;  %v4599_v47 = vsel %vm1875_vm9, %v4582_v53, %v7527_v11  ;;  %v16456_v36 = vld [vmem:[#allocation211_spill] sm:$0xff] }
 0x742   : >> { %16446 = vst [vmem:[#allocation349_spill] sm:$0xff] %v13949_v12  ;;  %v16453_v12 = vld [vmem:[#allocation199_spill] sm:$0xff]  ;;  %v4574_v0 = vsel %vm1858_vm8, %v4557_v62, %v7467_v40  ;;  %v7667_v46 = vunpack.i.l.bf16 %v16456_v36  ;;  %v4616_v49 = vsel %vm1892_vm10, %v4599_v47, %v7567_v29 }
 0x743   : >> { %v13959_v16 = vpop.permute.xlu0 %5152  ;;  %5184 = vrot.lane.b32.xlu1 %v13239_v59, %s7999_s8  ;;  %v7607_v32 = vunpack.i.l.bf16 %v16453_v12  ;;  %v4591_v2 = vsel %vm1875_vm9, %v4574_v0, %v7507_v4  ;;  %v16458_v62 = vld [vmem:[#allocation219_spill] sm:$0xff] }
 0x744   : >> { %16451 = vst [vmem:[#allocation179_spill] sm:$0xff] %v13959_v16  ;;  %v16457_v16 = vld [vmem:[#allocation215_spill] sm:$0xff]  ;;  %v4608_v40 = vsel %vm1892_vm10, %v4591_v2, %v7547_v15  ;;  %v7707_v21 = vunpack.i.l.bf16 %v16458_v62  ;;  %v16462_v2 = vld [vmem:[#allocation266_spill] sm:$0xff] }
 0x745   : >> { %5162 = vrot.lane.b32.xlu0 %v13158_v42, %s7999_s8  ;;  %v5451_v59 = vpop.permute.xlu1 %5450  ;;  %v7687_v12 = vunpack.i.l.bf16 %v16457_v16  ;;  %v4625_v42 = vsel %vm1909_vm11, %v4608_v40, %v7587_v8  ;;  %v4633_v4 = vsel %vm1909_vm11, %v4616_v49, %v7607_v32  ;;  %v16460_v11 = vld [vmem:[#allocation227_spill] sm:$0xff] }
 0x746   : >> { %v7747_v0 = vunpack.i.l.bf16 %v16460_v11  ;;  %v4642_v53 = vsel %vm16461_vm12, %v4625_v42, %v7627_v1  ;;  %v4650_v16 = vsel %vm16461_vm12, %v4633_v4, %v7647_v56  ;;  %v7906_v15 = vld [vmem:[%s12151_s12 + $0x128] sm:$0xff]  ;;  %v7907_v42 = vld [vmem:[%s12151_s12 + $0x120] sm:$0xff] }
 0x747   : >> { %v5449_v33 = vpop.permute.xlu0 %5448  ;;  %5458 = vrot.lane.b32.xlu1 %v16459_v58, %s8003_s20  ;;  %v5598_v29 = vsel %vm225_vm0, %v7906_v15, %v16462_v2  ;;  %v4659_v58 = vsel %vm1943_vm13, %v4642_v53, %v7667_v46  ;;  %v13994_v8 = vsel %vm1943_vm13, %v4650_v16, %v7687_v12  ;;  %v16463_v32 = vld [vmem:[#allocation291_spill] sm:$0xff] }
 0x748   : >> { %v5622_v40 = vsel %vm1807_vm4, %v5598_v29, %v16463_v32  ;;  %v4676_v1 = vsel %vm1960_vm14, %v4659_v58, %v7707_v21  ;;  %v16464_v56 = vld [vmem:[#allocation223_spill] sm:$0xff]  ;;  %v16468_v29 = vld [vmem:[#allocation238_spill] sm:$0xff] }
 0x749   : >> { %5186 = vrot.lane.b32.xlu0 %v13262_v63, %s7999_s8  ;;  %v5475_v47 = vpop.permute.xlu1 %5474  ;;  %v7727_v49 = vunpack.i.l.bf16 %v16464_v56  ;;  %v16465_v4 = vld [vmem:[#allocation267_spill] sm:$0xff]  ;;  %v5646_v63 = vsel %vm1824_vm5, %v5622_v40, %v13692_v52  ;;  %v4693_v53 = vsel %vm16467_vm15, %v4676_v1, %v7747_v0  ;;  %v7787_v58 = vunpack.i.l.bf16 %v16468_v29 }
 0x74a   : >> { %v5597_v15 = vsel %vm225_vm0, %v7907_v42, %v16465_v4  ;;  %v16466_v16 = vld [vmem:[#allocation231_spill] sm:$0xff]  ;;  %v5670_v21 = vsel %vm1841_vm6, %v5646_v63, %v13803_v6  ;;  %v16469_v42 = vld [vmem:[#allocation278_spill] sm:$0xff] }
 0x74b   : >> { %v5473_v2 = vpop.permute.xlu0 %5472  ;;  %5233 = vrot.lane.b32.xlu1 %v13112_v44, %s8000_s16  ;;  %v7767_v12 = vunpack.i.l.bf16 %v16466_v16  ;;  %v5621_v46 = vsel %vm1807_vm4, %v5597_v15, %v13494_v24  ;;  %v7908_v32 = vld [vmem:[%s12151_s12 + $0x188] sm:$0xff]  ;;  %v5694_v40 = vsel %vm1858_vm8, %v5670_v21, %v13861_v48  ;;  %v16470_v6 = vld [vmem:[#allocation250_spill] sm:$0xff] }
 0x74c   : >> { %v5610_v52 = vsel %vm225_vm0, %v7908_v32, %v16469_v42  ;;  %v5645_v44 = vsel %vm1824_vm5, %v5621_v46, %v13694_v3  ;;  %v7827_v4 = vunpack.i.l.bf16 %v16470_v6  ;;  %v5718_v15 = vsel %vm1875_vm9, %v5694_v40, %v13879_v37  ;;  %v7909_v3 = vld [vmem:[%s12151_s12 + $0x180] sm:$0xff]  ;;  %v16471_v63 = vld [vmem:[#allocation279_spill] sm:$0xff]  ;;  %v7910_v42 = vld [vmem:[%s12151_s12 + $0x230] sm:$0xff] }
 0x74d   : >> { %5482 = vrot.lane.b32.xlu0 %v13379_v27, %s8003_s20  ;;  %v14023_v24 = vpop.permute.xlu1 %5249  ;;  %v5634_v0 = vsel %vm1807_vm4, %v5610_v52, %v13589_v55  ;;  %v5669_v1 = vsel %vm1841_vm6, %v5645_v44, %v13805_v61  ;;  %v5609_v48 = vsel %vm225_vm0, %v7909_v3, %v16471_v63  ;;  %v5742_v55 = vsel %vm1892_vm10, %v5718_v15, %v13905_v25  ;;  %v16474_v63 = vld [vmem:[#allocation245_spill] sm:$0xff] }
 0x74e   : >> { %v5658_v27 = vsel %vm1824_vm5, %v5634_v0, %v13755_v43  ;;  %v5693_v46 = vsel %vm1858_vm8, %v5669_v1, %v13851_v39  ;;  %v5633_v37 = vsel %vm1807_vm4, %v5609_v48, %v13602_v22  ;;  %v5766_v39 = vsel %vm1909_vm11, %v5742_v55, %v13919_v10 }
 0x74f   : >> { %v14041_v21 = vpop.permute.xlu0 %5225  ;;  %5257 = vrot.lane.b32.xlu1 %v13228_v31, %s8000_s16  ;;  %v5682_v61 = vsel %vm1841_vm6, %v5658_v27, %v13853_v9  ;;  %v5717_v43 = vsel %vm1875_vm9, %v5693_v46, %v13867_v17  ;;  %v5657_v25 = vsel %vm1824_vm5, %v5633_v37, %v13757_v35  ;;  %v5790_v22 = vsel %vm16461_vm12, %v5766_v39, %v5451_v59 }
 0x750   : >> { %v5706_v32 = vsel %vm1858_vm8, %v5682_v61, %v13869_v26  ;;  %v5741_v31 = vsel %vm1892_vm10, %v5717_v43, %v13888_v19  ;;  %v5681_v17 = vsel %vm1841_vm6, %v5657_v25, %v13843_v14  ;;  %v16472_v14 = vld [vmem:[#allocation258_spill] sm:$0xff]  ;;  %v4710_v3 = vsel %vm16473_vm7, %v4693_v53, %v7787_v58 }
 0x751   : >> { %5235 = vrot.lane.b32.xlu0 %v7910_v42, %s8000_s16  ;;  %v5528_v9 = vpop.permute.xlu1 %5527  ;;  %v5730_v10 = vsel %vm1875_vm9, %v5706_v32, %v13893_v54  ;;  %v5765_v35 = vsel %vm1909_vm11, %v5741_v31, %v13921_v30  ;;  %v5705_v19 = vsel %vm1858_vm8, %v5681_v17, %v13859_v38  ;;  %v7867_v40 = vunpack.i.l.bf16 %v16472_v14  ;;  %v16477_v58 = vld [vmem:[#allocation262_spill] sm:$0xff] }
 0x752   : >> { %v14069_v26 = vsel %vm1943_vm13, %v5790_v22, %v5528_v9  ;;  %v5754_v59 = vsel %vm1892_vm10, %v5730_v10, %v13913_v34  ;;  %v5789_v52 = vsel %vm16461_vm12, %v5765_v35, %v5449_v33  ;;  %v5729_v30 = vsel %vm1875_vm9, %v5705_v19, %v13877_v50  ;;  %v14137_v31 = vld [vmem:[%s12151_s12 + $0x2a0] sm:$0xff]  ;;  %v14140_v22 = vld [vmem:[%s12151_s12 + $0x2a8] sm:$0xff] }
 0x753   : >> { %v5526_v44 = vpop.permute.xlu0 %5525  ;;  %5535 = vrot.lane.b32.xlu1 %v13464_v60, %s8004_s21  ;;  %v5862_v54 = vrot.slane %v14069_v26, 1  ;;  %v5778_v0 = vsel %vm1909_vm11, %v5754_v59, %v13929_v51  ;;  %v5753_v34 = vsel %vm1892_vm10, %v5729_v30, %v13899_v7  ;;  %v7807_v48 = vunpack.i.l.bf16 %v16474_v63  ;;  %v16476_v7 = vld [vmem:[#allocation254_spill] sm:$0xff]  ;;  %v16479_v9 = vld [vmem:[#allocation319_spill] sm:$0xff] }
 0x754   : >> { %v5813_v38 = vsel %vm1943_vm13, %v5789_v52, %v5526_v44  ;;  %v5802_v33 = vsel %vm16461_vm12, %v5778_v0, %v5475_v47  ;;  %v5777_v50 = vsel %vm1909_vm11, %v5753_v34, %v13935_v20  ;;  %v4727_v27 = vsel %vm16475_vm3, %v4710_v3, %v7827_v4  ;;  %v16482_v59 = vld [vmem:[#allocation239_spill] sm:$0xff] }
 0x755   : >> { %5259 = vrot.lane.b32.xlu0 %v13242_v13, %s8000_s16  ;;  %v5552_v1 = vpop.permute.xlu1 %5551  ;;  %v5861_v15 = vrot.slane %v5813_v38, 1  ;;  %v7847_v46 = vunpack.i.l.bf16 %v16476_v7  ;;  %v5801_v47 = vsel %vm16461_vm12, %v5777_v50, %v5473_v2  ;;  %v4684_v20 = vsel %vm1960_vm14, %v13994_v8, %v7727_v49  ;;  %v16484_v44 = vld [vmem:[#allocation235_spill] sm:$0xff] }
 0x756   : >> { %v14095_v51 = vsel %vm1943_vm13, %v5802_v33, %v5552_v1  ;;  %v7887_v4 = vunpack.i.l.bf16 %v16477_v58  ;;  %v4744_v2 = vsel %vm16478_vm1, %v4727_v27, %v7867_v40  ;;  %v4701_v8 = vsel %vm16467_vm15, %v4684_v20, %v7767_v12  ;;  %v16485_v30 = vld [vmem:[#allocation139_spill] sm:$0xff] }
 0x757   : >> { %v5550_v55 = vpop.permute.xlu0 %5549  ;;  %v5863_v13 = vsel %vm844_vm2, %v5861_v15, %v5862_v54  ;;  %5310 = vrot.lane.b32.xlu1 %v13449_v23, %s8001_s17  ;;  %v5882_v53 = vrot.slane %v14095_v51, 1  ;;  %v4718_v49 = vsel %vm16473_vm7, %v4701_v8, %v7807_v48  ;;  %v14147_v17 = vrot.slane %v14137_v31, 7  ;;  %v16486_v38 = vld [vmem:[#allocation143_spill] sm:$0xff] }
 0x758   : >> { %v5825_v37 = vsel %vm1943_vm13, %v5801_v47, %v5550_v55  ;;  %6430 = vmatprep.mubr.msk.f32.mxu0 %vm1960_vm14, %v5863_v13  ;;  %v4735_v25 = vsel %vm16475_vm3, %v4718_v49, %v7847_v46  ;;  %v14150_v10 = vrot.slane %v14140_v22, 7  ;;  %vm16483_vm15 = vcmask 1040384   ;;  %v16487_v1 = vld [vmem:[#allocation147_spill] sm:$0xff] }
 0x759   : >> { %5559 = vrot.lane.b32.xlu0 %v13891_v5, %s8004_s21  ;;  %6032 = vmatmul.mubr.f32.vlgmr.msra.gmra.mrb[0].mxu0 %v4744_v2  ;;  %v14116_v23 = vpop.permute.xlu1 %5326  ;;  %v5881_v61 = vrot.slane %v5825_v37, 1  ;;  %v4752_v32 = vsel %vm16478_vm1, %v4735_v25, %v7887_v4  ;;  %v7308_v0 = vunpack.i.h.bf16 %v16485_v30  ;;  %v7328_v34 = vunpack.i.h.bf16 %v16486_v38  ;;  %v16488_v3 = vld [vmem:[#allocation151_spill] sm:$0xff] }
 0x75a   : >> { %16480 = vst [vmem:[#allocation195_spill] sm:$0xff] %v14150_v10  ;;  %v14163_v52 = vsel %vm16483_vm15, %v14147_v17, %v14150_v10  ;;  %v7348_v15 = vunpack.i.h.bf16 %v16487_v1  ;;  %v7368_v48 = vunpack.i.h.bf16 %v16488_v3  ;;  %v16489_v50 = vld [vmem:[#allocation155_spill] sm:$0xff]  ;;  %v7508_v3 = vunpack.i.h.bf16 %v16447_v18 }
 0x75b   : >> { %v14122_v43 = vpop.permute.xlu0 %5302  ;;  %v5883_v39 = vsel %vm844_vm2, %v5881_v61, %v5882_v53  ;;  %5334 = vrot.lane.b32.xlu1 %v13884_v28, %s8001_s17  ;;  %v7388_v27 = vunpack.i.h.bf16 %v16489_v50  ;;  %v16490_v46 = vld [vmem:[#allocation159_spill] sm:$0xff]  ;;  %vm16515_vm7 = vcmask 785408   ;;  %vm16516_vm3 = vcmask 850944  }
 0x75c   : >> { %6438 = vmatprep.mubr.msk.f32.mxu1 %vm1960_vm14, %v5883_v39  ;;  %v7408_v47 = vunpack.i.h.bf16 %v16490_v46  ;;  %v16491_v13 = vld [vmem:[#allocation163_spill] sm:$0xff]  ;;  %vm16518_vm1 = vmmov %vm16515_vm7  ;;  %vm16519_vm15 = vcmask 916480  }
 0x75d   : >> { %5312 = vrot.lane.b32.xlu0 %v13491_v41, %s8001_s17  ;;  %6072 = vmatmul.mubr.f32.vlgmr.msra.gmra.mrb[0].mxu1 %v4752_v32  ;;  %v14134_v12 = vpop.permute.xlu1 %5103  ;;  %v16481_v41 = vld [vmem:[#allocation347_spill] sm:$0xff]  ;;  %v7428_v20 = vunpack.i.h.bf16 %v16491_v13 }
 0x75e   : >> { %v16492_v4 = vld [vmem:[#allocation167_spill] sm:$0xff] }
 0x75f   : >> { %v14142_v42 = vpop.permute.xlu0 %5101  ;;  %5111 = vrot.lane.b32.xlu1 %v16479_v9, %s7998_s15  ;;  %v7448_v37 = vunpack.i.h.bf16 %v16492_v4  ;;  %v7911_v2 = vld [vmem:[%s12151_s12 + $0x8] sm:$0xff] }
 0x760   : >> { %v4507_v61 = vsel %vm225_vm0, %v7911_v2, %v7308_v0  ;;  %v7912_v8 = vld [vmem:[%s12151_s12 + $0x68] sm:$0xff]  ;;  %v16497_v2 = vld [vmem:[#allocation233_spill] sm:$0xff] }
 0x761   : >> { %5336 = vrot.lane.b32.xlu0 %v16481_v41, %s8001_s17  ;;  %v14154_v35 = vpop.permute.xlu1 %5403  ;;  %v4515_v49 = vsel %vm225_vm0, %v7912_v8, %v7328_v34  ;;  %v16493_v39 = vld [vmem:[#allocation171_spill] sm:$0xff]  ;;  %v4524_v38 = vsel %vm1807_vm4, %v4507_v61, %v7348_v15  ;;  %v7588_v61 = vunpack.i.h.bf16 %v16452_v57 }
 0x762   : >> { %v7468_v25 = vunpack.i.h.bf16 %v16493_v39  ;;  %v16494_v32 = vld [vmem:[#allocation175_spill] sm:$0xff]  ;;  %v4532_v1 = vsel %vm1807_vm4, %v4515_v49, %v7368_v48  ;;  %v4541_v34 = vsel %vm1824_vm5, %v4524_v38, %v7388_v27 }
 0x763   : >> { %v14156_v19 = vpop.permute.xlu0 %5379  ;;  %5389 = vrot.lane.b32.xlu1 %v16482_v59, %s8002_s19  ;;  %v7488_v9 = vunpack.i.h.bf16 %v16494_v32  ;;  %v16495_v50 = vld [vmem:[#allocation183_spill] sm:$0xff]  ;;  %v4549_v46 = vsel %vm1824_vm5, %v4532_v1, %v7408_v47 }
 0x764   : >> { %v7528_v0 = vunpack.i.h.bf16 %v16495_v50  ;;  %v16496_v13 = vld [vmem:[#allocation187_spill] sm:$0xff]  ;;  %v4566_v15 = vsel %vm1841_vm6, %v4549_v46, %v7448_v37 }
 0x765   : >> { %5387 = vrot.lane.b32.xlu0 %v16484_v44, %s8002_s19  ;;  %v14167_v40 = vpop.permute.xlu1 %5156  ;;  %v7548_v4 = vunpack.i.h.bf16 %v16496_v13  ;;  %v16498_v48 = vld [vmem:[#allocation191_spill] sm:$0xff]  ;;  %v4583_v47 = vsel %vm1858_vm8, %v4566_v15, %v7488_v9  ;;  %v7668_v9 = vunpack.i.h.bf16 %v16456_v36  ;;  %v16503_v15 = vld [vmem:[#allocation281_spill] sm:$0xff] }
 0x766   : >> { %v7568_v18 = vunpack.i.h.bf16 %v16498_v48  ;;  %v16499_v49 = vld [vmem:[#allocation199_spill] sm:$0xff]  ;;  %v4600_v57 = vsel %vm1875_vm9, %v4583_v47, %v7528_v0 }
 0x767   : >> { %v14171_v33 = vpop.permute.xlu0 %5154  ;;  %5413 = vrot.lane.b32.xlu1 %v14163_v52, %s8002_s19  ;;  %v7608_v39 = vunpack.i.h.bf16 %v16499_v49  ;;  %v16500_v32 = vld [vmem:[#allocation203_spill] sm:$0xff]  ;;  %v14232_v49 = vld [vmem:[%s12151_s12 + $0x240] sm:$0xff] }
 0x768   : >> { %v7628_v38 = vunpack.i.h.bf16 %v16500_v32  ;;  %v14217_v50 = vld [vmem:[%s12151_s12 + $0x248] sm:$0xff]  ;;  %v4617_v0 = vsel %vm1892_vm10, %v4600_v57, %v7568_v18  ;;  %v16508_v57 = vld [vmem:[#allocation348_spill] sm:$0xff] }
 0x769   : >> { %5411 = vrot.lane.b32.xlu0 %v14147_v17, %s8002_s19  ;;  %v14181_v55 = vpop.permute.xlu1 %5180  ;;  %v16501_v37 = vld [vmem:[#allocation207_spill] sm:$0xff]  ;;  %v4634_v47 = vsel %vm1909_vm11, %v4617_v0, %v7608_v39 }
 0x76a   : >> { %v16502_v46 = vld [vmem:[#allocation215_spill] sm:$0xff] }
 0x76b   : >> { %v14191_v30 = vpop.permute.xlu0 %5178  ;;  %5188 = vrot.lane.b32.xlu1 %v13249_v45, %s7999_s8  ;;  %v4558_v45 = vsel %vm1841_vm6, %v4541_v34, %v7428_v20  ;;  %v7688_v13 = vunpack.i.h.bf16 %v16502_v46  ;;  %v16507_v39 = vld [vmem:[#allocation295_spill] sm:$0xff] }
 0x76c   : >> { %v4575_v27 = vsel %vm1858_vm8, %v4558_v45, %v7468_v25  ;;  %v7648_v25 = vunpack.i.h.bf16 %v16501_v37  ;;  %v7914_v45 = vld [vmem:[%s12151_s12 + $0x190] sm:$0x3]  ;;  %v16505_v37 = vld [vmem:[#allocation269_spill] sm:$0xff] }
 0x76d   : >> { %5164 = vrot.lane.b32.xlu0 %v16497_v2, %s7999_s8  ;;  %v14204_v8 = vpop.permute.xlu1 %5476  ;;  %v4592_v20 = vsel %vm1875_vm9, %v4575_v27, %v7508_v3  ;;  %v7708_v2 = vunpack.i.h.bf16 %v16458_v62  ;;  %v5611_v48 = vsel %vm225_vm0, %v7914_v45, %v16503_v15  ;;  %v16504_v27 = vld [vmem:[#allocation308_spill] sm:$0xff]  ;;  %v16506_v45 = vld [vmem:[#allocation329_spill] sm:$0xff] }
 0x76e   : >> { %v4609_v34 = vsel %vm1892_vm10, %v4592_v20, %v7548_v4  ;;  %v7728_v4 = vunpack.i.h.bf16 %v16464_v56  ;;  %v5635_v62 = vsel %vm1807_vm4, %v5611_v48, %v16504_v27  ;;  %v7916_v20 = vld [vmem:[%s12151_s12 + $0x130] sm:$0x3]  ;;  %v4651_v56 = vsel %vm16461_vm12, %v4634_v47, %v7648_v25 }
 0x76f   : >> { %v14214_v1 = vpop.permute.xlu0 %5452  ;;  %5462 = vrot.lane.b32.xlu1 %v14217_v50, %s8003_s20  ;;  %v4626_v36 = vsel %vm1909_vm11, %v4609_v34, %v7588_v61  ;;  %v5599_v46 = vsel %vm225_vm0, %v7916_v20, %v16505_v37  ;;  %v5659_v15 = vsel %vm1824_vm5, %v5635_v62, %v16506_v45  ;;  %v4668_v48 = vsel %vm1943_vm13, %v4651_v56, %v7688_v13  ;;  %v16510_v62 = vld [vmem:[#allocation349_spill] sm:$0xff] }
 0x770   : >> { %v4643_v32 = vsel %vm16461_vm12, %v4626_v36, %v7628_v38  ;;  %v5623_v38 = vsel %vm1807_vm4, %v5599_v46, %v16507_v39  ;;  %v5683_v34 = vsel %vm1841_vm6, %v5659_v15, %v16508_v57  ;;  %v16509_v36 = vld [vmem:[#allocation318_spill] sm:$0xff]  ;;  %v4685_v47 = vsel %vm1960_vm14, %v4668_v48, %v7728_v4  ;;  %v16513_v15 = vld [vmem:[#allocation179_spill] sm:$0xff]  ;;  %v7918_v48 = vld [vmem:[%s12151_s12 + $0x238] sm:$0x3] }
 0x771   : >> { %5460 = vrot.lane.b32.xlu0 %v14232_v49, %s8003_s20  ;;  %v14236_v3 = vpop.permute.xlu1 %5229  ;;  %v4660_v61 = vsel %vm1943_vm13, %v4643_v32, %v7668_v9  ;;  %v5647_v27 = vsel %vm1824_vm5, %v5623_v38, %v16509_v36  ;;  %v5707_v20 = vsel %vm1858_vm8, %v5683_v34, %v16510_v62  ;;  %v14271_v9 = vld [vmem:[%s12151_s12 + $0x2b0] sm:$0x3]  ;;  %v7748_v13 = vunpack.i.h.bf16 %v16460_v11  ;;  %v16512_v32 = vld [vmem:[#allocation339_spill] sm:$0xff]  ;;  %v7917_v11 = vld [vmem:[%s12151_s12 + $0x298] sm:$0x3] }
 0x772   : >> { %v4677_v0 = vsel %vm1960_vm14, %v4660_v61, %v7708_v2  ;;  %16511 = vst [vmem:[#allocation211_spill] sm:$0xff] %v14271_v9  ;;  %v5671_v2 = vsel %vm1841_vm6, %v5647_v27, %v16512_v32  ;;  %v5731_v37 = vsel %vm1875_vm9, %v5707_v20, %v14023_v24  ;;  %v7768_v46 = vunpack.i.h.bf16 %v16466_v16  ;;  %v16514_v20 = vld [vmem:[#allocation294_spill] sm:$0xff] }
 0x773   : >> { %v14250_v18 = vpop.permute.xlu0 %5227  ;;  %5486 = vrot.lane.b32.xlu1 %v14140_v22, %s8003_s20  ;;  %v7808_v45 = vunpack.i.h.bf16 %v16474_v63  ;;  %v5695_v56 = vsel %vm1858_vm8, %v5671_v2, %v16513_v15  ;;  %v5755_v61 = vsel %vm1892_vm10, %v5731_v37, %v14116_v23  ;;  %v5294_v16 = vrot.slane %v14140_v22, 1 }
 0x774   : >> { %v5719_v39 = vsel %vm1875_vm9, %v5695_v56, %v14041_v21  ;;  %v5779_v24 = vsel %vm1909_vm11, %v5755_v61, %v14154_v35  ;;  %v14295_v63 = vrot.slane %v14271_v9, 1  ;;  %v7788_v38 = vunpack.i.h.bf16 %v16468_v29 }
 0x775   : >> { %5484 = vrot.lane.b32.xlu0 %v14137_v31, %s8003_s20  ;;  %v14268_v25 = vpop.permute.xlu1 %5253  ;;  %v7848_v23 = vunpack.i.h.bf16 %v16476_v7  ;;  %v5743_v57 = vsel %vm1892_vm10, %v5719_v39, %v14122_v43  ;;  %v5803_v34 = vsel %vm16461_vm12, %v5779_v24, %v14204_v8  ;;  %v7888_v35 = vunpack.i.h.bf16 %v16477_v58 }
 0x776   : >> { %v5767_v36 = vsel %vm1909_vm11, %v5743_v57, %v14156_v19  ;;  %v5293_v29 = vrot.slane %v14137_v31, 1  ;;  %v7828_v7 = vunpack.i.h.bf16 %v16470_v6  ;;  %v4702_v32 = vsel %vm16515_vm7, %v4685_v47, %v7768_v46  ;;  %vm16520_vm7 = vmmov %vm16516_vm3  ;;  %v16526_v57 = vld [vmem:[#allocation236_spill] sm:$0xff] }
 0x777   : >> { %v14285_v4 = vpop.permute.xlu0 %5251  ;;  %5261 = vrot.lane.b32.xlu1 %v7917_v11, %s8000_s16  ;;  %v5791_v43 = vsel %vm16461_vm12, %v5767_v36, %v14214_v1  ;;  %v7868_v58 = vunpack.i.h.bf16 %v16472_v14  ;;  %v14320_v2 = vsel %vm844_vm2, %v5294_v16, %v14295_v63  ;;  %v4719_v6 = vsel %vm16516_vm3, %v4702_v32, %v7808_v45  ;;  %v16517_v1 = vld [vmem:[#allocation290_spill] sm:$0xff] }
 0x778   : >> { %v4694_v14 = vsel %vm16518_vm1, %v4677_v0, %v7748_v13  ;;  %v4736_v46 = vsel %vm16519_vm15, %v4719_v6, %v7848_v23  ;;  %v14334_v56 = vsel %vm844_vm2, %v5293_v29, %v5294_v16  ;;  %vm16521_vm3 = vcmask 982016   ;;  %vm16522_vm1 = vmmov %vm16519_vm15  ;;  %v16534_v6 = vld [vmem:[#allocation166_spill] sm:$0xff] }
 0x779   : >> { %5237 = vrot.lane.b32.xlu0 %v7918_v48, %s8000_s16  ;;  %v5554_v21 = vpop.permute.xlu1 %5553  ;;  %v4711_v45 = vsel %vm16520_vm7, %v4694_v14, %v7788_v38  ;;  %v4753_v61 = vsel %vm16521_vm3, %v4736_v46, %v7888_v35  ;;  %vm16523_vm15 = vmmov %vm16521_vm3  ;;  %v16525_v38 = vld [vmem:[#allocation141_spill] sm:$0xff]  ;;  %vm16558_vm7 = vcmask 785408   ;;  %vm16573_vm3 = vcmask 850944  }
 0x77a   : >> { %v5827_v27 = vsel %vm1943_vm13, %v5803_v34, %v5554_v21  ;;  %v7312_v23 = vunpack.i.l.bf16 %v16525_v38  ;;  %v16529_v21 = vld [vmem:[#allocation146_spill] sm:$0xff] }
 0x77b   : >> { %v5884_v62 = vrot.slane %v5827_v27, 1  ;;  %v5530_v8 = vpop.permute.xlu0 %5529  ;;  %5539 = vrot.lane.b32.xlu1 %v16514_v20, %s8004_s21  ;;  %v7352_v35 = vunpack.i.l.bf16 %v16529_v21  ;;  %v16531_v27 = vld [vmem:[#allocation154_spill] sm:$0xff] }
 0x77c   : >> { %v5815_v19 = vsel %vm1943_vm13, %v5791_v43, %v5530_v8  ;;  %v7392_v29 = vunpack.i.l.bf16 %v16531_v27  ;;  %v16532_v43 = vld [vmem:[#allocation158_spill] sm:$0xff] }
 0x77d   : >> { %v5864_v37 = vrot.slane %v5815_v19, 1  ;;  %5537 = vrot.lane.b32.xlu0 %v16517_v1, %s8004_s21  ;;  %v14325_v15 = vpop.permute.xlu1 %5306  ;;  %v5885_v47 = vsel %vm844_vm2, %v5882_v53, %v5884_v62  ;;  %v4728_v53 = vsel %vm16522_vm1, %v4711_v45, %v7828_v7  ;;  %v7412_v62 = vunpack.i.l.bf16 %v16532_v43  ;;  %v16533_v8 = vld [vmem:[#allocation162_spill] sm:$0xff]  ;;  %v7920_v45 = vld [vmem:[%s12151_s12 + $0x78] sm:$0xff] }
 0x77e   : >> { %6439 = vmatprep.mubr.msk.f32.mxu1 %vm1960_vm14, %v5885_v47  ;;  %v4745_v0 = vsel %vm16523_vm15, %v4728_v53, %v7868_v58  ;;  %v7432_v32 = vunpack.i.l.bf16 %v16533_v8  ;;  %v7919_v58 = vld [vmem:[%s12151_s12 + $0x18] sm:$0xff]  ;;  %v16535_v47 = vld [vmem:[#allocation170_spill] sm:$0xff] }
 0x77f   : >> { %v14338_v11 = vpop.permute.xlu0 %5304  ;;  %v5865_v51 = vsel %vm844_vm2, %v5862_v54, %v5864_v37  ;;  %5563 = vrot.lane.b32.xlu1 %v14320_v2, %s8004_s21  ;;  %6077 = vmatmul.mubr.f32.gmra.mrb[2].mxu1 %v4753_v61  ;;  %v4508_v19 = vsel %vm225_vm0, %v7919_v58, %v7312_v23  ;;  %v7452_v37 = vunpack.i.l.bf16 %v16534_v6  ;;  %v7472_v14 = vunpack.i.l.bf16 %v16535_v47 }
 0x780   : >> { %6431 = vmatprep.mubr.msk.f32.mxu0 %vm1960_vm14, %v5865_v51  ;;  %v16536_v51 = vld [vmem:[#allocation174_spill] sm:$0xff] }
 0x781   : >> { %5561 = vrot.lane.b32.xlu0 %v14334_v56, %s8004_s21  ;;  %6037 = vmatmul.mubr.f32.gmra.mrb[2].mxu0 %v4745_v0  ;;  %v14350_v13 = vpop.permute.xlu1 %5330  ;;  %v7492_v53 = vunpack.i.l.bf16 %v16536_v51  ;;  %v16537_v0 = vld [vmem:[#allocation178_spill] sm:$0xff] }
 0x783   : >> { %v14352_v39 = vpop.permute.xlu0 %5328  ;;  %5338 = vrot.lane.b32.xlu1 %v13891_v5, %s8001_s17 }
 0x785   : >> { %5314 = vrot.lane.b32.xlu0 %v13464_v60, %s8001_s17  ;;  %v14358_v26 = vpop.permute.xlu1 %5381 }
 0x787   : >> { %v14360_v54 = vpop.permute.xlu0 %5105  ;;  %5115 = vrot.lane.b32.xlu1 %v16481_v41, %s7998_s15  ;;  %v16528_v41 = vld [vmem:[#allocation142_spill] sm:$0xff] }
 0x788   : >> { %16524 = vst [vmem:[#allocation219_spill] sm:$0xff] %v14360_v54  ;;  %v7332_v48 = vunpack.i.l.bf16 %v16528_v41  ;;  %v7512_v54 = vunpack.i.l.bf16 %v16537_v0  ;;  %v16542_v0 = vld [vmem:[#allocation194_spill] sm:$0xff] }
 0x789   : >> { %5113 = vrot.lane.b32.xlu0 %v13884_v28, %s7998_s15  ;;  %v14366_v24 = vpop.permute.xlu1 %5405  ;;  %v16530_v28 = vld [vmem:[#allocation150_spill] sm:$0xff]  ;;  %v7592_v51 = vunpack.i.l.bf16 %v16542_v0 }
 0x78a   : >> { %v7372_v36 = vunpack.i.l.bf16 %v16530_v28  ;;  %v4516_v61 = vsel %vm225_vm0, %v7920_v45, %v7332_v48 }
 0x78b   : >> { %v14368_v16 = vpop.permute.xlu0 %5383  ;;  %5415 = vrot.lane.b32.xlu1 %v14150_v10, %s8002_s19  ;;  %v16539_v10 = vld [vmem:[#allocation186_spill] sm:$0xff] }
 0x78c   : >> { %v4533_v23 = vsel %vm1807_vm4, %v4516_v61, %v7372_v36  ;;  %v7552_v47 = vunpack.i.l.bf16 %v16539_v10  ;;  %v16543_v61 = vld [vmem:[#allocation198_spill] sm:$0xff] }
 0x78d   : >> { %5391 = vrot.lane.b32.xlu0 %v16526_v57, %s8002_s19  ;;  %v14375_v34 = vpop.permute.xlu1 %5158  ;;  %v4550_v48 = vsel %vm1824_vm5, %v4533_v23, %v7412_v62  ;;  %v16544_v10 = vld [vmem:[#allocation202_spill] sm:$0xff] }
 0x78e   : >> { %16527 = vst [vmem:[#allocation265_spill] sm:$0xff] %v14375_v34  ;;  %v16538_v34 = vld [vmem:[#allocation182_spill] sm:$0xff]  ;;  %v4567_v36 = vsel %vm1841_vm6, %v4550_v48, %v7452_v37 }
 0x78f   : >> { %v14381_v7 = vpop.permute.xlu0 %5407  ;;  %5168 = vrot.lane.b32.xlu1 %v16482_v59, %s7999_s8  ;;  %v4525_v59 = vsel %vm1807_vm4, %v4508_v19, %v7352_v35  ;;  %v7532_v57 = vunpack.i.l.bf16 %v16538_v34  ;;  %v16541_v19 = vld [vmem:[#allocation190_spill] sm:$0xff]  ;;  %v7632_v34 = vunpack.i.l.bf16 %v16544_v10  ;;  %v4584_v62 = vsel %vm1858_vm8, %v4567_v36, %v7492_v53 }
 0x790   : >> { %v4542_v58 = vsel %vm1824_vm5, %v4525_v59, %v7392_v29  ;;  %v7572_v45 = vunpack.i.l.bf16 %v16541_v19  ;;  %v7612_v59 = vunpack.i.l.bf16 %v16543_v61  ;;  %v16545_v23 = vld [vmem:[#allocation206_spill] sm:$0xff] }
 0x791   : >> { %5166 = vrot.lane.b32.xlu0 %v16484_v44, %s7999_s8  ;;  %v14393_v46 = vpop.permute.xlu1 %5454  ;;  %v4559_v35 = vsel %vm1841_vm6, %v4542_v58, %v7432_v32  ;;  %v7652_v58 = vunpack.i.l.bf16 %v16545_v23  ;;  %v16546_v37 = vld [vmem:[#allocation210_spill] sm:$0xff] }
 0x792   : >> { %v4576_v29 = vsel %vm1858_vm8, %v4559_v35, %v7472_v14  ;;  %v7672_v48 = vunpack.i.l.bf16 %v16546_v37  ;;  %v4601_v14 = vsel %vm1875_vm9, %v4584_v62, %v7532_v57  ;;  %v16548_v61 = vld [vmem:[#allocation218_spill] sm:$0xff]  ;;  %v16550_v62 = vld [vmem:[#allocation268_spill] sm:$0xff] }
 0x793   : >> { %v14404_v44 = vpop.permute.xlu0 %5182  ;;  %5192 = vrot.lane.b32.xlu1 %v14163_v52, %s7999_s8  ;;  %v4593_v32 = vsel %vm1875_vm9, %v4576_v29, %v7512_v54  ;;  %v4618_v54 = vsel %vm1892_vm10, %v4601_v14, %v7572_v45  ;;  %v16549_v36 = vld [vmem:[#allocation226_spill] sm:$0xff]  ;;  %v16552_v14 = vld [vmem:[#allocation293_spill] sm:$0xff] }
 0x794   : >> { %16540 = vst [vmem:[#allocation227_spill] sm:$0xff] %v14404_v44  ;;  %v4610_v35 = vsel %vm1892_vm10, %v4593_v32, %v7552_v47  ;;  %v16547_v44 = vld [vmem:[#allocation214_spill] sm:$0xff]  ;;  %v7752_v29 = vunpack.i.l.bf16 %v16549_v36  ;;  %v4635_v37 = vsel %vm1909_vm11, %v4618_v54, %v7612_v59  ;;  %v7921_v47 = vld [vmem:[%s12151_s12 + $0x138] sm:$0xff] }
 0x795   : >> { %5190 = vrot.lane.b32.xlu0 %v14147_v17, %s7999_s8  ;;  %v14418_v52 = vpop.permute.xlu1 %5478  ;;  %v7692_v10 = vunpack.i.l.bf16 %v16547_v44  ;;  %v7712_v17 = vunpack.i.l.bf16 %v16548_v61  ;;  %v4627_v53 = vsel %vm1909_vm11, %v4610_v35, %v7592_v51  ;;  %v5600_v32 = vsel %vm225_vm0, %v7921_v47, %v16550_v62  ;;  %v14439_v44 = vld [vmem:[%s12151_s12 + $0x250] sm:$0x3]  ;;  %v7923_v54 = vld [vmem:[%s12151_s12 + $0x140] sm:$0xff]  ;;  %v16554_v62 = vld [vmem:[#allocation317_spill] sm:$0xff] }
 0x796   : >> { %v4644_v57 = vsel %vm16461_vm12, %v4627_v53, %v7632_v34  ;;  %16551 = vst [vmem:[#allocation266_spill] sm:$0xff] %v14439_v44  ;;  %v4652_v51 = vsel %vm16461_vm12, %v4635_v37, %v7652_v58  ;;  %v5624_v59 = vsel %vm1807_vm4, %v5600_v32, %v16552_v14  ;;  %v16553_v53 = vld [vmem:[#allocation271_spill] sm:$0xff]  ;;  %v16555_v58 = vld [vmem:[#allocation222_spill] sm:$0xff]  ;;  %v7924_v14 = vld [vmem:[%s12151_s12 + $0x198] sm:$0xff] }
 0x797   : >> { %v5457_v0 = vpop.permute.xlu0 %5456  ;;  %5488 = vrot.lane.b32.xlu1 %v14271_v9, %s8003_s20  ;;  %v4661_v45 = vsel %vm1943_vm13, %v4644_v57, %v7672_v48  ;;  %v14450_v34 = vsel %vm1943_vm13, %v4652_v51, %v7692_v10  ;;  %v5601_v47 = vsel %vm225_vm0, %v7923_v54, %v16553_v53  ;;  %v16556_v48 = vld [vmem:[#allocation297_spill] sm:$0xff]  ;;  %v16557_v57 = vld [vmem:[#allocation338_spill] sm:$0xff]  ;;  %v16560_v54 = vld [vmem:[#allocation280_spill] sm:$0xff] }
 0x798   : >> { %v4678_v35 = vsel %vm1960_vm14, %v4661_v45, %v7712_v17  ;;  %v5625_v10 = vsel %vm1807_vm4, %v5601_v47, %v16556_v48  ;;  %v16559_v51 = vld [vmem:[#allocation230_spill] sm:$0xff]  ;;  %v16561_v53 = vld [vmem:[#allocation321_spill] sm:$0xff] }
 0x799   : >> { %5464 = vrot.lane.b32.xlu0 %v14439_v44, %s8003_s20  ;;  %v14443_v9 = vpop.permute.xlu1 %5231  ;;  %v5648_v44 = vsel %vm1824_vm5, %v5624_v59, %v16554_v62  ;;  %v4695_v32 = vsel %vm16558_vm7, %v4678_v35, %v7752_v29  ;;  %v5612_v59 = vsel %vm225_vm0, %v7924_v14, %v16560_v54  ;;  %v16562_v48 = vld [vmem:[#allocation237_spill] sm:$0xff]  ;;  %v7925_v54 = vld [vmem:[%s12151_s12 + $0x1a0] sm:$0xff] }
 0x79a   : >> { %v5672_v17 = vsel %vm1841_vm6, %v5648_v44, %v16557_v57  ;;  %v7792_v44 = vunpack.i.l.bf16 %v16562_v48  ;;  %v16563_v57 = vld [vmem:[#allocation306_spill] sm:$0xff]  ;;  %v16564_v35 = vld [vmem:[#allocation341_spill] sm:$0xff] }
 0x79b   : >> { %v5481_v36 = vpop.permute.xlu0 %5480  ;;  %5241 = vrot.lane.b32.xlu1 %v14217_v50, %s8000_s16  ;;  %v5649_v50 = vsel %vm1824_vm5, %v5625_v10, %v16561_v53  ;;  %v5696_v62 = vsel %vm1858_vm8, %v5672_v17, %v14171_v33  ;;  %v5636_v29 = vsel %vm1807_vm4, %v5612_v59, %v16563_v57  ;;  %v16565_v10 = vld [vmem:[#allocation283_spill] sm:$0xff]  ;;  %v16566_v33 = vld [vmem:[#allocation328_spill] sm:$0xff] }
 0x79c   : >> { %v5673_v45 = vsel %vm1841_vm6, %v5649_v50, %v16564_v35  ;;  %v5720_v14 = vsel %vm1875_vm9, %v5696_v62, %v14250_v18  ;;  %v5613_v53 = vsel %vm225_vm0, %v7925_v54, %v16565_v10  ;;  %v5660_v17 = vsel %vm1824_vm5, %v5636_v29, %v16566_v33  ;;  %v16567_v50 = vld [vmem:[#allocation310_spill] sm:$0xff] }
 0x79d   : >> { %5239 = vrot.lane.b32.xlu0 %v14232_v49, %s8000_s16  ;;  %v5532_v47 = vpop.permute.xlu1 %5531  ;;  %v5697_v49 = vsel %vm1858_vm8, %v5673_v45, %v14167_v40  ;;  %v5744_v37 = vsel %vm1892_vm10, %v5720_v14, %v14338_v11  ;;  %v5637_v18 = vsel %vm1807_vm4, %v5613_v53, %v16567_v50  ;;  %v5684_v62 = vsel %vm1841_vm6, %v5660_v17, %v14142_v42  ;;  %v16568_v45 = vld [vmem:[#allocation331_spill] sm:$0xff]  ;;  %v16569_v14 = vld [vmem:[#allocation249_spill] sm:$0xff]  ;;  %v16571_v17 = vld [vmem:[#allocation292_spill] sm:$0xff] }
 0x79e   : >> { %v5721_v57 = vsel %vm1875_vm9, %v5697_v49, %v14236_v3  ;;  %v5768_v40 = vsel %vm1909_vm11, %v5744_v37, %v14358_v26  ;;  %v5661_v11 = vsel %vm1824_vm5, %v5637_v18, %v16568_v45  ;;  %v5708_v29 = vsel %vm1858_vm8, %v5684_v62, %v14191_v30  ;;  %v16574_v62 = vld [vmem:[#allocation253_spill] sm:$0xff] }
 0x79f   : >> { %v14492_v59 = vpop.permute.xlu0 %5255  ;;  %5265 = vrot.lane.b32.xlu1 %v14140_v22, %s8000_s16  ;;  %v5745_v22 = vsel %vm1892_vm10, %v5721_v57, %v14325_v15  ;;  %v5792_v35 = vsel %vm16461_vm12, %v5768_v40, %v14393_v46  ;;  %v5685_v3 = vsel %vm1841_vm6, %v5661_v11, %v14134_v12  ;;  %v5732_v26 = vsel %vm1875_vm9, %v5708_v29, %v14285_v4  ;;  %v16570_v12 = vld [vmem:[#allocation257_spill] sm:$0xff] }
 0x7a0   : >> { %v5769_v37 = vsel %vm1909_vm11, %v5745_v22, %v14368_v16  ;;  %v5816_v30 = vsel %vm1943_vm13, %v5792_v35, %v5532_v47  ;;  %v7832_v15 = vunpack.i.l.bf16 %v16569_v14  ;;  %v5709_v46 = vsel %vm1858_vm8, %v5685_v3, %v14181_v55 }
 0x7a1   : >> { %5263 = vrot.lane.b32.xlu0 %v14137_v31, %s8000_s16  ;;  %v5556_v42 = vpop.permute.xlu1 %5555  ;;  %v5756_v31 = vsel %vm1892_vm10, %v5732_v26, %v14352_v39  ;;  %v5793_v54 = vsel %vm16461_vm12, %v5769_v37, %v5457_v0  ;;  %v7872_v4 = vunpack.i.l.bf16 %v16570_v12  ;;  %v5733_v16 = vsel %vm1875_vm9, %v5709_v46, %v14268_v25  ;;  %v16572_v25 = vld [vmem:[#allocation243_spill] sm:$0xff] }
 0x7a2   : >> { %v5780_v47 = vsel %vm1909_vm11, %v5756_v31, %v14366_v24  ;;  %v5757_v55 = vsel %vm1892_vm10, %v5733_v16, %v14350_v13  ;;  %v5866_v0 = vrot.slane %v5816_v30, 1  ;;  %v7812_v50 = vunpack.i.l.bf16 %v16572_v25  ;;  %v14593_v31 = vld [vmem:[%s12151_s12 + $0x2b8] sm:$0xff] }
 0x7a3   : >> { %v5534_v10 = vpop.permute.xlu0 %5533  ;;  %5565 = vrot.lane.b32.xlu1 %v14295_v63, %s8004_s21  ;;  %v5804_v39 = vsel %vm16461_vm12, %v5780_v47, %v14418_v52  ;;  %v5781_v24 = vsel %vm1909_vm11, %v5757_v55, %v14381_v7  ;;  %v4712_v13 = vsel %vm16573_vm3, %v4695_v32, %v7792_v44  ;;  %v7852_v57 = vunpack.i.l.bf16 %v16574_v62  ;;  %v16576_v32 = vld [vmem:[#allocation261_spill] sm:$0xff]  ;;  %v16578_v47 = vld [vmem:[#allocation247_spill] sm:$0xff] }
 0x7a4   : >> { %v14535_v53 = vsel %vm1943_vm13, %v5793_v54, %v5534_v10  ;;  %v5828_v18 = vsel %vm1943_vm13, %v5804_v39, %v5556_v42  ;;  %v5805_v52 = vsel %vm16461_vm12, %v5781_v24, %v5481_v36  ;;  %v4729_v11 = vsel %vm16522_vm1, %v4712_v13, %v7832_v15  ;;  %v14596_v54 = vld [vmem:[%s12151_s12 + $0x2c0] sm:$0xff] }
 0x7a5   : >> { %v5867_v33 = vrot.slane %v14535_v53, 1  ;;  %5541 = vrot.lane.b32.xlu0 %v16571_v17, %s8004_s21  ;;  %v14544_v49 = vpop.permute.xlu1 %5308  ;;  %v16575_v7 = vunpack.i.l.bf16 %v16555_v58  ;;  %v7892_v44 = vunpack.i.l.bf16 %v16576_v32  ;;  %v4746_v36 = vsel %vm16523_vm15, %v4729_v11, %v7872_v4  ;;  %v16580_v39 = vld [vmem:[#allocation242_spill] sm:$0xff] }
 0x7a6   : >> { %v5886_v35 = vrot.slane %v5828_v18, 1  ;;  %v5373_v4 = vrot.slane %v14596_v54, 7  ;;  %v7373_v24 = vunpack.i.h.bf16 %v16530_v28  ;;  %v7393_v18 = vunpack.i.h.bf16 %v16531_v27  ;;  %v16581_v11 = vld [vmem:[#allocation170_spill] sm:$0xff] }
 0x7a7   : >> { %v5558_v40 = vpop.permute.xlu0 %5557  ;;  %v5868_v45 = vsel %vm844_vm2, %v5866_v0, %v5867_v33  ;;  %5318 = vrot.lane.b32.xlu1 %v16514_v20, %s8001_s17  ;;  %v4686_v29 = vsel %vm1960_vm14, %v14450_v34, %v16575_v7  ;;  %v16577_v34 = vunpack.i.l.bf16 %v16559_v51  ;;  %v7473_v7 = vunpack.i.h.bf16 %v16581_v11 }
 0x7a8   : >> { %v14565_v22 = vsel %vm1943_vm13, %v5805_v52, %v5558_v40  ;;  %6432 = vmatprep.mubr.msk.f32.mxu0 %vm1960_vm14, %v5868_v45  ;;  %v7926_v52 = vld [vmem:[%s12151_s12 + $0x20] sm:$0xff]  ;;  %v7453_v45 = vunpack.i.h.bf16 %v16534_v6 }
 0x7a9   : >> { %v5887_v20 = vrot.slane %v14565_v22, 1  ;;  %5316 = vrot.lane.b32.xlu0 %v16517_v1, %s8001_s17  ;;  %6042 = vmatmul.mubr.f32.gmra.mrb[4].mxu0 %v4746_v36  ;;  %v14572_v42 = vpop.permute.xlu1 %5107  ;;  %v4703_v3 = vsel %vm16558_vm7, %v4686_v29, %v16577_v34  ;;  %vm16579_vm7 = vcmask 1040384   ;;  %v16582_v29 = vld [vmem:[#allocation174_spill] sm:$0xff]  ;;  %v16584_v34 = vld [vmem:[#allocation195_spill] sm:$0xff] }
 0x7aa   : >> { %v4720_v26 = vsel %vm16573_vm3, %v4703_v3, %v7812_v50  ;;  %v7353_v50 = vunpack.i.h.bf16 %v16529_v21  ;;  %v7927_v21 = vld [vmem:[%s12151_s12 + $0x80] sm:$0xff]  ;;  %vm16605_vm3 = vcmask 785408  }
 0x7ab   : >> { %v14578_v37 = vpop.permute.xlu0 %5332  ;;  %v5888_v30 = vsel %vm844_vm2, %v5886_v35, %v5887_v20  ;;  %5342 = vrot.lane.b32.xlu1 %v14320_v2, %s8001_s17  ;;  %v4737_v1 = vsel %vm16522_vm1, %v4720_v26, %v7852_v57  ;;  %v5372_v2 = vrot.slane %v14593_v31, 7  ;;  %v7433_v57 = vunpack.i.h.bf16 %v16533_v8  ;;  %v16583_v36 = vld [vmem:[#allocation178_spill] sm:$0xff] }
 0x7ac   : >> { %6440 = vmatprep.mubr.msk.f32.mxu1 %vm1960_vm14, %v5888_v30  ;;  %v4754_v15 = vsel %vm16523_vm15, %v4737_v1, %v7892_v44  ;;  %v7493_v44 = vunpack.i.h.bf16 %v16582_v29  ;;  %v7513_v35 = vunpack.i.h.bf16 %v16583_v36  ;;  %v16585_v30 = vld [vmem:[#allocation182_spill] sm:$0xff]  ;;  %vm16606_vm1 = vcmask 850944  }
 0x7ad   : >> { %5340 = vrot.lane.b32.xlu0 %v14334_v56, %s8001_s17  ;;  %6082 = vmatmul.mubr.f32.gmra.mrb[4].mxu1 %v4754_v15  ;;  %v14590_v46 = vpop.permute.xlu1 %5385  ;;  %v5374_v55 = vsel %vm16579_vm7, %v5372_v2, %v5373_v4  ;;  %v7533_v1 = vunpack.i.h.bf16 %v16585_v30  ;;  %v16586_v15 = vld [vmem:[#allocation186_spill] sm:$0xff]  ;;  %vm16608_vm15 = vcmask 916480   ;;  %vm16609_vm7 = vcmask 982016  }
 0x7af   : >> { %v14598_v10 = vpop.permute.xlu0 %5109  ;;  %5117 = vrot.lane.b32.xlu1 %v13891_v5, %s7998_s15  ;;  %v7313_v5 = vunpack.i.h.bf16 %v16525_v38  ;;  %v7413_v38 = vunpack.i.h.bf16 %v16532_v43 }
 0x7b1   : >> { %5093 = vrot.lane.b32.xlu0 %v13464_v60, %s7998_s15  ;;  %v14606_v56 = vpop.permute.xlu1 %5160  ;;  %v7333_v60 = vunpack.i.h.bf16 %v16528_v41  ;;  %v4509_v40 = vsel %vm225_vm0, %v7926_v52, %v7313_v5  ;;  %v16587_v5 = vld [vmem:[#allocation194_spill] sm:$0xff]  ;;  %s6446_s15 = sshll.u32 %s7975_s29, 7  ;;  %s3436_s29 = sadd.s32 1, %s7975_s29  }
 0x7b2   : >> { %v4526_v27 = vsel %vm1807_vm4, %v4509_v40, %v7353_v50  ;;  %v16588_v50 = vld [vmem:[#allocation270_spill] sm:$0xff]  ;;  %p3433_p5 = scmp.ge.s32.totalorder %s3436_s29, 4  }
 0x7b3   : >> { %v14608_v16 = vpop.permute.xlu0 %5409  ;;  %5395 = vrot.lane.b32.xlu1 %v16578_v47, %s8002_s19  ;;  %v4517_v28 = vsel %vm225_vm0, %v7927_v21, %v7333_v60  ;;  %v4543_v8 = vsel %vm1824_vm5, %v4526_v27, %v7393_v18  ;;  %v7928_v60 = vld [vmem:[%s12151_s12 + $0x148] sm:$0x3]  ;;  %v16589_v18 = vld [vmem:[#allocation236_spill] sm:$0xff]  ;;  %v16590_v52 = vld [vmem:[#allocation198_spill] sm:$0xff] }
 0x7b4   : >> { %v4534_v43 = vsel %vm1807_vm4, %v4517_v28, %v7373_v24  ;;  %v4560_v26 = vsel %vm1841_vm6, %v4543_v8, %v7433_v57  ;;  %v5602_v24 = vsel %vm225_vm0, %v7928_v60, %v16588_v50  ;;  %v7613_v40 = vunpack.i.h.bf16 %v16590_v52  ;;  %v16591_v21 = vld [vmem:[#allocation202_spill] sm:$0xff]  ;;  %v16592_v28 = vld [vmem:[#allocation296_spill] sm:$0xff]  ;;  %v7930_v60 = vld [vmem:[%s12151_s12 + $0x258] sm:$0xff] }
 0x7b5   : >> { %5393 = vrot.lane.b32.xlu0 %v16580_v39, %s8002_s19  ;;  %v14618_v0 = vpop.permute.xlu1 %5184  ;;  %v4551_v3 = vsel %vm1824_vm5, %v4534_v43, %v7413_v38  ;;  %v7593_v39 = vunpack.i.h.bf16 %v16587_v5  ;;  %v4577_v57 = vsel %vm1858_vm8, %v4560_v26, %v7473_v7  ;;  %v7653_v43 = vunpack.i.h.bf16 %v16545_v23  ;;  %v16593_v8 = vld [vmem:[#allocation320_spill] sm:$0xff]  ;;  %v7929_v7 = vld [vmem:[%s12151_s12 + $0x260] sm:$0xff]  ;;  %v7931_v52 = vld [vmem:[%s12151_s12 + $0x1a8] sm:$0x3] }
 0x7b6   : >> { %v4568_v47 = vsel %vm1841_vm6, %v4551_v3, %v7453_v45  ;;  %v7633_v45 = vunpack.i.h.bf16 %v16591_v21  ;;  %v4594_v11 = vsel %vm1875_vm9, %v4577_v57, %v7513_v35  ;;  %v16594_v26 = vld [vmem:[#allocation210_spill] sm:$0xff] }
 0x7b7   : >> { %v14624_v13 = vpop.permute.xlu0 %5162  ;;  %5419 = vrot.lane.b32.xlu1 %v5374_v55, %s8002_s19  ;;  %v7573_v55 = vunpack.i.h.bf16 %v16541_v19  ;;  %v5626_v19 = vsel %vm1807_vm4, %v5602_v24, %v16592_v28  ;;  %v4585_v27 = vsel %vm1858_vm8, %v4568_v47, %v7493_v44  ;;  %v7673_v30 = vunpack.i.h.bf16 %v16594_v26  ;;  %v16595_v44 = vld [vmem:[#allocation340_spill] sm:$0xff]  ;;  %v16596_v47 = vld [vmem:[#allocation265_spill] sm:$0xff]  ;;  %v16598_v21 = vld [vmem:[#allocation282_spill] sm:$0xff] }
 0x7b8   : >> { %v5650_v29 = vsel %vm1824_vm5, %v5626_v19, %v16593_v8  ;;  %v7713_v24 = vunpack.i.h.bf16 %v16548_v61  ;;  %v5614_v28 = vsel %vm225_vm0, %v7931_v52, %v16598_v21  ;;  %v7813_v21 = vunpack.i.h.bf16 %v16572_v25 }
 0x7b9   : >> { %5417 = vrot.lane.b32.xlu0 %v5372_v2, %s8002_s19  ;;  %v5459_v41 = vpop.permute.xlu1 %5458  ;;  %v7553_v2 = vunpack.i.h.bf16 %v16586_v15  ;;  %v5674_v35 = vsel %vm1841_vm6, %v5650_v29, %v16595_v44  ;;  %v7833_v29 = vunpack.i.h.bf16 %v16569_v14 }
 0x7ba   : >> { %v5698_v5 = vsel %vm1858_vm8, %v5674_v35, %v16596_v47  ;;  %v7733_v35 = vunpack.i.h.bf16 %v16555_v58 }
 0x7bb   : >> { %v14641_v6 = vpop.permute.xlu0 %5186  ;;  %5194 = vrot.lane.b32.xlu1 %v16584_v34, %s7999_s8  ;;  %v4602_v34 = vsel %vm1875_vm9, %v4585_v27, %v7533_v1  ;;  %v4611_v3 = vsel %vm1892_vm10, %v4594_v11, %v7553_v2 }
 0x7bc   : >> { %v4619_v23 = vsel %vm1892_vm10, %v4602_v34, %v7573_v55  ;;  %v4628_v15 = vsel %vm1909_vm11, %v4611_v3, %v7593_v39  ;;  %v16597_v39 = vld [vmem:[#allocation226_spill] sm:$0xff] }
 0x7bd   : >> { %5170 = vrot.lane.b32.xlu0 %v16589_v18, %s7999_s8  ;;  %v14657_v38 = vpop.permute.xlu1 %5233  ;;  %v4636_v1 = vsel %vm1909_vm11, %v4619_v23, %v7613_v40  ;;  %v4645_v2 = vsel %vm16461_vm12, %v4628_v15, %v7633_v45  ;;  %v5722_v18 = vsel %vm1875_vm9, %v5698_v5, %v14443_v9  ;;  %v7753_v57 = vunpack.i.h.bf16 %v16597_v39  ;;  %v16599_v45 = vld [vmem:[#allocation309_spill] sm:$0xff]  ;;  %v16603_v23 = vld [vmem:[#allocation227_spill] sm:$0xff]  ;;  %v16607_v39 = vld [vmem:[#allocation266_spill] sm:$0xff] }
 0x7be   : >> { %v4653_v55 = vsel %vm16461_vm12, %v4636_v1, %v7653_v43  ;;  %v5746_v19 = vsel %vm1892_vm10, %v5722_v18, %v14544_v49  ;;  %v4662_v61 = vsel %vm1943_vm13, %v4645_v2, %v7673_v30  ;;  %v7793_v9 = vunpack.i.h.bf16 %v16562_v48  ;;  %v16600_v43 = vld [vmem:[#allocation214_spill] sm:$0xff]  ;;  %v14716_v48 = vld [vmem:[%s12151_s12 + $0x2c8] sm:$0x3] }
 0x7bf   : >> { %v14669_v36 = vpop.permute.xlu0 %5482  ;;  %5468 = vrot.lane.b32.xlu1 %v7929_v7, %s8003_s20  ;;  %v5638_v27 = vsel %vm1807_vm4, %v5614_v28, %v16599_v45  ;;  %v5770_v11 = vsel %vm1909_vm11, %v5746_v19, %v14590_v46  ;;  %v7693_v8 = vunpack.i.h.bf16 %v16600_v43  ;;  %v16601_v49 = vld [vmem:[#allocation330_spill] sm:$0xff]  ;;  %v4679_v26 = vsel %vm1960_vm14, %v4662_v61, %v7713_v24  ;;  %v16602_v46 = vld [vmem:[#allocation219_spill] sm:$0xff] }
 0x7c0   : >> { %v5662_v7 = vsel %vm1824_vm5, %v5638_v27, %v16601_v49  ;;  %v5794_v34 = vsel %vm16461_vm12, %v5770_v11, %v5459_v41  ;;  %v7873_v30 = vunpack.i.h.bf16 %v16570_v12  ;;  %v16604_v5 = vld [vmem:[#allocation211_spill] sm:$0xff]  ;;  %v5521_v2 = vrot.slane %v14596_v54, 1 }
 0x7c1   : >> { %5466 = vrot.lane.b32.xlu0 %v7930_v60, %s8003_s20  ;;  %v14684_v50 = vpop.permute.xlu1 %5257  ;;  %v5686_v44 = vsel %vm1841_vm6, %v5662_v7, %v16602_v46  ;;  %v4696_v60 = vsel %vm16605_vm3, %v4679_v26, %v7753_v57  ;;  %v5523_v58 = vrot.slane %v14716_v48, 1  ;;  %v7773_v24 = vunpack.i.h.bf16 %v16559_v51 }
 0x7c2   : >> { %v5710_v41 = vsel %vm1858_vm8, %v5686_v44, %v16603_v23  ;;  %v4713_v1 = vsel %vm16606_vm1, %v4696_v60, %v7793_v9  ;;  %v4670_v19 = vsel %vm1943_vm13, %v4653_v55, %v7693_v8  ;;  %v7853_v61 = vunpack.i.h.bf16 %v16574_v62  ;;  %v16610_v9 = vld [vmem:[#allocation307_spill] sm:$0xff]  ;;  %v16611_v62 = vld [vmem:[#allocation304_spill] sm:$0xff] }
 0x7c3   : >> { %v14698_v40 = vpop.permute.xlu0 %5235  ;;  %5492 = vrot.lane.b32.xlu1 %v14596_v54, %s8003_s20  ;;  %v5734_v12 = vsel %vm1875_vm9, %v5710_v41, %v14492_v59  ;;  %v4730_v57 = vsel %vm16608_vm15, %v4713_v1, %v7833_v29  ;;  %v4687_v25 = vsel %vm1960_vm14, %v4670_v19, %v7733_v35  ;;  %v16615_v44 = vld [vmem:[#allocation244_spill] sm:$0xff]  ;;  %v16617_v35 = vld [vmem:[#allocation153_spill] sm:$0xff] }
 0x7c4   : >> { %v5758_v18 = vsel %vm1892_vm10, %v5734_v12, %v14578_v37  ;;  %v4747_v51 = vsel %vm16609_vm7, %v4730_v57, %v7873_v30  ;;  %v5520_v37 = vrot.slane %v14593_v31, 1  ;;  %v4704_v27 = vsel %vm16605_vm3, %v4687_v25, %v7773_v24  ;;  %v16614_v30 = vld [vmem:[#allocation145_spill] sm:$0xff]  ;;  %v7932_v24 = vld [vmem:[%s12151_s12 + $0x30] sm:$0xff] }
 0x7c5   : >> { %5490 = vrot.lane.b32.xlu0 %v14593_v31, %s8003_s20  ;;  %v5536_v3 = vpop.permute.xlu1 %5535  ;;  %v5782_v28 = vsel %vm1909_vm11, %v5758_v18, %v14608_v16  ;;  %v7893_v16 = vunpack.i.h.bf16 %v16576_v32  ;;  %v5524_v31 = vsel %vm844_vm2, %v5521_v2, %v5523_v58  ;;  %v4721_v43 = vsel %vm16606_vm1, %v4704_v27, %v7813_v21  ;;  %v16618_v41 = vld [vmem:[#allocation157_spill] sm:$0xff] }
 0x7c6   : >> { %v5818_v14 = vsel %vm1943_vm13, %v5794_v34, %v5536_v3  ;;  %v5806_v53 = vsel %vm16461_vm12, %v5782_v28, %v14669_v36  ;;  %v5522_v11 = vsel %vm844_vm2, %v5520_v37, %v5521_v2  ;;  %v4738_v29 = vsel %vm16608_vm15, %v4721_v43, %v7853_v61  ;;  %v16613_v3 = vld [vmem:[#allocation138_spill] sm:$0xff]  ;;  %v16621_v1 = vld [vmem:[#allocation169_spill] sm:$0xff]  ;;  %v7934_v37 = vld [vmem:[%s12151_s12 + $0x268] sm:$0x3] }
 0x7c7   : >> { %v5869_v15 = vrot.slane %v5818_v14, 1  ;;  %v14726_v47 = vpop.permute.xlu0 %5259  ;;  %5267 = vrot.lane.b32.xlu1 %v16604_v5, %s8000_s16  ;;  %v4755_v49 = vsel %vm16609_vm7, %v4738_v29, %v7893_v16  ;;  %v7317_v26 = vunpack.i.l.bf16 %v16613_v3  ;;  %v7337_v46 = vunpack.i.l.bf16 %v16614_v30  ;;  %v16619_v5 = vld [vmem:[#allocation161_spill] sm:$0xff] }
 0x7c8   : >> { %v7377_v23 = vunpack.i.l.bf16 %v16617_v35  ;;  %v7417_v54 = vunpack.i.l.bf16 %v16619_v5  ;;  %v7457_v2 = vunpack.i.l.bf16 %v16621_v1  ;;  %v16622_v57 = vld [vmem:[#allocation173_spill] sm:$0xff] }
 0x7c9   : >> { %5243 = vrot.lane.b32.xlu0 %v16607_v39, %s8000_s16  ;;  %v14741_v52 = vpop.permute.xlu1 %5310  ;;  %v5870_v59 = vsel %vm844_vm2, %v5867_v33, %v5869_v15  ;;  %v7397_v15 = vunpack.i.l.bf16 %v16618_v41  ;;  %v4510_v18 = vsel %vm225_vm0, %v7932_v24, %v7317_v26  ;;  %v7933_v39 = vld [vmem:[%s12151_s12 + $0x90] sm:$0xff]  ;;  %v7477_v21 = vunpack.i.l.bf16 %v16622_v57  ;;  %v16623_v28 = vld [vmem:[#allocation177_spill] sm:$0xff] }
 0x7ca   : >> { %6433 = vmatprep.mubr.msk.f32.mxu0 %vm1960_vm14, %v5870_v59  ;;  %v4518_v59 = vsel %vm225_vm0, %v7933_v39, %v7337_v46  ;;  %v16626_v25 = vld [vmem:[#allocation185_spill] sm:$0xff] }
 0x7cb   : >> { %v5560_v33 = vpop.permute.xlu0 %5559  ;;  %5545 = vrot.lane.b32.xlu1 %v16610_v9, %s8004_s21  ;;  %6047 = vmatmul.mubr.f32.gmra.mrb[6].mxu0 %v4747_v51  ;;  %v7497_v51 = vunpack.i.l.bf16 %v16623_v28  ;;  %v7537_v16 = vunpack.i.l.bf16 %v16626_v25  ;;  %v16628_v27 = vld [vmem:[#allocation193_spill] sm:$0xff] }
 0x7cc   : >> { %v5830_v45 = vsel %vm1943_vm13, %v5806_v53, %v5560_v33  ;;  %v4535_v53 = vsel %vm1807_vm4, %v4518_v59, %v7377_v23  ;;  %v16625_v33 = vld [vmem:[#allocation181_spill] sm:$0xff] }
 0x7cd   : >> { %v5889_v55 = vrot.slane %v5830_v45, 1  ;;  %5543 = vrot.lane.b32.xlu0 %v16611_v62, %s8004_s21  ;;  %v14767_v36 = vpop.permute.xlu1 %5334  ;;  %v7517_v9 = vunpack.i.l.bf16 %v16625_v33  ;;  %v16631_v46 = vld [vmem:[#allocation201_spill] sm:$0xff] }
 0x7ce   : >> { %v16633_v24 = vld [vmem:[#allocation209_spill] sm:$0xff] }
 0x7cf   : >> { %v14772_v8 = vpop.permute.xlu0 %5312  ;;  %v5890_v32 = vsel %vm844_vm2, %v5887_v20, %v5889_v55  ;;  %5569 = vrot.lane.b32.xlu1 %v5524_v31, %s8004_s21  ;;  %v4552_v31 = vsel %vm1824_vm5, %v4535_v53, %v7417_v54  ;;  %v16627_v55 = vld [vmem:[#allocation189_spill] sm:$0xff] }
 0x7d0   : >> { %6441 = vmatprep.mubr.msk.f32.mxu1 %vm1960_vm14, %v5890_v32  ;;  %v7557_v62 = vunpack.i.l.bf16 %v16627_v55  ;;  %v4569_v29 = vsel %vm1841_vm6, %v4552_v31, %v7457_v2  ;;  %v16634_v39 = vld [vmem:[#allocation305_spill] sm:$0xff] }
 0x7d1   : >> { %5567 = vrot.lane.b32.xlu0 %v5522_v11, %s8004_s21  ;;  %6087 = vmatmul.mubr.f32.gmra.mrb[6].mxu1 %v4755_v49  ;;  %v14782_v7 = vpop.permute.xlu1 %5111  ;;  %v7577_v11 = vunpack.i.l.bf16 %v16628_v27  ;;  %v16630_v49 = vld [vmem:[#allocation197_spill] sm:$0xff]  ;;  %v4586_v23 = vsel %vm1858_vm8, %v4569_v29, %v7497_v51 }
 0x7d2   : >> { %16612 = vst [vmem:[#allocation291_spill] sm:$0xff] %v14782_v7  ;;  %v7597_v26 = vunpack.i.l.bf16 %v16630_v49  ;;  %v16635_v2 = vld [vmem:[#allocation213_spill] sm:$0xff]  ;;  %v16648_v7 = vld [vmem:[#allocation284_spill] sm:$0xff] }
 0x7d3   : >> { %v14784_v34 = vpop.permute.xlu0 %5336  ;;  %5344 = vrot.lane.b32.xlu1 %v14295_v63, %s8001_s17  ;;  %v7677_v59 = vunpack.i.l.bf16 %v16635_v2  ;;  %v16637_v53 = vld [vmem:[#allocation221_spill] sm:$0xff] }
 0x7d5   : >> { %5320 = vrot.lane.b32.xlu0 %v16571_v17, %s8001_s17  ;;  %v14790_v22 = vpop.permute.xlu1 %5389  ;;  %v16616_v17 = vld [vmem:[#allocation149_spill] sm:$0xff]  ;;  %s15172_s17 = scalar_lea.vmem %s8783_s24, %s6446_s15 }
 0x7d6   : >> { %v7357_v14 = vunpack.i.l.bf16 %v16616_v17 }
 0x7d7   : >> { %v14792_v20 = vpop.permute.xlu0 %5387  ;;  %5421 = vrot.lane.b32.xlu1 %v5373_v4, %s8002_s19  ;;  %v16620_v4 = vld [vmem:[#allocation165_spill] sm:$0xff] }
 0x7d8   : >> { %v7437_v12 = vunpack.i.l.bf16 %v16620_v4  ;;  %v4527_v61 = vsel %vm1807_vm4, %v4510_v18, %v7357_v14  ;;  %v7657_v18 = vunpack.i.l.bf16 %v16633_v24 }
 0x7d9   : >> { %5397 = vrot.lane.b32.xlu0 %v16615_v44, %s8002_s19  ;;  %v14801_v63 = vpop.permute.xlu1 %5413  ;;  %v4544_v45 = vsel %vm1824_vm5, %v4527_v61, %v7397_v15  ;;  %v7617_v44 = vunpack.i.l.bf16 %v16631_v46  ;;  %v16632_v15 = vld [vmem:[#allocation205_spill] sm:$0xff]  ;;  %s15205_s19 = scalar_lea.vmem %s8788_s27, %s6446_s15 }
 0x7da   : >> { %v4561_v32 = vsel %vm1841_vm6, %v4544_v45, %v7437_v12  ;;  %v7637_v54 = vunpack.i.l.bf16 %v16632_v15  ;;  %v4603_v12 = vsel %vm1875_vm9, %v4586_v23, %v7537_v16  ;;  %v7717_v45 = vunpack.i.l.bf16 %v16637_v53  ;;  %v7935_v23 = vld [vmem:[%s12151_s12 + $0x158] sm:$0xff]  ;;  %v16646_v53 = vld [vmem:[#allocation342_spill] sm:$0xff] }
 0x7db   : >> { %v14807_v60 = vpop.permute.xlu0 %5411  ;;  %5494 = vrot.lane.b32.xlu1 %v14716_v48, %s8003_s20  ;;  %v4578_v14 = vsel %vm1858_vm8, %v4561_v32, %v7477_v21  ;;  %v4620_v51 = vsel %vm1892_vm10, %v4603_v12, %v7577_v11 }
 0x7dc   : >> { %v4637_v29 = vsel %vm1909_vm11, %v4620_v51, %v7617_v44  ;;  %v16641_v51 = vld [vmem:[#allocation225_spill] sm:$0xff] }
 0x7dd   : >> { %5470 = vrot.lane.b32.xlu0 %v7934_v37, %s8003_s20  ;;  %v14821_v19 = vpop.permute.xlu1 %5188  ;;  %v16636_v37 = vld [vmem:[#allocation217_spill] sm:$0xff] }
 0x7de   : >> { %16624 = vst [vmem:[#allocation223_spill] sm:$0xff] %v14821_v19  ;;  %v7697_v61 = vunpack.i.l.bf16 %v16636_v37  ;;  %v7937_v19 = vld [vmem:[%s12151_s12 + $0x1b8] sm:$0xff] }
 0x7df   : >> { %v14831_v43 = vpop.permute.xlu0 %5164  ;;  %5571 = vrot.lane.b32.xlu1 %v5523_v58, %s8004_s21  ;;  %v4595_v58 = vsel %vm1875_vm9, %v4578_v14, %v7517_v9  ;;  %v4654_v14 = vsel %vm16461_vm12, %v4637_v29, %v7657_v18  ;;  %v16642_v18 = vld [vmem:[#allocation273_spill] sm:$0xff] }
 0x7e0   : >> { %16629 = vst [vmem:[#allocation267_spill] sm:$0xff] %v14831_v43  ;;  %v4612_v21 = vsel %vm1892_vm10, %v4595_v58, %v7557_v62  ;;  %v16639_v43 = vld [vmem:[#allocation272_spill] sm:$0xff]  ;;  %v14863_v12 = vsel %vm1943_vm13, %v4654_v14, %v7697_v61  ;;  %v16645_v61 = vld [vmem:[#allocation299_spill] sm:$0xff] }
 0x7e1   : >> { %5547 = vrot.lane.b32.xlu0 %v16634_v39, %s8004_s21  ;;  %v5463_v48 = vpop.permute.xlu1 %5462  ;;  %v4629_v32 = vsel %vm1909_vm11, %v4612_v21, %v7597_v26  ;;  %v16638_v39 = vld [vmem:[#allocation229_spill] sm:$0xff]  ;;  %v5604_v62 = vsel %vm225_vm0, %v7935_v23, %v16639_v43  ;;  %v16640_v26 = vld [vmem:[#allocation298_spill] sm:$0xff] }
 0x7e2   : >> { %v7757_v9 = vunpack.i.l.bf16 %v16638_v39  ;;  %v4646_v16 = vsel %vm16461_vm12, %v4629_v32, %v7637_v54  ;;  %v5628_v44 = vsel %vm1807_vm4, %v5604_v62, %v16640_v26  ;;  %v7737_v54 = vunpack.i.l.bf16 %v16641_v51  ;;  %v7936_v32 = vld [vmem:[%s12151_s12 + $0x150] sm:$0xff]  ;;  %v16643_v39 = vld [vmem:[#allocation322_spill] sm:$0xff]  ;;  %v16651_v51 = vld [vmem:[#allocation311_spill] sm:$0xff] }
 0x7e3   : >> { %v5461_v31 = vpop.permute.xlu0 %5460  ;;  %v4663_v58 = vsel %vm1943_vm13, %v4646_v16, %v7677_v59  ;;  %v5603_v29 = vsel %vm225_vm0, %v7936_v32, %v16642_v18  ;;  %v5652_v43 = vsel %vm1824_vm5, %v5628_v44, %v16643_v39  ;;  %v16644_v59 = vld [vmem:[#allocation234_spill] sm:$0xff]  ;;  %v5616_v32 = vsel %vm225_vm0, %v7937_v19, %v16648_v7  ;;  %v16649_v18 = vld [vmem:[#allocation323_spill] sm:$0xff]  ;;  %v7938_v7 = vld [vmem:[%s12151_s12 + $0x1b0] sm:$0xff] }
 0x7e4   : >> { %v4680_v21 = vsel %vm1960_vm14, %v4663_v58, %v7717_v45  ;;  %v5627_v14 = vsel %vm1807_vm4, %v5603_v29, %v16645_v61  ;;  %v5676_v62 = vsel %vm1841_vm6, %v5652_v43, %v16646_v53  ;;  %v16647_v58 = vld [vmem:[#allocation241_spill] sm:$0xff]  ;;  %v16650_v29 = vld [vmem:[#allocation252_spill] sm:$0xff]  ;;  %v5640_v53 = vsel %vm1807_vm4, %v5616_v32, %v16651_v51 }
 0x7e5   : >> { %v5487_v11 = vpop.permute.xlu1 %5486  ;;  %v4697_v45 = vsel %vm16605_vm3, %v4680_v21, %v7757_v9  ;;  %v7797_v26 = vunpack.i.l.bf16 %v16647_v58  ;;  %v5651_v39 = vsel %vm1824_vm5, %v5627_v14, %v16649_v18  ;;  %v5700_v44 = vsel %vm1858_vm8, %v5676_v62, %v14624_v13  ;;  %v16652_v9 = vld [vmem:[#allocation343_spill] sm:$0xff]  ;;  %v16653_v19 = vld [vmem:[#allocation285_spill] sm:$0xff]  ;;  %v16654_v18 = vld [vmem:[#allocation332_spill] sm:$0xff] }
 0x7e6   : >> { %v7837_v61 = vunpack.i.l.bf16 %v16650_v29  ;;  %v5675_v21 = vsel %vm1841_vm6, %v5651_v39, %v16652_v9  ;;  %v5724_v43 = vsel %vm1875_vm9, %v5700_v44, %v14698_v40  ;;  %v5615_v14 = vsel %vm225_vm0, %v7938_v7, %v16653_v19  ;;  %v16655_v32 = vld [vmem:[#allocation312_spill] sm:$0xff]  ;;  %v16656_v9 = vld [vmem:[#allocation333_spill] sm:$0xff] }
 0x7e7   : >> { %v5485_v23 = vpop.permute.xlu0 %5484  ;;  %v5664_v13 = vsel %vm1824_vm5, %v5640_v53, %v16654_v18  ;;  %v5699_v62 = vsel %vm1858_vm8, %v5675_v21, %v14606_v56  ;;  %v5748_v29 = vsel %vm1892_vm10, %v5724_v43, %v14772_v8  ;;  %v5639_v39 = vsel %vm1807_vm4, %v5615_v14, %v16655_v32  ;;  %v16657_v14 = vld [vmem:[#allocation260_spill] sm:$0xff] }
 0x7e8   : >> { %v5688_v40 = vsel %vm1841_vm6, %v5664_v13, %v14598_v10  ;;  %v5723_v44 = vsel %vm1875_vm9, %v5699_v62, %v14657_v38  ;;  %v5772_v53 = vsel %vm1909_vm11, %v5748_v29, %v14790_v22  ;;  %v5663_v56 = vsel %vm1824_vm5, %v5639_v39, %v16656_v9  ;;  %v16658_v39 = vld [vmem:[#allocation248_spill] sm:$0xff] }
 0x7e9   : >> { %v14888_v16 = vpop.permute.xlu1 %5261  ;;  %v5712_v8 = vsel %vm1858_vm8, %v5688_v40, %v14641_v6  ;;  %v5747_v21 = vsel %vm1892_vm10, %v5723_v44, %v14741_v52  ;;  %v5796_v43 = vsel %vm16461_vm12, %v5772_v53, %v5463_v48  ;;  %v5687_v10 = vsel %vm1841_vm6, %v5663_v56, %v14572_v42  ;;  %v16659_v53 = vld [vmem:[#allocation256_spill] sm:$0xff] }
 0x7ea   : >> { %v5736_v38 = vsel %vm1875_vm9, %v5712_v8, %v14726_v47  ;;  %v5771_v22 = vsel %vm1909_vm11, %v5747_v21, %v14792_v20  ;;  %v5711_v6 = vsel %vm1858_vm8, %v5687_v10, %v14618_v0  ;;  %v7877_v18 = vunpack.i.l.bf16 %v16657_v14 }
 0x7eb   : >> { %v14906_v51 = vpop.permute.xlu0 %5237  ;;  %v5760_v52 = vsel %vm1892_vm10, %v5736_v38, %v14784_v34  ;;  %v5795_v48 = vsel %vm16461_vm12, %v5771_v22, %v5461_v31  ;;  %v5735_v47 = vsel %vm1875_vm9, %v5711_v6, %v14684_v50  ;;  %v4714_v32 = vsel %vm16606_vm1, %v4697_v45, %v7797_v26 }
 0x7ec   : >> { %v5784_v20 = vsel %vm1909_vm11, %v5760_v52, %v14801_v63  ;;  %v5759_v0 = vsel %vm1892_vm10, %v5735_v47, %v14767_v36  ;;  %v7817_v40 = vunpack.i.l.bf16 %v16658_v39  ;;  %v4731_v63 = vsel %vm16608_vm15, %v4714_v32, %v7837_v61 }
 0x7ed   : >> { %v5540_v7 = vpop.permute.xlu1 %5539  ;;  %v5808_v34 = vsel %vm16461_vm12, %v5784_v20, %v5487_v11  ;;  %v5783_v44 = vsel %vm1909_vm11, %v5759_v0, %v14807_v60  ;;  %v7857_v9 = vunpack.i.l.bf16 %v16659_v53  ;;  %v4688_v26 = vsel %vm1960_vm14, %v14863_v12, %v7737_v54  ;;  %v16660_v60 = vld [vmem:[#allocation264_spill] sm:$0xff] }
 0x7ee   : >> { %v14930_v29 = vsel %vm1943_vm13, %v5796_v43, %v5540_v7  ;;  %v5807_v36 = vsel %vm16461_vm12, %v5783_v44, %v5485_v23  ;;  %v7897_v8 = vunpack.i.l.bf16 %v16660_v60  ;;  %v4748_v61 = vsel %vm16609_vm7, %v4731_v63, %v7877_v18  ;;  %v7939_v63 = vld [vmem:[%s12151_s12 + $0x38] sm:$0xff] }
 0x7ef   : >> { %v5872_v19 = vrot.slane %v14930_v29, 1  ;;  %v5538_v42 = vpop.permute.xlu0 %5537  ;;  %v16661_v7 = vunpack.i.l.bf16 %v16644_v59  ;;  %v7318_v20 = vunpack.i.h.bf16 %v16613_v3  ;;  %v7338_v0 = vunpack.i.h.bf16 %v16614_v30 }
 0x7f0   : >> { %v5819_v13 = vsel %vm1943_vm13, %v5795_v48, %v5538_v42  ;;  %v7438_v44 = vunpack.i.h.bf16 %v16620_v4  ;;  %v7458_v3 = vunpack.i.h.bf16 %v16621_v1 }
 0x7f1   : >> { %v5871_v62 = vrot.slane %v5819_v13, 1  ;;  %v5564_v31 = vpop.permute.xlu1 %5563  ;;  %v4705_v10 = vsel %vm16605_vm3, %v4688_v26, %v16661_v7  ;;  %v7538_v26 = vunpack.i.h.bf16 %v16626_v25 }
 0x7f2   : >> { %v14952_v50 = vsel %vm1943_vm13, %v5808_v34, %v5564_v31  ;;  %v4722_v38 = vsel %vm16606_vm1, %v4705_v10, %v7817_v40  ;;  %v7358_v34 = vunpack.i.h.bf16 %v16616_v17  ;;  %v7398_v31 = vunpack.i.h.bf16 %v16618_v41  ;;  %v7940_v17 = vld [vmem:[%s12151_s12 + $0x98] sm:$0xff] }
 0x7f3   : >> { %v5892_v11 = vrot.slane %v14952_v50, 1  ;;  %v5562_v56 = vpop.permute.xlu0 %5561  ;;  %v5873_v45 = vsel %vm844_vm2, %v5871_v62, %v5872_v19  ;;  %v4739_v54 = vsel %vm16608_vm15, %v4722_v38, %v7857_v9  ;;  %v7378_v62 = vunpack.i.h.bf16 %v16617_v35  ;;  %vm16676_vm15 = vmmov %vm16605_vm3 }
 0x7f4   : >> { %v5831_v21 = vsel %vm1943_vm13, %v5807_v36, %v5562_v56  ;;  %6434 = vmatprep.mubr.msk.f32.mxu0 %vm1960_vm14, %v5873_v45  ;;  %v4756_v6 = vsel %vm16609_vm7, %v4739_v54, %v7897_v8  ;;  %v7418_v40 = vunpack.i.h.bf16 %v16619_v5  ;;  %v4511_v9 = vsel %vm225_vm0, %v7939_v63, %v7318_v20  ;;  %v16662_v20 = vld [vmem:[#allocation287_spill] sm:$0xff] }
 0x7f5   : >> { %v5891_v43 = vrot.slane %v5831_v21, 1  ;;  %6052 = vmatmul.mubr.f32.gmra.mrb[8].mxu0 %v4748_v61  ;;  %v14967_v23 = vpop.permute.xlu1 %5338  ;;  %v7478_v36 = vunpack.i.h.bf16 %v16622_v57  ;;  %v4519_v35 = vsel %vm225_vm0, %v7940_v17, %v7338_v0  ;;  %v4528_v41 = vsel %vm1807_vm4, %v4511_v9, %v7358_v34  ;;  %v16665_v9 = vld [vmem:[#allocation335_spill] sm:$0xff]  ;;  %v16666_v17 = vld [vmem:[#allocation225_spill] sm:$0xff] }
 0x7f6   : >> { %v7498_v56 = vunpack.i.h.bf16 %v16623_v28  ;;  %v7518_v5 = vunpack.i.h.bf16 %v16625_v33  ;;  %v4536_v4 = vsel %vm1807_vm4, %v4519_v35, %v7378_v62  ;;  %v4545_v45 = vsel %vm1824_vm5, %v4528_v41, %v7398_v31  ;;  %v16663_v31 = vld [vmem:[#allocation314_spill] sm:$0xff]  ;;  %v16667_v35 = vld [vmem:[#allocation301_spill] sm:$0xff] }
 0x7f7   : >> { %v14973_v22 = vpop.permute.xlu0 %5314  ;;  %v5893_v12 = vsel %vm844_vm2, %v5891_v43, %v5892_v11  ;;  %v4553_v57 = vsel %vm1824_vm5, %v4536_v4, %v7418_v40  ;;  %v4562_v8 = vsel %vm1841_vm6, %v4545_v45, %v7438_v44  ;;  %v7558_v21 = vunpack.i.h.bf16 %v16627_v55  ;;  %v16664_v44 = vld [vmem:[#allocation275_spill] sm:$0xff] }
 0x7f8   : >> { %6442 = vmatprep.mubr.msk.f32.mxu1 %vm1960_vm14, %v5893_v12  ;;  %v4570_v61 = vsel %vm1841_vm6, %v4553_v57, %v7458_v3  ;;  %v4579_v28 = vsel %vm1858_vm8, %v4562_v8, %v7478_v36  ;;  %v7578_v33 = vunpack.i.h.bf16 %v16628_v27  ;;  %v7598_v43 = vunpack.i.h.bf16 %v16630_v49  ;;  %v16670_v8 = vld [vmem:[#allocation223_spill] sm:$0xff] }
 0x7f9   : >> { %6092 = vmatmul.mubr.f32.gmra.mrb[8].mxu1 %v4756_v6  ;;  %v14981_v52 = vpop.permute.xlu1 %5115  ;;  %v4587_v25 = vsel %vm1858_vm8, %v4570_v61, %v7498_v56  ;;  %v4596_v10 = vsel %vm1875_vm9, %v4579_v28, %v7518_v5  ;;  %v7618_v38 = vunpack.i.h.bf16 %v16631_v46  ;;  %v7638_v55 = vunpack.i.h.bf16 %v16632_v15  ;;  %v7941_v6 = vld [vmem:[%s12151_s12 + $0x1c0] sm:$0x3]  ;;  %v16668_v56 = vld [vmem:[#allocation291_spill] sm:$0xff] }
 0x7fa   : >> { %v4604_v12 = vsel %vm1875_vm9, %v4587_v25, %v7538_v26  ;;  %v7658_v54 = vunpack.i.h.bf16 %v16633_v24  ;;  %v5617_v27 = vsel %vm225_vm0, %v7941_v6, %v16662_v20  ;;  %v4613_v49 = vsel %vm1892_vm10, %v4596_v10, %v7558_v21  ;;  %v7942_v24 = vld [vmem:[%s12151_s12 + $0x160] sm:$0x3]  ;;  %v16669_v26 = vld [vmem:[#allocation325_spill] sm:$0xff] }
 0x7fb   : >> { %v14983_v48 = vpop.permute.xlu0 %5113  ;;  %v7678_v34 = vunpack.i.h.bf16 %v16635_v2  ;;  %v7698_v62 = vunpack.i.h.bf16 %v16636_v37  ;;  %v5641_v46 = vsel %vm1807_vm4, %v5617_v27, %v16663_v31  ;;  %v4621_v40 = vsel %vm1892_vm10, %v4604_v12, %v7578_v33  ;;  %v16674_v31 = vld [vmem:[#allocation229_spill] sm:$0xff] }
 0x7fc   : >> { %v4630_v15 = vsel %vm1909_vm11, %v4613_v49, %v7598_v43  ;;  %v5605_v63 = vsel %vm225_vm0, %v7942_v24, %v16664_v44  ;;  %v5665_v3 = vsel %vm1824_vm5, %v5641_v46, %v16665_v9  ;;  %v4638_v2 = vsel %vm1909_vm11, %v4621_v40, %v7618_v38  ;;  %v16671_v43 = vld [vmem:[#allocation345_spill] sm:$0xff] }
 0x7fd   : >> { %v14985_v42 = vpop.permute.xlu1 %5415  ;;  %v7738_v37 = vunpack.i.h.bf16 %v16666_v17  ;;  %v5629_v41 = vsel %vm1807_vm4, %v5605_v63, %v16667_v35  ;;  %v5689_v5 = vsel %vm1841_vm6, %v5665_v3, %v16668_v56  ;;  %v4647_v4 = vsel %vm16461_vm12, %v4630_v15, %v7638_v55  ;;  %v16672_v38 = vld [vmem:[#allocation221_spill] sm:$0xff] }
 0x7fe   : >> { %v4655_v45 = vsel %vm16461_vm12, %v4638_v2, %v7658_v54  ;;  %v5653_v57 = vsel %vm1824_vm5, %v5629_v41, %v16669_v26  ;;  %v5713_v21 = vsel %vm1858_vm8, %v5689_v5, %v16670_v8  ;;  %v4664_v28 = vsel %vm1943_vm13, %v4647_v4, %v7678_v34  ;;  %v16673_v54 = vld [vmem:[#allocation267_spill] sm:$0xff] }
 0x7ff   : >> { %v14987_v18 = vpop.permute.xlu0 %5391  ;;  %v4672_v33 = vsel %vm1943_vm13, %v4655_v45, %v7698_v62  ;;  %v5677_v25 = vsel %vm1841_vm6, %v5653_v57, %v16671_v43  ;;  %v5737_v10 = vsel %vm1875_vm9, %v5713_v21, %v14888_v16  ;;  %v7718_v12 = vunpack.i.h.bf16 %v16672_v38  ;;  %v16682_v57 = vld [vmem:[#allocation140_spill] sm:$0xff] }
 0x800   : >> { %v7778_v55 = vunpack.i.h.bf16 %v16644_v59  ;;  %v5701_v6 = vsel %vm1858_vm8, %v5677_v25, %v16673_v54  ;;  %v5761_v20 = vsel %vm1892_vm10, %v5737_v10, %v14967_v23  ;;  %v4689_v49 = vsel %vm1960_vm14, %v4672_v33, %v7738_v37  ;;  %v16683_v21 = vld [vmem:[#allocation144_spill] sm:$0xff] }
 0x801   : >> { %v14989_v47 = vpop.permute.xlu1 %5168  ;;  %v7818_v34 = vunpack.i.h.bf16 %v16658_v39  ;;  %v5725_v62 = vsel %vm1875_vm9, %v5701_v6, %v14906_v51  ;;  %v5785_v16 = vsel %vm1909_vm11, %v5761_v20, %v14985_v42  ;;  %v7758_v59 = vunpack.i.h.bf16 %v16674_v31  ;;  %v16675_v42 = vld [vmem:[#allocation252_spill] sm:$0xff] }
 0x802   : >> { %v7858_v46 = vunpack.i.h.bf16 %v16659_v53  ;;  %v5749_v40 = vsel %vm1892_vm10, %v5725_v62, %v14973_v22  ;;  %v7798_v24 = vunpack.i.h.bf16 %v16647_v58  ;;  %v7898_v39 = vunpack.i.h.bf16 %v16660_v60  ;;  %v16684_v25 = vld [vmem:[#allocation148_spill] sm:$0xff] }
 0x803   : >> { %v14992_v13 = vpop.permute.xlu0 %5166  ;;  %v5773_v51 = vsel %vm1909_vm11, %v5749_v40, %v14987_v18  ;;  %v7838_v63 = vunpack.i.h.bf16 %v16675_v42  ;;  %v4706_v22 = vsel %vm16605_vm3, %v4689_v49, %v7778_v55  ;;  %v7878_v2 = vunpack.i.h.bf16 %v16657_v14  ;;  %vm16678_vm3 = vmmov %vm16606_vm1  ;;  %v16685_v54 = vld [vmem:[#allocation152_spill] sm:$0xff] }
 0x804   : >> { %v4723_v60 = vsel %vm16606_vm1, %v4706_v22, %v7818_v34  ;;  %vm16677_vm7 = vcmask 916480   ;;  %v7323_v29 = vunpack.i.h.bf16 %v16682_v57  ;;  %v7342_v43 = vunpack.i.l.bf16 %v16683_v21  ;;  %v16686_v49 = vld [vmem:[#allocation156_spill] sm:$0xff] }
 0x805   : >> { %v14998_v32 = vpop.permute.xlu1 %5192  ;;  %v4740_v35 = vsel %vm16677_vm7, %v4723_v60, %v7858_v46  ;;  %vm16680_vm1 = vmmov %vm16677_vm7  ;;  %v7363_v10 = vunpack.i.h.bf16 %v16684_v25  ;;  %v7362_v38 = vunpack.i.l.bf16 %v16684_v25  ;;  %v7383_v6 = vunpack.i.h.bf16 %v16685_v54  ;;  %v16687_v46 = vld [vmem:[#allocation160_spill] sm:$0xff] }
 0x806   : >> { %v7382_v20 = vunpack.i.l.bf16 %v16685_v54  ;;  %v7402_v34 = vunpack.i.l.bf16 %v16686_v49  ;;  %v7423_v40 = vunpack.i.h.bf16 %v16687_v46  ;;  %v16689_v42 = vld [vmem:[#allocation168_spill] sm:$0xff] }
 0x807   : >> { %v15006_v30 = vpop.permute.xlu0 %5190 }
 0x809   : >> { %v5489_v1 = vpop.permute.xlu1 %5488 }
 0x80a   : >> { %v5809_v23 = vsel %vm16461_vm12, %v5785_v16, %v5489_v1  ;;  %v4681_v1 = vsel %vm1960_vm14, %v4664_v28, %v7718_v12  ;;  %v7343_v28 = vunpack.i.h.bf16 %v16683_v21  ;;  %v7943_v12 = vld [vmem:[%s12151_s12 + $0x50] sm:$0xff]  ;;  %v7944_v16 = vld [vmem:[%s12151_s12 + $0x48] sm:$0xff] }
 0x80b   : >> { %v5465_v7 = vpop.permute.xlu0 %5464  ;;  %v4513_v55 = vsel %vm225_vm0, %v7943_v12, %v7323_v29  ;;  %v16710_v12 = vld [vmem:[#allocation274_spill] sm:$0xff] }
 0x80c   : >> { %v5797_v9 = vsel %vm16461_vm12, %v5773_v51, %v5465_v7  ;;  %v4698_v7 = vsel %vm16676_vm15, %v4681_v1, %v7758_v59  ;;  %vm16679_vm12 = vcmask 982016   ;;  %v7403_v59 = vunpack.i.h.bf16 %v16686_v49  ;;  %v6130_v49 = vld [vmem:[%s15172_s17] sm:$0xff] }
 0x80d   : >> { %v15032_v0 = vpop.permute.xlu1 %5241  ;;  %v4715_v41 = vsel %vm16678_vm3, %v4698_v7, %v7798_v24  ;;  %v4757_v14 = vsel %vm16679_vm12, %v4740_v35, %v7898_v39  ;;  %vm16681_vm15 = vmmov %vm16679_vm12  ;;  %v16688_v39 = vld [vmem:[#allocation164_spill] sm:$0xff]  ;;  %v4530_v22 = vsel %vm1807_vm4, %v4513_v55, %v7363_v10  ;;  %vm16705_vm12 = vcmask 588800  }
 0x80e   : >> { %v4732_v50 = vsel %vm16680_vm1, %v4715_v41, %v7838_v63  ;;  %v7443_v51 = vunpack.i.h.bf16 %v16688_v39  ;;  %v7462_v63 = vunpack.i.l.bf16 %v16689_v42  ;;  %v16691_v7 = vld [vmem:[#allocation172_spill] sm:$0xff]  ;;  %vm16706_vm7 = vmmov %vm16705_vm12  ;;  %vm16715_vm3 = vcmask 785408  }
 0x80f   : >> { %v15046_v36 = vpop.permute.xlu0 %5239  ;;  %v7482_v35 = vunpack.i.l.bf16 %v16691_v7  ;;  %v16693_v55 = vld [vmem:[#allocation180_spill] sm:$0xff]  ;;  %vm16726_vm1 = vmmov %vm16706_vm7 }
 0x810   : >> { %v7522_v54 = vunpack.i.l.bf16 %v16693_v55 }
 0x811   : >> { %v15060_v61 = vpop.permute.xlu1 %5265 }
 0x813   : >> { %v15074_v27 = vpop.permute.xlu0 %5263 }
 0x815   : >> { %v5566_v15 = vpop.permute.xlu1 %5565 }
 0x816   : >> { %v5833_v44 = vsel %vm1943_vm13, %v5809_v23, %v5566_v15  ;;  %v7422_v23 = vunpack.i.l.bf16 %v16687_v46  ;;  %v7945_v15 = vld [vmem:[%s12151_s12 + $0xb0] sm:$0xff] }
 0x817   : >> { %v5894_v53 = vrot.slane %v5833_v44, 1  ;;  %v5542_v3 = vpop.permute.xlu0 %5541  ;;  %v4521_v24 = vsel %vm225_vm0, %v7945_v15, %v7343_v28  ;;  %v7442_v44 = vunpack.i.l.bf16 %v16688_v39  ;;  %v16697_v39 = vld [vmem:[#allocation196_spill] sm:$0xff] }
 0x818   : >> { %v5821_v58 = vsel %vm1943_vm13, %v5797_v9, %v5542_v3  ;;  %v4538_v60 = vsel %vm1807_vm4, %v4521_v24, %v7383_v6  ;;  %v16694_v6 = vld [vmem:[#allocation184_spill] sm:$0xff] }
 0x819   : >> { %v5874_v17 = vrot.slane %v5821_v58, 1  ;;  %v15099_v18 = vpop.permute.xlu1 %5318  ;;  %v5895_v37 = vsel %vm844_vm2, %v5892_v11, %v5894_v53  ;;  %v4749_v11 = vsel %vm16681_vm15, %v4732_v50, %v7878_v2  ;;  %v7946_v53 = vld [vmem:[%s12151_s12 + $0xa8] sm:$0xff]  ;;  %v7463_v2 = vunpack.i.h.bf16 %v16689_v42  ;;  %v15161_v58 = vld [vmem:[%s15508_s4] ss:$0 sm:$0xff]  ;;  %vm16727_vm15 = vmmov %vm16726_vm1 }
 0x81a   : >> { %6443 = vmatprep.mubr.msk.f32.mxu1 %vm1960_vm14, %v5895_v37  ;;  %v4520_v3 = vsel %vm225_vm0, %v7946_v53, %v7342_v43  ;;  %16690 = vst [vmem:[#allocation231_spill] sm:$0xff] %v15161_v58  ;;  %v4555_v50 = vsel %vm1824_vm5, %v4538_v60, %v7423_v40  ;;  %v16699_v53 = vld [vmem:[#allocation204_spill] sm:$0xff] }
 0x81b   : >> { %v15109_v56 = vpop.permute.xlu0 %5316  ;;  %v5875_v5 = vsel %vm844_vm2, %v5872_v19, %v5874_v17  ;;  %6097 = vmatmul.mubr.f32.gmra.mrb[10].mxu1 %v4757_v14  ;;  %v7322_v19 = vunpack.i.l.bf16 %v16682_v57  ;;  %v4537_v17 = vsel %vm1807_vm4, %v4520_v3, %v7382_v20  ;;  %v4547_v14 = vsel %vm1824_vm5, %v4530_v22, %v7403_v59  ;;  %v16696_v59 = vld [vmem:[#allocation192_spill] sm:$0xff] }
 0x81c   : >> { %6435 = vmatprep.mubr.msk.f32.mxu0 %vm1960_vm14, %v5875_v5  ;;  %v4554_v5 = vsel %vm1824_vm5, %v4537_v17, %v7422_v23  ;;  %v15180_v21 = vsel %vm1841_vm6, %v4547_v14, %v7443_v51  ;;  %v7542_v20 = vunpack.i.l.bf16 %v16694_v6  ;;  %v7582_v46 = vunpack.i.l.bf16 %v16696_v59  ;;  %v16700_v22 = vld [vmem:[#allocation208_spill] sm:$0xff] }
 0x81d   : >> { %6057 = vmatmul.mubr.f32.gmra.mrb[10].mxu0 %v4749_v11  ;;  %v15117_v4 = vpop.permute.xlu1 %5342  ;;  %v4512_v31 = vsel %vm225_vm0, %v7944_v16, %v7322_v19  ;;  %v16692_v11 = vld [vmem:[#allocation176_spill] sm:$0xff]  ;;  %v4571_v28 = vsel %vm1841_vm6, %v4554_v5, %v7462_v63  ;;  %v7602_v51 = vunpack.i.l.bf16 %v16697_v39  ;;  %v7642_v3 = vunpack.i.l.bf16 %v16699_v53 }
 0x81e   : >> { %v4529_v1 = vsel %vm1807_vm4, %v4512_v31, %v7362_v38  ;;  %v7502_v57 = vunpack.i.l.bf16 %v16692_v11  ;;  %v15187_v38 = vsel %vm1841_vm6, %v4555_v50, %v7463_v2  ;;  %v16695_v16 = vld [vmem:[#allocation188_spill] sm:$0xff] }
 0x81f   : >> { %v15119_v45 = vpop.permute.xlu0 %5340  ;;  %v4546_v37 = vsel %vm1824_vm5, %v4529_v1, %v7402_v34  ;;  %v7562_v31 = vunpack.i.l.bf16 %v16695_v16  ;;  %v7662_v1 = vunpack.i.l.bf16 %v16700_v22  ;;  %v16701_v5 = vld [vmem:[#allocation212_spill] sm:$0xff] }
 0x820   : >> { %v4563_v19 = vsel %vm1841_vm6, %v4546_v37, %v7442_v44  ;;  %v4588_v24 = vsel %vm1858_vm8, %v4571_v28, %v7502_v57  ;;  %v16698_v44 = vld [vmem:[#allocation200_spill] sm:$0xff]  ;;  %v7682_v50 = vunpack.i.l.bf16 %v16701_v5 }
 0x821   : >> { %v15121_v26 = vpop.permute.xlu1 %5117  ;;  %v4580_v34 = vsel %vm1858_vm8, %v4563_v19, %v7482_v35  ;;  %v7622_v42 = vunpack.i.l.bf16 %v16698_v44  ;;  %v4605_v14 = vsel %vm1875_vm9, %v4588_v24, %v7542_v20  ;;  %v16702_v57 = vld [vmem:[#allocation216_spill] sm:$0xff]  ;;  %v6138_v19 = vld [vmem:[%s15172_s17 + $0x40] sm:$0xff] }
 0x822   : >> { %v4597_v35 = vsel %vm1875_vm9, %v4580_v34, %v7522_v54  ;;  %v16704_v24 = vld [vmem:[#allocation228_spill] sm:$0xff] }
 0x823   : >> { %v15124_v8 = vpop.permute.xlu0 %5093  ;;  %v4614_v28 = vsel %vm1892_vm10, %v4597_v35, %v7562_v31  ;;  %v7947_v35 = vld [vmem:[%s12151_s12 + $0x170] sm:$0xff] }
 0x824   : >> { %v4631_v20 = vsel %vm1909_vm11, %v4614_v28, %v7602_v51  ;;  %v16708_v28 = vld [vmem:[#allocation303_spill] sm:$0xff] }
 0x825   : >> { %v15128_v33 = vpop.permute.xlu1 %5395  ;;  %v4648_v31 = vsel %vm16705_vm12, %v4631_v20, %v7642_v3  ;;  %vm16729_vm12 = vmmov %vm16726_vm1 }
 0x826   : >> { %v4665_v51 = vsel %vm1943_vm13, %v4648_v31, %v7682_v50 }
 0x827   : >> { %v15138_v62 = vpop.permute.xlu0 %5393 }
 0x829   : >> { %v15151_v9 = vpop.permute.xlu1 %5419 }
 0x82b   : >> { %v15167_v41 = vpop.permute.xlu0 %5417 }
 0x82c   : >> { %v6033_v29 = vpop.f32.mrb[0].mxu0 }
 0x82d   : >> { %v6034_v43 = vadd.f32 %v15161_v58, %v6033_v29  ;;  %v6035_v25 = vpop.f32.mrb[1].mxu0  ;;  %v15184_v10 = vpop.permute.xlu1 %5194  ;;  %v7702_v29 = vunpack.i.l.bf16 %v16702_v57 }
 0x82e   : >> { %v16703_v25 = vld [vmem:[#allocation220_spill] sm:$0xff] }
 0x82f   : >> { %v6112_v40 = vmax.f32 %v6034_v43, 0.0  ;;  %v15196_v23 = vpop.permute.xlu0 %5170  ;;  %v4622_v43 = vsel %vm1892_vm10, %v4605_v14, %v7582_v46  ;;  %v16707_v14 = vld [vmem:[#allocation277_spill] sm:$0xff] }
 0x830   : >> { %v6073_v63 = vpop.f32.mrb[0].mxu1  ;;  %v4639_v34 = vsel %vm1909_vm11, %v4622_v43, %v7622_v42 }
 0x831   : >> { %v6146_v2 = vadd.f32 %v6130_v49, %v6112_v40  ;;  %v6074_v60 = vadd.f32 %v15161_v58, %v6073_v63  ;;  %v6075_v17 = vpop.f32.mrb[1].mxu1  ;;  %v5469_v37 = vpop.permute.xlu1 %5468  ;;  %v7722_v49 = vunpack.i.l.bf16 %v16703_v25  ;;  %v4656_v46 = vsel %vm16706_vm7, %v4639_v34, %v7662_v1  ;;  %v16709_v1 = vld [vmem:[#allocation224_spill] sm:$0xff]  ;;  %v7948_v34 = vld [vmem:[%s12151_s12 + $0x168] sm:$0xff] }
 0x832   : >> { %v7762_v17 = vunpack.i.l.bf16 %v16704_v24  ;;  %v15232_v42 = vsel %vm1943_vm13, %v4656_v46, %v7702_v29  ;;  %v16712_v29 = vld [vmem:[#allocation232_spill] sm:$0xff]  ;;  %vm16730_vm7 = vcmask 850944  }
 0x833   : >> { %6163 = vst.msk [vmem:[%s15205_s19] sm:$0xff] %vm225_vm0, %v6146_v2  ;;  %v6120_v40 = vmax.f32 %v6074_v60, 0.0  ;;  %v5467_v63 = vpop.permute.xlu0 %5466  ;;  %v5607_v2 = vsel %vm225_vm0, %v7947_v35, %v16707_v14  ;;  %v4682_v3 = vsel %vm1960_vm14, %v4665_v51, %v7722_v49  ;;  %v16713_v46 = vld [vmem:[#allocation300_spill] sm:$0xff] }
 0x834   : >> { %v5631_v43 = vsel %vm1807_vm4, %v5607_v2, %v16708_v28  ;;  %v16714_v2 = vld [vmem:[#allocation346_spill] sm:$0xff]  ;;  %v4699_v51 = vsel %vm16715_vm3, %v4682_v3, %v7762_v17  ;;  %v16716_v28 = vld [vmem:[#allocation240_spill] sm:$0xff]  ;;  %vm16732_vm3 = vcmask 916480  }
 0x835   : >> { %v6154_v60 = vadd.f32 %v6138_v19, %v6120_v40  ;;  %v5493_v15 = vpop.permute.xlu1 %5492  ;;  %v5606_v19 = vsel %vm225_vm0, %v7948_v34, %v16710_v12  ;;  %v16711_v40 = vld [vmem:[#allocation327_spill] sm:$0xff]  ;;  %v7802_v54 = vunpack.i.l.bf16 %v16716_v28  ;;  %v7949_v12 = vld [vmem:[%s12151_s12 + $0x1d0] sm:$0xff]  ;;  %v16717_v34 = vld [vmem:[#allocation289_spill] sm:$0xff] }
 0x836   : >> { %v5655_v35 = vsel %vm1824_vm5, %v5631_v43, %v16711_v40  ;;  %v5630_v14 = vsel %vm1807_vm4, %v5606_v19, %v16713_v46  ;;  %v5619_v43 = vsel %vm225_vm0, %v7949_v12, %v16717_v34  ;;  %v16718_v40 = vld [vmem:[#allocation324_spill] sm:$0xff]  ;;  %v16719_v19 = vld [vmem:[#allocation251_spill] sm:$0xff]  ;;  %v16722_v34 = vld [vmem:[#allocation286_spill] sm:$0xff] }
 0x837   : >> { %6171 = vst.msk [vmem:[%s15205_s19 + $0x40] sm:$0xff] %vm225_vm0, %v6154_v60  ;;  %v5491_v50 = vpop.permute.xlu0 %5490  ;;  %v5679_v49 = vsel %vm1841_vm6, %v5655_v35, %v16714_v2  ;;  %v5654_v60 = vsel %vm1824_vm5, %v5630_v14, %v16718_v40  ;;  %v7842_v46 = vunpack.i.l.bf16 %v16719_v19  ;;  %v16720_v58 = vld [vmem:[#allocation316_spill] sm:$0xff]  ;;  %v7950_v12 = vld [vmem:[%s12151_s12 + $0x1c8] sm:$0xff]  ;;  %v16723_v40 = vld [vmem:[#allocation337_spill] sm:$0xff] }
 0x838   : >> { %v5703_v31 = vsel %vm1858_vm8, %v5679_v49, %v14989_v47  ;;  %v5643_v35 = vsel %vm1807_vm4, %v5619_v43, %v16720_v58  ;;  %v16721_v17 = vld [vmem:[#allocation344_spill] sm:$0xff]  ;;  %v5618_v14 = vsel %vm225_vm0, %v7950_v12, %v16722_v34  ;;  %v16724_v43 = vld [vmem:[#allocation313_spill] sm:$0xff] }
 0x839   : >> { %v15259_v20 = vpop.permute.xlu1 %5267  ;;  %v5678_v3 = vsel %vm1841_vm6, %v5654_v60, %v16721_v17  ;;  %v5727_v2 = vsel %vm1875_vm9, %v5703_v31, %v15032_v0  ;;  %v5667_v47 = vsel %vm1824_vm5, %v5643_v35, %v16723_v40  ;;  %v5642_v60 = vsel %vm1807_vm4, %v5618_v14, %v16724_v43  ;;  %v16725_v17 = vld [vmem:[#allocation334_spill] sm:$0xff]  ;;  %v16728_v14 = vld [vmem:[#allocation259_spill] sm:$0xff] }
 0x83a   : >> { %v5702_v49 = vsel %vm1858_vm8, %v5678_v3, %v14992_v13  ;;  %v5751_v19 = vsel %vm1892_vm10, %v5727_v2, %v15099_v18  ;;  %v5691_v0 = vsel %vm1841_vm6, %v5667_v47, %v14981_v52  ;;  %v5666_v13 = vsel %vm1824_vm5, %v5642_v60, %v16725_v17  ;;  %v16731_v60 = vld [vmem:[#allocation246_spill] sm:$0xff] }
 0x83b   : >> { %v15277_v58 = vpop.permute.xlu0 %5243  ;;  %v5726_v31 = vsel %vm1875_vm9, %v5702_v49, %v15046_v36  ;;  %v5775_v35 = vsel %vm1909_vm11, %v5751_v19, %v15128_v33  ;;  %v5715_v18 = vsel %vm1858_vm8, %v5691_v0, %v14998_v32  ;;  %v5690_v52 = vsel %vm1841_vm6, %v5666_v13, %v14983_v48 }
 0x83c   : >> { %v5750_v3 = vsel %vm1892_vm10, %v5726_v31, %v15109_v56  ;;  %v5799_v2 = vsel %vm16726_vm1, %v5775_v35, %v5469_v37  ;;  %v5739_v36 = vsel %vm1875_vm9, %v5715_v18, %v15060_v61  ;;  %v5714_v32 = vsel %vm1858_vm8, %v5690_v52, %v15006_v30  ;;  %v16733_v35 = vld [vmem:[#allocation255_spill] sm:$0xff] }
 0x83d   : >> { %v5546_v12 = vpop.permute.xlu1 %5545  ;;  %v5774_v33 = vsel %vm1909_vm11, %v5750_v3, %v15138_v62  ;;  %v5763_v56 = vsel %vm1892_vm10, %v5739_v36, %v15117_v4  ;;  %v7882_v40 = vunpack.i.l.bf16 %v16728_v14  ;;  %v5738_v61 = vsel %vm1875_vm9, %v5714_v32, %v15074_v27  ;;  %v16735_v18 = vld [vmem:[#allocation263_spill] sm:$0xff] }
 0x83e   : >> { %v15301_v19 = vsel %vm1943_vm13, %v5799_v2, %v5546_v12  ;;  %v5798_v37 = vsel %vm16727_vm15, %v5774_v33, %v5467_v63  ;;  %v5787_v62 = vsel %vm1909_vm11, %v5763_v56, %v15151_v9  ;;  %v5762_v30 = vsel %vm1892_vm10, %v5738_v61, %v15119_v45 }
 0x83f   : >> { %v5877_v34 = vrot.slane %v15301_v19, 1  ;;  %v5544_v48 = vpop.permute.xlu0 %5543  ;;  %v5811_v4 = vsel %vm16729_vm12, %v5787_v62, %v5493_v15  ;;  %v4716_v43 = vsel %vm16730_vm7, %v4699_v51, %v7802_v54  ;;  %v7822_v0 = vunpack.i.l.bf16 %v16731_v60 }
 0x840   : >> { %v5822_v47 = vsel %vm1943_vm13, %v5798_v37, %v5544_v48  ;;  %v5786_v31 = vsel %vm1909_vm11, %v5762_v30, %v15167_v41  ;;  %v4733_v9 = vsel %vm16732_vm3, %v4716_v43, %v7842_v46  ;;  %v7862_v17 = vunpack.i.l.bf16 %v16733_v35  ;;  %v16744_v43 = vld [vmem:[#allocation288_spill] sm:$0xff] }
 0x841   : >> { %v5876_v49 = vrot.slane %v5822_v47, 1  ;;  %v5570_v63 = vpop.permute.xlu1 %5569  ;;  %v5810_v45 = vsel %vm16726_vm1, %v5786_v31, %v5491_v50  ;;  %v16734_v51 = vunpack.i.l.bf16 %v16709_v1  ;;  %v7902_v3 = vunpack.i.l.bf16 %v16735_v18 }
 0x842   : >> { %v15323_v27 = vsel %vm1943_vm13, %v5811_v4, %v5570_v63  ;;  %vm16736_vm15 = vcmask 982016   ;;  %v7563_v2 = vunpack.i.h.bf16 %v16695_v16  ;;  %v7583_v12 = vunpack.i.h.bf16 %v16696_v59  ;;  %v7951_v63 = vld [vmem:[%s12151_s12 + $0x1d8] sm:$0x3] }
 0x843   : >> { %v5897_v15 = vrot.slane %v15323_v27, 1  ;;  %v5568_v13 = vpop.permute.xlu0 %5567  ;;  %v5878_v54 = vsel %vm844_vm2, %v5876_v49, %v5877_v34  ;;  %v4690_v41 = vsel %vm1960_vm14, %v15232_v42, %v16734_v51  ;;  %v4750_v50 = vsel %vm16736_vm15, %v4733_v9, %v7882_v40  ;;  %vm16743_vm1 = vmmov %vm16736_vm15  ;;  %v16745_v9 = vld [vmem:[#allocation315_spill] sm:$0xff] }
 0x844   : >> { %v5834_v46 = vsel %vm1943_vm13, %v5810_v45, %v5568_v13  ;;  %6436 = vmatprep.mubr.msk.f32.mxu0 %vm1960_vm14, %v5878_v54  ;;  %v16737_v33 = vunpack.i.l.bf16 %v16712_v29  ;;  %vm16738_vm12 = vcmask 785408   ;;  %v16739_v42 = vunpack.i.h.bf16 %v16691_v7  ;;  %v16746_v54 = vld [vmem:[#allocation276_spill] sm:$0xff] }
 0x845   : >> { %v5896_v52 = vrot.slane %v5834_v46, 1  ;;  %6062 = vmatmul.mubr.f32.gmra.mrb[12].mxu0 %v4750_v50  ;;  %v5345_v36 = vpop.permute.xlu1 %5344  ;;  %v7603_v37 = vunpack.i.h.bf16 %v16697_v39  ;;  %v7623_v48 = vunpack.i.h.bf16 %v16698_v44  ;;  %v16740_v59 = vunpack.i.h.bf16 %v16692_v11 }
 0x846   : >> { %v4707_v32 = vsel %vm16738_vm12, %v4690_v41, %v16737_v33  ;;  %v4581_v56 = vsel %vm1858_vm8, %v15180_v21, %v16739_v42  ;;  %v16741_v61 = vunpack.i.h.bf16 %v16693_v55  ;;  %v16742_v44 = vunpack.i.h.bf16 %v16694_v6  ;;  %v16747_v41 = vld [vmem:[#allocation336_spill] sm:$0xff]  ;;  %v16751_v33 = vld [vmem:[#allocation326_spill] sm:$0xff] }
 0x847   : >> { %v4724_v16 = vsel %vm16730_vm7, %v4707_v32, %v7822_v0  ;;  %v4589_v40 = vsel %vm1858_vm8, %v15187_v38, %v16740_v59  ;;  %v5321_v7 = vpop.permute.xlu0 %5320  ;;  %v5898_v21 = vsel %vm844_vm2, %v5896_v52, %v5897_v15  ;;  %v7643_v11 = vunpack.i.h.bf16 %v16699_v53 }
 0x848   : >> { %v4598_v62 = vsel %vm1875_vm9, %v4581_v56, %v16741_v61  ;;  %v4741_v39 = vsel %vm16732_vm3, %v4724_v16, %v7862_v17  ;;  %v4606_v47 = vsel %vm1875_vm9, %v4589_v40, %v16742_v44  ;;  %v7663_v30 = vunpack.i.h.bf16 %v16700_v22  ;;  %6444 = vmatprep.mubr.msk.f32.mxu1 %vm1960_vm14, %v5898_v21 }
 0x849   : >> { %v4758_v38 = vsel %vm16743_vm1, %v4741_v39, %v7902_v3  ;;  %v4615_v55 = vsel %vm1892_vm10, %v4598_v62, %v7563_v2  ;;  %v4623_v4 = vsel %vm1892_vm10, %v4606_v47, %v7583_v12  ;;  %v7683_v49 = vunpack.i.h.bf16 %v16701_v5  ;;  %v5422_v0 = vpop.permute.xlu1 %5421  ;;  %v7952_v5 = vld [vmem:[%s12151_s12 + $0x178] sm:$0x3] }
 0x84a   : >> { %v5620_v6 = vsel %vm225_vm0, %v7951_v63, %v16744_v43  ;;  %6102 = vmatmul.mubr.f32.gmra.mrb[12].mxu1 %v4758_v38  ;;  %v4632_v53 = vsel %vm1909_vm11, %v4615_v55, %v7603_v37  ;;  %v4640_v22 = vsel %vm1909_vm11, %v4623_v4, %v7623_v48  ;;  %v7703_v31 = vunpack.i.h.bf16 %v16702_v57  ;;  %v16750_v57 = vld [vmem:[#allocation302_spill] sm:$0xff]  ;;  %v16757_v4 = vld [vmem:[#allocation231_spill] sm:$0xff] }
 0x84b   : >> { %v5644_v17 = vsel %vm1807_vm4, %v5620_v6, %v16745_v9  ;;  %v7723_v45 = vunpack.i.h.bf16 %v16703_v25  ;;  %v7743_v13 = vunpack.i.h.bf16 %v16709_v1  ;;  %v5608_v51 = vsel %vm225_vm0, %v7952_v5, %v16746_v54  ;;  %v5398_v46 = vpop.permute.xlu0 %5397 }
 0x84c   : >> { %v5668_v3 = vsel %vm1824_vm5, %v5644_v17, %v16747_v41  ;;  %vm16748_vm15 = vcmask 588800   ;;  %v5632_v12 = vsel %vm1807_vm4, %v5608_v51, %v16750_v57  ;;  %v7783_v52 = vunpack.i.h.bf16 %v16712_v29 }
 0x84d   : >> { %v4649_v50 = vsel %vm16748_vm15, %v4632_v53, %v7643_v11  ;;  %vm16749_vm12 = vmmov %vm16748_vm15  ;;  %v5692_v25 = vsel %vm1841_vm6, %v5668_v3, %v15121_v26  ;;  %v5656_v32 = vsel %vm1824_vm5, %v5632_v12, %v16751_v33  ;;  %v5495_v56 = vpop.permute.xlu1 %5494  ;;  %v7823_v48 = vunpack.i.h.bf16 %v16731_v60  ;;  %v6140_v33 = vld [vmem:[%s15172_s17 + $0x50] sm:$0xff] }
 0x84e   : >> { %v4657_v2 = vsel %vm16749_vm12, %v4640_v22, %v7663_v30  ;;  %v4666_v1 = vsel %vm1943_vm13, %v4649_v50, %v7683_v49  ;;  %v5716_v42 = vsel %vm1858_vm8, %v5692_v25, %v15184_v10  ;;  %v5680_v16 = vsel %vm1841_vm6, %v5656_v32, %v15124_v8  ;;  %vm16752_vm7 = vmmov %vm16749_vm12  ;;  %v16755_v30 = vld [vmem:[#allocation251_spill] sm:$0xff] }
 0x84f   : >> { %v4674_v37 = vsel %vm1943_vm13, %v4657_v2, %v7703_v31  ;;  %v5740_v26 = vsel %vm1875_vm9, %v5716_v42, %v15259_v20  ;;  %v4683_v59 = vsel %vm1960_vm14, %v4666_v1, %v7723_v45  ;;  %v5704_v40 = vsel %vm1858_vm8, %v5680_v16, %v15196_v23  ;;  %v5471_v61 = vpop.permute.xlu0 %5470  ;;  %vm16756_vm15 = vmmov %vm16752_vm7  ;;  %v6132_v2 = vld [vmem:[%s15172_s17 + $0x10] sm:$0xff]  ;;  %v6133_v16 = vld [vmem:[%s15172_s17 + $0x18] sm:$0xff] }
 0x850   : >> { %v4691_v29 = vsel %vm1960_vm14, %v4674_v37, %v7743_v13  ;;  %v5764_v10 = vsel %vm1892_vm10, %v5740_v26, %v5345_v36  ;;  %v7763_v62 = vunpack.i.h.bf16 %v16704_v24  ;;  %v7863_v60 = vunpack.i.h.bf16 %v16733_v35 }
 0x851   : >> { %v5728_v8 = vsel %vm1875_vm9, %v5704_v40, %v15277_v58  ;;  %v5788_v21 = vsel %vm1909_vm11, %v5764_v10, %v5422_v0  ;;  %v7803_v20 = vunpack.i.h.bf16 %v16716_v28  ;;  %v5572_v47 = vpop.permute.xlu1 %5571  ;;  %vm16753_vm3 = vcmask 785408   ;;  %v6139_v0 = vld [vmem:[%s15172_s17 + $0x48] sm:$0xff] }
 0x852   : >> { %v5752_v39 = vsel %vm1892_vm10, %v5728_v8, %v5321_v7  ;;  %v5812_v44 = vsel %vm16752_vm7, %v5788_v21, %v5495_v56  ;;  %v4708_v23 = vsel %vm16753_vm3, %v4691_v29, %v7783_v52  ;;  %v7903_v36 = vunpack.i.h.bf16 %v16735_v18  ;;  %v6078_v11 = vpop.f32.mrb[2].mxu1  ;;  %vm16758_vm12 = vmmov %vm16753_vm3 }
 0x853   : >> { %v5776_v24 = vsel %vm1909_vm11, %v5752_v39, %v5398_v46  ;;  %v5836_v35 = vsel %vm1943_vm13, %v5812_v44, %v5572_v47  ;;  %vm16754_vm1 = vcmask 850944   ;;  %v7843_v38 = vunpack.i.h.bf16 %v16755_v30  ;;  %v5548_v55 = vpop.permute.xlu0 %5547  ;;  %v6080_v63 = vpop.f32.mrb[3].mxu1  ;;  %v6134_v39 = vld [vmem:[%s15172_s17 + $0x20] sm:$0xff] }
 0x854   : >> { %v4725_v58 = vsel %vm16754_vm1, %v4708_v23, %v7823_v48  ;;  %v5800_v28 = vsel %vm16756_vm15, %v5776_v24, %v5471_v61  ;;  %v5899_v7 = vrot.slane %v5836_v35, 1  ;;  %v6079_v49 = vadd.f32 %v16757_v4, %v6078_v11  ;;  %v6038_v6 = vpop.f32.mrb[2].mxu0  ;;  %vm16760_vm3 = vmmov %vm16754_vm1  ;;  %v6141_v61 = vld [vmem:[%s15172_s17 + $0x58] sm:$0xff]  ;;  %v6142_v35 = vld [vmem:[%s15172_s17 + $0x60] sm:$0xff] }
 0x855   : >> { %v7883_v43 = vunpack.i.h.bf16 %v16728_v14  ;;  %v5824_v18 = vsel %vm1943_vm13, %v5800_v28, %v5548_v55  ;;  %v4700_v53 = vsel %vm16758_vm12, %v4683_v59, %v7763_v62  ;;  %vm16759_vm7 = vcmask 916480   ;;  %v6040_v45 = vpop.f32.mrb[3].mxu0  ;;  %v6131_v14 = vld [vmem:[%s15172_s17 + $0x8] sm:$0xff] }
 0x856   : >> { %v4742_v22 = vsel %vm16759_vm7, %v4725_v58, %v7863_v60  ;;  %v5879_v31 = vrot.slane %v5824_v18, 1  ;;  %v6039_v9 = vadd.f32 %v16757_v4, %v6038_v6  ;;  %v6121_v17 = vmax.f32 %v6079_v49, 0.0  ;;  %vm16762_vm15 = vmmov %vm16759_vm7  ;;  %v6143_v55 = vld [vmem:[%s15172_s17 + $0x68] sm:$0xff] }
 0x857   : >> { %v5900_v13 = vsel %vm844_vm2, %v5897_v15, %v5899_v7  ;;  %v4717_v5 = vsel %vm16760_vm3, %v4700_v53, %v7803_v20  ;;  %vm16761_vm1 = vcmask 982016   ;;  %v6135_v18 = vld [vmem:[%s15172_s17 + $0x28] sm:$0xff] }
 0x858   : >> { %6445 = vmatprep.mubr.msk.f32.mxu1 %vm1960_vm14, %v5900_v13  ;;  %v4759_v54 = vsel %vm16761_vm1, %v4742_v22, %v7903_v36  ;;  %v6113_v51 = vmax.f32 %v6039_v9, 0.0  ;;  %v6155_v41 = vadd.f32 %v6139_v0, %v6121_v17  ;;  %v5880_v3 = vsel %vm844_vm2, %v5877_v34, %v5879_v31  ;;  %vm16763_vm12 = vmmov %vm16761_vm1  ;;  %v6136_v17 = vld [vmem:[%s15172_s17 + $0x30] sm:$0xff] }
 0x859   : >> { %v4734_v46 = vsel %vm16762_vm15, %v4717_v5, %v7843_v38  ;;  %6107 = vmatmul.mubr.f32.gmra.mrb[14].mxu1 %v4759_v54  ;;  %6437 = vmatprep.mubr.msk.f32.mxu0 %vm1960_vm14, %v5880_v3 }
 0x85a   : >> { %v4751_v27 = vsel %vm16763_vm12, %v4734_v46, %v7883_v43  ;;  %v6147_v15 = vadd.f32 %v6131_v14, %v6113_v51  ;;  %6172 = vst.msk [vmem:[%s15205_s19 + $0x48] sm:$0xff] %vm225_vm0, %v6155_v41  ;;  %v6144_v51 = vld [vmem:[%s15172_s17 + $0x70] sm:$0xff] }
 0x85b   : >> { %6067 = vmatmul.mubr.f32.gmra.mrb[14].mxu0 %v4751_v27 }
 0x85c   : >> { %6164 = vst.msk [vmem:[%s15205_s19 + $0x8] sm:$0xff] %vm225_vm0, %v6147_v15 }
 0x87c   : >> { %v6043_v50 = vpop.f32.mrb[4].mxu0 }
 0x87d   : >> { %v6044_v19 = vadd.f32 %v16757_v4, %v6043_v50  ;;  %v6045_v34 = vpop.f32.mrb[5].mxu0 }
 0x87f   : >> { %v6114_v57 = vmax.f32 %v6044_v19, 0.0  ;;  %v6145_v19 = vld [vmem:[%s15172_s17 + $0x78] sm:$0xff] }
 0x880   : >> { %v6083_v12 = vpop.f32.mrb[4].mxu1 }
 0x881   : >> { %v6148_v25 = vadd.f32 %v6132_v2, %v6114_v57  ;;  %v6084_v1 = vadd.f32 %v16757_v4, %v6083_v12  ;;  %v6085_v52 = vpop.f32.mrb[5].mxu1  ;;  %v6137_v12 = vld [vmem:[%s15172_s17 + $0x38] sm:$0xff] }
 0x883   : >> { %6165 = vst.msk [vmem:[%s15205_s19 + $0x10] sm:$0xff] %vm225_vm0, %v6148_v25  ;;  %v6122_v32 = vmax.f32 %v6084_v1, 0.0 }
 0x885   : >> { %v6156_v42 = vadd.f32 %v6140_v33, %v6122_v32 }
 0x887   : >> { %6173 = vst.msk [vmem:[%s15205_s19 + $0x50] sm:$0xff] %vm225_vm0, %v6156_v42 }
 0x89e   : >> { %v6048_v56 = vpop.f32.mrb[6].mxu0 }
 0x89f   : >> { %v6049_v37 = vadd.f32 %v16757_v4, %v6048_v56  ;;  %v6050_v48 = vpop.f32.mrb[7].mxu0 }
 0x8a1   : >> { %v6115_v26 = vmax.f32 %v6049_v37, 0.0 }
 0x8a3   : >> { %v6149_v59 = vadd.f32 %v6133_v16, %v6115_v26 }
 0x8a4   : >> { %v6088_v29 = vpop.f32.mrb[6].mxu1 }
 0x8a5   : >> { %6166 = vst.msk [vmem:[%s15205_s19 + $0x18] sm:$0xff] %vm225_vm0, %v6149_v59  ;;  %v6089_v40 = vadd.f32 %v16757_v4, %v6088_v29  ;;  %v6090_v10 = vpop.f32.mrb[7].mxu1 }
 0x8a7   : >> { %v6123_v62 = vmax.f32 %v6089_v40, 0.0 }
 0x8a9   : >> { %v6157_v60 = vadd.f32 %v6141_v61, %v6123_v62 }
 0x8ab   : >> { %6174 = vst.msk [vmem:[%s15205_s19 + $0x58] sm:$0xff] %vm225_vm0, %v6157_v60 }
 0x8c8   : >> { %v6053_v8 = vpop.f32.mrb[8].mxu0 }
 0x8c9   : >> { %v6054_v21 = vadd.f32 %v16757_v4, %v6053_v8  ;;  %v6055_v20 = vpop.f32.mrb[9].mxu0 }
 0x8cb   : >> { %v6116_v44 = vmax.f32 %v6054_v21, 0.0 }
 0x8cc   : >> { %v6093_v47 = vpop.f32.mrb[8].mxu1 }
 0x8cd   : >> { %v6150_v23 = vadd.f32 %v6134_v39, %v6116_v44  ;;  %v6094_v36 = vadd.f32 %v16757_v4, %v6093_v47  ;;  %v6095_v24 = vpop.f32.mrb[9].mxu1 }
 0x8cf   : >> { %6167 = vst.msk [vmem:[%s15205_s19 + $0x20] sm:$0xff] %vm225_vm0, %v6150_v23  ;;  %v6124_v11 = vmax.f32 %v6094_v36, 0.0 }
 0x8d1   : >> { %v6158_v58 = vadd.f32 %v6142_v35, %v6124_v11 }
 0x8d3   : >> { %6175 = vst.msk [vmem:[%s15205_s19 + $0x60] sm:$0xff] %vm225_vm0, %v6158_v58 }
 0x8ee   : >> { %v6098_v30 = vpop.f32.mrb[10].mxu1 }
 0x8ef   : >> { %v6099_v38 = vadd.f32 %v16757_v4, %v6098_v30  ;;  %v6100_v28 = vpop.f32.mrb[11].mxu1 }
 0x8f0   : >> { %v6058_v7 = vpop.f32.mrb[10].mxu0 }
 0x8f1   : >> { %v6059_v49 = vadd.f32 %v16757_v4, %v6058_v7  ;;  %v6125_v63 = vmax.f32 %v6099_v38, 0.0  ;;  %v6060_v43 = vpop.f32.mrb[11].mxu0 }
 0x8f3   : >> { %v6117_v6 = vmax.f32 %v6059_v49, 0.0  ;;  %v6159_v0 = vadd.f32 %v6143_v55, %v6125_v63 }
 0x8f5   : >> { %v6151_v53 = vadd.f32 %v6135_v18, %v6117_v6  ;;  %6176 = vst.msk [vmem:[%s15205_s19 + $0x68] sm:$0xff] %vm225_vm0, %v6159_v0 }
 0x8f7   : >> { %6168 = vst.msk [vmem:[%s15205_s19 + $0x28] sm:$0xff] %vm225_vm0, %v6151_v53 }
 0x918   : >> { %v6063_v22 = vpop.f32.mrb[12].mxu0 }
 0x919   : >> { %v6064_v31 = vadd.f32 %v16757_v4, %v6063_v22  ;;  %v6065_v9 = vpop.f32.mrb[13].mxu0 }
 0x91b   : >> { %v6118_v45 = vmax.f32 %v6064_v31, 0.0 }
 0x91d   : >> { %v6103_v13 = vpop.f32.mrb[12].mxu1  ;;  %v6152_v14 = vadd.f32 %v6136_v17, %v6118_v45 }
 0x91e   : >> { %v6104_v5 = vadd.f32 %v16757_v4, %v6103_v13  ;;  %v6105_v54 = vpop.f32.mrb[13].mxu1 }
 0x91f   : >> { %6169 = vst.msk [vmem:[%s15205_s19 + $0x30] sm:$0xff] %vm225_vm0, %v6152_v14 }
 0x920   : >> { %v6126_v41 = vmax.f32 %v6104_v5, 0.0 }
 0x922   : >> { %v6160_v3 = vadd.f32 %v6144_v51, %v6126_v41 }
 0x924   : >> { %6177 = vst.msk [vmem:[%s15205_s19 + $0x70] sm:$0xff] %vm225_vm0, %v6160_v3 }
 0x92c   : >> { %v6108_v46 = vpop.f32.mrb[14].mxu1 }
 0x92d   : >> { %v6109_v27 = vadd.f32 %v16757_v4, %v6108_v46  ;;  %v6110_v15 = vpop.f32.mrb[15].mxu1 }
 0x92e   : >> { %v6068_v50 = vpop.f32.mrb[14].mxu0 }
 0x92f   : >> { %v6069_v34 = vadd.f32 %v16757_v4, %v6068_v50  ;;  %v6127_v2 = vmax.f32 %v6109_v27, 0.0  ;;  %v6070_v57 = vpop.f32.mrb[15].mxu0  ;;  %3435 = sbr.rel (!%p3433_p5) target bundleno = 1287 (0x507), region = 105 }
 0x931   : >> { %v6119_v25 = vmax.f32 %v6069_v34, 0.0  ;;  %v6161_v1 = vadd.f32 %v6145_v19, %v6127_v2 }
 0x933   : >> { %v6153_v52 = vadd.f32 %v6137_v12, %v6119_v25  ;;  %6178 = vst.msk [vmem:[%s15205_s19 + $0x78] sm:$0xff] %vm225_vm0, %v6161_v1 }
 0x935   : >> { %6170 = vst.msk [vmem:[%s15205_s19 + $0x38] sm:$0xff] %vm225_vm0, %v6153_v52 }
 0x936 PF: > { %s15_s18 = sadd.s32 1, %s7967_s18  }
 0x937   : > { %p12_p6 = scmp.ge.s32.totalorder %s15_s18, 4  }
 0x939   :  { %14 = sbr.rel (!%p12_p6) target bundleno = 1 (0x1), region = 116 }

</bundles_post_ra>
